<compile_context>
chip_gen: v7x
topology: tpu7x:2x2x1
jax: 0.10.0
libtpu: 0.0.40
codegen_flags: <defaults>
</compile_context>

<pallas_src>
import jax
import jax.numpy as jnp
from jax import lax
from jax.experimental import pallas as pl
from jax.experimental.pallas import tpu as pltpu

EPS = 1e-5                       # PyTorch default eps (InstanceNorm3d, BatchNorm1d)
CONV_KSIZE = (3, 5, 2)
CONV_STRIDE = (2, 1, 1)
CONV_PAD = (4, 2, 0)
COUT = 33


# ----------------------------- fused Pallas kernel ---------------------------

def _fused_encoder_kernel(patches_ref, wc_ref, bc_ref, wlr_ref, bl_ref,
                          gamma_ref, beta_ref, out_ref, feat_ref):
    """Single-launch fused forward.

      patches_ref: (N, K, P) f32   im2col patches, K = Cin*kd*kh*kw, P = D'*H'*W'
      wc_ref:      (Cout, K) bf16  conv weight (pre-flattened at init)
      bc_ref:      (Cout, 1) f32   conv bias
      wlr_ref:     (Cout, P, O) bf16  Linear weight, laid out so that
                                      flat[n, c*P+p] @ lin_w.T == sum_c feat@wlr[c]
      bl_ref / gamma_ref / beta_ref: (1, O) f32
      out_ref:     (N, O) f32
      feat_ref:    VMEM scratch (N, Cout, P) f32  (normalized conv features)
    """
    n_batch = patches_ref.shape[0]
    cout = wc_ref.shape[0]
    n_out = out_ref.shape[1]

    wc = wc_ref[...]                                            # (Cout, K) bf16

    # ---- Conv3d (matmul over im2col patches) + ReLU + InstanceNorm3d -------
    # Whole batch handled in this one grid step (static unroll over N).
    for n in range(n_batch):
        pat = patches_ref[n].astype(jnp.bfloat16)               # (K, P)
        conv = jnp.dot(wc, pat,
                       preferred_element_type=jnp.float32)      # (Cout, P) f32
        conv = jnp.maximum(conv + bc_ref[...], 0.0)             # bias + ReLU
        mean = jnp.mean(conv, axis=1, keepdims=True)            # per-channel
        var = jnp.mean((conv - mean) ** 2, axis=1, keepdims=True)  # biased var
        feat_ref[n] = (conv - mean) * lax.rsqrt(var + EPS)      # no affine

    # ---- flatten + Linear:  y[n] = sum_{c,p} feat[n,c,p] * wlr[c,p,:] -------
    # Per-channel accumulation == flat(N, Cout*P) @ lin_w.T ; weight streamed
    # through the MXU exactly once, only 2-D dots and row loads are used.
    acc = jnp.zeros((n_batch, n_out), jnp.float32)
    for c in range(cout):
        rows = [feat_ref[n, c:c + 1, :] for n in range(n_batch)]   # N x (1, P)
        lhs = jnp.concatenate(rows, axis=0).astype(jnp.bfloat16)   # (N, P)
        acc = acc + jnp.dot(lhs, wlr_ref[c],
                            preferred_element_type=jnp.float32)    # (N, O)
    y = acc + bl_ref[...]

    # ---- BatchNorm1d (training-mode batch statistics) -----------------------
    bm = jnp.mean(y, axis=0, keepdims=True)
    bv = jnp.mean((y - bm) ** 2, axis=0, keepdims=True)          # biased var
    y = (y - bm) * lax.rsqrt(bv + EPS)
    y = y * gamma_ref[...] + beta_ref[...]

    # ---- softmax(dim=1) ------------------------------------------------------
    m = jnp.max(y, axis=1, keepdims=True)
    e = jnp.exp(y - m)
    denom = jnp.sum(e, axis=1, keepdims=True)
    out_ref[...] = e * pl.reciprocal(denom, approx=True)


# ------------------------------ JAX glue --------------------------------------

def im2col_3d(images, ksize, stride, pad):
    """images (N, Cin, D, H, W) -> patches (N, K, P); K ordered (cin,kd,kh,kw),
    P ordered row-major over (d', h', w') — matches torch Conv3d + reshape."""
    n, c, d, h, w = images.shape
    kd, kh, kw = ksize
    sd, sh, sw = stride
    pd, ph, pw = pad
    xp = jnp.pad(images, ((0, 0), (0, 0), (pd, pd), (ph, ph), (pw, pw)))
    do = (d + 2 * pd - kd) // sd + 1
    ho = (h + 2 * ph - kh) // sh + 1
    wo = (w + 2 * pw - kw) // sw + 1
    cols = jnp.stack(
        [xp[:, :, dk:dk + sd * do:sd, hk:hk + sh * ho:sh, wk:wk + sw * wo:sw]
         for dk in range(kd) for hk in range(kh) for wk in range(kw)],
        axis=2)                                   # (N, Cin, Kt, Do, Ho, Wo)
    patches = cols.reshape(n, c * kd * kh * kw, do * ho * wo)
    return patches, (do, ho, wo)


def prepare_kernel_params(params):
    """One-time (init-time) weight preparation: flatten/transpose/cast so the
    jitted forward does no per-call weight layout work."""
    cout = params['conv_w'].shape[0]
    o, f = params['lin_w'].shape
    p = f // cout
    return {
        'wc': params['conv_w'].reshape(cout, -1).astype(jnp.bfloat16),   # (C, K)
        'bc': params['conv_b'].reshape(cout, 1).astype(jnp.float32),     # (C, 1)
        # lin_w is (O, F) with F = c*P + p (channel-major, torch flatten order)
        'wlr': params['lin_w'].T.reshape(cout, p, o).astype(jnp.bfloat16),
        'bl': params['lin_b'].reshape(1, o).astype(jnp.float32),
        'gamma': params['gamma'].reshape(1, o).astype(jnp.float32),
        'beta': params['beta'].reshape(1, o).astype(jnp.float32),
    }


@jax.jit
def encoder_cnn_forward(images, kp):
    patches, _ = im2col_3d(images, CONV_KSIZE, CONV_STRIDE, CONV_PAD)  # (N,K,P)
    n, k, p = patches.shape
    cout = kp['wc'].shape[0]
    o = kp['bl'].shape[1]

    # Everything fits easily in VMEM at this size (~5 MiB incl. double
    # buffers) so one grid step with full-array blocks is optimal.
    out = pl.pallas_call(
        _fused_encoder_kernel,
        out_shape=jax.ShapeDtypeStruct((n, o), jnp.float32),
        grid=(1,),
        in_specs=[
            pl.BlockSpec((n, k, p), lambda i: (0, 0, 0)),      # patches
            pl.BlockSpec((cout, k), lambda i: (0, 0)),         # conv weight
            pl.BlockSpec((cout, 1), lambda i: (0, 0)),         # conv bias
            pl.BlockSpec((cout, p, o), lambda i: (0, 0, 0)),   # linear weight
            pl.BlockSpec((1, o), lambda i: (0, 0)),            # linear bias
            pl.BlockSpec((1, o), lambda i: (0, 0)),            # bn gamma
            pl.BlockSpec((1, o), lambda i: (0, 0)),            # bn beta
        ],
        out_specs=pl.BlockSpec((n, o), lambda i: (0, 0)),
        scratch_shapes=[pltpu.VMEM((n, cout, p), jnp.float32)],
        compiler_params=pltpu.CompilerParams(
            dimension_semantics=("arbitrary",)),
    )(patches, kp['wc'], kp['bc'], kp['wlr'], kp['bl'], kp['gamma'],
      kp['beta'])
    return out


# ------------------------- pure-JAX f32 reference -----------------------------

def reference_forward(images, params):
    conv = lax.conv_general_dilated(
        images, params['conv_w'],
        window_strides=CONV_STRIDE,
        padding=((4, 4), (2, 2), (0, 0)),
        dimension_numbers=('NCDHW', 'OIDHW', 'NCDHW'))
    conv = conv + params['conv_b'][None, :, None, None, None]
    x = jax.nn.relu(conv)
    mean = x.mean(axis=(2, 3, 4), keepdims=True)
    var = ((x - mean) ** 2).mean(axis=(2, 3, 4), keepdims=True)
    x = (x - mean) / jnp.sqrt(var + EPS)
    x = x.reshape(x.shape[0], -1)
    y = x @ params['lin_w'].T + params['lin_b']
    bm = y.mean(axis=0, keepdims=True)
    bv = ((y - bm) ** 2).mean(axis=0, keepdims=True)
    y = (y - bm) / jnp.sqrt(bv + EPS)
    y = y * params['gamma'] + params['beta']
    return jax.nn.softmax(y, axis=1)


# ------------------------------- setup ----------------------------------------

def init_params(key, cnn_out_size, in_shape):
    # NOTE: the original module hard-codes spatial size 50 for the Linear;
    # here the Linear is sized from the actual (small) input so the forward
    # composes — same structure, synthetic small shapes.
    _, _, d, h, w = in_shape
    do = (d + 2 * 4 - 3) // 2 + 1
    ho = (h + 2 * 2 - 5) // 1 + 1
    wo = (w + 2 * 0 - 2) // 1 + 1
    f = COUT * do * ho * wo
    k1, k2, k3, k4 = jax.random.split(key, 4)
    return {
        'conv_w': 0.1 * jax.random.normal(k1, (COUT, 1, 3, 5, 2), jnp.float32),
        'conv_b': 0.1 * jax.random.normal(k2, (COUT,), jnp.float32),
        'lin_w': 0.02 * jax.random.normal(k3, (cnn_out_size, f), jnp.float32),
        'lin_b': 0.02 * jax.random.normal(k4, (cnn_out_size,), jnp.float32),
        'gamma': jnp.ones((cnn_out_size,), jnp.float32),   # BatchNorm1d weight
        'beta': jnp.zeros((cnn_out_size,), jnp.float32),   # BatchNorm1d bias
    }


if __name__ == "__main__":
    key = jax.random.PRNGKey(0)
    kparam, kx = jax.random.split(key)

    in_shape = (8, 1, 6, 8, 6)     # (N, Cin=1, D, H, W) -> conv out P = 240
    cnn_out = 32

    images = jax.random.normal(kx, in_shape, jnp.float32)
    params = init_params(kparam, cnn_out, in_shape)
    kernel_params = prepare_kernel_params(params)   # one-time layout/bf16 prep

    out = encoder_cnn_forward(images, kernel_params)
    out = jax.block_until_ready(out)

    ref = reference_forward(images, params)
    assert out.shape == (in_shape[0], cnn_out)
    # Tolerances account for bf16 MXU operands + approx reciprocal vs the f32
    # reference (batch-stat BatchNorm amplifies small input perturbations).
    assert bool(jnp.allclose(jnp.sum(out, axis=1), 1.0, atol=1e-2))
    assert bool(jnp.allclose(out, ref, rtol=2e-2, atol=5e-3)), \
        float(jnp.max(jnp.abs(out - ref)))
    print("KERNEL_OK")
</pallas_src>

<mosaic_0001>
module attributes {stable_mosaic.version = 11 : i64} {
  func.func @_fused_encoder_kernel(%arg0: i32, %arg1: memref<8x30x240xf32, #tpu.memory_space<vmem>>, %arg2: memref<33x30xbf16, #tpu.memory_space<vmem>>, %arg3: memref<33x1xf32, #tpu.memory_space<vmem>>, %arg4: memref<33x240x32xbf16, #tpu.memory_space<vmem>>, %arg5: memref<1x32xf32, #tpu.memory_space<vmem>>, %arg6: memref<1x32xf32, #tpu.memory_space<vmem>>, %arg7: memref<1x32xf32, #tpu.memory_space<vmem>>, %arg8: memref<8x32xf32, #tpu.memory_space<vmem>>, %arg9: memref<8x33x240xf32, #tpu.memory_space<vmem>>) attributes {dimension_semantics = [#tpu.dimension_semantics<arbitrary>], iteration_bounds = array<i64: 1>, scalar_prefetch = 0 : i64, scratch_operands = 1 : i64, tpu.core_type = #tpu.core_type<tc>, window_params = [{pipeline_mode = #tpu.pipeline_mode<synchronous>, transform_indices = @transform_0, window_bounds = array<i64: 8, 30, 240>}, {pipeline_mode = #tpu.pipeline_mode<synchronous>, transform_indices = @transform_1, window_bounds = array<i64: 33, 30>}, {pipeline_mode = #tpu.pipeline_mode<synchronous>, transform_indices = @transform_2, window_bounds = array<i64: 33, 1>}, {pipeline_mode = #tpu.pipeline_mode<synchronous>, transform_indices = @transform_3, window_bounds = array<i64: 33, 240, 32>}, {pipeline_mode = #tpu.pipeline_mode<synchronous>, transform_indices = @transform_4, window_bounds = array<i64: 1, 32>}, {pipeline_mode = #tpu.pipeline_mode<synchronous>, transform_indices = @transform_5, window_bounds = array<i64: 1, 32>}, {pipeline_mode = #tpu.pipeline_mode<synchronous>, transform_indices = @transform_6, window_bounds = array<i64: 1, 32>}, {pipeline_mode = #tpu.pipeline_mode<synchronous>, transform_indices = @transform_7, window_bounds = array<i64: 8, 32>}]} {
    %c0 = arith.constant 0 : index
    %c0_0 = arith.constant 0 : index
    %0 = vector.load %arg2[%c0, %c0_0] : memref<33x30xbf16, #tpu.memory_space<vmem>>, vector<33x30xbf16>
    %c0_1 = arith.constant 0 : index
    %c0_2 = arith.constant 0 : index
    %c0_3 = arith.constant 0 : index
    %1 = vector.load %arg1[%c0_1, %c0_2, %c0_3] : memref<8x30x240xf32, #tpu.memory_space<vmem>>, vector<1x30x240xf32>
    %2 = vector.shape_cast %1 : vector<1x30x240xf32> to vector<30x240xf32>
    %3 = arith.truncf %2 : vector<30x240xf32> to vector<30x240xbf16>
    %cst = arith.constant dense<0.000000e+00> : vector<33x240xf32>
    %4 = tpu.matmul %0, %3, %cst {dimension_numbers = #tpu.dot_dimension_numbers<[1], [0], [0], [1], [0, 0, 1, 1], [], []>} : vector<33x30xbf16>, vector<30x240xbf16>, vector<33x240xf32> -> vector<33x240xf32>
    %c0_4 = arith.constant 0 : index
    %c0_5 = arith.constant 0 : index
    %5 = vector.load %arg3[%c0_4, %c0_5] : memref<33x1xf32, #tpu.memory_space<vmem>>, vector<33x1xf32>
    %6 = vector.broadcast %5 : vector<33x1xf32> to vector<33x240xf32>
    %7 = arith.addf %4, %6 : vector<33x240xf32>
    %cst_6 = arith.constant 0.000000e+00 : f32
    %8 = vector.broadcast %cst_6 : f32 to vector<33x240xf32>
    %9 = arith.maximumf %7, %8 : vector<33x240xf32>
    %cst_7 = arith.constant dense<0.000000e+00> : vector<33xf32>
    %10 = vector.multi_reduction <add>, %9, %cst_7 [1] : vector<33x240xf32> to vector<33xf32>
    %11 = vector.shape_cast %10 : vector<33xf32> to vector<33x1xf32>
    %cst_8 = arith.constant 2.400000e+02 : f32
    %12 = vector.broadcast %cst_8 : f32 to vector<33x1xf32>
    %13 = arith.divf %11, %12 : vector<33x1xf32>
    %14 = vector.broadcast %13 : vector<33x1xf32> to vector<33x240xf32>
    %15 = arith.subf %9, %14 : vector<33x240xf32>
    %16 = arith.mulf %15, %15 : vector<33x240xf32>
    %cst_9 = arith.constant dense<0.000000e+00> : vector<33xf32>
    %17 = vector.multi_reduction <add>, %16, %cst_9 [1] : vector<33x240xf32> to vector<33xf32>
    %18 = vector.shape_cast %17 : vector<33xf32> to vector<33x1xf32>
    %cst_10 = arith.constant 2.400000e+02 : f32
    %19 = vector.broadcast %cst_10 : f32 to vector<33x1xf32>
    %20 = arith.divf %18, %19 : vector<33x1xf32>
    %21 = vector.broadcast %13 : vector<33x1xf32> to vector<33x240xf32>
    %22 = arith.subf %9, %21 : vector<33x240xf32>
    %cst_11 = arith.constant 9.99999974E-6 : f32
    %23 = vector.broadcast %cst_11 : f32 to vector<33x1xf32>
    %24 = arith.addf %20, %23 : vector<33x1xf32>
    %25 = math.rsqrt %24 : vector<33x1xf32>
    %26 = vector.broadcast %25 : vector<33x1xf32> to vector<33x240xf32>
    %27 = arith.mulf %22, %26 : vector<33x240xf32>
    %c0_12 = arith.constant 0 : index
    %c0_13 = arith.constant 0 : index
    %c0_14 = arith.constant 0 : index
    %28 = vector.load %arg9[%c0_12, %c0_13, %c0_14] : memref<8x33x240xf32, #tpu.memory_space<vmem>>, vector<1x33x240xf32>
    %29 = vector.shape_cast %28 : vector<1x33x240xf32> to vector<33x240xf32>
    %30 = vector.shape_cast %27 : vector<33x240xf32> to vector<1x33x240xf32>
    tpu.vector_store %arg9[%c0_12, %c0_13, %c0_14], %30 {strides = array<i32>} : memref<8x33x240xf32, #tpu.memory_space<vmem>>, vector<1x33x240xf32>,
    %c1 = arith.constant 1 : index
    %c0_15 = arith.constant 0 : index
    %c0_16 = arith.constant 0 : index
    %31 = vector.load %arg1[%c1, %c0_15, %c0_16] : memref<8x30x240xf32, #tpu.memory_space<vmem>>, vector<1x30x240xf32>
    %32 = vector.shape_cast %31 : vector<1x30x240xf32> to vector<30x240xf32>
    %33 = arith.truncf %32 : vector<30x240xf32> to vector<30x240xbf16>
    %cst_17 = arith.constant dense<0.000000e+00> : vector<33x240xf32>
    %34 = tpu.matmul %0, %33, %cst_17 {dimension_numbers = #tpu.dot_dimension_numbers<[1], [0], [0], [1], [0, 0, 1, 1], [], []>} : vector<33x30xbf16>, vector<30x240xbf16>, vector<33x240xf32> -> vector<33x240xf32>
    %c0_18 = arith.constant 0 : index
    %c0_19 = arith.constant 0 : index
    %35 = vector.load %arg3[%c0_18, %c0_19] : memref<33x1xf32, #tpu.memory_space<vmem>>, vector<33x1xf32>
    %36 = vector.broadcast %35 : vector<33x1xf32> to vector<33x240xf32>
    %37 = arith.addf %34, %36 : vector<33x240xf32>
    %cst_20 = arith.constant 0.000000e+00 : f32
    %38 = vector.broadcast %cst_20 : f32 to vector<33x240xf32>
    %39 = arith.maximumf %37, %38 : vector<33x240xf32>
    %cst_21 = arith.constant dense<0.000000e+00> : vector<33xf32>
    %40 = vector.multi_reduction <add>, %39, %cst_21 [1] : vector<33x240xf32> to vector<33xf32>
    %41 = vector.shape_cast %40 : vector<33xf32> to vector<33x1xf32>
    %cst_22 = arith.constant 2.400000e+02 : f32
    %42 = vector.broadcast %cst_22 : f32 to vector<33x1xf32>
    %43 = arith.divf %41, %42 : vector<33x1xf32>
    %44 = vector.broadcast %43 : vector<33x1xf32> to vector<33x240xf32>
    %45 = arith.subf %39, %44 : vector<33x240xf32>
    %46 = arith.mulf %45, %45 : vector<33x240xf32>
    %cst_23 = arith.constant dense<0.000000e+00> : vector<33xf32>
    %47 = vector.multi_reduction <add>, %46, %cst_23 [1] : vector<33x240xf32> to vector<33xf32>
    %48 = vector.shape_cast %47 : vector<33xf32> to vector<33x1xf32>
    %cst_24 = arith.constant 2.400000e+02 : f32
    %49 = vector.broadcast %cst_24 : f32 to vector<33x1xf32>
    %50 = arith.divf %48, %49 : vector<33x1xf32>
    %51 = vector.broadcast %43 : vector<33x1xf32> to vector<33x240xf32>
    %52 = arith.subf %39, %51 : vector<33x240xf32>
    %cst_25 = arith.constant 9.99999974E-6 : f32
    %53 = vector.broadcast %cst_25 : f32 to vector<33x1xf32>
    %54 = arith.addf %50, %53 : vector<33x1xf32>
    %55 = math.rsqrt %54 : vector<33x1xf32>
    %56 = vector.broadcast %55 : vector<33x1xf32> to vector<33x240xf32>
    %57 = arith.mulf %52, %56 : vector<33x240xf32>
    %c1_26 = arith.constant 1 : index
    %c0_27 = arith.constant 0 : index
    %c0_28 = arith.constant 0 : index
    %58 = vector.load %arg9[%c1_26, %c0_27, %c0_28] : memref<8x33x240xf32, #tpu.memory_space<vmem>>, vector<1x33x240xf32>
    %59 = vector.shape_cast %58 : vector<1x33x240xf32> to vector<33x240xf32>
    %60 = vector.shape_cast %57 : vector<33x240xf32> to vector<1x33x240xf32>
    tpu.vector_store %arg9[%c1_26, %c0_27, %c0_28], %60 {strides = array<i32>} : memref<8x33x240xf32, #tpu.memory_space<vmem>>, vector<1x33x240xf32>,
    %c2 = arith.constant 2 : index
    %c0_29 = arith.constant 0 : index
    %c0_30 = arith.constant 0 : index
    %61 = vector.load %arg1[%c2, %c0_29, %c0_30] : memref<8x30x240xf32, #tpu.memory_space<vmem>>, vector<1x30x240xf32>
    %62 = vector.shape_cast %61 : vector<1x30x240xf32> to vector<30x240xf32>
    %63 = arith.truncf %62 : vector<30x240xf32> to vector<30x240xbf16>
    %cst_31 = arith.constant dense<0.000000e+00> : vector<33x240xf32>
    %64 = tpu.matmul %0, %63, %cst_31 {dimension_numbers = #tpu.dot_dimension_numbers<[1], [0], [0], [1], [0, 0, 1, 1], [], []>} : vector<33x30xbf16>, vector<30x240xbf16>, vector<33x240xf32> -> vector<33x240xf32>
    %c0_32 = arith.constant 0 : index
    %c0_33 = arith.constant 0 : index
    %65 = vector.load %arg3[%c0_32, %c0_33] : memref<33x1xf32, #tpu.memory_space<vmem>>, vector<33x1xf32>
    %66 = vector.broadcast %65 : vector<33x1xf32> to vector<33x240xf32>
    %67 = arith.addf %64, %66 : vector<33x240xf32>
    %cst_34 = arith.constant 0.000000e+00 : f32
    %68 = vector.broadcast %cst_34 : f32 to vector<33x240xf32>
    %69 = arith.maximumf %67, %68 : vector<33x240xf32>
    %cst_35 = arith.constant dense<0.000000e+00> : vector<33xf32>
    %70 = vector.multi_reduction <add>, %69, %cst_35 [1] : vector<33x240xf32> to vector<33xf32>
    %71 = vector.shape_cast %70 : vector<33xf32> to vector<33x1xf32>
    %cst_36 = arith.constant 2.400000e+02 : f32
    %72 = vector.broadcast %cst_36 : f32 to vector<33x1xf32>
    %73 = arith.divf %71, %72 : vector<33x1xf32>
    %74 = vector.broadcast %73 : vector<33x1xf32> to vector<33x240xf32>
    %75 = arith.subf %69, %74 : vector<33x240xf32>
    %76 = arith.mulf %75, %75 : vector<33x240xf32>
    %cst_37 = arith.constant dense<0.000000e+00> : vector<33xf32>
    %77 = vector.multi_reduction <add>, %76, %cst_37 [1] : vector<33x240xf32> to vector<33xf32>
    %78 = vector.shape_cast %77 : vector<33xf32> to vector<33x1xf32>
    %cst_38 = arith.constant 2.400000e+02 : f32
    %79 = vector.broadcast %cst_38 : f32 to vector<33x1xf32>
    %80 = arith.divf %78, %79 : vector<33x1xf32>
    %81 = vector.broadcast %73 : vector<33x1xf32> to vector<33x240xf32>
    %82 = arith.subf %69, %81 : vector<33x240xf32>
    %cst_39 = arith.constant 9.99999974E-6 : f32
    %83 = vector.broadcast %cst_39 : f32 to vector<33x1xf32>
    %84 = arith.addf %80, %83 : vector<33x1xf32>
    %85 = math.rsqrt %84 : vector<33x1xf32>
    %86 = vector.broadcast %85 : vector<33x1xf32> to vector<33x240xf32>
    %87 = arith.mulf %82, %86 : vector<33x240xf32>
    %c2_40 = arith.constant 2 : index
    %c0_41 = arith.constant 0 : index
    %c0_42 = arith.constant 0 : index
    %88 = vector.load %arg9[%c2_40, %c0_41, %c0_42] : memref<8x33x240xf32, #tpu.memory_space<vmem>>, vector<1x33x240xf32>
    %89 = vector.shape_cast %88 : vector<1x33x240xf32> to vector<33x240xf32>
    %90 = vector.shape_cast %87 : vector<33x240xf32> to vector<1x33x240xf32>
    tpu.vector_store %arg9[%c2_40, %c0_41, %c0_42], %90 {strides = array<i32>} : memref<8x33x240xf32, #tpu.memory_space<vmem>>, vector<1x33x240xf32>,
    %c3 = arith.constant 3 : index
    %c0_43 = arith.constant 0 : index
    %c0_44 = arith.constant 0 : index
    %91 = vector.load %arg1[%c3, %c0_43, %c0_44] : memref<8x30x240xf32, #tpu.memory_space<vmem>>, vector<1x30x240xf32>
    %92 = vector.shape_cast %91 : vector<1x30x240xf32> to vector<30x240xf32>
    %93 = arith.truncf %92 : vector<30x240xf32> to vector<30x240xbf16>
    %cst_45 = arith.constant dense<0.000000e+00> : vector<33x240xf32>
    %94 = tpu.matmul %0, %93, %cst_45 {dimension_numbers = #tpu.dot_dimension_numbers<[1], [0], [0], [1], [0, 0, 1, 1], [], []>} : vector<33x30xbf16>, vector<30x240xbf16>, vector<33x240xf32> -> vector<33x240xf32>
    %c0_46 = arith.constant 0 : index
    %c0_47 = arith.constant 0 : index
    %95 = vector.load %arg3[%c0_46, %c0_47] : memref<33x1xf32, #tpu.memory_space<vmem>>, vector<33x1xf32>
    %96 = vector.broadcast %95 : vector<33x1xf32> to vector<33x240xf32>
    %97 = arith.addf %94, %96 : vector<33x240xf32>
    %cst_48 = arith.constant 0.000000e+00 : f32
    %98 = vector.broadcast %cst_48 : f32 to vector<33x240xf32>
    %99 = arith.maximumf %97, %98 : vector<33x240xf32>
    %cst_49 = arith.constant dense<0.000000e+00> : vector<33xf32>
    %100 = vector.multi_reduction <add>, %99, %cst_49 [1] : vector<33x240xf32> to vector<33xf32>
    %101 = vector.shape_cast %100 : vector<33xf32> to vector<33x1xf32>
    %cst_50 = arith.constant 2.400000e+02 : f32
    %102 = vector.broadcast %cst_50 : f32 to vector<33x1xf32>
    %103 = arith.divf %101, %102 : vector<33x1xf32>
    %104 = vector.broadcast %103 : vector<33x1xf32> to vector<33x240xf32>
    %105 = arith.subf %99, %104 : vector<33x240xf32>
    %106 = arith.mulf %105, %105 : vector<33x240xf32>
    %cst_51 = arith.constant dense<0.000000e+00> : vector<33xf32>
    %107 = vector.multi_reduction <add>, %106, %cst_51 [1] : vector<33x240xf32> to vector<33xf32>
    %108 = vector.shape_cast %107 : vector<33xf32> to vector<33x1xf32>
    %cst_52 = arith.constant 2.400000e+02 : f32
    %109 = vector.broadcast %cst_52 : f32 to vector<33x1xf32>
    %110 = arith.divf %108, %109 : vector<33x1xf32>
    %111 = vector.broadcast %103 : vector<33x1xf32> to vector<33x240xf32>
    %112 = arith.subf %99, %111 : vector<33x240xf32>
    %cst_53 = arith.constant 9.99999974E-6 : f32
    %113 = vector.broadcast %cst_53 : f32 to vector<33x1xf32>
    %114 = arith.addf %110, %113 : vector<33x1xf32>
    %115 = math.rsqrt %114 : vector<33x1xf32>
    %116 = vector.broadcast %115 : vector<33x1xf32> to vector<33x240xf32>
    %117 = arith.mulf %112, %116 : vector<33x240xf32>
    %c3_54 = arith.constant 3 : index
    %c0_55 = arith.constant 0 : index
    %c0_56 = arith.constant 0 : index
    %118 = vector.load %arg9[%c3_54, %c0_55, %c0_56] : memref<8x33x240xf32, #tpu.memory_space<vmem>>, vector<1x33x240xf32>
    %119 = vector.shape_cast %118 : vector<1x33x240xf32> to vector<33x240xf32>
    %120 = vector.shape_cast %117 : vector<33x240xf32> to vector<1x33x240xf32>
    tpu.vector_store %arg9[%c3_54, %c0_55, %c0_56], %120 {strides = array<i32>} : memref<8x33x240xf32, #tpu.memory_space<vmem>>, vector<1x33x240xf32>,
    %c4 = arith.constant 4 : index
    %c0_57 = arith.constant 0 : index
    %c0_58 = arith.constant 0 : index
    %121 = vector.load %arg1[%c4, %c0_57, %c0_58] : memref<8x30x240xf32, #tpu.memory_space<vmem>>, vector<1x30x240xf32>
    %122 = vector.shape_cast %121 : vector<1x30x240xf32> to vector<30x240xf32>
    %123 = arith.truncf %122 : vector<30x240xf32> to vector<30x240xbf16>
    %cst_59 = arith.constant dense<0.000000e+00> : vector<33x240xf32>
    %124 = tpu.matmul %0, %123, %cst_59 {dimension_numbers = #tpu.dot_dimension_numbers<[1], [0], [0], [1], [0, 0, 1, 1], [], []>} : vector<33x30xbf16>, vector<30x240xbf16>, vector<33x240xf32> -> vector<33x240xf32>
    %c0_60 = arith.constant 0 : index
    %c0_61 = arith.constant 0 : index
    %125 = vector.load %arg3[%c0_60, %c0_61] : memref<33x1xf32, #tpu.memory_space<vmem>>, vector<33x1xf32>
    %126 = vector.broadcast %125 : vector<33x1xf32> to vector<33x240xf32>
    %127 = arith.addf %124, %126 : vector<33x240xf32>
    %cst_62 = arith.constant 0.000000e+00 : f32
    %128 = vector.broadcast %cst_62 : f32 to vector<33x240xf32>
    %129 = arith.maximumf %127, %128 : vector<33x240xf32>
    %cst_63 = arith.constant dense<0.000000e+00> : vector<33xf32>
    %130 = vector.multi_reduction <add>, %129, %cst_63 [1] : vector<33x240xf32> to vector<33xf32>
    %131 = vector.shape_cast %130 : vector<33xf32> to vector<33x1xf32>
    %cst_64 = arith.constant 2.400000e+02 : f32
    %132 = vector.broadcast %cst_64 : f32 to vector<33x1xf32>
    %133 = arith.divf %131, %132 : vector<33x1xf32>
    %134 = vector.broadcast %133 : vector<33x1xf32> to vector<33x240xf32>
    %135 = arith.subf %129, %134 : vector<33x240xf32>
    %136 = arith.mulf %135, %135 : vector<33x240xf32>
    %cst_65 = arith.constant dense<0.000000e+00> : vector<33xf32>
    %137 = vector.multi_reduction <add>, %136, %cst_65 [1] : vector<33x240xf32> to vector<33xf32>
    %138 = vector.shape_cast %137 : vector<33xf32> to vector<33x1xf32>
    %cst_66 = arith.constant 2.400000e+02 : f32
    %139 = vector.broadcast %cst_66 : f32 to vector<33x1xf32>
    %140 = arith.divf %138, %139 : vector<33x1xf32>
    %141 = vector.broadcast %133 : vector<33x1xf32> to vector<33x240xf32>
    %142 = arith.subf %129, %141 : vector<33x240xf32>
    %cst_67 = arith.constant 9.99999974E-6 : f32
    %143 = vector.broadcast %cst_67 : f32 to vector<33x1xf32>
    %144 = arith.addf %140, %143 : vector<33x1xf32>
    %145 = math.rsqrt %144 : vector<33x1xf32>
    %146 = vector.broadcast %145 : vector<33x1xf32> to vector<33x240xf32>
    %147 = arith.mulf %142, %146 : vector<33x240xf32>
    %c4_68 = arith.constant 4 : index
    %c0_69 = arith.constant 0 : index
    %c0_70 = arith.constant 0 : index
    %148 = vector.load %arg9[%c4_68, %c0_69, %c0_70] : memref<8x33x240xf32, #tpu.memory_space<vmem>>, vector<1x33x240xf32>
    %149 = vector.shape_cast %148 : vector<1x33x240xf32> to vector<33x240xf32>
    %150 = vector.shape_cast %147 : vector<33x240xf32> to vector<1x33x240xf32>
    tpu.vector_store %arg9[%c4_68, %c0_69, %c0_70], %150 {strides = array<i32>} : memref<8x33x240xf32, #tpu.memory_space<vmem>>, vector<1x33x240xf32>,
    %c5 = arith.constant 5 : index
    %c0_71 = arith.constant 0 : index
    %c0_72 = arith.constant 0 : index
    %151 = vector.load %arg1[%c5, %c0_71, %c0_72] : memref<8x30x240xf32, #tpu.memory_space<vmem>>, vector<1x30x240xf32>
    %152 = vector.shape_cast %151 : vector<1x30x240xf32> to vector<30x240xf32>
    %153 = arith.truncf %152 : vector<30x240xf32> to vector<30x240xbf16>
    %cst_73 = arith.constant dense<0.000000e+00> : vector<33x240xf32>
    %154 = tpu.matmul %0, %153, %cst_73 {dimension_numbers = #tpu.dot_dimension_numbers<[1], [0], [0], [1], [0, 0, 1, 1], [], []>} : vector<33x30xbf16>, vector<30x240xbf16>, vector<33x240xf32> -> vector<33x240xf32>
    %c0_74 = arith.constant 0 : index
    %c0_75 = arith.constant 0 : index
    %155 = vector.load %arg3[%c0_74, %c0_75] : memref<33x1xf32, #tpu.memory_space<vmem>>, vector<33x1xf32>
    %156 = vector.broadcast %155 : vector<33x1xf32> to vector<33x240xf32>
    %157 = arith.addf %154, %156 : vector<33x240xf32>
    %cst_76 = arith.constant 0.000000e+00 : f32
    %158 = vector.broadcast %cst_76 : f32 to vector<33x240xf32>
    %159 = arith.maximumf %157, %158 : vector<33x240xf32>
    %cst_77 = arith.constant dense<0.000000e+00> : vector<33xf32>
    %160 = vector.multi_reduction <add>, %159, %cst_77 [1] : vector<33x240xf32> to vector<33xf32>
    %161 = vector.shape_cast %160 : vector<33xf32> to vector<33x1xf32>
    %cst_78 = arith.constant 2.400000e+02 : f32
    %162 = vector.broadcast %cst_78 : f32 to vector<33x1xf32>
    %163 = arith.divf %161, %162 : vector<33x1xf32>
    %164 = vector.broadcast %163 : vector<33x1xf32> to vector<33x240xf32>
    %165 = arith.subf %159, %164 : vector<33x240xf32>
    %166 = arith.mulf %165, %165 : vector<33x240xf32>
    %cst_79 = arith.constant dense<0.000000e+00> : vector<33xf32>
    %167 = vector.multi_reduction <add>, %166, %cst_79 [1] : vector<33x240xf32> to vector<33xf32>
    %168 = vector.shape_cast %167 : vector<33xf32> to vector<33x1xf32>
    %cst_80 = arith.constant 2.400000e+02 : f32
    %169 = vector.broadcast %cst_80 : f32 to vector<33x1xf32>
    %170 = arith.divf %168, %169 : vector<33x1xf32>
    %171 = vector.broadcast %163 : vector<33x1xf32> to vector<33x240xf32>
    %172 = arith.subf %159, %171 : vector<33x240xf32>
    %cst_81 = arith.constant 9.99999974E-6 : f32
    %173 = vector.broadcast %cst_81 : f32 to vector<33x1xf32>
    %174 = arith.addf %170, %173 : vector<33x1xf32>
    %175 = math.rsqrt %174 : vector<33x1xf32>
    %176 = vector.broadcast %175 : vector<33x1xf32> to vector<33x240xf32>
    %177 = arith.mulf %172, %176 : vector<33x240xf32>
    %c5_82 = arith.constant 5 : index
    %c0_83 = arith.constant 0 : index
    %c0_84 = arith.constant 0 : index
    %178 = vector.load %arg9[%c5_82, %c0_83, %c0_84] : memref<8x33x240xf32, #tpu.memory_space<vmem>>, vector<1x33x240xf32>
    %179 = vector.shape_cast %178 : vector<1x33x240xf32> to vector<33x240xf32>
    %180 = vector.shape_cast %177 : vector<33x240xf32> to vector<1x33x240xf32>
    tpu.vector_store %arg9[%c5_82, %c0_83, %c0_84], %180 {strides = array<i32>} : memref<8x33x240xf32, #tpu.memory_space<vmem>>, vector<1x33x240xf32>,
    %c6 = arith.constant 6 : index
    %c0_85 = arith.constant 0 : index
    %c0_86 = arith.constant 0 : index
    %181 = vector.load %arg1[%c6, %c0_85, %c0_86] : memref<8x30x240xf32, #tpu.memory_space<vmem>>, vector<1x30x240xf32>
    %182 = vector.shape_cast %181 : vector<1x30x240xf32> to vector<30x240xf32>
    %183 = arith.truncf %182 : vector<30x240xf32> to vector<30x240xbf16>
    %cst_87 = arith.constant dense<0.000000e+00> : vector<33x240xf32>
    %184 = tpu.matmul %0, %183, %cst_87 {dimension_numbers = #tpu.dot_dimension_numbers<[1], [0], [0], [1], [0, 0, 1, 1], [], []>} : vector<33x30xbf16>, vector<30x240xbf16>, vector<33x240xf32> -> vector<33x240xf32>
    %c0_88 = arith.constant 0 : index
    %c0_89 = arith.constant 0 : index
    %185 = vector.load %arg3[%c0_88, %c0_89] : memref<33x1xf32, #tpu.memory_space<vmem>>, vector<33x1xf32>
    %186 = vector.broadcast %185 : vector<33x1xf32> to vector<33x240xf32>
    %187 = arith.addf %184, %186 : vector<33x240xf32>
    %cst_90 = arith.constant 0.000000e+00 : f32
    %188 = vector.broadcast %cst_90 : f32 to vector<33x240xf32>
    %189 = arith.maximumf %187, %188 : vector<33x240xf32>
    %cst_91 = arith.constant dense<0.000000e+00> : vector<33xf32>
    %190 = vector.multi_reduction <add>, %189, %cst_91 [1] : vector<33x240xf32> to vector<33xf32>
    %191 = vector.shape_cast %190 : vector<33xf32> to vector<33x1xf32>
    %cst_92 = arith.constant 2.400000e+02 : f32
    %192 = vector.broadcast %cst_92 : f32 to vector<33x1xf32>
    %193 = arith.divf %191, %192 : vector<33x1xf32>
    %194 = vector.broadcast %193 : vector<33x1xf32> to vector<33x240xf32>
    %195 = arith.subf %189, %194 : vector<33x240xf32>
    %196 = arith.mulf %195, %195 : vector<33x240xf32>
    %cst_93 = arith.constant dense<0.000000e+00> : vector<33xf32>
    %197 = vector.multi_reduction <add>, %196, %cst_93 [1] : vector<33x240xf32> to vector<33xf32>
    %198 = vector.shape_cast %197 : vector<33xf32> to vector<33x1xf32>
    %cst_94 = arith.constant 2.400000e+02 : f32
    %199 = vector.broadcast %cst_94 : f32 to vector<33x1xf32>
    %200 = arith.divf %198, %199 : vector<33x1xf32>
    %201 = vector.broadcast %193 : vector<33x1xf32> to vector<33x240xf32>
    %202 = arith.subf %189, %201 : vector<33x240xf32>
    %cst_95 = arith.constant 9.99999974E-6 : f32
    %203 = vector.broadcast %cst_95 : f32 to vector<33x1xf32>
    %204 = arith.addf %200, %203 : vector<33x1xf32>
    %205 = math.rsqrt %204 : vector<33x1xf32>
    %206 = vector.broadcast %205 : vector<33x1xf32> to vector<33x240xf32>
    %207 = arith.mulf %202, %206 : vector<33x240xf32>
    %c6_96 = arith.constant 6 : index
    %c0_97 = arith.constant 0 : index
    %c0_98 = arith.constant 0 : index
    %208 = vector.load %arg9[%c6_96, %c0_97, %c0_98] : memref<8x33x240xf32, #tpu.memory_space<vmem>>, vector<1x33x240xf32>
    %209 = vector.shape_cast %208 : vector<1x33x240xf32> to vector<33x240xf32>
    %210 = vector.shape_cast %207 : vector<33x240xf32> to vector<1x33x240xf32>
    tpu.vector_store %arg9[%c6_96, %c0_97, %c0_98], %210 {strides = array<i32>} : memref<8x33x240xf32, #tpu.memory_space<vmem>>, vector<1x33x240xf32>,
    %c7 = arith.constant 7 : index
    %c0_99 = arith.constant 0 : index
    %c0_100 = arith.constant 0 : index
    %211 = vector.load %arg1[%c7, %c0_99, %c0_100] : memref<8x30x240xf32, #tpu.memory_space<vmem>>, vector<1x30x240xf32>
    %212 = vector.shape_cast %211 : vector<1x30x240xf32> to vector<30x240xf32>
    %213 = arith.truncf %212 : vector<30x240xf32> to vector<30x240xbf16>
    %cst_101 = arith.constant dense<0.000000e+00> : vector<33x240xf32>
    %214 = tpu.matmul %0, %213, %cst_101 {dimension_numbers = #tpu.dot_dimension_numbers<[1], [0], [0], [1], [0, 0, 1, 1], [], []>} : vector<33x30xbf16>, vector<30x240xbf16>, vector<33x240xf32> -> vector<33x240xf32>
    %c0_102 = arith.constant 0 : index
    %c0_103 = arith.constant 0 : index
    %215 = vector.load %arg3[%c0_102, %c0_103] : memref<33x1xf32, #tpu.memory_space<vmem>>, vector<33x1xf32>
    %216 = vector.broadcast %215 : vector<33x1xf32> to vector<33x240xf32>
    %217 = arith.addf %214, %216 : vector<33x240xf32>
    %cst_104 = arith.constant 0.000000e+00 : f32
    %218 = vector.broadcast %cst_104 : f32 to vector<33x240xf32>
    %219 = arith.maximumf %217, %218 : vector<33x240xf32>
    %cst_105 = arith.constant dense<0.000000e+00> : vector<33xf32>
    %220 = vector.multi_reduction <add>, %219, %cst_105 [1] : vector<33x240xf32> to vector<33xf32>
    %221 = vector.shape_cast %220 : vector<33xf32> to vector<33x1xf32>
    %cst_106 = arith.constant 2.400000e+02 : f32
    %222 = vector.broadcast %cst_106 : f32 to vector<33x1xf32>
    %223 = arith.divf %221, %222 : vector<33x1xf32>
    %224 = vector.broadcast %223 : vector<33x1xf32> to vector<33x240xf32>
    %225 = arith.subf %219, %224 : vector<33x240xf32>
    %226 = arith.mulf %225, %225 : vector<33x240xf32>
    %cst_107 = arith.constant dense<0.000000e+00> : vector<33xf32>
    %227 = vector.multi_reduction <add>, %226, %cst_107 [1] : vector<33x240xf32> to vector<33xf32>
    %228 = vector.shape_cast %227 : vector<33xf32> to vector<33x1xf32>
    %cst_108 = arith.constant 2.400000e+02 : f32
    %229 = vector.broadcast %cst_108 : f32 to vector<33x1xf32>
    %230 = arith.divf %228, %229 : vector<33x1xf32>
    %231 = vector.broadcast %223 : vector<33x1xf32> to vector<33x240xf32>
    %232 = arith.subf %219, %231 : vector<33x240xf32>
    %cst_109 = arith.constant 9.99999974E-6 : f32
    %233 = vector.broadcast %cst_109 : f32 to vector<33x1xf32>
    %234 = arith.addf %230, %233 : vector<33x1xf32>
    %235 = math.rsqrt %234 : vector<33x1xf32>
    %236 = vector.broadcast %235 : vector<33x1xf32> to vector<33x240xf32>
    %237 = arith.mulf %232, %236 : vector<33x240xf32>
    %c7_110 = arith.constant 7 : index
    %c0_111 = arith.constant 0 : index
    %c0_112 = arith.constant 0 : index
    %238 = vector.load %arg9[%c7_110, %c0_111, %c0_112] : memref<8x33x240xf32, #tpu.memory_space<vmem>>, vector<1x33x240xf32>
    %239 = vector.shape_cast %238 : vector<1x33x240xf32> to vector<33x240xf32>
    %240 = vector.shape_cast %237 : vector<33x240xf32> to vector<1x33x240xf32>
    tpu.vector_store %arg9[%c7_110, %c0_111, %c0_112], %240 {strides = array<i32>} : memref<8x33x240xf32, #tpu.memory_space<vmem>>, vector<1x33x240xf32>,
    %cst_113 = arith.constant 0.000000e+00 : f32
    %241 = vector.broadcast %cst_113 : f32 to vector<8x32xf32>
    %c0_114 = arith.constant 0 : index
    %c0_115 = arith.constant 0 : index
    %c0_116 = arith.constant 0 : index
    %242 = vector.load %arg9[%c0_114, %c0_115, %c0_116] : memref<8x33x240xf32, #tpu.memory_space<vmem>>, vector<1x1x240xf32>
    %243 = vector.shape_cast %242 : vector<1x1x240xf32> to vector<1x240xf32>
    %c1_117 = arith.constant 1 : index
    %c0_118 = arith.constant 0 : index
    %c0_119 = arith.constant 0 : index
    %244 = vector.load %arg9[%c1_117, %c0_118, %c0_119] : memref<8x33x240xf32, #tpu.memory_space<vmem>>, vector<1x1x240xf32>
    %245 = vector.shape_cast %244 : vector<1x1x240xf32> to vector<1x240xf32>
    %c2_120 = arith.constant 2 : index
    %c0_121 = arith.constant 0 : index
    %c0_122 = arith.constant 0 : index
    %246 = vector.load %arg9[%c2_120, %c0_121, %c0_122] : memref<8x33x240xf32, #tpu.memory_space<vmem>>, vector<1x1x240xf32>
    %247 = vector.shape_cast %246 : vector<1x1x240xf32> to vector<1x240xf32>
    %c3_123 = arith.constant 3 : index
    %c0_124 = arith.constant 0 : index
    %c0_125 = arith.constant 0 : index
    %248 = vector.load %arg9[%c3_123, %c0_124, %c0_125] : memref<8x33x240xf32, #tpu.memory_space<vmem>>, vector<1x1x240xf32>
    %249 = vector.shape_cast %248 : vector<1x1x240xf32> to vector<1x240xf32>
    %c4_126 = arith.constant 4 : index
    %c0_127 = arith.constant 0 : index
    %c0_128 = arith.constant 0 : index
    %250 = vector.load %arg9[%c4_126, %c0_127, %c0_128] : memref<8x33x240xf32, #tpu.memory_space<vmem>>, vector<1x1x240xf32>
    %251 = vector.shape_cast %250 : vector<1x1x240xf32> to vector<1x240xf32>
    %c5_129 = arith.constant 5 : index
    %c0_130 = arith.constant 0 : index
    %c0_131 = arith.constant 0 : index
    %252 = vector.load %arg9[%c5_129, %c0_130, %c0_131] : memref<8x33x240xf32, #tpu.memory_space<vmem>>, vector<1x1x240xf32>
    %253 = vector.shape_cast %252 : vector<1x1x240xf32> to vector<1x240xf32>
    %c6_132 = arith.constant 6 : index
    %c0_133 = arith.constant 0 : index
    %c0_134 = arith.constant 0 : index
    %254 = vector.load %arg9[%c6_132, %c0_133, %c0_134] : memref<8x33x240xf32, #tpu.memory_space<vmem>>, vector<1x1x240xf32>
    %255 = vector.shape_cast %254 : vector<1x1x240xf32> to vector<1x240xf32>
    %c7_135 = arith.constant 7 : index
    %c0_136 = arith.constant 0 : index
    %c0_137 = arith.constant 0 : index
    %256 = vector.load %arg9[%c7_135, %c0_136, %c0_137] : memref<8x33x240xf32, #tpu.memory_space<vmem>>, vector<1x1x240xf32>
    %257 = vector.shape_cast %256 : vector<1x1x240xf32> to vector<1x240xf32>
    %258 = tpu.concatenate %243, %245, %247, %249, %251, %253, %255, %257 in 0 : vector<1x240xf32>, vector<1x240xf32>, vector<1x240xf32>, vector<1x240xf32>, vector<1x240xf32>, vector<1x240xf32>, vector<1x240xf32>, vector<1x240xf32> -> vector<8x240xf32>
    %259 = arith.truncf %258 : vector<8x240xf32> to vector<8x240xbf16>
    %c0_138 = arith.constant 0 : index
    %c0_139 = arith.constant 0 : index
    %c0_140 = arith.constant 0 : index
    %260 = vector.load %arg4[%c0_138, %c0_139, %c0_140] : memref<33x240x32xbf16, #tpu.memory_space<vmem>>, vector<1x240x32xbf16>
    %261 = vector.shape_cast %260 : vector<1x240x32xbf16> to vector<240x32xbf16>
    %cst_141 = arith.constant dense<0.000000e+00> : vector<8x32xf32>
    %262 = tpu.matmul %259, %261, %cst_141 {dimension_numbers = #tpu.dot_dimension_numbers<[1], [0], [0], [1], [0, 0, 1, 1], [], []>} : vector<8x240xbf16>, vector<240x32xbf16>, vector<8x32xf32> -> vector<8x32xf32>
    %263 = arith.addf %241, %262 : vector<8x32xf32>
    %c0_142 = arith.constant 0 : index
    %c1_143 = arith.constant 1 : index
    %c0_144 = arith.constant 0 : index
    %264 = vector.load %arg9[%c0_142, %c1_143, %c0_144] : memref<8x33x240xf32, #tpu.memory_space<vmem>>, vector<1x1x240xf32>
    %265 = vector.shape_cast %264 : vector<1x1x240xf32> to vector<1x240xf32>
    %c1_145 = arith.constant 1 : index
    %c1_146 = arith.constant 1 : index
    %c0_147 = arith.constant 0 : index
    %266 = vector.load %arg9[%c1_145, %c1_146, %c0_147] : memref<8x33x240xf32, #tpu.memory_space<vmem>>, vector<1x1x240xf32>
    %267 = vector.shape_cast %266 : vector<1x1x240xf32> to vector<1x240xf32>
    %c2_148 = arith.constant 2 : index
    %c1_149 = arith.constant 1 : index
    %c0_150 = arith.constant 0 : index
    %268 = vector.load %arg9[%c2_148, %c1_149, %c0_150] : memref<8x33x240xf32, #tpu.memory_space<vmem>>, vector<1x1x240xf32>
    %269 = vector.shape_cast %268 : vector<1x1x240xf32> to vector<1x240xf32>
    %c3_151 = arith.constant 3 : index
    %c1_152 = arith.constant 1 : index
    %c0_153 = arith.constant 0 : index
    %270 = vector.load %arg9[%c3_151, %c1_152, %c0_153] : memref<8x33x240xf32, #tpu.memory_space<vmem>>, vector<1x1x240xf32>
    %271 = vector.shape_cast %270 : vector<1x1x240xf32> to vector<1x240xf32>
    %c4_154 = arith.constant 4 : index
    %c1_155 = arith.constant 1 : index
    %c0_156 = arith.constant 0 : index
    %272 = vector.load %arg9[%c4_154, %c1_155, %c0_156] : memref<8x33x240xf32, #tpu.memory_space<vmem>>, vector<1x1x240xf32>
    %273 = vector.shape_cast %272 : vector<1x1x240xf32> to vector<1x240xf32>
    %c5_157 = arith.constant 5 : index
    %c1_158 = arith.constant 1 : index
    %c0_159 = arith.constant 0 : index
    %274 = vector.load %arg9[%c5_157, %c1_158, %c0_159] : memref<8x33x240xf32, #tpu.memory_space<vmem>>, vector<1x1x240xf32>
    %275 = vector.shape_cast %274 : vector<1x1x240xf32> to vector<1x240xf32>
    %c6_160 = arith.constant 6 : index
    %c1_161 = arith.constant 1 : index
    %c0_162 = arith.constant 0 : index
    %276 = vector.load %arg9[%c6_160, %c1_161, %c0_162] : memref<8x33x240xf32, #tpu.memory_space<vmem>>, vector<1x1x240xf32>
    %277 = vector.shape_cast %276 : vector<1x1x240xf32> to vector<1x240xf32>
    %c7_163 = arith.constant 7 : index
    %c1_164 = arith.constant 1 : index
    %c0_165 = arith.constant 0 : index
    %278 = vector.load %arg9[%c7_163, %c1_164, %c0_165] : memref<8x33x240xf32, #tpu.memory_space<vmem>>, vector<1x1x240xf32>
    %279 = vector.shape_cast %278 : vector<1x1x240xf32> to vector<1x240xf32>
    %280 = tpu.concatenate %265, %267, %269, %271, %273, %275, %277, %279 in 0 : vector<1x240xf32>, vector<1x240xf32>, vector<1x240xf32>, vector<1x240xf32>, vector<1x240xf32>, vector<1x240xf32>, vector<1x240xf32>, vector<1x240xf32> -> vector<8x240xf32>
    %281 = arith.truncf %280 : vector<8x240xf32> to vector<8x240xbf16>
    %c1_166 = arith.constant 1 : index
    %c0_167 = arith.constant 0 : index
    %c0_168 = arith.constant 0 : index
    %282 = vector.load %arg4[%c1_166, %c0_167, %c0_168] : memref<33x240x32xbf16, #tpu.memory_space<vmem>>, vector<1x240x32xbf16>
    %283 = vector.shape_cast %282 : vector<1x240x32xbf16> to vector<240x32xbf16>
    %cst_169 = arith.constant dense<0.000000e+00> : vector<8x32xf32>
    %284 = tpu.matmul %281, %283, %cst_169 {dimension_numbers = #tpu.dot_dimension_numbers<[1], [0], [0], [1], [0, 0, 1, 1], [], []>} : vector<8x240xbf16>, vector<240x32xbf16>, vector<8x32xf32> -> vector<8x32xf32>
    %285 = arith.addf %263, %284 : vector<8x32xf32>
    %c0_170 = arith.constant 0 : index
    %c2_171 = arith.constant 2 : index
    %c0_172 = arith.constant 0 : index
    %286 = vector.load %arg9[%c0_170, %c2_171, %c0_172] : memref<8x33x240xf32, #tpu.memory_space<vmem>>, vector<1x1x240xf32>
    %287 = vector.shape_cast %286 : vector<1x1x240xf32> to vector<1x240xf32>
    %c1_173 = arith.constant 1 : index
    %c2_174 = arith.constant 2 : index
    %c0_175 = arith.constant 0 : index
    %288 = vector.load %arg9[%c1_173, %c2_174, %c0_175] : memref<8x33x240xf32, #tpu.memory_space<vmem>>, vector<1x1x240xf32>
    %289 = vector.shape_cast %288 : vector<1x1x240xf32> to vector<1x240xf32>
    %c2_176 = arith.constant 2 : index
    %c2_177 = arith.constant 2 : index
    %c0_178 = arith.constant 0 : index
    %290 = vector.load %arg9[%c2_176, %c2_177, %c0_178] : memref<8x33x240xf32, #tpu.memory_space<vmem>>, vector<1x1x240xf32>
    %291 = vector.shape_cast %290 : vector<1x1x240xf32> to vector<1x240xf32>
    %c3_179 = arith.constant 3 : index
    %c2_180 = arith.constant 2 : index
    %c0_181 = arith.constant 0 : index
    %292 = vector.load %arg9[%c3_179, %c2_180, %c0_181] : memref<8x33x240xf32, #tpu.memory_space<vmem>>, vector<1x1x240xf32>
    %293 = vector.shape_cast %292 : vector<1x1x240xf32> to vector<1x240xf32>
    %c4_182 = arith.constant 4 : index
    %c2_183 = arith.constant 2 : index
    %c0_184 = arith.constant 0 : index
    %294 = vector.load %arg9[%c4_182, %c2_183, %c0_184] : memref<8x33x240xf32, #tpu.memory_space<vmem>>, vector<1x1x240xf32>
    %295 = vector.shape_cast %294 : vector<1x1x240xf32> to vector<1x240xf32>
    %c5_185 = arith.constant 5 : index
    %c2_186 = arith.constant 2 : index
    %c0_187 = arith.constant 0 : index
    %296 = vector.load %arg9[%c5_185, %c2_186, %c0_187] : memref<8x33x240xf32, #tpu.memory_space<vmem>>, vector<1x1x240xf32>
    %297 = vector.shape_cast %296 : vector<1x1x240xf32> to vector<1x240xf32>
    %c6_188 = arith.constant 6 : index
    %c2_189 = arith.constant 2 : index
    %c0_190 = arith.constant 0 : index
    %298 = vector.load %arg9[%c6_188, %c2_189, %c0_190] : memref<8x33x240xf32, #tpu.memory_space<vmem>>, vector<1x1x240xf32>
    %299 = vector.shape_cast %298 : vector<1x1x240xf32> to vector<1x240xf32>
    %c7_191 = arith.constant 7 : index
    %c2_192 = arith.constant 2 : index
    %c0_193 = arith.constant 0 : index
    %300 = vector.load %arg9[%c7_191, %c2_192, %c0_193] : memref<8x33x240xf32, #tpu.memory_space<vmem>>, vector<1x1x240xf32>
    %301 = vector.shape_cast %300 : vector<1x1x240xf32> to vector<1x240xf32>
    %302 = tpu.concatenate %287, %289, %291, %293, %295, %297, %299, %301 in 0 : vector<1x240xf32>, vector<1x240xf32>, vector<1x240xf32>, vector<1x240xf32>, vector<1x240xf32>, vector<1x240xf32>, vector<1x240xf32>, vector<1x240xf32> -> vector<8x240xf32>
    %303 = arith.truncf %302 : vector<8x240xf32> to vector<8x240xbf16>
    %c2_194 = arith.constant 2 : index
    %c0_195 = arith.constant 0 : index
    %c0_196 = arith.constant 0 : index
    %304 = vector.load %arg4[%c2_194, %c0_195, %c0_196] : memref<33x240x32xbf16, #tpu.memory_space<vmem>>, vector<1x240x32xbf16>
    %305 = vector.shape_cast %304 : vector<1x240x32xbf16> to vector<240x32xbf16>
    %cst_197 = arith.constant dense<0.000000e+00> : vector<8x32xf32>
    %306 = tpu.matmul %303, %305, %cst_197 {dimension_numbers = #tpu.dot_dimension_numbers<[1], [0], [0], [1], [0, 0, 1, 1], [], []>} : vector<8x240xbf16>, vector<240x32xbf16>, vector<8x32xf32> -> vector<8x32xf32>
    %307 = arith.addf %285, %306 : vector<8x32xf32>
    %c0_198 = arith.constant 0 : index
    %c3_199 = arith.constant 3 : index
    %c0_200 = arith.constant 0 : index
    %308 = vector.load %arg9[%c0_198, %c3_199, %c0_200] : memref<8x33x240xf32, #tpu.memory_space<vmem>>, vector<1x1x240xf32>
    %309 = vector.shape_cast %308 : vector<1x1x240xf32> to vector<1x240xf32>
    %c1_201 = arith.constant 1 : index
    %c3_202 = arith.constant 3 : index
    %c0_203 = arith.constant 0 : index
    %310 = vector.load %arg9[%c1_201, %c3_202, %c0_203] : memref<8x33x240xf32, #tpu.memory_space<vmem>>, vector<1x1x240xf32>
    %311 = vector.shape_cast %310 : vector<1x1x240xf32> to vector<1x240xf32>
    %c2_204 = arith.constant 2 : index
    %c3_205 = arith.constant 3 : index
    %c0_206 = arith.constant 0 : index
    %312 = vector.load %arg9[%c2_204, %c3_205, %c0_206] : memref<8x33x240xf32, #tpu.memory_space<vmem>>, vector<1x1x240xf32>
    %313 = vector.shape_cast %312 : vector<1x1x240xf32> to vector<1x240xf32>
    %c3_207 = arith.constant 3 : index
    %c3_208 = arith.constant 3 : index
    %c0_209 = arith.constant 0 : index
    %314 = vector.load %arg9[%c3_207, %c3_208, %c0_209] : memref<8x33x240xf32, #tpu.memory_space<vmem>>, vector<1x1x240xf32>
    %315 = vector.shape_cast %314 : vector<1x1x240xf32> to vector<1x240xf32>
    %c4_210 = arith.constant 4 : index
    %c3_211 = arith.constant 3 : index
    %c0_212 = arith.constant 0 : index
    %316 = vector.load %arg9[%c4_210, %c3_211, %c0_212] : memref<8x33x240xf32, #tpu.memory_space<vmem>>, vector<1x1x240xf32>
    %317 = vector.shape_cast %316 : vector<1x1x240xf32> to vector<1x240xf32>
    %c5_213 = arith.constant 5 : index
    %c3_214 = arith.constant 3 : index
    %c0_215 = arith.constant 0 : index
    %318 = vector.load %arg9[%c5_213, %c3_214, %c0_215] : memref<8x33x240xf32, #tpu.memory_space<vmem>>, vector<1x1x240xf32>
    %319 = vector.shape_cast %318 : vector<1x1x240xf32> to vector<1x240xf32>
    %c6_216 = arith.constant 6 : index
    %c3_217 = arith.constant 3 : index
    %c0_218 = arith.constant 0 : index
    %320 = vector.load %arg9[%c6_216, %c3_217, %c0_218] : memref<8x33x240xf32, #tpu.memory_space<vmem>>, vector<1x1x240xf32>
    %321 = vector.shape_cast %320 : vector<1x1x240xf32> to vector<1x240xf32>
    %c7_219 = arith.constant 7 : index
    %c3_220 = arith.constant 3 : index
    %c0_221 = arith.constant 0 : index
    %322 = vector.load %arg9[%c7_219, %c3_220, %c0_221] : memref<8x33x240xf32, #tpu.memory_space<vmem>>, vector<1x1x240xf32>
    %323 = vector.shape_cast %322 : vector<1x1x240xf32> to vector<1x240xf32>
    %324 = tpu.concatenate %309, %311, %313, %315, %317, %319, %321, %323 in 0 : vector<1x240xf32>, vector<1x240xf32>, vector<1x240xf32>, vector<1x240xf32>, vector<1x240xf32>, vector<1x240xf32>, vector<1x240xf32>, vector<1x240xf32> -> vector<8x240xf32>
    %325 = arith.truncf %324 : vector<8x240xf32> to vector<8x240xbf16>
    %c3_222 = arith.constant 3 : index
    %c0_223 = arith.constant 0 : index
    %c0_224 = arith.constant 0 : index
    %326 = vector.load %arg4[%c3_222, %c0_223, %c0_224] : memref<33x240x32xbf16, #tpu.memory_space<vmem>>, vector<1x240x32xbf16>
    %327 = vector.shape_cast %326 : vector<1x240x32xbf16> to vector<240x32xbf16>
    %cst_225 = arith.constant dense<0.000000e+00> : vector<8x32xf32>
    %328 = tpu.matmul %325, %327, %cst_225 {dimension_numbers = #tpu.dot_dimension_numbers<[1], [0], [0], [1], [0, 0, 1, 1], [], []>} : vector<8x240xbf16>, vector<240x32xbf16>, vector<8x32xf32> -> vector<8x32xf32>
    %329 = arith.addf %307, %328 : vector<8x32xf32>
    %c0_226 = arith.constant 0 : index
    %c4_227 = arith.constant 4 : index
    %c0_228 = arith.constant 0 : index
    %330 = vector.load %arg9[%c0_226, %c4_227, %c0_228] : memref<8x33x240xf32, #tpu.memory_space<vmem>>, vector<1x1x240xf32>
    %331 = vector.shape_cast %330 : vector<1x1x240xf32> to vector<1x240xf32>
    %c1_229 = arith.constant 1 : index
    %c4_230 = arith.constant 4 : index
    %c0_231 = arith.constant 0 : index
    %332 = vector.load %arg9[%c1_229, %c4_230, %c0_231] : memref<8x33x240xf32, #tpu.memory_space<vmem>>, vector<1x1x240xf32>
    %333 = vector.shape_cast %332 : vector<1x1x240xf32> to vector<1x240xf32>
    %c2_232 = arith.constant 2 : index
    %c4_233 = arith.constant 4 : index
    %c0_234 = arith.constant 0 : index
    %334 = vector.load %arg9[%c2_232, %c4_233, %c0_234] : memref<8x33x240xf32, #tpu.memory_space<vmem>>, vector<1x1x240xf32>
    %335 = vector.shape_cast %334 : vector<1x1x240xf32> to vector<1x240xf32>
    %c3_235 = arith.constant 3 : index
    %c4_236 = arith.constant 4 : index
    %c0_237 = arith.constant 0 : index
    %336 = vector.load %arg9[%c3_235, %c4_236, %c0_237] : memref<8x33x240xf32, #tpu.memory_space<vmem>>, vector<1x1x240xf32>
    %337 = vector.shape_cast %336 : vector<1x1x240xf32> to vector<1x240xf32>
    %c4_238 = arith.constant 4 : index
    %c4_239 = arith.constant 4 : index
    %c0_240 = arith.constant 0 : index
    %338 = vector.load %arg9[%c4_238, %c4_239, %c0_240] : memref<8x33x240xf32, #tpu.memory_space<vmem>>, vector<1x1x240xf32>
    %339 = vector.shape_cast %338 : vector<1x1x240xf32> to vector<1x240xf32>
    %c5_241 = arith.constant 5 : index
    %c4_242 = arith.constant 4 : index
    %c0_243 = arith.constant 0 : index
    %340 = vector.load %arg9[%c5_241, %c4_242, %c0_243] : memref<8x33x240xf32, #tpu.memory_space<vmem>>, vector<1x1x240xf32>
    %341 = vector.shape_cast %340 : vector<1x1x240xf32> to vector<1x240xf32>
    %c6_244 = arith.constant 6 : index
    %c4_245 = arith.constant 4 : index
    %c0_246 = arith.constant 0 : index
    %342 = vector.load %arg9[%c6_244, %c4_245, %c0_246] : memref<8x33x240xf32, #tpu.memory_space<vmem>>, vector<1x1x240xf32>
    %343 = vector.shape_cast %342 : vector<1x1x240xf32> to vector<1x240xf32>
    %c7_247 = arith.constant 7 : index
    %c4_248 = arith.constant 4 : index
    %c0_249 = arith.constant 0 : index
    %344 = vector.load %arg9[%c7_247, %c4_248, %c0_249] : memref<8x33x240xf32, #tpu.memory_space<vmem>>, vector<1x1x240xf32>
    %345 = vector.shape_cast %344 : vector<1x1x240xf32> to vector<1x240xf32>
    %346 = tpu.concatenate %331, %333, %335, %337, %339, %341, %343, %345 in 0 : vector<1x240xf32>, vector<1x240xf32>, vector<1x240xf32>, vector<1x240xf32>, vector<1x240xf32>, vector<1x240xf32>, vector<1x240xf32>, vector<1x240xf32> -> vector<8x240xf32>
    %347 = arith.truncf %346 : vector<8x240xf32> to vector<8x240xbf16>
    %c4_250 = arith.constant 4 : index
    %c0_251 = arith.constant 0 : index
    %c0_252 = arith.constant 0 : index
    %348 = vector.load %arg4[%c4_250, %c0_251, %c0_252] : memref<33x240x32xbf16, #tpu.memory_space<vmem>>, vector<1x240x32xbf16>
    %349 = vector.shape_cast %348 : vector<1x240x32xbf16> to vector<240x32xbf16>
    %cst_253 = arith.constant dense<0.000000e+00> : vector<8x32xf32>
    %350 = tpu.matmul %347, %349, %cst_253 {dimension_numbers = #tpu.dot_dimension_numbers<[1], [0], [0], [1], [0, 0, 1, 1], [], []>} : vector<8x240xbf16>, vector<240x32xbf16>, vector<8x32xf32> -> vector<8x32xf32>
    %351 = arith.addf %329, %350 : vector<8x32xf32>
    %c0_254 = arith.constant 0 : index
    %c5_255 = arith.constant 5 : index
    %c0_256 = arith.constant 0 : index
    %352 = vector.load %arg9[%c0_254, %c5_255, %c0_256] : memref<8x33x240xf32, #tpu.memory_space<vmem>>, vector<1x1x240xf32>
    %353 = vector.shape_cast %352 : vector<1x1x240xf32> to vector<1x240xf32>
    %c1_257 = arith.constant 1 : index
    %c5_258 = arith.constant 5 : index
    %c0_259 = arith.constant 0 : index
    %354 = vector.load %arg9[%c1_257, %c5_258, %c0_259] : memref<8x33x240xf32, #tpu.memory_space<vmem>>, vector<1x1x240xf32>
    %355 = vector.shape_cast %354 : vector<1x1x240xf32> to vector<1x240xf32>
    %c2_260 = arith.constant 2 : index
    %c5_261 = arith.constant 5 : index
    %c0_262 = arith.constant 0 : index
    %356 = vector.load %arg9[%c2_260, %c5_261, %c0_262] : memref<8x33x240xf32, #tpu.memory_space<vmem>>, vector<1x1x240xf32>
    %357 = vector.shape_cast %356 : vector<1x1x240xf32> to vector<1x240xf32>
    %c3_263 = arith.constant 3 : index
    %c5_264 = arith.constant 5 : index
    %c0_265 = arith.constant 0 : index
    %358 = vector.load %arg9[%c3_263, %c5_264, %c0_265] : memref<8x33x240xf32, #tpu.memory_space<vmem>>, vector<1x1x240xf32>
    %359 = vector.shape_cast %358 : vector<1x1x240xf32> to vector<1x240xf32>
    %c4_266 = arith.constant 4 : index
    %c5_267 = arith.constant 5 : index
    %c0_268 = arith.constant 0 : index
    %360 = vector.load %arg9[%c4_266, %c5_267, %c0_268] : memref<8x33x240xf32, #tpu.memory_space<vmem>>, vector<1x1x240xf32>
    %361 = vector.shape_cast %360 : vector<1x1x240xf32> to vector<1x240xf32>
    %c5_269 = arith.constant 5 : index
    %c5_270 = arith.constant 5 : index
    %c0_271 = arith.constant 0 : index
    %362 = vector.load %arg9[%c5_269, %c5_270, %c0_271] : memref<8x33x240xf32, #tpu.memory_space<vmem>>, vector<1x1x240xf32>
    %363 = vector.shape_cast %362 : vector<1x1x240xf32> to vector<1x240xf32>
    %c6_272 = arith.constant 6 : index
    %c5_273 = arith.constant 5 : index
    %c0_274 = arith.constant 0 : index
    %364 = vector.load %arg9[%c6_272, %c5_273, %c0_274] : memref<8x33x240xf32, #tpu.memory_space<vmem>>, vector<1x1x240xf32>
    %365 = vector.shape_cast %364 : vector<1x1x240xf32> to vector<1x240xf32>
    %c7_275 = arith.constant 7 : index
    %c5_276 = arith.constant 5 : index
    %c0_277 = arith.constant 0 : index
    %366 = vector.load %arg9[%c7_275, %c5_276, %c0_277] : memref<8x33x240xf32, #tpu.memory_space<vmem>>, vector<1x1x240xf32>
    %367 = vector.shape_cast %366 : vector<1x1x240xf32> to vector<1x240xf32>
    %368 = tpu.concatenate %353, %355, %357, %359, %361, %363, %365, %367 in 0 : vector<1x240xf32>, vector<1x240xf32>, vector<1x240xf32>, vector<1x240xf32>, vector<1x240xf32>, vector<1x240xf32>, vector<1x240xf32>, vector<1x240xf32> -> vector<8x240xf32>
    %369 = arith.truncf %368 : vector<8x240xf32> to vector<8x240xbf16>
    %c5_278 = arith.constant 5 : index
    %c0_279 = arith.constant 0 : index
    %c0_280 = arith.constant 0 : index
    %370 = vector.load %arg4[%c5_278, %c0_279, %c0_280] : memref<33x240x32xbf16, #tpu.memory_space<vmem>>, vector<1x240x32xbf16>
    %371 = vector.shape_cast %370 : vector<1x240x32xbf16> to vector<240x32xbf16>
    %cst_281 = arith.constant dense<0.000000e+00> : vector<8x32xf32>
    %372 = tpu.matmul %369, %371, %cst_281 {dimension_numbers = #tpu.dot_dimension_numbers<[1], [0], [0], [1], [0, 0, 1, 1], [], []>} : vector<8x240xbf16>, vector<240x32xbf16>, vector<8x32xf32> -> vector<8x32xf32>
    %373 = arith.addf %351, %372 : vector<8x32xf32>
    %c0_282 = arith.constant 0 : index
    %c6_283 = arith.constant 6 : index
    %c0_284 = arith.constant 0 : index
    %374 = vector.load %arg9[%c0_282, %c6_283, %c0_284] : memref<8x33x240xf32, #tpu.memory_space<vmem>>, vector<1x1x240xf32>
    %375 = vector.shape_cast %374 : vector<1x1x240xf32> to vector<1x240xf32>
    %c1_285 = arith.constant 1 : index
    %c6_286 = arith.constant 6 : index
    %c0_287 = arith.constant 0 : index
    %376 = vector.load %arg9[%c1_285, %c6_286, %c0_287] : memref<8x33x240xf32, #tpu.memory_space<vmem>>, vector<1x1x240xf32>
    %377 = vector.shape_cast %376 : vector<1x1x240xf32> to vector<1x240xf32>
    %c2_288 = arith.constant 2 : index
    %c6_289 = arith.constant 6 : index
    %c0_290 = arith.constant 0 : index
    %378 = vector.load %arg9[%c2_288, %c6_289, %c0_290] : memref<8x33x240xf32, #tpu.memory_space<vmem>>, vector<1x1x240xf32>
    %379 = vector.shape_cast %378 : vector<1x1x240xf32> to vector<1x240xf32>
    %c3_291 = arith.constant 3 : index
    %c6_292 = arith.constant 6 : index
    %c0_293 = arith.constant 0 : index
    %380 = vector.load %arg9[%c3_291, %c6_292, %c0_293] : memref<8x33x240xf32, #tpu.memory_space<vmem>>, vector<1x1x240xf32>
    %381 = vector.shape_cast %380 : vector<1x1x240xf32> to vector<1x240xf32>
    %c4_294 = arith.constant 4 : index
    %c6_295 = arith.constant 6 : index
    %c0_296 = arith.constant 0 : index
    %382 = vector.load %arg9[%c4_294, %c6_295, %c0_296] : memref<8x33x240xf32, #tpu.memory_space<vmem>>, vector<1x1x240xf32>
    %383 = vector.shape_cast %382 : vector<1x1x240xf32> to vector<1x240xf32>
    %c5_297 = arith.constant 5 : index
    %c6_298 = arith.constant 6 : index
    %c0_299 = arith.constant 0 : index
    %384 = vector.load %arg9[%c5_297, %c6_298, %c0_299] : memref<8x33x240xf32, #tpu.memory_space<vmem>>, vector<1x1x240xf32>
    %385 = vector.shape_cast %384 : vector<1x1x240xf32> to vector<1x240xf32>
    %c6_300 = arith.constant 6 : index
    %c6_301 = arith.constant 6 : index
    %c0_302 = arith.constant 0 : index
    %386 = vector.load %arg9[%c6_300, %c6_301, %c0_302] : memref<8x33x240xf32, #tpu.memory_space<vmem>>, vector<1x1x240xf32>
    %387 = vector.shape_cast %386 : vector<1x1x240xf32> to vector<1x240xf32>
    %c7_303 = arith.constant 7 : index
    %c6_304 = arith.constant 6 : index
    %c0_305 = arith.constant 0 : index
    %388 = vector.load %arg9[%c7_303, %c6_304, %c0_305] : memref<8x33x240xf32, #tpu.memory_space<vmem>>, vector<1x1x240xf32>
    %389 = vector.shape_cast %388 : vector<1x1x240xf32> to vector<1x240xf32>
    %390 = tpu.concatenate %375, %377, %379, %381, %383, %385, %387, %389 in 0 : vector<1x240xf32>, vector<1x240xf32>, vector<1x240xf32>, vector<1x240xf32>, vector<1x240xf32>, vector<1x240xf32>, vector<1x240xf32>, vector<1x240xf32> -> vector<8x240xf32>
    %391 = arith.truncf %390 : vector<8x240xf32> to vector<8x240xbf16>
    %c6_306 = arith.constant 6 : index
    %c0_307 = arith.constant 0 : index
    %c0_308 = arith.constant 0 : index
    %392 = vector.load %arg4[%c6_306, %c0_307, %c0_308] : memref<33x240x32xbf16, #tpu.memory_space<vmem>>, vector<1x240x32xbf16>
    %393 = vector.shape_cast %392 : vector<1x240x32xbf16> to vector<240x32xbf16>
    %cst_309 = arith.constant dense<0.000000e+00> : vector<8x32xf32>
    %394 = tpu.matmul %391, %393, %cst_309 {dimension_numbers = #tpu.dot_dimension_numbers<[1], [0], [0], [1], [0, 0, 1, 1], [], []>} : vector<8x240xbf16>, vector<240x32xbf16>, vector<8x32xf32> -> vector<8x32xf32>
    %395 = arith.addf %373, %394 : vector<8x32xf32>
    %c0_310 = arith.constant 0 : index
    %c7_311 = arith.constant 7 : index
    %c0_312 = arith.constant 0 : index
    %396 = vector.load %arg9[%c0_310, %c7_311, %c0_312] : memref<8x33x240xf32, #tpu.memory_space<vmem>>, vector<1x1x240xf32>
    %397 = vector.shape_cast %396 : vector<1x1x240xf32> to vector<1x240xf32>
    %c1_313 = arith.constant 1 : index
    %c7_314 = arith.constant 7 : index
    %c0_315 = arith.constant 0 : index
    %398 = vector.load %arg9[%c1_313, %c7_314, %c0_315] : memref<8x33x240xf32, #tpu.memory_space<vmem>>, vector<1x1x240xf32>
    %399 = vector.shape_cast %398 : vector<1x1x240xf32> to vector<1x240xf32>
    %c2_316 = arith.constant 2 : index
    %c7_317 = arith.constant 7 : index
    %c0_318 = arith.constant 0 : index
    %400 = vector.load %arg9[%c2_316, %c7_317, %c0_318] : memref<8x33x240xf32, #tpu.memory_space<vmem>>, vector<1x1x240xf32>
    %401 = vector.shape_cast %400 : vector<1x1x240xf32> to vector<1x240xf32>
    %c3_319 = arith.constant 3 : index
    %c7_320 = arith.constant 7 : index
    %c0_321 = arith.constant 0 : index
    %402 = vector.load %arg9[%c3_319, %c7_320, %c0_321] : memref<8x33x240xf32, #tpu.memory_space<vmem>>, vector<1x1x240xf32>
    %403 = vector.shape_cast %402 : vector<1x1x240xf32> to vector<1x240xf32>
    %c4_322 = arith.constant 4 : index
    %c7_323 = arith.constant 7 : index
    %c0_324 = arith.constant 0 : index
    %404 = vector.load %arg9[%c4_322, %c7_323, %c0_324] : memref<8x33x240xf32, #tpu.memory_space<vmem>>, vector<1x1x240xf32>
    %405 = vector.shape_cast %404 : vector<1x1x240xf32> to vector<1x240xf32>
    %c5_325 = arith.constant 5 : index
    %c7_326 = arith.constant 7 : index
    %c0_327 = arith.constant 0 : index
    %406 = vector.load %arg9[%c5_325, %c7_326, %c0_327] : memref<8x33x240xf32, #tpu.memory_space<vmem>>, vector<1x1x240xf32>
    %407 = vector.shape_cast %406 : vector<1x1x240xf32> to vector<1x240xf32>
    %c6_328 = arith.constant 6 : index
    %c7_329 = arith.constant 7 : index
    %c0_330 = arith.constant 0 : index
    %408 = vector.load %arg9[%c6_328, %c7_329, %c0_330] : memref<8x33x240xf32, #tpu.memory_space<vmem>>, vector<1x1x240xf32>
    %409 = vector.shape_cast %408 : vector<1x1x240xf32> to vector<1x240xf32>
    %c7_331 = arith.constant 7 : index
    %c7_332 = arith.constant 7 : index
    %c0_333 = arith.constant 0 : index
    %410 = vector.load %arg9[%c7_331, %c7_332, %c0_333] : memref<8x33x240xf32, #tpu.memory_space<vmem>>, vector<1x1x240xf32>
    %411 = vector.shape_cast %410 : vector<1x1x240xf32> to vector<1x240xf32>
    %412 = tpu.concatenate %397, %399, %401, %403, %405, %407, %409, %411 in 0 : vector<1x240xf32>, vector<1x240xf32>, vector<1x240xf32>, vector<1x240xf32>, vector<1x240xf32>, vector<1x240xf32>, vector<1x240xf32>, vector<1x240xf32> -> vector<8x240xf32>
    %413 = arith.truncf %412 : vector<8x240xf32> to vector<8x240xbf16>
    %c7_334 = arith.constant 7 : index
    %c0_335 = arith.constant 0 : index
    %c0_336 = arith.constant 0 : index
    %414 = vector.load %arg4[%c7_334, %c0_335, %c0_336] : memref<33x240x32xbf16, #tpu.memory_space<vmem>>, vector<1x240x32xbf16>
    %415 = vector.shape_cast %414 : vector<1x240x32xbf16> to vector<240x32xbf16>
    %cst_337 = arith.constant dense<0.000000e+00> : vector<8x32xf32>
    %416 = tpu.matmul %413, %415, %cst_337 {dimension_numbers = #tpu.dot_dimension_numbers<[1], [0], [0], [1], [0, 0, 1, 1], [], []>} : vector<8x240xbf16>, vector<240x32xbf16>, vector<8x32xf32> -> vector<8x32xf32>
    %417 = arith.addf %395, %416 : vector<8x32xf32>
    %c0_338 = arith.constant 0 : index
    %c8 = arith.constant 8 : index
    %c0_339 = arith.constant 0 : index
    %418 = vector.load %arg9[%c0_338, %c8, %c0_339] : memref<8x33x240xf32, #tpu.memory_space<vmem>>, vector<1x1x240xf32>
    %419 = vector.shape_cast %418 : vector<1x1x240xf32> to vector<1x240xf32>
    %c1_340 = arith.constant 1 : index
    %c8_341 = arith.constant 8 : index
    %c0_342 = arith.constant 0 : index
    %420 = vector.load %arg9[%c1_340, %c8_341, %c0_342] : memref<8x33x240xf32, #tpu.memory_space<vmem>>, vector<1x1x240xf32>
    %421 = vector.shape_cast %420 : vector<1x1x240xf32> to vector<1x240xf32>
    %c2_343 = arith.constant 2 : index
    %c8_344 = arith.constant 8 : index
    %c0_345 = arith.constant 0 : index
    %422 = vector.load %arg9[%c2_343, %c8_344, %c0_345] : memref<8x33x240xf32, #tpu.memory_space<vmem>>, vector<1x1x240xf32>
    %423 = vector.shape_cast %422 : vector<1x1x240xf32> to vector<1x240xf32>
    %c3_346 = arith.constant 3 : index
    %c8_347 = arith.constant 8 : index
    %c0_348 = arith.constant 0 : index
    %424 = vector.load %arg9[%c3_346, %c8_347, %c0_348] : memref<8x33x240xf32, #tpu.memory_space<vmem>>, vector<1x1x240xf32>
    %425 = vector.shape_cast %424 : vector<1x1x240xf32> to vector<1x240xf32>
    %c4_349 = arith.constant 4 : index
    %c8_350 = arith.constant 8 : index
    %c0_351 = arith.constant 0 : index
    %426 = vector.load %arg9[%c4_349, %c8_350, %c0_351] : memref<8x33x240xf32, #tpu.memory_space<vmem>>, vector<1x1x240xf32>
    %427 = vector.shape_cast %426 : vector<1x1x240xf32> to vector<1x240xf32>
    %c5_352 = arith.constant 5 : index
    %c8_353 = arith.constant 8 : index
    %c0_354 = arith.constant 0 : index
    %428 = vector.load %arg9[%c5_352, %c8_353, %c0_354] : memref<8x33x240xf32, #tpu.memory_space<vmem>>, vector<1x1x240xf32>
    %429 = vector.shape_cast %428 : vector<1x1x240xf32> to vector<1x240xf32>
    %c6_355 = arith.constant 6 : index
    %c8_356 = arith.constant 8 : index
    %c0_357 = arith.constant 0 : index
    %430 = vector.load %arg9[%c6_355, %c8_356, %c0_357] : memref<8x33x240xf32, #tpu.memory_space<vmem>>, vector<1x1x240xf32>
    %431 = vector.shape_cast %430 : vector<1x1x240xf32> to vector<1x240xf32>
    %c7_358 = arith.constant 7 : index
    %c8_359 = arith.constant 8 : index
    %c0_360 = arith.constant 0 : index
    %432 = vector.load %arg9[%c7_358, %c8_359, %c0_360] : memref<8x33x240xf32, #tpu.memory_space<vmem>>, vector<1x1x240xf32>
    %433 = vector.shape_cast %432 : vector<1x1x240xf32> to vector<1x240xf32>
    %434 = tpu.concatenate %419, %421, %423, %425, %427, %429, %431, %433 in 0 : vector<1x240xf32>, vector<1x240xf32>, vector<1x240xf32>, vector<1x240xf32>, vector<1x240xf32>, vector<1x240xf32>, vector<1x240xf32>, vector<1x240xf32> -> vector<8x240xf32>
    %435 = arith.truncf %434 : vector<8x240xf32> to vector<8x240xbf16>
    %c8_361 = arith.constant 8 : index
    %c0_362 = arith.constant 0 : index
    %c0_363 = arith.constant 0 : index
    %436 = vector.load %arg4[%c8_361, %c0_362, %c0_363] : memref<33x240x32xbf16, #tpu.memory_space<vmem>>, vector<1x240x32xbf16>
    %437 = vector.shape_cast %436 : vector<1x240x32xbf16> to vector<240x32xbf16>
    %cst_364 = arith.constant dense<0.000000e+00> : vector<8x32xf32>
    %438 = tpu.matmul %435, %437, %cst_364 {dimension_numbers = #tpu.dot_dimension_numbers<[1], [0], [0], [1], [0, 0, 1, 1], [], []>} : vector<8x240xbf16>, vector<240x32xbf16>, vector<8x32xf32> -> vector<8x32xf32>
    %439 = arith.addf %417, %438 : vector<8x32xf32>
    %c0_365 = arith.constant 0 : index
    %c9 = arith.constant 9 : index
    %c0_366 = arith.constant 0 : index
    %440 = vector.load %arg9[%c0_365, %c9, %c0_366] : memref<8x33x240xf32, #tpu.memory_space<vmem>>, vector<1x1x240xf32>
    %441 = vector.shape_cast %440 : vector<1x1x240xf32> to vector<1x240xf32>
    %c1_367 = arith.constant 1 : index
    %c9_368 = arith.constant 9 : index
    %c0_369 = arith.constant 0 : index
    %442 = vector.load %arg9[%c1_367, %c9_368, %c0_369] : memref<8x33x240xf32, #tpu.memory_space<vmem>>, vector<1x1x240xf32>
    %443 = vector.shape_cast %442 : vector<1x1x240xf32> to vector<1x240xf32>
    %c2_370 = arith.constant 2 : index
    %c9_371 = arith.constant 9 : index
    %c0_372 = arith.constant 0 : index
    %444 = vector.load %arg9[%c2_370, %c9_371, %c0_372] : memref<8x33x240xf32, #tpu.memory_space<vmem>>, vector<1x1x240xf32>
    %445 = vector.shape_cast %444 : vector<1x1x240xf32> to vector<1x240xf32>
    %c3_373 = arith.constant 3 : index
    %c9_374 = arith.constant 9 : index
    %c0_375 = arith.constant 0 : index
    %446 = vector.load %arg9[%c3_373, %c9_374, %c0_375] : memref<8x33x240xf32, #tpu.memory_space<vmem>>, vector<1x1x240xf32>
    %447 = vector.shape_cast %446 : vector<1x1x240xf32> to vector<1x240xf32>
    %c4_376 = arith.constant 4 : index
    %c9_377 = arith.constant 9 : index
    %c0_378 = arith.constant 0 : index
    %448 = vector.load %arg9[%c4_376, %c9_377, %c0_378] : memref<8x33x240xf32, #tpu.memory_space<vmem>>, vector<1x1x240xf32>
    %449 = vector.shape_cast %448 : vector<1x1x240xf32> to vector<1x240xf32>
    %c5_379 = arith.constant 5 : index
    %c9_380 = arith.constant 9 : index
    %c0_381 = arith.constant 0 : index
    %450 = vector.load %arg9[%c5_379, %c9_380, %c0_381] : memref<8x33x240xf32, #tpu.memory_space<vmem>>, vector<1x1x240xf32>
    %451 = vector.shape_cast %450 : vector<1x1x240xf32> to vector<1x240xf32>
    %c6_382 = arith.constant 6 : index
    %c9_383 = arith.constant 9 : index
    %c0_384 = arith.constant 0 : index
    %452 = vector.load %arg9[%c6_382, %c9_383, %c0_384] : memref<8x33x240xf32, #tpu.memory_space<vmem>>, vector<1x1x240xf32>
    %453 = vector.shape_cast %452 : vector<1x1x240xf32> to vector<1x240xf32>
    %c7_385 = arith.constant 7 : index
    %c9_386 = arith.constant 9 : index
    %c0_387 = arith.constant 0 : index
    %454 = vector.load %arg9[%c7_385, %c9_386, %c0_387] : memref<8x33x240xf32, #tpu.memory_space<vmem>>, vector<1x1x240xf32>
    %455 = vector.shape_cast %454 : vector<1x1x240xf32> to vector<1x240xf32>
    %456 = tpu.concatenate %441, %443, %445, %447, %449, %451, %453, %455 in 0 : vector<1x240xf32>, vector<1x240xf32>, vector<1x240xf32>, vector<1x240xf32>, vector<1x240xf32>, vector<1x240xf32>, vector<1x240xf32>, vector<1x240xf32> -> vector<8x240xf32>
    %457 = arith.truncf %456 : vector<8x240xf32> to vector<8x240xbf16>
    %c9_388 = arith.constant 9 : index
    %c0_389 = arith.constant 0 : index
    %c0_390 = arith.constant 0 : index
    %458 = vector.load %arg4[%c9_388, %c0_389, %c0_390] : memref<33x240x32xbf16, #tpu.memory_space<vmem>>, vector<1x240x32xbf16>
    %459 = vector.shape_cast %458 : vector<1x240x32xbf16> to vector<240x32xbf16>
    %cst_391 = arith.constant dense<0.000000e+00> : vector<8x32xf32>
    %460 = tpu.matmul %457, %459, %cst_391 {dimension_numbers = #tpu.dot_dimension_numbers<[1], [0], [0], [1], [0, 0, 1, 1], [], []>} : vector<8x240xbf16>, vector<240x32xbf16>, vector<8x32xf32> -> vector<8x32xf32>
    %461 = arith.addf %439, %460 : vector<8x32xf32>
    %c0_392 = arith.constant 0 : index
    %c10 = arith.constant 10 : index
    %c0_393 = arith.constant 0 : index
    %462 = vector.load %arg9[%c0_392, %c10, %c0_393] : memref<8x33x240xf32, #tpu.memory_space<vmem>>, vector<1x1x240xf32>
    %463 = vector.shape_cast %462 : vector<1x1x240xf32> to vector<1x240xf32>
    %c1_394 = arith.constant 1 : index
    %c10_395 = arith.constant 10 : index
    %c0_396 = arith.constant 0 : index
    %464 = vector.load %arg9[%c1_394, %c10_395, %c0_396] : memref<8x33x240xf32, #tpu.memory_space<vmem>>, vector<1x1x240xf32>
    %465 = vector.shape_cast %464 : vector<1x1x240xf32> to vector<1x240xf32>
    %c2_397 = arith.constant 2 : index
    %c10_398 = arith.constant 10 : index
    %c0_399 = arith.constant 0 : index
    %466 = vector.load %arg9[%c2_397, %c10_398, %c0_399] : memref<8x33x240xf32, #tpu.memory_space<vmem>>, vector<1x1x240xf32>
    %467 = vector.shape_cast %466 : vector<1x1x240xf32> to vector<1x240xf32>
    %c3_400 = arith.constant 3 : index
    %c10_401 = arith.constant 10 : index
    %c0_402 = arith.constant 0 : index
    %468 = vector.load %arg9[%c3_400, %c10_401, %c0_402] : memref<8x33x240xf32, #tpu.memory_space<vmem>>, vector<1x1x240xf32>
    %469 = vector.shape_cast %468 : vector<1x1x240xf32> to vector<1x240xf32>
    %c4_403 = arith.constant 4 : index
    %c10_404 = arith.constant 10 : index
    %c0_405 = arith.constant 0 : index
    %470 = vector.load %arg9[%c4_403, %c10_404, %c0_405] : memref<8x33x240xf32, #tpu.memory_space<vmem>>, vector<1x1x240xf32>
    %471 = vector.shape_cast %470 : vector<1x1x240xf32> to vector<1x240xf32>
    %c5_406 = arith.constant 5 : index
    %c10_407 = arith.constant 10 : index
    %c0_408 = arith.constant 0 : index
    %472 = vector.load %arg9[%c5_406, %c10_407, %c0_408] : memref<8x33x240xf32, #tpu.memory_space<vmem>>, vector<1x1x240xf32>
    %473 = vector.shape_cast %472 : vector<1x1x240xf32> to vector<1x240xf32>
    %c6_409 = arith.constant 6 : index
    %c10_410 = arith.constant 10 : index
    %c0_411 = arith.constant 0 : index
    %474 = vector.load %arg9[%c6_409, %c10_410, %c0_411] : memref<8x33x240xf32, #tpu.memory_space<vmem>>, vector<1x1x240xf32>
    %475 = vector.shape_cast %474 : vector<1x1x240xf32> to vector<1x240xf32>
    %c7_412 = arith.constant 7 : index
    %c10_413 = arith.constant 10 : index
    %c0_414 = arith.constant 0 : index
    %476 = vector.load %arg9[%c7_412, %c10_413, %c0_414] : memref<8x33x240xf32, #tpu.memory_space<vmem>>, vector<1x1x240xf32>
    %477 = vector.shape_cast %476 : vector<1x1x240xf32> to vector<1x240xf32>
    %478 = tpu.concatenate %463, %465, %467, %469, %471, %473, %475, %477 in 0 : vector<1x240xf32>, vector<1x240xf32>, vector<1x240xf32>, vector<1x240xf32>, vector<1x240xf32>, vector<1x240xf32>, vector<1x240xf32>, vector<1x240xf32> -> vector<8x240xf32>
    %479 = arith.truncf %478 : vector<8x240xf32> to vector<8x240xbf16>
    %c10_415 = arith.constant 10 : index
    %c0_416 = arith.constant 0 : index
    %c0_417 = arith.constant 0 : index
    %480 = vector.load %arg4[%c10_415, %c0_416, %c0_417] : memref<33x240x32xbf16, #tpu.memory_space<vmem>>, vector<1x240x32xbf16>
    %481 = vector.shape_cast %480 : vector<1x240x32xbf16> to vector<240x32xbf16>
    %cst_418 = arith.constant dense<0.000000e+00> : vector<8x32xf32>
    %482 = tpu.matmul %479, %481, %cst_418 {dimension_numbers = #tpu.dot_dimension_numbers<[1], [0], [0], [1], [0, 0, 1, 1], [], []>} : vector<8x240xbf16>, vector<240x32xbf16>, vector<8x32xf32> -> vector<8x32xf32>
    %483 = arith.addf %461, %482 : vector<8x32xf32>
    %c0_419 = arith.constant 0 : index
    %c11 = arith.constant 11 : index
    %c0_420 = arith.constant 0 : index
    %484 = vector.load %arg9[%c0_419, %c11, %c0_420] : memref<8x33x240xf32, #tpu.memory_space<vmem>>, vector<1x1x240xf32>
    %485 = vector.shape_cast %484 : vector<1x1x240xf32> to vector<1x240xf32>
    %c1_421 = arith.constant 1 : index
    %c11_422 = arith.constant 11 : index
    %c0_423 = arith.constant 0 : index
    %486 = vector.load %arg9[%c1_421, %c11_422, %c0_423] : memref<8x33x240xf32, #tpu.memory_space<vmem>>, vector<1x1x240xf32>
    %487 = vector.shape_cast %486 : vector<1x1x240xf32> to vector<1x240xf32>
    %c2_424 = arith.constant 2 : index
    %c11_425 = arith.constant 11 : index
    %c0_426 = arith.constant 0 : index
    %488 = vector.load %arg9[%c2_424, %c11_425, %c0_426] : memref<8x33x240xf32, #tpu.memory_space<vmem>>, vector<1x1x240xf32>
    %489 = vector.shape_cast %488 : vector<1x1x240xf32> to vector<1x240xf32>
    %c3_427 = arith.constant 3 : index
    %c11_428 = arith.constant 11 : index
    %c0_429 = arith.constant 0 : index
    %490 = vector.load %arg9[%c3_427, %c11_428, %c0_429] : memref<8x33x240xf32, #tpu.memory_space<vmem>>, vector<1x1x240xf32>
    %491 = vector.shape_cast %490 : vector<1x1x240xf32> to vector<1x240xf32>
    %c4_430 = arith.constant 4 : index
    %c11_431 = arith.constant 11 : index
    %c0_432 = arith.constant 0 : index
    %492 = vector.load %arg9[%c4_430, %c11_431, %c0_432] : memref<8x33x240xf32, #tpu.memory_space<vmem>>, vector<1x1x240xf32>
    %493 = vector.shape_cast %492 : vector<1x1x240xf32> to vector<1x240xf32>
    %c5_433 = arith.constant 5 : index
    %c11_434 = arith.constant 11 : index
    %c0_435 = arith.constant 0 : index
    %494 = vector.load %arg9[%c5_433, %c11_434, %c0_435] : memref<8x33x240xf32, #tpu.memory_space<vmem>>, vector<1x1x240xf32>
    %495 = vector.shape_cast %494 : vector<1x1x240xf32> to vector<1x240xf32>
    %c6_436 = arith.constant 6 : index
    %c11_437 = arith.constant 11 : index
    %c0_438 = arith.constant 0 : index
    %496 = vector.load %arg9[%c6_436, %c11_437, %c0_438] : memref<8x33x240xf32, #tpu.memory_space<vmem>>, vector<1x1x240xf32>
    %497 = vector.shape_cast %496 : vector<1x1x240xf32> to vector<1x240xf32>
    %c7_439 = arith.constant 7 : index
    %c11_440 = arith.constant 11 : index
    %c0_441 = arith.constant 0 : index
    %498 = vector.load %arg9[%c7_439, %c11_440, %c0_441] : memref<8x33x240xf32, #tpu.memory_space<vmem>>, vector<1x1x240xf32>
    %499 = vector.shape_cast %498 : vector<1x1x240xf32> to vector<1x240xf32>
    %500 = tpu.concatenate %485, %487, %489, %491, %493, %495, %497, %499 in 0 : vector<1x240xf32>, vector<1x240xf32>, vector<1x240xf32>, vector<1x240xf32>, vector<1x240xf32>, vector<1x240xf32>, vector<1x240xf32>, vector<1x240xf32> -> vector<8x240xf32>
    %501 = arith.truncf %500 : vector<8x240xf32> to vector<8x240xbf16>
    %c11_442 = arith.constant 11 : index
    %c0_443 = arith.constant 0 : index
    %c0_444 = arith.constant 0 : index
    %502 = vector.load %arg4[%c11_442, %c0_443, %c0_444] : memref<33x240x32xbf16, #tpu.memory_space<vmem>>, vector<1x240x32xbf16>
    %503 = vector.shape_cast %502 : vector<1x240x32xbf16> to vector<240x32xbf16>
    %cst_445 = arith.constant dense<0.000000e+00> : vector<8x32xf32>
    %504 = tpu.matmul %501, %503, %cst_445 {dimension_numbers = #tpu.dot_dimension_numbers<[1], [0], [0], [1], [0, 0, 1, 1], [], []>} : vector<8x240xbf16>, vector<240x32xbf16>, vector<8x32xf32> -> vector<8x32xf32>
    %505 = arith.addf %483, %504 : vector<8x32xf32>
    %c0_446 = arith.constant 0 : index
    %c12 = arith.constant 12 : index
    %c0_447 = arith.constant 0 : index
    %506 = vector.load %arg9[%c0_446, %c12, %c0_447] : memref<8x33x240xf32, #tpu.memory_space<vmem>>, vector<1x1x240xf32>
    %507 = vector.shape_cast %506 : vector<1x1x240xf32> to vector<1x240xf32>
    %c1_448 = arith.constant 1 : index
    %c12_449 = arith.constant 12 : index
    %c0_450 = arith.constant 0 : index
    %508 = vector.load %arg9[%c1_448, %c12_449, %c0_450] : memref<8x33x240xf32, #tpu.memory_space<vmem>>, vector<1x1x240xf32>
    %509 = vector.shape_cast %508 : vector<1x1x240xf32> to vector<1x240xf32>
    %c2_451 = arith.constant 2 : index
    %c12_452 = arith.constant 12 : index
    %c0_453 = arith.constant 0 : index
    %510 = vector.load %arg9[%c2_451, %c12_452, %c0_453] : memref<8x33x240xf32, #tpu.memory_space<vmem>>, vector<1x1x240xf32>
    %511 = vector.shape_cast %510 : vector<1x1x240xf32> to vector<1x240xf32>
    %c3_454 = arith.constant 3 : index
    %c12_455 = arith.constant 12 : index
    %c0_456 = arith.constant 0 : index
    %512 = vector.load %arg9[%c3_454, %c12_455, %c0_456] : memref<8x33x240xf32, #tpu.memory_space<vmem>>, vector<1x1x240xf32>
    %513 = vector.shape_cast %512 : vector<1x1x240xf32> to vector<1x240xf32>
    %c4_457 = arith.constant 4 : index
    %c12_458 = arith.constant 12 : index
    %c0_459 = arith.constant 0 : index
    %514 = vector.load %arg9[%c4_457, %c12_458, %c0_459] : memref<8x33x240xf32, #tpu.memory_space<vmem>>, vector<1x1x240xf32>
    %515 = vector.shape_cast %514 : vector<1x1x240xf32> to vector<1x240xf32>
    %c5_460 = arith.constant 5 : index
    %c12_461 = arith.constant 12 : index
    %c0_462 = arith.constant 0 : index
    %516 = vector.load %arg9[%c5_460, %c12_461, %c0_462] : memref<8x33x240xf32, #tpu.memory_space<vmem>>, vector<1x1x240xf32>
    %517 = vector.shape_cast %516 : vector<1x1x240xf32> to vector<1x240xf32>
    %c6_463 = arith.constant 6 : index
    %c12_464 = arith.constant 12 : index
    %c0_465 = arith.constant 0 : index
    %518 = vector.load %arg9[%c6_463, %c12_464, %c0_465] : memref<8x33x240xf32, #tpu.memory_space<vmem>>, vector<1x1x240xf32>
    %519 = vector.shape_cast %518 : vector<1x1x240xf32> to vector<1x240xf32>
    %c7_466 = arith.constant 7 : index
    %c12_467 = arith.constant 12 : index
    %c0_468 = arith.constant 0 : index
    %520 = vector.load %arg9[%c7_466, %c12_467, %c0_468] : memref<8x33x240xf32, #tpu.memory_space<vmem>>, vector<1x1x240xf32>
    %521 = vector.shape_cast %520 : vector<1x1x240xf32> to vector<1x240xf32>
    %522 = tpu.concatenate %507, %509, %511, %513, %515, %517, %519, %521 in 0 : vector<1x240xf32>, vector<1x240xf32>, vector<1x240xf32>, vector<1x240xf32>, vector<1x240xf32>, vector<1x240xf32>, vector<1x240xf32>, vector<1x240xf32> -> vector<8x240xf32>
    %523 = arith.truncf %522 : vector<8x240xf32> to vector<8x240xbf16>
    %c12_469 = arith.constant 12 : index
    %c0_470 = arith.constant 0 : index
    %c0_471 = arith.constant 0 : index
    %524 = vector.load %arg4[%c12_469, %c0_470, %c0_471] : memref<33x240x32xbf16, #tpu.memory_space<vmem>>, vector<1x240x32xbf16>
    %525 = vector.shape_cast %524 : vector<1x240x32xbf16> to vector<240x32xbf16>
    %cst_472 = arith.constant dense<0.000000e+00> : vector<8x32xf32>
    %526 = tpu.matmul %523, %525, %cst_472 {dimension_numbers = #tpu.dot_dimension_numbers<[1], [0], [0], [1], [0, 0, 1, 1], [], []>} : vector<8x240xbf16>, vector<240x32xbf16>, vector<8x32xf32> -> vector<8x32xf32>
    %527 = arith.addf %505, %526 : vector<8x32xf32>
    %c0_473 = arith.constant 0 : index
    %c13 = arith.constant 13 : index
    %c0_474 = arith.constant 0 : index
    %528 = vector.load %arg9[%c0_473, %c13, %c0_474] : memref<8x33x240xf32, #tpu.memory_space<vmem>>, vector<1x1x240xf32>
    %529 = vector.shape_cast %528 : vector<1x1x240xf32> to vector<1x240xf32>
    %c1_475 = arith.constant 1 : index
    %c13_476 = arith.constant 13 : index
    %c0_477 = arith.constant 0 : index
    %530 = vector.load %arg9[%c1_475, %c13_476, %c0_477] : memref<8x33x240xf32, #tpu.memory_space<vmem>>, vector<1x1x240xf32>
    %531 = vector.shape_cast %530 : vector<1x1x240xf32> to vector<1x240xf32>
    %c2_478 = arith.constant 2 : index
    %c13_479 = arith.constant 13 : index
    %c0_480 = arith.constant 0 : index
    %532 = vector.load %arg9[%c2_478, %c13_479, %c0_480] : memref<8x33x240xf32, #tpu.memory_space<vmem>>, vector<1x1x240xf32>
    %533 = vector.shape_cast %532 : vector<1x1x240xf32> to vector<1x240xf32>
    %c3_481 = arith.constant 3 : index
    %c13_482 = arith.constant 13 : index
    %c0_483 = arith.constant 0 : index
    %534 = vector.load %arg9[%c3_481, %c13_482, %c0_483] : memref<8x33x240xf32, #tpu.memory_space<vmem>>, vector<1x1x240xf32>
    %535 = vector.shape_cast %534 : vector<1x1x240xf32> to vector<1x240xf32>
    %c4_484 = arith.constant 4 : index
    %c13_485 = arith.constant 13 : index
    %c0_486 = arith.constant 0 : index
    %536 = vector.load %arg9[%c4_484, %c13_485, %c0_486] : memref<8x33x240xf32, #tpu.memory_space<vmem>>, vector<1x1x240xf32>
    %537 = vector.shape_cast %536 : vector<1x1x240xf32> to vector<1x240xf32>
    %c5_487 = arith.constant 5 : index
    %c13_488 = arith.constant 13 : index
    %c0_489 = arith.constant 0 : index
    %538 = vector.load %arg9[%c5_487, %c13_488, %c0_489] : memref<8x33x240xf32, #tpu.memory_space<vmem>>, vector<1x1x240xf32>
    %539 = vector.shape_cast %538 : vector<1x1x240xf32> to vector<1x240xf32>
    %c6_490 = arith.constant 6 : index
    %c13_491 = arith.constant 13 : index
    %c0_492 = arith.constant 0 : index
    %540 = vector.load %arg9[%c6_490, %c13_491, %c0_492] : memref<8x33x240xf32, #tpu.memory_space<vmem>>, vector<1x1x240xf32>
    %541 = vector.shape_cast %540 : vector<1x1x240xf32> to vector<1x240xf32>
    %c7_493 = arith.constant 7 : index
    %c13_494 = arith.constant 13 : index
    %c0_495 = arith.constant 0 : index
    %542 = vector.load %arg9[%c7_493, %c13_494, %c0_495] : memref<8x33x240xf32, #tpu.memory_space<vmem>>, vector<1x1x240xf32>
    %543 = vector.shape_cast %542 : vector<1x1x240xf32> to vector<1x240xf32>
    %544 = tpu.concatenate %529, %531, %533, %535, %537, %539, %541, %543 in 0 : vector<1x240xf32>, vector<1x240xf32>, vector<1x240xf32>, vector<1x240xf32>, vector<1x240xf32>, vector<1x240xf32>, vector<1x240xf32>, vector<1x240xf32> -> vector<8x240xf32>
    %545 = arith.truncf %544 : vector<8x240xf32> to vector<8x240xbf16>
    %c13_496 = arith.constant 13 : index
    %c0_497 = arith.constant 0 : index
    %c0_498 = arith.constant 0 : index
    %546 = vector.load %arg4[%c13_496, %c0_497, %c0_498] : memref<33x240x32xbf16, #tpu.memory_space<vmem>>, vector<1x240x32xbf16>
    %547 = vector.shape_cast %546 : vector<1x240x32xbf16> to vector<240x32xbf16>
    %cst_499 = arith.constant dense<0.000000e+00> : vector<8x32xf32>
    %548 = tpu.matmul %545, %547, %cst_499 {dimension_numbers = #tpu.dot_dimension_numbers<[1], [0], [0], [1], [0, 0, 1, 1], [], []>} : vector<8x240xbf16>, vector<240x32xbf16>, vector<8x32xf32> -> vector<8x32xf32>
    %549 = arith.addf %527, %548 : vector<8x32xf32>
    %c0_500 = arith.constant 0 : index
    %c14 = arith.constant 14 : index
    %c0_501 = arith.constant 0 : index
    %550 = vector.load %arg9[%c0_500, %c14, %c0_501] : memref<8x33x240xf32, #tpu.memory_space<vmem>>, vector<1x1x240xf32>
    %551 = vector.shape_cast %550 : vector<1x1x240xf32> to vector<1x240xf32>
    %c1_502 = arith.constant 1 : index
    %c14_503 = arith.constant 14 : index
    %c0_504 = arith.constant 0 : index
    %552 = vector.load %arg9[%c1_502, %c14_503, %c0_504] : memref<8x33x240xf32, #tpu.memory_space<vmem>>, vector<1x1x240xf32>
    %553 = vector.shape_cast %552 : vector<1x1x240xf32> to vector<1x240xf32>
    %c2_505 = arith.constant 2 : index
    %c14_506 = arith.constant 14 : index
    %c0_507 = arith.constant 0 : index
    %554 = vector.load %arg9[%c2_505, %c14_506, %c0_507] : memref<8x33x240xf32, #tpu.memory_space<vmem>>, vector<1x1x240xf32>
    %555 = vector.shape_cast %554 : vector<1x1x240xf32> to vector<1x240xf32>
    %c3_508 = arith.constant 3 : index
    %c14_509 = arith.constant 14 : index
    %c0_510 = arith.constant 0 : index
    %556 = vector.load %arg9[%c3_508, %c14_509, %c0_510] : memref<8x33x240xf32, #tpu.memory_space<vmem>>, vector<1x1x240xf32>
    %557 = vector.shape_cast %556 : vector<1x1x240xf32> to vector<1x240xf32>
    %c4_511 = arith.constant 4 : index
    %c14_512 = arith.constant 14 : index
    %c0_513 = arith.constant 0 : index
    %558 = vector.load %arg9[%c4_511, %c14_512, %c0_513] : memref<8x33x240xf32, #tpu.memory_space<vmem>>, vector<1x1x240xf32>
    %559 = vector.shape_cast %558 : vector<1x1x240xf32> to vector<1x240xf32>
    %c5_514 = arith.constant 5 : index
    %c14_515 = arith.constant 14 : index
    %c0_516 = arith.constant 0 : index
    %560 = vector.load %arg9[%c5_514, %c14_515, %c0_516] : memref<8x33x240xf32, #tpu.memory_space<vmem>>, vector<1x1x240xf32>
    %561 = vector.shape_cast %560 : vector<1x1x240xf32> to vector<1x240xf32>
    %c6_517 = arith.constant 6 : index
    %c14_518 = arith.constant 14 : index
    %c0_519 = arith.constant 0 : index
    %562 = vector.load %arg9[%c6_517, %c14_518, %c0_519] : memref<8x33x240xf32, #tpu.memory_space<vmem>>, vector<1x1x240xf32>
    %563 = vector.shape_cast %562 : vector<1x1x240xf32> to vector<1x240xf32>
    %c7_520 = arith.constant 7 : index
    %c14_521 = arith.constant 14 : index
    %c0_522 = arith.constant 0 : index
    %564 = vector.load %arg9[%c7_520, %c14_521, %c0_522] : memref<8x33x240xf32, #tpu.memory_space<vmem>>, vector<1x1x240xf32>
    %565 = vector.shape_cast %564 : vector<1x1x240xf32> to vector<1x240xf32>
    %566 = tpu.concatenate %551, %553, %555, %557, %559, %561, %563, %565 in 0 : vector<1x240xf32>, vector<1x240xf32>, vector<1x240xf32>, vector<1x240xf32>, vector<1x240xf32>, vector<1x240xf32>, vector<1x240xf32>, vector<1x240xf32> -> vector<8x240xf32>
    %567 = arith.truncf %566 : vector<8x240xf32> to vector<8x240xbf16>
    %c14_523 = arith.constant 14 : index
    %c0_524 = arith.constant 0 : index
    %c0_525 = arith.constant 0 : index
    %568 = vector.load %arg4[%c14_523, %c0_524, %c0_525] : memref<33x240x32xbf16, #tpu.memory_space<vmem>>, vector<1x240x32xbf16>
    %569 = vector.shape_cast %568 : vector<1x240x32xbf16> to vector<240x32xbf16>
    %cst_526 = arith.constant dense<0.000000e+00> : vector<8x32xf32>
    %570 = tpu.matmul %567, %569, %cst_526 {dimension_numbers = #tpu.dot_dimension_numbers<[1], [0], [0], [1], [0, 0, 1, 1], [], []>} : vector<8x240xbf16>, vector<240x32xbf16>, vector<8x32xf32> -> vector<8x32xf32>
    %571 = arith.addf %549, %570 : vector<8x32xf32>
    %c0_527 = arith.constant 0 : index
    %c15 = arith.constant 15 : index
    %c0_528 = arith.constant 0 : index
    %572 = vector.load %arg9[%c0_527, %c15, %c0_528] : memref<8x33x240xf32, #tpu.memory_space<vmem>>, vector<1x1x240xf32>
    %573 = vector.shape_cast %572 : vector<1x1x240xf32> to vector<1x240xf32>
    %c1_529 = arith.constant 1 : index
    %c15_530 = arith.constant 15 : index
    %c0_531 = arith.constant 0 : index
    %574 = vector.load %arg9[%c1_529, %c15_530, %c0_531] : memref<8x33x240xf32, #tpu.memory_space<vmem>>, vector<1x1x240xf32>
    %575 = vector.shape_cast %574 : vector<1x1x240xf32> to vector<1x240xf32>
    %c2_532 = arith.constant 2 : index
    %c15_533 = arith.constant 15 : index
    %c0_534 = arith.constant 0 : index
    %576 = vector.load %arg9[%c2_532, %c15_533, %c0_534] : memref<8x33x240xf32, #tpu.memory_space<vmem>>, vector<1x1x240xf32>
    %577 = vector.shape_cast %576 : vector<1x1x240xf32> to vector<1x240xf32>
    %c3_535 = arith.constant 3 : index
    %c15_536 = arith.constant 15 : index
    %c0_537 = arith.constant 0 : index
    %578 = vector.load %arg9[%c3_535, %c15_536, %c0_537] : memref<8x33x240xf32, #tpu.memory_space<vmem>>, vector<1x1x240xf32>
    %579 = vector.shape_cast %578 : vector<1x1x240xf32> to vector<1x240xf32>
    %c4_538 = arith.constant 4 : index
    %c15_539 = arith.constant 15 : index
    %c0_540 = arith.constant 0 : index
    %580 = vector.load %arg9[%c4_538, %c15_539, %c0_540] : memref<8x33x240xf32, #tpu.memory_space<vmem>>, vector<1x1x240xf32>
    %581 = vector.shape_cast %580 : vector<1x1x240xf32> to vector<1x240xf32>
    %c5_541 = arith.constant 5 : index
    %c15_542 = arith.constant 15 : index
    %c0_543 = arith.constant 0 : index
    %582 = vector.load %arg9[%c5_541, %c15_542, %c0_543] : memref<8x33x240xf32, #tpu.memory_space<vmem>>, vector<1x1x240xf32>
    %583 = vector.shape_cast %582 : vector<1x1x240xf32> to vector<1x240xf32>
    %c6_544 = arith.constant 6 : index
    %c15_545 = arith.constant 15 : index
    %c0_546 = arith.constant 0 : index
    %584 = vector.load %arg9[%c6_544, %c15_545, %c0_546] : memref<8x33x240xf32, #tpu.memory_space<vmem>>, vector<1x1x240xf32>
    %585 = vector.shape_cast %584 : vector<1x1x240xf32> to vector<1x240xf32>
    %c7_547 = arith.constant 7 : index
    %c15_548 = arith.constant 15 : index
    %c0_549 = arith.constant 0 : index
    %586 = vector.load %arg9[%c7_547, %c15_548, %c0_549] : memref<8x33x240xf32, #tpu.memory_space<vmem>>, vector<1x1x240xf32>
    %587 = vector.shape_cast %586 : vector<1x1x240xf32> to vector<1x240xf32>
    %588 = tpu.concatenate %573, %575, %577, %579, %581, %583, %585, %587 in 0 : vector<1x240xf32>, vector<1x240xf32>, vector<1x240xf32>, vector<1x240xf32>, vector<1x240xf32>, vector<1x240xf32>, vector<1x240xf32>, vector<1x240xf32> -> vector<8x240xf32>
    %589 = arith.truncf %588 : vector<8x240xf32> to vector<8x240xbf16>
    %c15_550 = arith.constant 15 : index
    %c0_551 = arith.constant 0 : index
    %c0_552 = arith.constant 0 : index
    %590 = vector.load %arg4[%c15_550, %c0_551, %c0_552] : memref<33x240x32xbf16, #tpu.memory_space<vmem>>, vector<1x240x32xbf16>
    %591 = vector.shape_cast %590 : vector<1x240x32xbf16> to vector<240x32xbf16>
    %cst_553 = arith.constant dense<0.000000e+00> : vector<8x32xf32>
    %592 = tpu.matmul %589, %591, %cst_553 {dimension_numbers = #tpu.dot_dimension_numbers<[1], [0], [0], [1], [0, 0, 1, 1], [], []>} : vector<8x240xbf16>, vector<240x32xbf16>, vector<8x32xf32> -> vector<8x32xf32>
    %593 = arith.addf %571, %592 : vector<8x32xf32>
    %c0_554 = arith.constant 0 : index
    %c16 = arith.constant 16 : index
    %c0_555 = arith.constant 0 : index
    %594 = vector.load %arg9[%c0_554, %c16, %c0_555] : memref<8x33x240xf32, #tpu.memory_space<vmem>>, vector<1x1x240xf32>
    %595 = vector.shape_cast %594 : vector<1x1x240xf32> to vector<1x240xf32>
    %c1_556 = arith.constant 1 : index
    %c16_557 = arith.constant 16 : index
    %c0_558 = arith.constant 0 : index
    %596 = vector.load %arg9[%c1_556, %c16_557, %c0_558] : memref<8x33x240xf32, #tpu.memory_space<vmem>>, vector<1x1x240xf32>
    %597 = vector.shape_cast %596 : vector<1x1x240xf32> to vector<1x240xf32>
    %c2_559 = arith.constant 2 : index
    %c16_560 = arith.constant 16 : index
    %c0_561 = arith.constant 0 : index
    %598 = vector.load %arg9[%c2_559, %c16_560, %c0_561] : memref<8x33x240xf32, #tpu.memory_space<vmem>>, vector<1x1x240xf32>
    %599 = vector.shape_cast %598 : vector<1x1x240xf32> to vector<1x240xf32>
    %c3_562 = arith.constant 3 : index
    %c16_563 = arith.constant 16 : index
    %c0_564 = arith.constant 0 : index
    %600 = vector.load %arg9[%c3_562, %c16_563, %c0_564] : memref<8x33x240xf32, #tpu.memory_space<vmem>>, vector<1x1x240xf32>
    %601 = vector.shape_cast %600 : vector<1x1x240xf32> to vector<1x240xf32>
    %c4_565 = arith.constant 4 : index
    %c16_566 = arith.constant 16 : index
    %c0_567 = arith.constant 0 : index
    %602 = vector.load %arg9[%c4_565, %c16_566, %c0_567] : memref<8x33x240xf32, #tpu.memory_space<vmem>>, vector<1x1x240xf32>
    %603 = vector.shape_cast %602 : vector<1x1x240xf32> to vector<1x240xf32>
    %c5_568 = arith.constant 5 : index
    %c16_569 = arith.constant 16 : index
    %c0_570 = arith.constant 0 : index
    %604 = vector.load %arg9[%c5_568, %c16_569, %c0_570] : memref<8x33x240xf32, #tpu.memory_space<vmem>>, vector<1x1x240xf32>
    %605 = vector.shape_cast %604 : vector<1x1x240xf32> to vector<1x240xf32>
    %c6_571 = arith.constant 6 : index
    %c16_572 = arith.constant 16 : index
    %c0_573 = arith.constant 0 : index
    %606 = vector.load %arg9[%c6_571, %c16_572, %c0_573] : memref<8x33x240xf32, #tpu.memory_space<vmem>>, vector<1x1x240xf32>
    %607 = vector.shape_cast %606 : vector<1x1x240xf32> to vector<1x240xf32>
    %c7_574 = arith.constant 7 : index
    %c16_575 = arith.constant 16 : index
    %c0_576 = arith.constant 0 : index
    %608 = vector.load %arg9[%c7_574, %c16_575, %c0_576] : memref<8x33x240xf32, #tpu.memory_space<vmem>>, vector<1x1x240xf32>
    %609 = vector.shape_cast %608 : vector<1x1x240xf32> to vector<1x240xf32>
    %610 = tpu.concatenate %595, %597, %599, %601, %603, %605, %607, %609 in 0 : vector<1x240xf32>, vector<1x240xf32>, vector<1x240xf32>, vector<1x240xf32>, vector<1x240xf32>, vector<1x240xf32>, vector<1x240xf32>, vector<1x240xf32> -> vector<8x240xf32>
    %611 = arith.truncf %610 : vector<8x240xf32> to vector<8x240xbf16>
    %c16_577 = arith.constant 16 : index
    %c0_578 = arith.constant 0 : index
    %c0_579 = arith.constant 0 : index
    %612 = vector.load %arg4[%c16_577, %c0_578, %c0_579] : memref<33x240x32xbf16, #tpu.memory_space<vmem>>, vector<1x240x32xbf16>
    %613 = vector.shape_cast %612 : vector<1x240x32xbf16> to vector<240x32xbf16>
    %cst_580 = arith.constant dense<0.000000e+00> : vector<8x32xf32>
    %614 = tpu.matmul %611, %613, %cst_580 {dimension_numbers = #tpu.dot_dimension_numbers<[1], [0], [0], [1], [0, 0, 1, 1], [], []>} : vector<8x240xbf16>, vector<240x32xbf16>, vector<8x32xf32> -> vector<8x32xf32>
    %615 = arith.addf %593, %614 : vector<8x32xf32>
    %c0_581 = arith.constant 0 : index
    %c17 = arith.constant 17 : index
    %c0_582 = arith.constant 0 : index
    %616 = vector.load %arg9[%c0_581, %c17, %c0_582] : memref<8x33x240xf32, #tpu.memory_space<vmem>>, vector<1x1x240xf32>
    %617 = vector.shape_cast %616 : vector<1x1x240xf32> to vector<1x240xf32>
    %c1_583 = arith.constant 1 : index
    %c17_584 = arith.constant 17 : index
    %c0_585 = arith.constant 0 : index
    %618 = vector.load %arg9[%c1_583, %c17_584, %c0_585] : memref<8x33x240xf32, #tpu.memory_space<vmem>>, vector<1x1x240xf32>
    %619 = vector.shape_cast %618 : vector<1x1x240xf32> to vector<1x240xf32>
    %c2_586 = arith.constant 2 : index
    %c17_587 = arith.constant 17 : index
    %c0_588 = arith.constant 0 : index
    %620 = vector.load %arg9[%c2_586, %c17_587, %c0_588] : memref<8x33x240xf32, #tpu.memory_space<vmem>>, vector<1x1x240xf32>
    %621 = vector.shape_cast %620 : vector<1x1x240xf32> to vector<1x240xf32>
    %c3_589 = arith.constant 3 : index
    %c17_590 = arith.constant 17 : index
    %c0_591 = arith.constant 0 : index
    %622 = vector.load %arg9[%c3_589, %c17_590, %c0_591] : memref<8x33x240xf32, #tpu.memory_space<vmem>>, vector<1x1x240xf32>
    %623 = vector.shape_cast %622 : vector<1x1x240xf32> to vector<1x240xf32>
    %c4_592 = arith.constant 4 : index
    %c17_593 = arith.constant 17 : index
    %c0_594 = arith.constant 0 : index
    %624 = vector.load %arg9[%c4_592, %c17_593, %c0_594] : memref<8x33x240xf32, #tpu.memory_space<vmem>>, vector<1x1x240xf32>
    %625 = vector.shape_cast %624 : vector<1x1x240xf32> to vector<1x240xf32>
    %c5_595 = arith.constant 5 : index
    %c17_596 = arith.constant 17 : index
    %c0_597 = arith.constant 0 : index
    %626 = vector.load %arg9[%c5_595, %c17_596, %c0_597] : memref<8x33x240xf32, #tpu.memory_space<vmem>>, vector<1x1x240xf32>
    %627 = vector.shape_cast %626 : vector<1x1x240xf32> to vector<1x240xf32>
    %c6_598 = arith.constant 6 : index
    %c17_599 = arith.constant 17 : index
    %c0_600 = arith.constant 0 : index
    %628 = vector.load %arg9[%c6_598, %c17_599, %c0_600] : memref<8x33x240xf32, #tpu.memory_space<vmem>>, vector<1x1x240xf32>
    %629 = vector.shape_cast %628 : vector<1x1x240xf32> to vector<1x240xf32>
    %c7_601 = arith.constant 7 : index
    %c17_602 = arith.constant 17 : index
    %c0_603 = arith.constant 0 : index
    %630 = vector.load %arg9[%c7_601, %c17_602, %c0_603] : memref<8x33x240xf32, #tpu.memory_space<vmem>>, vector<1x1x240xf32>
    %631 = vector.shape_cast %630 : vector<1x1x240xf32> to vector<1x240xf32>
    %632 = tpu.concatenate %617, %619, %621, %623, %625, %627, %629, %631 in 0 : vector<1x240xf32>, vector<1x240xf32>, vector<1x240xf32>, vector<1x240xf32>, vector<1x240xf32>, vector<1x240xf32>, vector<1x240xf32>, vector<1x240xf32> -> vector<8x240xf32>
    %633 = arith.truncf %632 : vector<8x240xf32> to vector<8x240xbf16>
    %c17_604 = arith.constant 17 : index
    %c0_605 = arith.constant 0 : index
    %c0_606 = arith.constant 0 : index
    %634 = vector.load %arg4[%c17_604, %c0_605, %c0_606] : memref<33x240x32xbf16, #tpu.memory_space<vmem>>, vector<1x240x32xbf16>
    %635 = vector.shape_cast %634 : vector<1x240x32xbf16> to vector<240x32xbf16>
    %cst_607 = arith.constant dense<0.000000e+00> : vector<8x32xf32>
    %636 = tpu.matmul %633, %635, %cst_607 {dimension_numbers = #tpu.dot_dimension_numbers<[1], [0], [0], [1], [0, 0, 1, 1], [], []>} : vector<8x240xbf16>, vector<240x32xbf16>, vector<8x32xf32> -> vector<8x32xf32>
    %637 = arith.addf %615, %636 : vector<8x32xf32>
    %c0_608 = arith.constant 0 : index
    %c18 = arith.constant 18 : index
    %c0_609 = arith.constant 0 : index
    %638 = vector.load %arg9[%c0_608, %c18, %c0_609] : memref<8x33x240xf32, #tpu.memory_space<vmem>>, vector<1x1x240xf32>
    %639 = vector.shape_cast %638 : vector<1x1x240xf32> to vector<1x240xf32>
    %c1_610 = arith.constant 1 : index
    %c18_611 = arith.constant 18 : index
    %c0_612 = arith.constant 0 : index
    %640 = vector.load %arg9[%c1_610, %c18_611, %c0_612] : memref<8x33x240xf32, #tpu.memory_space<vmem>>, vector<1x1x240xf32>
    %641 = vector.shape_cast %640 : vector<1x1x240xf32> to vector<1x240xf32>
    %c2_613 = arith.constant 2 : index
    %c18_614 = arith.constant 18 : index
    %c0_615 = arith.constant 0 : index
    %642 = vector.load %arg9[%c2_613, %c18_614, %c0_615] : memref<8x33x240xf32, #tpu.memory_space<vmem>>, vector<1x1x240xf32>
    %643 = vector.shape_cast %642 : vector<1x1x240xf32> to vector<1x240xf32>
    %c3_616 = arith.constant 3 : index
    %c18_617 = arith.constant 18 : index
    %c0_618 = arith.constant 0 : index
    %644 = vector.load %arg9[%c3_616, %c18_617, %c0_618] : memref<8x33x240xf32, #tpu.memory_space<vmem>>, vector<1x1x240xf32>
    %645 = vector.shape_cast %644 : vector<1x1x240xf32> to vector<1x240xf32>
    %c4_619 = arith.constant 4 : index
    %c18_620 = arith.constant 18 : index
    %c0_621 = arith.constant 0 : index
    %646 = vector.load %arg9[%c4_619, %c18_620, %c0_621] : memref<8x33x240xf32, #tpu.memory_space<vmem>>, vector<1x1x240xf32>
    %647 = vector.shape_cast %646 : vector<1x1x240xf32> to vector<1x240xf32>
    %c5_622 = arith.constant 5 : index
    %c18_623 = arith.constant 18 : index
    %c0_624 = arith.constant 0 : index
    %648 = vector.load %arg9[%c5_622, %c18_623, %c0_624] : memref<8x33x240xf32, #tpu.memory_space<vmem>>, vector<1x1x240xf32>
    %649 = vector.shape_cast %648 : vector<1x1x240xf32> to vector<1x240xf32>
    %c6_625 = arith.constant 6 : index
    %c18_626 = arith.constant 18 : index
    %c0_627 = arith.constant 0 : index
    %650 = vector.load %arg9[%c6_625, %c18_626, %c0_627] : memref<8x33x240xf32, #tpu.memory_space<vmem>>, vector<1x1x240xf32>
    %651 = vector.shape_cast %650 : vector<1x1x240xf32> to vector<1x240xf32>
    %c7_628 = arith.constant 7 : index
    %c18_629 = arith.constant 18 : index
    %c0_630 = arith.constant 0 : index
    %652 = vector.load %arg9[%c7_628, %c18_629, %c0_630] : memref<8x33x240xf32, #tpu.memory_space<vmem>>, vector<1x1x240xf32>
    %653 = vector.shape_cast %652 : vector<1x1x240xf32> to vector<1x240xf32>
    %654 = tpu.concatenate %639, %641, %643, %645, %647, %649, %651, %653 in 0 : vector<1x240xf32>, vector<1x240xf32>, vector<1x240xf32>, vector<1x240xf32>, vector<1x240xf32>, vector<1x240xf32>, vector<1x240xf32>, vector<1x240xf32> -> vector<8x240xf32>
    %655 = arith.truncf %654 : vector<8x240xf32> to vector<8x240xbf16>
    %c18_631 = arith.constant 18 : index
    %c0_632 = arith.constant 0 : index
    %c0_633 = arith.constant 0 : index
    %656 = vector.load %arg4[%c18_631, %c0_632, %c0_633] : memref<33x240x32xbf16, #tpu.memory_space<vmem>>, vector<1x240x32xbf16>
    %657 = vector.shape_cast %656 : vector<1x240x32xbf16> to vector<240x32xbf16>
    %cst_634 = arith.constant dense<0.000000e+00> : vector<8x32xf32>
    %658 = tpu.matmul %655, %657, %cst_634 {dimension_numbers = #tpu.dot_dimension_numbers<[1], [0], [0], [1], [0, 0, 1, 1], [], []>} : vector<8x240xbf16>, vector<240x32xbf16>, vector<8x32xf32> -> vector<8x32xf32>
    %659 = arith.addf %637, %658 : vector<8x32xf32>
    %c0_635 = arith.constant 0 : index
    %c19 = arith.constant 19 : index
    %c0_636 = arith.constant 0 : index
    %660 = vector.load %arg9[%c0_635, %c19, %c0_636] : memref<8x33x240xf32, #tpu.memory_space<vmem>>, vector<1x1x240xf32>
    %661 = vector.shape_cast %660 : vector<1x1x240xf32> to vector<1x240xf32>
    %c1_637 = arith.constant 1 : index
    %c19_638 = arith.constant 19 : index
    %c0_639 = arith.constant 0 : index
    %662 = vector.load %arg9[%c1_637, %c19_638, %c0_639] : memref<8x33x240xf32, #tpu.memory_space<vmem>>, vector<1x1x240xf32>
    %663 = vector.shape_cast %662 : vector<1x1x240xf32> to vector<1x240xf32>
    %c2_640 = arith.constant 2 : index
    %c19_641 = arith.constant 19 : index
    %c0_642 = arith.constant 0 : index
    %664 = vector.load %arg9[%c2_640, %c19_641, %c0_642] : memref<8x33x240xf32, #tpu.memory_space<vmem>>, vector<1x1x240xf32>
    %665 = vector.shape_cast %664 : vector<1x1x240xf32> to vector<1x240xf32>
    %c3_643 = arith.constant 3 : index
    %c19_644 = arith.constant 19 : index
    %c0_645 = arith.constant 0 : index
    %666 = vector.load %arg9[%c3_643, %c19_644, %c0_645] : memref<8x33x240xf32, #tpu.memory_space<vmem>>, vector<1x1x240xf32>
    %667 = vector.shape_cast %666 : vector<1x1x240xf32> to vector<1x240xf32>
    %c4_646 = arith.constant 4 : index
    %c19_647 = arith.constant 19 : index
    %c0_648 = arith.constant 0 : index
    %668 = vector.load %arg9[%c4_646, %c19_647, %c0_648] : memref<8x33x240xf32, #tpu.memory_space<vmem>>, vector<1x1x240xf32>
    %669 = vector.shape_cast %668 : vector<1x1x240xf32> to vector<1x240xf32>
    %c5_649 = arith.constant 5 : index
    %c19_650 = arith.constant 19 : index
    %c0_651 = arith.constant 0 : index
    %670 = vector.load %arg9[%c5_649, %c19_650, %c0_651] : memref<8x33x240xf32, #tpu.memory_space<vmem>>, vector<1x1x240xf32>
    %671 = vector.shape_cast %670 : vector<1x1x240xf32> to vector<1x240xf32>
    %c6_652 = arith.constant 6 : index
    %c19_653 = arith.constant 19 : index
    %c0_654 = arith.constant 0 : index
    %672 = vector.load %arg9[%c6_652, %c19_653, %c0_654] : memref<8x33x240xf32, #tpu.memory_space<vmem>>, vector<1x1x240xf32>
    %673 = vector.shape_cast %672 : vector<1x1x240xf32> to vector<1x240xf32>
    %c7_655 = arith.constant 7 : index
    %c19_656 = arith.constant 19 : index
    %c0_657 = arith.constant 0 : index
    %674 = vector.load %arg9[%c7_655, %c19_656, %c0_657] : memref<8x33x240xf32, #tpu.memory_space<vmem>>, vector<1x1x240xf32>
    %675 = vector.shape_cast %674 : vector<1x1x240xf32> to vector<1x240xf32>
    %676 = tpu.concatenate %661, %663, %665, %667, %669, %671, %673, %675 in 0 : vector<1x240xf32>, vector<1x240xf32>, vector<1x240xf32>, vector<1x240xf32>, vector<1x240xf32>, vector<1x240xf32>, vector<1x240xf32>, vector<1x240xf32> -> vector<8x240xf32>
    %677 = arith.truncf %676 : vector<8x240xf32> to vector<8x240xbf16>
    %c19_658 = arith.constant 19 : index
    %c0_659 = arith.constant 0 : index
    %c0_660 = arith.constant 0 : index
    %678 = vector.load %arg4[%c19_658, %c0_659, %c0_660] : memref<33x240x32xbf16, #tpu.memory_space<vmem>>, vector<1x240x32xbf16>
    %679 = vector.shape_cast %678 : vector<1x240x32xbf16> to vector<240x32xbf16>
    %cst_661 = arith.constant dense<0.000000e+00> : vector<8x32xf32>
    %680 = tpu.matmul %677, %679, %cst_661 {dimension_numbers = #tpu.dot_dimension_numbers<[1], [0], [0], [1], [0, 0, 1, 1], [], []>} : vector<8x240xbf16>, vector<240x32xbf16>, vector<8x32xf32> -> vector<8x32xf32>
    %681 = arith.addf %659, %680 : vector<8x32xf32>
    %c0_662 = arith.constant 0 : index
    %c20 = arith.constant 20 : index
    %c0_663 = arith.constant 0 : index
    %682 = vector.load %arg9[%c0_662, %c20, %c0_663] : memref<8x33x240xf32, #tpu.memory_space<vmem>>, vector<1x1x240xf32>
    %683 = vector.shape_cast %682 : vector<1x1x240xf32> to vector<1x240xf32>
    %c1_664 = arith.constant 1 : index
    %c20_665 = arith.constant 20 : index
    %c0_666 = arith.constant 0 : index
    %684 = vector.load %arg9[%c1_664, %c20_665, %c0_666] : memref<8x33x240xf32, #tpu.memory_space<vmem>>, vector<1x1x240xf32>
    %685 = vector.shape_cast %684 : vector<1x1x240xf32> to vector<1x240xf32>
    %c2_667 = arith.constant 2 : index
    %c20_668 = arith.constant 20 : index
    %c0_669 = arith.constant 0 : index
    %686 = vector.load %arg9[%c2_667, %c20_668, %c0_669] : memref<8x33x240xf32, #tpu.memory_space<vmem>>, vector<1x1x240xf32>
    %687 = vector.shape_cast %686 : vector<1x1x240xf32> to vector<1x240xf32>
    %c3_670 = arith.constant 3 : index
    %c20_671 = arith.constant 20 : index
    %c0_672 = arith.constant 0 : index
    %688 = vector.load %arg9[%c3_670, %c20_671, %c0_672] : memref<8x33x240xf32, #tpu.memory_space<vmem>>, vector<1x1x240xf32>
    %689 = vector.shape_cast %688 : vector<1x1x240xf32> to vector<1x240xf32>
    %c4_673 = arith.constant 4 : index
    %c20_674 = arith.constant 20 : index
    %c0_675 = arith.constant 0 : index
    %690 = vector.load %arg9[%c4_673, %c20_674, %c0_675] : memref<8x33x240xf32, #tpu.memory_space<vmem>>, vector<1x1x240xf32>
    %691 = vector.shape_cast %690 : vector<1x1x240xf32> to vector<1x240xf32>
    %c5_676 = arith.constant 5 : index
    %c20_677 = arith.constant 20 : index
    %c0_678 = arith.constant 0 : index
    %692 = vector.load %arg9[%c5_676, %c20_677, %c0_678] : memref<8x33x240xf32, #tpu.memory_space<vmem>>, vector<1x1x240xf32>
    %693 = vector.shape_cast %692 : vector<1x1x240xf32> to vector<1x240xf32>
    %c6_679 = arith.constant 6 : index
    %c20_680 = arith.constant 20 : index
    %c0_681 = arith.constant 0 : index
    %694 = vector.load %arg9[%c6_679, %c20_680, %c0_681] : memref<8x33x240xf32, #tpu.memory_space<vmem>>, vector<1x1x240xf32>
    %695 = vector.shape_cast %694 : vector<1x1x240xf32> to vector<1x240xf32>
    %c7_682 = arith.constant 7 : index
    %c20_683 = arith.constant 20 : index
    %c0_684 = arith.constant 0 : index
    %696 = vector.load %arg9[%c7_682, %c20_683, %c0_684] : memref<8x33x240xf32, #tpu.memory_space<vmem>>, vector<1x1x240xf32>
    %697 = vector.shape_cast %696 : vector<1x1x240xf32> to vector<1x240xf32>
    %698 = tpu.concatenate %683, %685, %687, %689, %691, %693, %695, %697 in 0 : vector<1x240xf32>, vector<1x240xf32>, vector<1x240xf32>, vector<1x240xf32>, vector<1x240xf32>, vector<1x240xf32>, vector<1x240xf32>, vector<1x240xf32> -> vector<8x240xf32>
    %699 = arith.truncf %698 : vector<8x240xf32> to vector<8x240xbf16>
    %c20_685 = arith.constant 20 : index
    %c0_686 = arith.constant 0 : index
    %c0_687 = arith.constant 0 : index
    %700 = vector.load %arg4[%c20_685, %c0_686, %c0_687] : memref<33x240x32xbf16, #tpu.memory_space<vmem>>, vector<1x240x32xbf16>
    %701 = vector.shape_cast %700 : vector<1x240x32xbf16> to vector<240x32xbf16>
    %cst_688 = arith.constant dense<0.000000e+00> : vector<8x32xf32>
    %702 = tpu.matmul %699, %701, %cst_688 {dimension_numbers = #tpu.dot_dimension_numbers<[1], [0], [0], [1], [0, 0, 1, 1], [], []>} : vector<8x240xbf16>, vector<240x32xbf16>, vector<8x32xf32> -> vector<8x32xf32>
    %703 = arith.addf %681, %702 : vector<8x32xf32>
    %c0_689 = arith.constant 0 : index
    %c21 = arith.constant 21 : index
    %c0_690 = arith.constant 0 : index
    %704 = vector.load %arg9[%c0_689, %c21, %c0_690] : memref<8x33x240xf32, #tpu.memory_space<vmem>>, vector<1x1x240xf32>
    %705 = vector.shape_cast %704 : vector<1x1x240xf32> to vector<1x240xf32>
    %c1_691 = arith.constant 1 : index
    %c21_692 = arith.constant 21 : index
    %c0_693 = arith.constant 0 : index
    %706 = vector.load %arg9[%c1_691, %c21_692, %c0_693] : memref<8x33x240xf32, #tpu.memory_space<vmem>>, vector<1x1x240xf32>
    %707 = vector.shape_cast %706 : vector<1x1x240xf32> to vector<1x240xf32>
    %c2_694 = arith.constant 2 : index
    %c21_695 = arith.constant 21 : index
    %c0_696 = arith.constant 0 : index
    %708 = vector.load %arg9[%c2_694, %c21_695, %c0_696] : memref<8x33x240xf32, #tpu.memory_space<vmem>>, vector<1x1x240xf32>
    %709 = vector.shape_cast %708 : vector<1x1x240xf32> to vector<1x240xf32>
    %c3_697 = arith.constant 3 : index
    %c21_698 = arith.constant 21 : index
    %c0_699 = arith.constant 0 : index
    %710 = vector.load %arg9[%c3_697, %c21_698, %c0_699] : memref<8x33x240xf32, #tpu.memory_space<vmem>>, vector<1x1x240xf32>
    %711 = vector.shape_cast %710 : vector<1x1x240xf32> to vector<1x240xf32>
    %c4_700 = arith.constant 4 : index
    %c21_701 = arith.constant 21 : index
    %c0_702 = arith.constant 0 : index
    %712 = vector.load %arg9[%c4_700, %c21_701, %c0_702] : memref<8x33x240xf32, #tpu.memory_space<vmem>>, vector<1x1x240xf32>
    %713 = vector.shape_cast %712 : vector<1x1x240xf32> to vector<1x240xf32>
    %c5_703 = arith.constant 5 : index
    %c21_704 = arith.constant 21 : index
    %c0_705 = arith.constant 0 : index
    %714 = vector.load %arg9[%c5_703, %c21_704, %c0_705] : memref<8x33x240xf32, #tpu.memory_space<vmem>>, vector<1x1x240xf32>
    %715 = vector.shape_cast %714 : vector<1x1x240xf32> to vector<1x240xf32>
    %c6_706 = arith.constant 6 : index
    %c21_707 = arith.constant 21 : index
    %c0_708 = arith.constant 0 : index
    %716 = vector.load %arg9[%c6_706, %c21_707, %c0_708] : memref<8x33x240xf32, #tpu.memory_space<vmem>>, vector<1x1x240xf32>
    %717 = vector.shape_cast %716 : vector<1x1x240xf32> to vector<1x240xf32>
    %c7_709 = arith.constant 7 : index
    %c21_710 = arith.constant 21 : index
    %c0_711 = arith.constant 0 : index
    %718 = vector.load %arg9[%c7_709, %c21_710, %c0_711] : memref<8x33x240xf32, #tpu.memory_space<vmem>>, vector<1x1x240xf32>
    %719 = vector.shape_cast %718 : vector<1x1x240xf32> to vector<1x240xf32>
    %720 = tpu.concatenate %705, %707, %709, %711, %713, %715, %717, %719 in 0 : vector<1x240xf32>, vector<1x240xf32>, vector<1x240xf32>, vector<1x240xf32>, vector<1x240xf32>, vector<1x240xf32>, vector<1x240xf32>, vector<1x240xf32> -> vector<8x240xf32>
    %721 = arith.truncf %720 : vector<8x240xf32> to vector<8x240xbf16>
    %c21_712 = arith.constant 21 : index
    %c0_713 = arith.constant 0 : index
    %c0_714 = arith.constant 0 : index
    %722 = vector.load %arg4[%c21_712, %c0_713, %c0_714] : memref<33x240x32xbf16, #tpu.memory_space<vmem>>, vector<1x240x32xbf16>
    %723 = vector.shape_cast %722 : vector<1x240x32xbf16> to vector<240x32xbf16>
    %cst_715 = arith.constant dense<0.000000e+00> : vector<8x32xf32>
    %724 = tpu.matmul %721, %723, %cst_715 {dimension_numbers = #tpu.dot_dimension_numbers<[1], [0], [0], [1], [0, 0, 1, 1], [], []>} : vector<8x240xbf16>, vector<240x32xbf16>, vector<8x32xf32> -> vector<8x32xf32>
    %725 = arith.addf %703, %724 : vector<8x32xf32>
    %c0_716 = arith.constant 0 : index
    %c22 = arith.constant 22 : index
    %c0_717 = arith.constant 0 : index
    %726 = vector.load %arg9[%c0_716, %c22, %c0_717] : memref<8x33x240xf32, #tpu.memory_space<vmem>>, vector<1x1x240xf32>
    %727 = vector.shape_cast %726 : vector<1x1x240xf32> to vector<1x240xf32>
    %c1_718 = arith.constant 1 : index
    %c22_719 = arith.constant 22 : index
    %c0_720 = arith.constant 0 : index
    %728 = vector.load %arg9[%c1_718, %c22_719, %c0_720] : memref<8x33x240xf32, #tpu.memory_space<vmem>>, vector<1x1x240xf32>
    %729 = vector.shape_cast %728 : vector<1x1x240xf32> to vector<1x240xf32>
    %c2_721 = arith.constant 2 : index
    %c22_722 = arith.constant 22 : index
    %c0_723 = arith.constant 0 : index
    %730 = vector.load %arg9[%c2_721, %c22_722, %c0_723] : memref<8x33x240xf32, #tpu.memory_space<vmem>>, vector<1x1x240xf32>
    %731 = vector.shape_cast %730 : vector<1x1x240xf32> to vector<1x240xf32>
    %c3_724 = arith.constant 3 : index
    %c22_725 = arith.constant 22 : index
    %c0_726 = arith.constant 0 : index
    %732 = vector.load %arg9[%c3_724, %c22_725, %c0_726] : memref<8x33x240xf32, #tpu.memory_space<vmem>>, vector<1x1x240xf32>
    %733 = vector.shape_cast %732 : vector<1x1x240xf32> to vector<1x240xf32>
    %c4_727 = arith.constant 4 : index
    %c22_728 = arith.constant 22 : index
    %c0_729 = arith.constant 0 : index
    %734 = vector.load %arg9[%c4_727, %c22_728, %c0_729] : memref<8x33x240xf32, #tpu.memory_space<vmem>>, vector<1x1x240xf32>
    %735 = vector.shape_cast %734 : vector<1x1x240xf32> to vector<1x240xf32>
    %c5_730 = arith.constant 5 : index
    %c22_731 = arith.constant 22 : index
    %c0_732 = arith.constant 0 : index
    %736 = vector.load %arg9[%c5_730, %c22_731, %c0_732] : memref<8x33x240xf32, #tpu.memory_space<vmem>>, vector<1x1x240xf32>
    %737 = vector.shape_cast %736 : vector<1x1x240xf32> to vector<1x240xf32>
    %c6_733 = arith.constant 6 : index
    %c22_734 = arith.constant 22 : index
    %c0_735 = arith.constant 0 : index
    %738 = vector.load %arg9[%c6_733, %c22_734, %c0_735] : memref<8x33x240xf32, #tpu.memory_space<vmem>>, vector<1x1x240xf32>
    %739 = vector.shape_cast %738 : vector<1x1x240xf32> to vector<1x240xf32>
    %c7_736 = arith.constant 7 : index
    %c22_737 = arith.constant 22 : index
    %c0_738 = arith.constant 0 : index
    %740 = vector.load %arg9[%c7_736, %c22_737, %c0_738] : memref<8x33x240xf32, #tpu.memory_space<vmem>>, vector<1x1x240xf32>
    %741 = vector.shape_cast %740 : vector<1x1x240xf32> to vector<1x240xf32>
    %742 = tpu.concatenate %727, %729, %731, %733, %735, %737, %739, %741 in 0 : vector<1x240xf32>, vector<1x240xf32>, vector<1x240xf32>, vector<1x240xf32>, vector<1x240xf32>, vector<1x240xf32>, vector<1x240xf32>, vector<1x240xf32> -> vector<8x240xf32>
    %743 = arith.truncf %742 : vector<8x240xf32> to vector<8x240xbf16>
    %c22_739 = arith.constant 22 : index
    %c0_740 = arith.constant 0 : index
    %c0_741 = arith.constant 0 : index
    %744 = vector.load %arg4[%c22_739, %c0_740, %c0_741] : memref<33x240x32xbf16, #tpu.memory_space<vmem>>, vector<1x240x32xbf16>
    %745 = vector.shape_cast %744 : vector<1x240x32xbf16> to vector<240x32xbf16>
    %cst_742 = arith.constant dense<0.000000e+00> : vector<8x32xf32>
    %746 = tpu.matmul %743, %745, %cst_742 {dimension_numbers = #tpu.dot_dimension_numbers<[1], [0], [0], [1], [0, 0, 1, 1], [], []>} : vector<8x240xbf16>, vector<240x32xbf16>, vector<8x32xf32> -> vector<8x32xf32>
    %747 = arith.addf %725, %746 : vector<8x32xf32>
    %c0_743 = arith.constant 0 : index
    %c23 = arith.constant 23 : index
    %c0_744 = arith.constant 0 : index
    %748 = vector.load %arg9[%c0_743, %c23, %c0_744] : memref<8x33x240xf32, #tpu.memory_space<vmem>>, vector<1x1x240xf32>
    %749 = vector.shape_cast %748 : vector<1x1x240xf32> to vector<1x240xf32>
    %c1_745 = arith.constant 1 : index
    %c23_746 = arith.constant 23 : index
    %c0_747 = arith.constant 0 : index
    %750 = vector.load %arg9[%c1_745, %c23_746, %c0_747] : memref<8x33x240xf32, #tpu.memory_space<vmem>>, vector<1x1x240xf32>
    %751 = vector.shape_cast %750 : vector<1x1x240xf32> to vector<1x240xf32>
    %c2_748 = arith.constant 2 : index
    %c23_749 = arith.constant 23 : index
    %c0_750 = arith.constant 0 : index
    %752 = vector.load %arg9[%c2_748, %c23_749, %c0_750] : memref<8x33x240xf32, #tpu.memory_space<vmem>>, vector<1x1x240xf32>
    %753 = vector.shape_cast %752 : vector<1x1x240xf32> to vector<1x240xf32>
    %c3_751 = arith.constant 3 : index
    %c23_752 = arith.constant 23 : index
    %c0_753 = arith.constant 0 : index
    %754 = vector.load %arg9[%c3_751, %c23_752, %c0_753] : memref<8x33x240xf32, #tpu.memory_space<vmem>>, vector<1x1x240xf32>
    %755 = vector.shape_cast %754 : vector<1x1x240xf32> to vector<1x240xf32>
    %c4_754 = arith.constant 4 : index
    %c23_755 = arith.constant 23 : index
    %c0_756 = arith.constant 0 : index
    %756 = vector.load %arg9[%c4_754, %c23_755, %c0_756] : memref<8x33x240xf32, #tpu.memory_space<vmem>>, vector<1x1x240xf32>
    %757 = vector.shape_cast %756 : vector<1x1x240xf32> to vector<1x240xf32>
    %c5_757 = arith.constant 5 : index
    %c23_758 = arith.constant 23 : index
    %c0_759 = arith.constant 0 : index
    %758 = vector.load %arg9[%c5_757, %c23_758, %c0_759] : memref<8x33x240xf32, #tpu.memory_space<vmem>>, vector<1x1x240xf32>
    %759 = vector.shape_cast %758 : vector<1x1x240xf32> to vector<1x240xf32>
    %c6_760 = arith.constant 6 : index
    %c23_761 = arith.constant 23 : index
    %c0_762 = arith.constant 0 : index
    %760 = vector.load %arg9[%c6_760, %c23_761, %c0_762] : memref<8x33x240xf32, #tpu.memory_space<vmem>>, vector<1x1x240xf32>
    %761 = vector.shape_cast %760 : vector<1x1x240xf32> to vector<1x240xf32>
    %c7_763 = arith.constant 7 : index
    %c23_764 = arith.constant 23 : index
    %c0_765 = arith.constant 0 : index
    %762 = vector.load %arg9[%c7_763, %c23_764, %c0_765] : memref<8x33x240xf32, #tpu.memory_space<vmem>>, vector<1x1x240xf32>
    %763 = vector.shape_cast %762 : vector<1x1x240xf32> to vector<1x240xf32>
    %764 = tpu.concatenate %749, %751, %753, %755, %757, %759, %761, %763 in 0 : vector<1x240xf32>, vector<1x240xf32>, vector<1x240xf32>, vector<1x240xf32>, vector<1x240xf32>, vector<1x240xf32>, vector<1x240xf32>, vector<1x240xf32> -> vector<8x240xf32>
    %765 = arith.truncf %764 : vector<8x240xf32> to vector<8x240xbf16>
    %c23_766 = arith.constant 23 : index
    %c0_767 = arith.constant 0 : index
    %c0_768 = arith.constant 0 : index
    %766 = vector.load %arg4[%c23_766, %c0_767, %c0_768] : memref<33x240x32xbf16, #tpu.memory_space<vmem>>, vector<1x240x32xbf16>
    %767 = vector.shape_cast %766 : vector<1x240x32xbf16> to vector<240x32xbf16>
    %cst_769 = arith.constant dense<0.000000e+00> : vector<8x32xf32>
    %768 = tpu.matmul %765, %767, %cst_769 {dimension_numbers = #tpu.dot_dimension_numbers<[1], [0], [0], [1], [0, 0, 1, 1], [], []>} : vector<8x240xbf16>, vector<240x32xbf16>, vector<8x32xf32> -> vector<8x32xf32>
    %769 = arith.addf %747, %768 : vector<8x32xf32>
    %c0_770 = arith.constant 0 : index
    %c24 = arith.constant 24 : index
    %c0_771 = arith.constant 0 : index
    %770 = vector.load %arg9[%c0_770, %c24, %c0_771] : memref<8x33x240xf32, #tpu.memory_space<vmem>>, vector<1x1x240xf32>
    %771 = vector.shape_cast %770 : vector<1x1x240xf32> to vector<1x240xf32>
    %c1_772 = arith.constant 1 : index
    %c24_773 = arith.constant 24 : index
    %c0_774 = arith.constant 0 : index
    %772 = vector.load %arg9[%c1_772, %c24_773, %c0_774] : memref<8x33x240xf32, #tpu.memory_space<vmem>>, vector<1x1x240xf32>
    %773 = vector.shape_cast %772 : vector<1x1x240xf32> to vector<1x240xf32>
    %c2_775 = arith.constant 2 : index
    %c24_776 = arith.constant 24 : index
    %c0_777 = arith.constant 0 : index
    %774 = vector.load %arg9[%c2_775, %c24_776, %c0_777] : memref<8x33x240xf32, #tpu.memory_space<vmem>>, vector<1x1x240xf32>
    %775 = vector.shape_cast %774 : vector<1x1x240xf32> to vector<1x240xf32>
    %c3_778 = arith.constant 3 : index
    %c24_779 = arith.constant 24 : index
    %c0_780 = arith.constant 0 : index
    %776 = vector.load %arg9[%c3_778, %c24_779, %c0_780] : memref<8x33x240xf32, #tpu.memory_space<vmem>>, vector<1x1x240xf32>
    %777 = vector.shape_cast %776 : vector<1x1x240xf32> to vector<1x240xf32>
    %c4_781 = arith.constant 4 : index
    %c24_782 = arith.constant 24 : index
    %c0_783 = arith.constant 0 : index
    %778 = vector.load %arg9[%c4_781, %c24_782, %c0_783] : memref<8x33x240xf32, #tpu.memory_space<vmem>>, vector<1x1x240xf32>
    %779 = vector.shape_cast %778 : vector<1x1x240xf32> to vector<1x240xf32>
    %c5_784 = arith.constant 5 : index
    %c24_785 = arith.constant 24 : index
    %c0_786 = arith.constant 0 : index
    %780 = vector.load %arg9[%c5_784, %c24_785, %c0_786] : memref<8x33x240xf32, #tpu.memory_space<vmem>>, vector<1x1x240xf32>
    %781 = vector.shape_cast %780 : vector<1x1x240xf32> to vector<1x240xf32>
    %c6_787 = arith.constant 6 : index
    %c24_788 = arith.constant 24 : index
    %c0_789 = arith.constant 0 : index
    %782 = vector.load %arg9[%c6_787, %c24_788, %c0_789] : memref<8x33x240xf32, #tpu.memory_space<vmem>>, vector<1x1x240xf32>
    %783 = vector.shape_cast %782 : vector<1x1x240xf32> to vector<1x240xf32>
    %c7_790 = arith.constant 7 : index
    %c24_791 = arith.constant 24 : index
    %c0_792 = arith.constant 0 : index
    %784 = vector.load %arg9[%c7_790, %c24_791, %c0_792] : memref<8x33x240xf32, #tpu.memory_space<vmem>>, vector<1x1x240xf32>
    %785 = vector.shape_cast %784 : vector<1x1x240xf32> to vector<1x240xf32>
    %786 = tpu.concatenate %771, %773, %775, %777, %779, %781, %783, %785 in 0 : vector<1x240xf32>, vector<1x240xf32>, vector<1x240xf32>, vector<1x240xf32>, vector<1x240xf32>, vector<1x240xf32>, vector<1x240xf32>, vector<1x240xf32> -> vector<8x240xf32>
    %787 = arith.truncf %786 : vector<8x240xf32> to vector<8x240xbf16>
    %c24_793 = arith.constant 24 : index
    %c0_794 = arith.constant 0 : index
    %c0_795 = arith.constant 0 : index
    %788 = vector.load %arg4[%c24_793, %c0_794, %c0_795] : memref<33x240x32xbf16, #tpu.memory_space<vmem>>, vector<1x240x32xbf16>
    %789 = vector.shape_cast %788 : vector<1x240x32xbf16> to vector<240x32xbf16>
    %cst_796 = arith.constant dense<0.000000e+00> : vector<8x32xf32>
    %790 = tpu.matmul %787, %789, %cst_796 {dimension_numbers = #tpu.dot_dimension_numbers<[1], [0], [0], [1], [0, 0, 1, 1], [], []>} : vector<8x240xbf16>, vector<240x32xbf16>, vector<8x32xf32> -> vector<8x32xf32>
    %791 = arith.addf %769, %790 : vector<8x32xf32>
    %c0_797 = arith.constant 0 : index
    %c25 = arith.constant 25 : index
    %c0_798 = arith.constant 0 : index
    %792 = vector.load %arg9[%c0_797, %c25, %c0_798] : memref<8x33x240xf32, #tpu.memory_space<vmem>>, vector<1x1x240xf32>
    %793 = vector.shape_cast %792 : vector<1x1x240xf32> to vector<1x240xf32>
    %c1_799 = arith.constant 1 : index
    %c25_800 = arith.constant 25 : index
    %c0_801 = arith.constant 0 : index
    %794 = vector.load %arg9[%c1_799, %c25_800, %c0_801] : memref<8x33x240xf32, #tpu.memory_space<vmem>>, vector<1x1x240xf32>
    %795 = vector.shape_cast %794 : vector<1x1x240xf32> to vector<1x240xf32>
    %c2_802 = arith.constant 2 : index
    %c25_803 = arith.constant 25 : index
    %c0_804 = arith.constant 0 : index
    %796 = vector.load %arg9[%c2_802, %c25_803, %c0_804] : memref<8x33x240xf32, #tpu.memory_space<vmem>>, vector<1x1x240xf32>
    %797 = vector.shape_cast %796 : vector<1x1x240xf32> to vector<1x240xf32>
    %c3_805 = arith.constant 3 : index
    %c25_806 = arith.constant 25 : index
    %c0_807 = arith.constant 0 : index
    %798 = vector.load %arg9[%c3_805, %c25_806, %c0_807] : memref<8x33x240xf32, #tpu.memory_space<vmem>>, vector<1x1x240xf32>
    %799 = vector.shape_cast %798 : vector<1x1x240xf32> to vector<1x240xf32>
    %c4_808 = arith.constant 4 : index
    %c25_809 = arith.constant 25 : index
    %c0_810 = arith.constant 0 : index
    %800 = vector.load %arg9[%c4_808, %c25_809, %c0_810] : memref<8x33x240xf32, #tpu.memory_space<vmem>>, vector<1x1x240xf32>
    %801 = vector.shape_cast %800 : vector<1x1x240xf32> to vector<1x240xf32>
    %c5_811 = arith.constant 5 : index
    %c25_812 = arith.constant 25 : index
    %c0_813 = arith.constant 0 : index
    %802 = vector.load %arg9[%c5_811, %c25_812, %c0_813] : memref<8x33x240xf32, #tpu.memory_space<vmem>>, vector<1x1x240xf32>
    %803 = vector.shape_cast %802 : vector<1x1x240xf32> to vector<1x240xf32>
    %c6_814 = arith.constant 6 : index
    %c25_815 = arith.constant 25 : index
    %c0_816 = arith.constant 0 : index
    %804 = vector.load %arg9[%c6_814, %c25_815, %c0_816] : memref<8x33x240xf32, #tpu.memory_space<vmem>>, vector<1x1x240xf32>
    %805 = vector.shape_cast %804 : vector<1x1x240xf32> to vector<1x240xf32>
    %c7_817 = arith.constant 7 : index
    %c25_818 = arith.constant 25 : index
    %c0_819 = arith.constant 0 : index
    %806 = vector.load %arg9[%c7_817, %c25_818, %c0_819] : memref<8x33x240xf32, #tpu.memory_space<vmem>>, vector<1x1x240xf32>
    %807 = vector.shape_cast %806 : vector<1x1x240xf32> to vector<1x240xf32>
    %808 = tpu.concatenate %793, %795, %797, %799, %801, %803, %805, %807 in 0 : vector<1x240xf32>, vector<1x240xf32>, vector<1x240xf32>, vector<1x240xf32>, vector<1x240xf32>, vector<1x240xf32>, vector<1x240xf32>, vector<1x240xf32> -> vector<8x240xf32>
    %809 = arith.truncf %808 : vector<8x240xf32> to vector<8x240xbf16>
    %c25_820 = arith.constant 25 : index
    %c0_821 = arith.constant 0 : index
    %c0_822 = arith.constant 0 : index
    %810 = vector.load %arg4[%c25_820, %c0_821, %c0_822] : memref<33x240x32xbf16, #tpu.memory_space<vmem>>, vector<1x240x32xbf16>
    %811 = vector.shape_cast %810 : vector<1x240x32xbf16> to vector<240x32xbf16>
    %cst_823 = arith.constant dense<0.000000e+00> : vector<8x32xf32>
    %812 = tpu.matmul %809, %811, %cst_823 {dimension_numbers = #tpu.dot_dimension_numbers<[1], [0], [0], [1], [0, 0, 1, 1], [], []>} : vector<8x240xbf16>, vector<240x32xbf16>, vector<8x32xf32> -> vector<8x32xf32>
    %813 = arith.addf %791, %812 : vector<8x32xf32>
    %c0_824 = arith.constant 0 : index
    %c26 = arith.constant 26 : index
    %c0_825 = arith.constant 0 : index
    %814 = vector.load %arg9[%c0_824, %c26, %c0_825] : memref<8x33x240xf32, #tpu.memory_space<vmem>>, vector<1x1x240xf32>
    %815 = vector.shape_cast %814 : vector<1x1x240xf32> to vector<1x240xf32>
    %c1_826 = arith.constant 1 : index
    %c26_827 = arith.constant 26 : index
    %c0_828 = arith.constant 0 : index
    %816 = vector.load %arg9[%c1_826, %c26_827, %c0_828] : memref<8x33x240xf32, #tpu.memory_space<vmem>>, vector<1x1x240xf32>
    %817 = vector.shape_cast %816 : vector<1x1x240xf32> to vector<1x240xf32>
    %c2_829 = arith.constant 2 : index
    %c26_830 = arith.constant 26 : index
    %c0_831 = arith.constant 0 : index
    %818 = vector.load %arg9[%c2_829, %c26_830, %c0_831] : memref<8x33x240xf32, #tpu.memory_space<vmem>>, vector<1x1x240xf32>
    %819 = vector.shape_cast %818 : vector<1x1x240xf32> to vector<1x240xf32>
    %c3_832 = arith.constant 3 : index
    %c26_833 = arith.constant 26 : index
    %c0_834 = arith.constant 0 : index
    %820 = vector.load %arg9[%c3_832, %c26_833, %c0_834] : memref<8x33x240xf32, #tpu.memory_space<vmem>>, vector<1x1x240xf32>
    %821 = vector.shape_cast %820 : vector<1x1x240xf32> to vector<1x240xf32>
    %c4_835 = arith.constant 4 : index
    %c26_836 = arith.constant 26 : index
    %c0_837 = arith.constant 0 : index
    %822 = vector.load %arg9[%c4_835, %c26_836, %c0_837] : memref<8x33x240xf32, #tpu.memory_space<vmem>>, vector<1x1x240xf32>
    %823 = vector.shape_cast %822 : vector<1x1x240xf32> to vector<1x240xf32>
    %c5_838 = arith.constant 5 : index
    %c26_839 = arith.constant 26 : index
    %c0_840 = arith.constant 0 : index
    %824 = vector.load %arg9[%c5_838, %c26_839, %c0_840] : memref<8x33x240xf32, #tpu.memory_space<vmem>>, vector<1x1x240xf32>
    %825 = vector.shape_cast %824 : vector<1x1x240xf32> to vector<1x240xf32>
    %c6_841 = arith.constant 6 : index
    %c26_842 = arith.constant 26 : index
    %c0_843 = arith.constant 0 : index
    %826 = vector.load %arg9[%c6_841, %c26_842, %c0_843] : memref<8x33x240xf32, #tpu.memory_space<vmem>>, vector<1x1x240xf32>
    %827 = vector.shape_cast %826 : vector<1x1x240xf32> to vector<1x240xf32>
    %c7_844 = arith.constant 7 : index
    %c26_845 = arith.constant 26 : index
    %c0_846 = arith.constant 0 : index
    %828 = vector.load %arg9[%c7_844, %c26_845, %c0_846] : memref<8x33x240xf32, #tpu.memory_space<vmem>>, vector<1x1x240xf32>
    %829 = vector.shape_cast %828 : vector<1x1x240xf32> to vector<1x240xf32>
    %830 = tpu.concatenate %815, %817, %819, %821, %823, %825, %827, %829 in 0 : vector<1x240xf32>, vector<1x240xf32>, vector<1x240xf32>, vector<1x240xf32>, vector<1x240xf32>, vector<1x240xf32>, vector<1x240xf32>, vector<1x240xf32> -> vector<8x240xf32>
    %831 = arith.truncf %830 : vector<8x240xf32> to vector<8x240xbf16>
    %c26_847 = arith.constant 26 : index
    %c0_848 = arith.constant 0 : index
    %c0_849 = arith.constant 0 : index
    %832 = vector.load %arg4[%c26_847, %c0_848, %c0_849] : memref<33x240x32xbf16, #tpu.memory_space<vmem>>, vector<1x240x32xbf16>
    %833 = vector.shape_cast %832 : vector<1x240x32xbf16> to vector<240x32xbf16>
    %cst_850 = arith.constant dense<0.000000e+00> : vector<8x32xf32>
    %834 = tpu.matmul %831, %833, %cst_850 {dimension_numbers = #tpu.dot_dimension_numbers<[1], [0], [0], [1], [0, 0, 1, 1], [], []>} : vector<8x240xbf16>, vector<240x32xbf16>, vector<8x32xf32> -> vector<8x32xf32>
    %835 = arith.addf %813, %834 : vector<8x32xf32>
    %c0_851 = arith.constant 0 : index
    %c27 = arith.constant 27 : index
    %c0_852 = arith.constant 0 : index
    %836 = vector.load %arg9[%c0_851, %c27, %c0_852] : memref<8x33x240xf32, #tpu.memory_space<vmem>>, vector<1x1x240xf32>
    %837 = vector.shape_cast %836 : vector<1x1x240xf32> to vector<1x240xf32>
    %c1_853 = arith.constant 1 : index
    %c27_854 = arith.constant 27 : index
    %c0_855 = arith.constant 0 : index
    %838 = vector.load %arg9[%c1_853, %c27_854, %c0_855] : memref<8x33x240xf32, #tpu.memory_space<vmem>>, vector<1x1x240xf32>
    %839 = vector.shape_cast %838 : vector<1x1x240xf32> to vector<1x240xf32>
    %c2_856 = arith.constant 2 : index
    %c27_857 = arith.constant 27 : index
    %c0_858 = arith.constant 0 : index
    %840 = vector.load %arg9[%c2_856, %c27_857, %c0_858] : memref<8x33x240xf32, #tpu.memory_space<vmem>>, vector<1x1x240xf32>
    %841 = vector.shape_cast %840 : vector<1x1x240xf32> to vector<1x240xf32>
    %c3_859 = arith.constant 3 : index
    %c27_860 = arith.constant 27 : index
    %c0_861 = arith.constant 0 : index
    %842 = vector.load %arg9[%c3_859, %c27_860, %c0_861] : memref<8x33x240xf32, #tpu.memory_space<vmem>>, vector<1x1x240xf32>
    %843 = vector.shape_cast %842 : vector<1x1x240xf32> to vector<1x240xf32>
    %c4_862 = arith.constant 4 : index
    %c27_863 = arith.constant 27 : index
    %c0_864 = arith.constant 0 : index
    %844 = vector.load %arg9[%c4_862, %c27_863, %c0_864] : memref<8x33x240xf32, #tpu.memory_space<vmem>>, vector<1x1x240xf32>
    %845 = vector.shape_cast %844 : vector<1x1x240xf32> to vector<1x240xf32>
    %c5_865 = arith.constant 5 : index
    %c27_866 = arith.constant 27 : index
    %c0_867 = arith.constant 0 : index
    %846 = vector.load %arg9[%c5_865, %c27_866, %c0_867] : memref<8x33x240xf32, #tpu.memory_space<vmem>>, vector<1x1x240xf32>
    %847 = vector.shape_cast %846 : vector<1x1x240xf32> to vector<1x240xf32>
    %c6_868 = arith.constant 6 : index
    %c27_869 = arith.constant 27 : index
    %c0_870 = arith.constant 0 : index
    %848 = vector.load %arg9[%c6_868, %c27_869, %c0_870] : memref<8x33x240xf32, #tpu.memory_space<vmem>>, vector<1x1x240xf32>
    %849 = vector.shape_cast %848 : vector<1x1x240xf32> to vector<1x240xf32>
    %c7_871 = arith.constant 7 : index
    %c27_872 = arith.constant 27 : index
    %c0_873 = arith.constant 0 : index
    %850 = vector.load %arg9[%c7_871, %c27_872, %c0_873] : memref<8x33x240xf32, #tpu.memory_space<vmem>>, vector<1x1x240xf32>
    %851 = vector.shape_cast %850 : vector<1x1x240xf32> to vector<1x240xf32>
    %852 = tpu.concatenate %837, %839, %841, %843, %845, %847, %849, %851 in 0 : vector<1x240xf32>, vector<1x240xf32>, vector<1x240xf32>, vector<1x240xf32>, vector<1x240xf32>, vector<1x240xf32>, vector<1x240xf32>, vector<1x240xf32> -> vector<8x240xf32>
    %853 = arith.truncf %852 : vector<8x240xf32> to vector<8x240xbf16>
    %c27_874 = arith.constant 27 : index
    %c0_875 = arith.constant 0 : index
    %c0_876 = arith.constant 0 : index
    %854 = vector.load %arg4[%c27_874, %c0_875, %c0_876] : memref<33x240x32xbf16, #tpu.memory_space<vmem>>, vector<1x240x32xbf16>
    %855 = vector.shape_cast %854 : vector<1x240x32xbf16> to vector<240x32xbf16>
    %cst_877 = arith.constant dense<0.000000e+00> : vector<8x32xf32>
    %856 = tpu.matmul %853, %855, %cst_877 {dimension_numbers = #tpu.dot_dimension_numbers<[1], [0], [0], [1], [0, 0, 1, 1], [], []>} : vector<8x240xbf16>, vector<240x32xbf16>, vector<8x32xf32> -> vector<8x32xf32>
    %857 = arith.addf %835, %856 : vector<8x32xf32>
    %c0_878 = arith.constant 0 : index
    %c28 = arith.constant 28 : index
    %c0_879 = arith.constant 0 : index
    %858 = vector.load %arg9[%c0_878, %c28, %c0_879] : memref<8x33x240xf32, #tpu.memory_space<vmem>>, vector<1x1x240xf32>
    %859 = vector.shape_cast %858 : vector<1x1x240xf32> to vector<1x240xf32>
    %c1_880 = arith.constant 1 : index
    %c28_881 = arith.constant 28 : index
    %c0_882 = arith.constant 0 : index
    %860 = vector.load %arg9[%c1_880, %c28_881, %c0_882] : memref<8x33x240xf32, #tpu.memory_space<vmem>>, vector<1x1x240xf32>
    %861 = vector.shape_cast %860 : vector<1x1x240xf32> to vector<1x240xf32>
    %c2_883 = arith.constant 2 : index
    %c28_884 = arith.constant 28 : index
    %c0_885 = arith.constant 0 : index
    %862 = vector.load %arg9[%c2_883, %c28_884, %c0_885] : memref<8x33x240xf32, #tpu.memory_space<vmem>>, vector<1x1x240xf32>
    %863 = vector.shape_cast %862 : vector<1x1x240xf32> to vector<1x240xf32>
    %c3_886 = arith.constant 3 : index
    %c28_887 = arith.constant 28 : index
    %c0_888 = arith.constant 0 : index
    %864 = vector.load %arg9[%c3_886, %c28_887, %c0_888] : memref<8x33x240xf32, #tpu.memory_space<vmem>>, vector<1x1x240xf32>
    %865 = vector.shape_cast %864 : vector<1x1x240xf32> to vector<1x240xf32>
    %c4_889 = arith.constant 4 : index
    %c28_890 = arith.constant 28 : index
    %c0_891 = arith.constant 0 : index
    %866 = vector.load %arg9[%c4_889, %c28_890, %c0_891] : memref<8x33x240xf32, #tpu.memory_space<vmem>>, vector<1x1x240xf32>
    %867 = vector.shape_cast %866 : vector<1x1x240xf32> to vector<1x240xf32>
    %c5_892 = arith.constant 5 : index
    %c28_893 = arith.constant 28 : index
    %c0_894 = arith.constant 0 : index
    %868 = vector.load %arg9[%c5_892, %c28_893, %c0_894] : memref<8x33x240xf32, #tpu.memory_space<vmem>>, vector<1x1x240xf32>
    %869 = vector.shape_cast %868 : vector<1x1x240xf32> to vector<1x240xf32>
    %c6_895 = arith.constant 6 : index
    %c28_896 = arith.constant 28 : index
    %c0_897 = arith.constant 0 : index
    %870 = vector.load %arg9[%c6_895, %c28_896, %c0_897] : memref<8x33x240xf32, #tpu.memory_space<vmem>>, vector<1x1x240xf32>
    %871 = vector.shape_cast %870 : vector<1x1x240xf32> to vector<1x240xf32>
    %c7_898 = arith.constant 7 : index
    %c28_899 = arith.constant 28 : index
    %c0_900 = arith.constant 0 : index
    %872 = vector.load %arg9[%c7_898, %c28_899, %c0_900] : memref<8x33x240xf32, #tpu.memory_space<vmem>>, vector<1x1x240xf32>
    %873 = vector.shape_cast %872 : vector<1x1x240xf32> to vector<1x240xf32>
    %874 = tpu.concatenate %859, %861, %863, %865, %867, %869, %871, %873 in 0 : vector<1x240xf32>, vector<1x240xf32>, vector<1x240xf32>, vector<1x240xf32>, vector<1x240xf32>, vector<1x240xf32>, vector<1x240xf32>, vector<1x240xf32> -> vector<8x240xf32>
    %875 = arith.truncf %874 : vector<8x240xf32> to vector<8x240xbf16>
    %c28_901 = arith.constant 28 : index
    %c0_902 = arith.constant 0 : index
    %c0_903 = arith.constant 0 : index
    %876 = vector.load %arg4[%c28_901, %c0_902, %c0_903] : memref<33x240x32xbf16, #tpu.memory_space<vmem>>, vector<1x240x32xbf16>
    %877 = vector.shape_cast %876 : vector<1x240x32xbf16> to vector<240x32xbf16>
    %cst_904 = arith.constant dense<0.000000e+00> : vector<8x32xf32>
    %878 = tpu.matmul %875, %877, %cst_904 {dimension_numbers = #tpu.dot_dimension_numbers<[1], [0], [0], [1], [0, 0, 1, 1], [], []>} : vector<8x240xbf16>, vector<240x32xbf16>, vector<8x32xf32> -> vector<8x32xf32>
    %879 = arith.addf %857, %878 : vector<8x32xf32>
    %c0_905 = arith.constant 0 : index
    %c29 = arith.constant 29 : index
    %c0_906 = arith.constant 0 : index
    %880 = vector.load %arg9[%c0_905, %c29, %c0_906] : memref<8x33x240xf32, #tpu.memory_space<vmem>>, vector<1x1x240xf32>
    %881 = vector.shape_cast %880 : vector<1x1x240xf32> to vector<1x240xf32>
    %c1_907 = arith.constant 1 : index
    %c29_908 = arith.constant 29 : index
    %c0_909 = arith.constant 0 : index
    %882 = vector.load %arg9[%c1_907, %c29_908, %c0_909] : memref<8x33x240xf32, #tpu.memory_space<vmem>>, vector<1x1x240xf32>
    %883 = vector.shape_cast %882 : vector<1x1x240xf32> to vector<1x240xf32>
    %c2_910 = arith.constant 2 : index
    %c29_911 = arith.constant 29 : index
    %c0_912 = arith.constant 0 : index
    %884 = vector.load %arg9[%c2_910, %c29_911, %c0_912] : memref<8x33x240xf32, #tpu.memory_space<vmem>>, vector<1x1x240xf32>
    %885 = vector.shape_cast %884 : vector<1x1x240xf32> to vector<1x240xf32>
    %c3_913 = arith.constant 3 : index
    %c29_914 = arith.constant 29 : index
    %c0_915 = arith.constant 0 : index
    %886 = vector.load %arg9[%c3_913, %c29_914, %c0_915] : memref<8x33x240xf32, #tpu.memory_space<vmem>>, vector<1x1x240xf32>
    %887 = vector.shape_cast %886 : vector<1x1x240xf32> to vector<1x240xf32>
    %c4_916 = arith.constant 4 : index
    %c29_917 = arith.constant 29 : index
    %c0_918 = arith.constant 0 : index
    %888 = vector.load %arg9[%c4_916, %c29_917, %c0_918] : memref<8x33x240xf32, #tpu.memory_space<vmem>>, vector<1x1x240xf32>
    %889 = vector.shape_cast %888 : vector<1x1x240xf32> to vector<1x240xf32>
    %c5_919 = arith.constant 5 : index
    %c29_920 = arith.constant 29 : index
    %c0_921 = arith.constant 0 : index
    %890 = vector.load %arg9[%c5_919, %c29_920, %c0_921] : memref<8x33x240xf32, #tpu.memory_space<vmem>>, vector<1x1x240xf32>
    %891 = vector.shape_cast %890 : vector<1x1x240xf32> to vector<1x240xf32>
    %c6_922 = arith.constant 6 : index
    %c29_923 = arith.constant 29 : index
    %c0_924 = arith.constant 0 : index
    %892 = vector.load %arg9[%c6_922, %c29_923, %c0_924] : memref<8x33x240xf32, #tpu.memory_space<vmem>>, vector<1x1x240xf32>
    %893 = vector.shape_cast %892 : vector<1x1x240xf32> to vector<1x240xf32>
    %c7_925 = arith.constant 7 : index
    %c29_926 = arith.constant 29 : index
    %c0_927 = arith.constant 0 : index
    %894 = vector.load %arg9[%c7_925, %c29_926, %c0_927] : memref<8x33x240xf32, #tpu.memory_space<vmem>>, vector<1x1x240xf32>
    %895 = vector.shape_cast %894 : vector<1x1x240xf32> to vector<1x240xf32>
    %896 = tpu.concatenate %881, %883, %885, %887, %889, %891, %893, %895 in 0 : vector<1x240xf32>, vector<1x240xf32>, vector<1x240xf32>, vector<1x240xf32>, vector<1x240xf32>, vector<1x240xf32>, vector<1x240xf32>, vector<1x240xf32> -> vector<8x240xf32>
    %897 = arith.truncf %896 : vector<8x240xf32> to vector<8x240xbf16>
    %c29_928 = arith.constant 29 : index
    %c0_929 = arith.constant 0 : index
    %c0_930 = arith.constant 0 : index
    %898 = vector.load %arg4[%c29_928, %c0_929, %c0_930] : memref<33x240x32xbf16, #tpu.memory_space<vmem>>, vector<1x240x32xbf16>
    %899 = vector.shape_cast %898 : vector<1x240x32xbf16> to vector<240x32xbf16>
    %cst_931 = arith.constant dense<0.000000e+00> : vector<8x32xf32>
    %900 = tpu.matmul %897, %899, %cst_931 {dimension_numbers = #tpu.dot_dimension_numbers<[1], [0], [0], [1], [0, 0, 1, 1], [], []>} : vector<8x240xbf16>, vector<240x32xbf16>, vector<8x32xf32> -> vector<8x32xf32>
    %901 = arith.addf %879, %900 : vector<8x32xf32>
    %c0_932 = arith.constant 0 : index
    %c30 = arith.constant 30 : index
    %c0_933 = arith.constant 0 : index
    %902 = vector.load %arg9[%c0_932, %c30, %c0_933] : memref<8x33x240xf32, #tpu.memory_space<vmem>>, vector<1x1x240xf32>
    %903 = vector.shape_cast %902 : vector<1x1x240xf32> to vector<1x240xf32>
    %c1_934 = arith.constant 1 : index
    %c30_935 = arith.constant 30 : index
    %c0_936 = arith.constant 0 : index
    %904 = vector.load %arg9[%c1_934, %c30_935, %c0_936] : memref<8x33x240xf32, #tpu.memory_space<vmem>>, vector<1x1x240xf32>
    %905 = vector.shape_cast %904 : vector<1x1x240xf32> to vector<1x240xf32>
    %c2_937 = arith.constant 2 : index
    %c30_938 = arith.constant 30 : index
    %c0_939 = arith.constant 0 : index
    %906 = vector.load %arg9[%c2_937, %c30_938, %c0_939] : memref<8x33x240xf32, #tpu.memory_space<vmem>>, vector<1x1x240xf32>
    %907 = vector.shape_cast %906 : vector<1x1x240xf32> to vector<1x240xf32>
    %c3_940 = arith.constant 3 : index
    %c30_941 = arith.constant 30 : index
    %c0_942 = arith.constant 0 : index
    %908 = vector.load %arg9[%c3_940, %c30_941, %c0_942] : memref<8x33x240xf32, #tpu.memory_space<vmem>>, vector<1x1x240xf32>
    %909 = vector.shape_cast %908 : vector<1x1x240xf32> to vector<1x240xf32>
    %c4_943 = arith.constant 4 : index
    %c30_944 = arith.constant 30 : index
    %c0_945 = arith.constant 0 : index
    %910 = vector.load %arg9[%c4_943, %c30_944, %c0_945] : memref<8x33x240xf32, #tpu.memory_space<vmem>>, vector<1x1x240xf32>
    %911 = vector.shape_cast %910 : vector<1x1x240xf32> to vector<1x240xf32>
    %c5_946 = arith.constant 5 : index
    %c30_947 = arith.constant 30 : index
    %c0_948 = arith.constant 0 : index
    %912 = vector.load %arg9[%c5_946, %c30_947, %c0_948] : memref<8x33x240xf32, #tpu.memory_space<vmem>>, vector<1x1x240xf32>
    %913 = vector.shape_cast %912 : vector<1x1x240xf32> to vector<1x240xf32>
    %c6_949 = arith.constant 6 : index
    %c30_950 = arith.constant 30 : index
    %c0_951 = arith.constant 0 : index
    %914 = vector.load %arg9[%c6_949, %c30_950, %c0_951] : memref<8x33x240xf32, #tpu.memory_space<vmem>>, vector<1x1x240xf32>
    %915 = vector.shape_cast %914 : vector<1x1x240xf32> to vector<1x240xf32>
    %c7_952 = arith.constant 7 : index
    %c30_953 = arith.constant 30 : index
    %c0_954 = arith.constant 0 : index
    %916 = vector.load %arg9[%c7_952, %c30_953, %c0_954] : memref<8x33x240xf32, #tpu.memory_space<vmem>>, vector<1x1x240xf32>
    %917 = vector.shape_cast %916 : vector<1x1x240xf32> to vector<1x240xf32>
    %918 = tpu.concatenate %903, %905, %907, %909, %911, %913, %915, %917 in 0 : vector<1x240xf32>, vector<1x240xf32>, vector<1x240xf32>, vector<1x240xf32>, vector<1x240xf32>, vector<1x240xf32>, vector<1x240xf32>, vector<1x240xf32> -> vector<8x240xf32>
    %919 = arith.truncf %918 : vector<8x240xf32> to vector<8x240xbf16>
    %c30_955 = arith.constant 30 : index
    %c0_956 = arith.constant 0 : index
    %c0_957 = arith.constant 0 : index
    %920 = vector.load %arg4[%c30_955, %c0_956, %c0_957] : memref<33x240x32xbf16, #tpu.memory_space<vmem>>, vector<1x240x32xbf16>
    %921 = vector.shape_cast %920 : vector<1x240x32xbf16> to vector<240x32xbf16>
    %cst_958 = arith.constant dense<0.000000e+00> : vector<8x32xf32>
    %922 = tpu.matmul %919, %921, %cst_958 {dimension_numbers = #tpu.dot_dimension_numbers<[1], [0], [0], [1], [0, 0, 1, 1], [], []>} : vector<8x240xbf16>, vector<240x32xbf16>, vector<8x32xf32> -> vector<8x32xf32>
    %923 = arith.addf %901, %922 : vector<8x32xf32>
    %c0_959 = arith.constant 0 : index
    %c31 = arith.constant 31 : index
    %c0_960 = arith.constant 0 : index
    %924 = vector.load %arg9[%c0_959, %c31, %c0_960] : memref<8x33x240xf32, #tpu.memory_space<vmem>>, vector<1x1x240xf32>
    %925 = vector.shape_cast %924 : vector<1x1x240xf32> to vector<1x240xf32>
    %c1_961 = arith.constant 1 : index
    %c31_962 = arith.constant 31 : index
    %c0_963 = arith.constant 0 : index
    %926 = vector.load %arg9[%c1_961, %c31_962, %c0_963] : memref<8x33x240xf32, #tpu.memory_space<vmem>>, vector<1x1x240xf32>
    %927 = vector.shape_cast %926 : vector<1x1x240xf32> to vector<1x240xf32>
    %c2_964 = arith.constant 2 : index
    %c31_965 = arith.constant 31 : index
    %c0_966 = arith.constant 0 : index
    %928 = vector.load %arg9[%c2_964, %c31_965, %c0_966] : memref<8x33x240xf32, #tpu.memory_space<vmem>>, vector<1x1x240xf32>
    %929 = vector.shape_cast %928 : vector<1x1x240xf32> to vector<1x240xf32>
    %c3_967 = arith.constant 3 : index
    %c31_968 = arith.constant 31 : index
    %c0_969 = arith.constant 0 : index
    %930 = vector.load %arg9[%c3_967, %c31_968, %c0_969] : memref<8x33x240xf32, #tpu.memory_space<vmem>>, vector<1x1x240xf32>
    %931 = vector.shape_cast %930 : vector<1x1x240xf32> to vector<1x240xf32>
    %c4_970 = arith.constant 4 : index
    %c31_971 = arith.constant 31 : index
    %c0_972 = arith.constant 0 : index
    %932 = vector.load %arg9[%c4_970, %c31_971, %c0_972] : memref<8x33x240xf32, #tpu.memory_space<vmem>>, vector<1x1x240xf32>
    %933 = vector.shape_cast %932 : vector<1x1x240xf32> to vector<1x240xf32>
    %c5_973 = arith.constant 5 : index
    %c31_974 = arith.constant 31 : index
    %c0_975 = arith.constant 0 : index
    %934 = vector.load %arg9[%c5_973, %c31_974, %c0_975] : memref<8x33x240xf32, #tpu.memory_space<vmem>>, vector<1x1x240xf32>
    %935 = vector.shape_cast %934 : vector<1x1x240xf32> to vector<1x240xf32>
    %c6_976 = arith.constant 6 : index
    %c31_977 = arith.constant 31 : index
    %c0_978 = arith.constant 0 : index
    %936 = vector.load %arg9[%c6_976, %c31_977, %c0_978] : memref<8x33x240xf32, #tpu.memory_space<vmem>>, vector<1x1x240xf32>
    %937 = vector.shape_cast %936 : vector<1x1x240xf32> to vector<1x240xf32>
    %c7_979 = arith.constant 7 : index
    %c31_980 = arith.constant 31 : index
    %c0_981 = arith.constant 0 : index
    %938 = vector.load %arg9[%c7_979, %c31_980, %c0_981] : memref<8x33x240xf32, #tpu.memory_space<vmem>>, vector<1x1x240xf32>
    %939 = vector.shape_cast %938 : vector<1x1x240xf32> to vector<1x240xf32>
    %940 = tpu.concatenate %925, %927, %929, %931, %933, %935, %937, %939 in 0 : vector<1x240xf32>, vector<1x240xf32>, vector<1x240xf32>, vector<1x240xf32>, vector<1x240xf32>, vector<1x240xf32>, vector<1x240xf32>, vector<1x240xf32> -> vector<8x240xf32>
    %941 = arith.truncf %940 : vector<8x240xf32> to vector<8x240xbf16>
    %c31_982 = arith.constant 31 : index
    %c0_983 = arith.constant 0 : index
    %c0_984 = arith.constant 0 : index
    %942 = vector.load %arg4[%c31_982, %c0_983, %c0_984] : memref<33x240x32xbf16, #tpu.memory_space<vmem>>, vector<1x240x32xbf16>
    %943 = vector.shape_cast %942 : vector<1x240x32xbf16> to vector<240x32xbf16>
    %cst_985 = arith.constant dense<0.000000e+00> : vector<8x32xf32>
    %944 = tpu.matmul %941, %943, %cst_985 {dimension_numbers = #tpu.dot_dimension_numbers<[1], [0], [0], [1], [0, 0, 1, 1], [], []>} : vector<8x240xbf16>, vector<240x32xbf16>, vector<8x32xf32> -> vector<8x32xf32>
    %945 = arith.addf %923, %944 : vector<8x32xf32>
    %c0_986 = arith.constant 0 : index
    %c32 = arith.constant 32 : index
    %c0_987 = arith.constant 0 : index
    %946 = vector.load %arg9[%c0_986, %c32, %c0_987] : memref<8x33x240xf32, #tpu.memory_space<vmem>>, vector<1x1x240xf32>
    %947 = vector.shape_cast %946 : vector<1x1x240xf32> to vector<1x240xf32>
    %c1_988 = arith.constant 1 : index
    %c32_989 = arith.constant 32 : index
    %c0_990 = arith.constant 0 : index
    %948 = vector.load %arg9[%c1_988, %c32_989, %c0_990] : memref<8x33x240xf32, #tpu.memory_space<vmem>>, vector<1x1x240xf32>
    %949 = vector.shape_cast %948 : vector<1x1x240xf32> to vector<1x240xf32>
    %c2_991 = arith.constant 2 : index
    %c32_992 = arith.constant 32 : index
    %c0_993 = arith.constant 0 : index
    %950 = vector.load %arg9[%c2_991, %c32_992, %c0_993] : memref<8x33x240xf32, #tpu.memory_space<vmem>>, vector<1x1x240xf32>
    %951 = vector.shape_cast %950 : vector<1x1x240xf32> to vector<1x240xf32>
    %c3_994 = arith.constant 3 : index
    %c32_995 = arith.constant 32 : index
    %c0_996 = arith.constant 0 : index
    %952 = vector.load %arg9[%c3_994, %c32_995, %c0_996] : memref<8x33x240xf32, #tpu.memory_space<vmem>>, vector<1x1x240xf32>
    %953 = vector.shape_cast %952 : vector<1x1x240xf32> to vector<1x240xf32>
    %c4_997 = arith.constant 4 : index
    %c32_998 = arith.constant 32 : index
    %c0_999 = arith.constant 0 : index
    %954 = vector.load %arg9[%c4_997, %c32_998, %c0_999] : memref<8x33x240xf32, #tpu.memory_space<vmem>>, vector<1x1x240xf32>
    %955 = vector.shape_cast %954 : vector<1x1x240xf32> to vector<1x240xf32>
    %c5_1000 = arith.constant 5 : index
    %c32_1001 = arith.constant 32 : index
    %c0_1002 = arith.constant 0 : index
    %956 = vector.load %arg9[%c5_1000, %c32_1001, %c0_1002] : memref<8x33x240xf32, #tpu.memory_space<vmem>>, vector<1x1x240xf32>
    %957 = vector.shape_cast %956 : vector<1x1x240xf32> to vector<1x240xf32>
    %c6_1003 = arith.constant 6 : index
    %c32_1004 = arith.constant 32 : index
    %c0_1005 = arith.constant 0 : index
    %958 = vector.load %arg9[%c6_1003, %c32_1004, %c0_1005] : memref<8x33x240xf32, #tpu.memory_space<vmem>>, vector<1x1x240xf32>
    %959 = vector.shape_cast %958 : vector<1x1x240xf32> to vector<1x240xf32>
    %c7_1006 = arith.constant 7 : index
    %c32_1007 = arith.constant 32 : index
    %c0_1008 = arith.constant 0 : index
    %960 = vector.load %arg9[%c7_1006, %c32_1007, %c0_1008] : memref<8x33x240xf32, #tpu.memory_space<vmem>>, vector<1x1x240xf32>
    %961 = vector.shape_cast %960 : vector<1x1x240xf32> to vector<1x240xf32>
    %962 = tpu.concatenate %947, %949, %951, %953, %955, %957, %959, %961 in 0 : vector<1x240xf32>, vector<1x240xf32>, vector<1x240xf32>, vector<1x240xf32>, vector<1x240xf32>, vector<1x240xf32>, vector<1x240xf32>, vector<1x240xf32> -> vector<8x240xf32>
    %963 = arith.truncf %962 : vector<8x240xf32> to vector<8x240xbf16>
    %c32_1009 = arith.constant 32 : index
    %c0_1010 = arith.constant 0 : index
    %c0_1011 = arith.constant 0 : index
    %964 = vector.load %arg4[%c32_1009, %c0_1010, %c0_1011] : memref<33x240x32xbf16, #tpu.memory_space<vmem>>, vector<1x240x32xbf16>
    %965 = vector.shape_cast %964 : vector<1x240x32xbf16> to vector<240x32xbf16>
    %cst_1012 = arith.constant dense<0.000000e+00> : vector<8x32xf32>
    %966 = tpu.matmul %963, %965, %cst_1012 {dimension_numbers = #tpu.dot_dimension_numbers<[1], [0], [0], [1], [0, 0, 1, 1], [], []>} : vector<8x240xbf16>, vector<240x32xbf16>, vector<8x32xf32> -> vector<8x32xf32>
    %967 = arith.addf %945, %966 : vector<8x32xf32>
    %c0_1013 = arith.constant 0 : index
    %c0_1014 = arith.constant 0 : index
    %968 = vector.load %arg5[%c0_1013, %c0_1014] : memref<1x32xf32, #tpu.memory_space<vmem>>, vector<1x32xf32>
    %969 = vector.broadcast %968 : vector<1x32xf32> to vector<8x32xf32>
    %970 = arith.addf %967, %969 : vector<8x32xf32>
    %cst_1015 = arith.constant dense<0.000000e+00> : vector<32xf32>
    %971 = vector.multi_reduction <add>, %970, %cst_1015 [0] : vector<8x32xf32> to vector<32xf32>
    %972 = vector.shape_cast %971 : vector<32xf32> to vector<1x32xf32>
    %cst_1016 = arith.constant 8.000000e+00 : f32
    %973 = vector.broadcast %cst_1016 : f32 to vector<1x32xf32>
    %974 = arith.divf %972, %973 : vector<1x32xf32>
    %975 = vector.broadcast %974 : vector<1x32xf32> to vector<8x32xf32>
    %976 = arith.subf %970, %975 : vector<8x32xf32>
    %977 = arith.mulf %976, %976 : vector<8x32xf32>
    %cst_1017 = arith.constant dense<0.000000e+00> : vector<32xf32>
    %978 = vector.multi_reduction <add>, %977, %cst_1017 [0] : vector<8x32xf32> to vector<32xf32>
    %979 = vector.shape_cast %978 : vector<32xf32> to vector<1x32xf32>
    %cst_1018 = arith.constant 8.000000e+00 : f32
    %980 = vector.broadcast %cst_1018 : f32 to vector<1x32xf32>
    %981 = arith.divf %979, %980 : vector<1x32xf32>
    %982 = vector.broadcast %974 : vector<1x32xf32> to vector<8x32xf32>
    %983 = arith.subf %970, %982 : vector<8x32xf32>
    %cst_1019 = arith.constant 9.99999974E-6 : f32
    %984 = vector.broadcast %cst_1019 : f32 to vector<1x32xf32>
    %985 = arith.addf %981, %984 : vector<1x32xf32>
    %986 = math.rsqrt %985 : vector<1x32xf32>
    %987 = vector.broadcast %986 : vector<1x32xf32> to vector<8x32xf32>
    %988 = arith.mulf %983, %987 : vector<8x32xf32>
    %c0_1020 = arith.constant 0 : index
    %c0_1021 = arith.constant 0 : index
    %989 = vector.load %arg6[%c0_1020, %c0_1021] : memref<1x32xf32, #tpu.memory_space<vmem>>, vector<1x32xf32>
    %990 = vector.broadcast %989 : vector<1x32xf32> to vector<8x32xf32>
    %991 = arith.mulf %988, %990 : vector<8x32xf32>
    %c0_1022 = arith.constant 0 : index
    %c0_1023 = arith.constant 0 : index
    %992 = vector.load %arg7[%c0_1022, %c0_1023] : memref<1x32xf32, #tpu.memory_space<vmem>>, vector<1x32xf32>
    %993 = vector.broadcast %992 : vector<1x32xf32> to vector<8x32xf32>
    %994 = arith.addf %991, %993 : vector<8x32xf32>
    %cst_1024 = arith.constant dense<0xFF800000> : vector<8xf32>
    %995 = vector.multi_reduction <maximumf>, %994, %cst_1024 [1] : vector<8x32xf32> to vector<8xf32>
    %996 = vector.shape_cast %995 : vector<8xf32> to vector<8x1xf32>
    %997 = vector.broadcast %996 : vector<8x1xf32> to vector<8x32xf32>
    %998 = arith.subf %994, %997 : vector<8x32xf32>
    %999 = math.exp %998 : vector<8x32xf32>
    %cst_1025 = arith.constant dense<0.000000e+00> : vector<8xf32>
    %1000 = vector.multi_reduction <add>, %999, %cst_1025 [1] : vector<8x32xf32> to vector<8xf32>
    %1001 = vector.shape_cast %1000 : vector<8xf32> to vector<8x1xf32>
    %1002 = tpu.reciprocal %1001 {approx = true} : vector<8x1xf32> -> vector<8x1xf32>
    %1003 = vector.broadcast %1002 : vector<8x1xf32> to vector<8x32xf32>
    %1004 = arith.mulf %999, %1003 : vector<8x32xf32>
    %c0_1026 = arith.constant 0 : index
    %c0_1027 = arith.constant 0 : index
    %1005 = vector.load %arg8[%c0_1026, %c0_1027] : memref<8x32xf32, #tpu.memory_space<vmem>>, vector<8x32xf32>
    tpu.vector_store %arg8[%c0_1026, %c0_1027], %1004 {strides = array<i32>} : memref<8x32xf32, #tpu.memory_space<vmem>>, vector<8x32xf32>,
    return
  }
  func.func @transform_0(%arg0: i32) -> (i32, i32, i32) {
    %c0_i32 = arith.constant 0 : i32
    %c0_i32_0 = arith.constant 0 : i32
    %c0_i32_1 = arith.constant 0 : i32
    %c0_i32_2 = arith.constant 0 : i32
    return %c0_i32, %c0_i32_0, %c0_i32_1 : i32, i32, i32
  }
  func.func @transform_1(%arg0: i32) -> (i32, i32) {
    %c0_i32 = arith.constant 0 : i32
    %c0_i32_0 = arith.constant 0 : i32
    %c0_i32_1 = arith.constant 0 : i32
    return %c0_i32, %c0_i32_0 : i32, i32
  }
  func.func @transform_2(%arg0: i32) -> (i32, i32) {
    %c0_i32 = arith.constant 0 : i32
    %c0_i32_0 = arith.constant 0 : i32
    %c0_i32_1 = arith.constant 0 : i32
    return %c0_i32, %c0_i32_0 : i32, i32
  }
  func.func @transform_3(%arg0: i32) -> (i32, i32, i32) {
    %c0_i32 = arith.constant 0 : i32
    %c0_i32_0 = arith.constant 0 : i32
    %c0_i32_1 = arith.constant 0 : i32
    %c0_i32_2 = arith.constant 0 : i32
    return %c0_i32, %c0_i32_0, %c0_i32_1 : i32, i32, i32
  }
  func.func @transform_4(%arg0: i32) -> (i32, i32) {
    %c0_i32 = arith.constant 0 : i32
    %c0_i32_0 = arith.constant 0 : i32
    %c0_i32_1 = arith.constant 0 : i32
    return %c0_i32, %c0_i32_0 : i32, i32
  }
  func.func @transform_5(%arg0: i32) -> (i32, i32) {
    %c0_i32 = arith.constant 0 : i32
    %c0_i32_0 = arith.constant 0 : i32
    %c0_i32_1 = arith.constant 0 : i32
    return %c0_i32, %c0_i32_0 : i32, i32
  }
  func.func @transform_6(%arg0: i32) -> (i32, i32) {
    %c0_i32 = arith.constant 0 : i32
    %c0_i32_0 = arith.constant 0 : i32
    %c0_i32_1 = arith.constant 0 : i32
    return %c0_i32, %c0_i32_0 : i32, i32
  }
  func.func @transform_7(%arg0: i32) -> (i32, i32) {
    %c0_i32 = arith.constant 0 : i32
    %c0_i32_0 = arith.constant 0 : i32
    %c0_i32_1 = arith.constant 0 : i32
    return %c0_i32, %c0_i32_0 : i32, i32
  }
}

</mosaic_0001>

<bundles_post_ra>
// kernel: encoder_cnn_forward.1
= control target key start
LH: loop header
LB: loop body
LE: loop exit
PB: predicated region body
PF: predicated region fallthrough
CT: control target
= control target key end

     0   :  { %v19529_v7 = vmov 0   ;;  %vm98_vm0 = vcmask 1046528   ;;  %vm88_vm1 = vcmask 244736   ;;  %vm176_vm2 = vcmask 916480   ;;  %s19521_s0 = inlined_call_operand.vmem [shape: f32[8,30,240], index: 0, kind: input, shape index: {}]   ;;  %s19522_s1 = inlined_call_operand.vmem [shape: bf16[33,30], index: 1, kind: input, shape index: {}]   ;;  %s19523_s2 = inlined_call_operand.vmem [shape: f32[33,1], index: 2, kind: input, shape index: {}]   ;;  %s19524_s3 = inlined_call_operand.vmem [shape: bf16[33,240,32], index: 3, kind: input, shape index: {}]   ;;  %s19525_s4 = inlined_call_operand.vmem [shape: f32[1,32], index: 4, kind: input, shape index: {}]   ;;  %s19526_s5 = inlined_call_operand.vmem [shape: f32[1,32], index: 5, kind: input, shape index: {}]   ;;  %s19527_s6 = inlined_call_operand.vmem [shape: f32[1,32], index: 6, kind: input, shape index: {}]   ;;  %s19528_s7 = inlined_call_operand.hbm [shape: f32[8,32], index: 7, kind: output, shape index: {}]  }
   0x1   :  { %v34_v0 = vld [vmem:[%s19521_s0 + $0x8] sm:$0xff]  ;;  %v36_v1 = vld [vmem:[%s19521_s0 + $0x18] sm:$0xff]  ;;  %v33_v5 = vld [vmem:[%s19521_s0] sm:$0xff]  ;;  %137 = vmatprep.mubr.bf16.mxu1 %v19529_v7  ;;  %586 = vmatprep.mubr.bf16.mxu0 %v19529_v7 }
   0x2   :  { %v11559_v2 = vld [vmem:[%s19521_s0 + $0x88] sm:$0xff]  ;;  %v42_v3 = vpack.c.bf16 %v36_v1, %v34_v0  ;;  %v11561_v4 = vld [vmem:[%s19521_s0 + $0x98] sm:$0xff]  ;;  %v35_v6 = vld [vmem:[%s19521_s0 + $0x10] sm:$0xff]  ;;  %13123 = vset.pattern.permute.xlu0 %v19529_v7  ;;  %13124 = vset.pattern.permute.xlu1 %v19529_v7 }
   0x3   :  { %v515_v8 = vpack.c.bf16 %v11561_v4, %v11559_v2  ;;  %v41_v9 = vpack.c.bf16 %v35_v6, %v33_v5  ;;  %v11558_v10 = vld [vmem:[%s19521_s0 + $0x80] sm:$0xff]  ;;  %v11560_v11 = vld [vmem:[%s19521_s0 + $0x90] sm:$0xff]  ;;  %v38_v12 = vld [vmem:[%s19521_s0 + $0x28] sm:$0xff] }
   0x4   :  { %105 = vmatprep.subr.bf16.mxu1 %v42_v3  ;;  %v514_v13 = vpack.c.bf16 %v11560_v11, %v11558_v10  ;;  %v40_v14 = vld [vmem:[%s19521_s0 + $0x38] sm:$0x3f]  ;;  %v11563_v15 = vld [vmem:[%s19521_s0 + $0xa8] sm:$0xff]  ;;  %v37_v19 = vld [vmem:[%s19521_s0 + $0x20] sm:$0xff] }
   0x5   :  { %v11565_v16 = vld [vmem:[%s19521_s0 + $0xb8] sm:$0x3f]  ;;  %554 = vmatprep.subr.bf16.mxu0 %v515_v8  ;;  %106 = vmatpush1.bf16.msra.mxu1 %v41_v9  ;;  %v44_v17 = vpack.c.bf16 %v40_v14, %v38_v12  ;;  %v39_v20 = vld [vmem:[%s19521_s0 + $0x30] sm:$0x3f]  ;;  %v11562_v21 = vld [vmem:[%s19521_s0 + $0xa0] sm:$0xff] }
   0x6   :  { %v517_v18 = vpack.c.bf16 %v11565_v16, %v11563_v15  ;;  %555 = vmatpush1.bf16.msra.mxu0 %v514_v13  ;;  %v43_v22 = vpack.c.bf16 %v39_v20, %v37_v19  ;;  %v11564_v23 = vld [vmem:[%s19521_s0 + $0xb0] sm:$0x3f]  ;;  %v13832_v25 = vld [vmem:[%s19522_s1] sm:$0xff]   ;;  %v11547_v26 = vld [vmem:[%s19521_s0 + $0x48] sm:$0xff] }
   0x7   :  { %11542 = vmatprep.subr.msk.bf16.mxu1 %vm98_vm0, %v44_v17  ;;  %v516_v24 = vpack.c.bf16 %v11564_v23, %v11562_v21  ;;  %v11549_v27 = vld [vmem:[%s19521_s0 + $0x58] sm:$0xff]  ;;  %v11546_v30 = vld [vmem:[%s19521_s0 + $0x40] sm:$0xff]  ;;  %v11548_v31 = vld [vmem:[%s19521_s0 + $0x50] sm:$0xff] }
   0x8   :  { %11566 = vmatprep.subr.msk.bf16.mxu0 %vm98_vm0, %v517_v18  ;;  %v100_v28 = vsel %vm98_vm0, %v43_v22, 0  ;;  %v292_v29 = vpack.c.bf16 %v11549_v27, %v11547_v26  ;;  %v291_v33 = vpack.c.bf16 %v11548_v31, %v11546_v30  ;;  %v11551_v34 = vld [vmem:[%s19521_s0 + $0x68] sm:$0xff]  ;;  %v11553_v35 = vld [vmem:[%s19521_s0 + $0x78] sm:$0x3f]  ;;  %v11550_v36 = vld [vmem:[%s19521_s0 + $0x60] sm:$0xff] }
   0x9   :  { %108 = vmatpush1.bf16.msra.mxu1 %v100_v28  ;;  %v549_v32 = vsel %vm98_vm0, %v516_v24, 0  ;;  %v11552_v37 = vld [vmem:[%s19521_s0 + $0x70] sm:$0x3f]  ;;  %v294_v38 = vpack.c.bf16 %v11553_v35, %v11551_v34  ;;  %v11583_v40 = vld [vmem:[%s19521_s0 + $0x108] sm:$0xff]  ;;  %v11585_v41 = vld [vmem:[%s19521_s0 + $0x118] sm:$0xff] }
   0xa   :  { %557 = vmatpush1.bf16.msra.mxu0 %v549_v32  ;;  %331 = vmatprep.subr.bf16.mxu1 %v292_v29  ;;  %v293_v39 = vpack.c.bf16 %v11552_v37, %v11550_v36  ;;  %v11582_v42 = vld [vmem:[%s19521_s0 + $0x100] sm:$0xff]  ;;  %v11584_v43 = vld [vmem:[%s19521_s0 + $0x110] sm:$0xff]  ;;  %v961_v44 = vpack.c.bf16 %v11585_v41, %v11583_v40  ;;  %v11587_v46 = vld [vmem:[%s19521_s0 + $0x128] sm:$0xff] }
   0xb   :  { %v960_v45 = vpack.c.bf16 %v11584_v43, %v11582_v42  ;;  %v11589_v47 = vld [vmem:[%s19521_s0 + $0x138] sm:$0x3f]  ;;  %v11586_v48 = vld [vmem:[%s19521_s0 + $0x120] sm:$0xff]  ;;  %v11588_v51 = vld [vmem:[%s19521_s0 + $0x130] sm:$0x3f] }
   0xc   :  { %11543 = vmatmul.mubr.msk.bf16.vlgmr.msra.gmra.mrb[0].mxu1 %vm88_vm1, %v13832_v25  ;;  %v326_v49 = vsel %vm98_vm0, %v293_v39, 0  ;;  %v963_v50 = vpack.c.bf16 %v11589_v47, %v11587_v46  ;;  %v11571_v52 = vld [vmem:[%s19521_s0 + $0xc8] sm:$0xff]  ;;  %v11573_v53 = vld [vmem:[%s19521_s0 + $0xd8] sm:$0xff]  ;;  %1000 = vmatprep.subr.bf16.mxu0 %v961_v44  ;;  %v962_v54 = vpack.c.bf16 %v11588_v51, %v11586_v48  ;;  %v11574_v60 = vld [vmem:[%s19521_s0 + $0xe0] sm:$0xff] }
   0xd   :  { %11567 = vmatmul.mubr.msk.bf16.vlgmr.msra.gmra.mrb[0].mxu0 %vm88_vm1, %v13832_v25  ;;  %332 = vmatpush1.bf16.msra.mxu1 %v291_v33  ;;  %v738_v55 = vpack.c.bf16 %v11573_v53, %v11571_v52  ;;  %v13901_v56 = vld [vmem:[%s19522_s1 + $0x8] sm:$0xff]   ;;  %v11609_v59 = vld [vmem:[%s19521_s0 + $0x198] sm:$0xff]  ;;  %v11576_v61 = vld [vmem:[%s19521_s0 + $0xf0] sm:$0x3f] }
   0xe   :  { %147 = vmatprep.mubr.bf16.mxu1 %v19529_v7  ;;  %596 = vmatprep.mubr.bf16.mxu0 %v19529_v7  ;;  %v995_v57 = vsel %vm98_vm0, %v962_v54, 0  ;;  %v11607_v58 = vld [vmem:[%s19521_s0 + $0x188] sm:$0xff]  ;;  %v11610_v63 = vld [vmem:[%s19521_s0 + $0x1a0] sm:$0xff]  ;;  %v11612_v0 = vld [vmem:[%s19521_s0 + $0x1b0] sm:$0x3f]  ;;  %v739_v1 = vpack.c.bf16 %v11576_v61, %v11574_v60 }
   0xf   :  { %11554 = vmatprep.subr.msk.bf16.mxu1 %vm98_vm0, %v294_v38  ;;  %1001 = vmatpush1.bf16.msra.mxu0 %v960_v45  ;;  %v1407_v62 = vpack.c.bf16 %v11609_v59, %v11607_v58  ;;  %v1408_v2 = vpack.c.bf16 %v11612_v0, %v11610_v63  ;;  %v11598_v3 = vld [vmem:[%s19521_s0 + $0x160] sm:$0xff]  ;;  %v11600_v4 = vld [vmem:[%s19521_s0 + $0x170] sm:$0x3f]  ;;  %v11575_v18 = vld [vmem:[%s19521_s0 + $0xe8] sm:$0xff] }
  0x10   :  { %11590 = vmatprep.subr.msk.bf16.mxu0 %vm98_vm0, %v963_v50  ;;  %v13938_v5 = vld [vmem:[%s19522_s1 + $0x10] ss:$0 sps:$4 sm:$0x11]   ;;  %v1185_v6 = vpack.c.bf16 %v11600_v4, %v11598_v3  ;;  %v45_v8 = vld [vmem:[%s19523_s2] sm:$0xff]  ;;  %v772_v10 = vsel %vm98_vm0, %v739_v1, 0  ;;  %v11611_v22 = vld [vmem:[%s19521_s0 + $0x1a8] sm:$0xff] }
  0x11   :  { %334 = vmatpush1.bf16.msra.mxu1 %v326_v49  ;;  %v11622_v9 = vld [vmem:[%s19521_s0 + $0x1e0] sm:$0xff]  ;;  %v1441_v11 = vsel %vm98_vm0, %v1408_v2, 0  ;;  %52 = vperm.xlu0 %13123, %v45_v8   ;;  %v11624_v12 = vld [vmem:[%s19521_s0 + $0x1f0] sm:$0x3f]  ;;  %v11577_v19 = vld [vmem:[%s19521_s0 + $0xf8] sm:$0x3f] }
  0x12   :  { %777 = vmatprep.subr.bf16.mxu1 %v738_v55  ;;  %525 = vperm.xlu1 %13124, %v45_v8   ;;  %v1631_v13 = vpack.c.bf16 %v11624_v12, %v11622_v9  ;;  %v11570_v14 = vld [vmem:[%s19521_s0 + $0xc0] sm:$0xff]  ;;  %v11572_v15 = vld [vmem:[%s19521_s0 + $0xd0] sm:$0xff]  ;;  %v1218_v16 = vsel %vm98_vm0, %v1185_v6, 0  ;;  %v11613_v23 = vld [vmem:[%s19521_s0 + $0x1b8] sm:$0x3f]  ;;  %v740_v28 = vpack.c.bf16 %v11577_v19, %v11575_v18 }
  0x13   :  { %1003 = vmatpush1.bf16.msra.mxu0 %v995_v57  ;;  %v11606_v20 = vld [vmem:[%s19521_s0 + $0x180] sm:$0xff]  ;;  %v11608_v21 = vld [vmem:[%s19521_s0 + $0x190] sm:$0xff]  ;;  %v737_v24 = vpack.c.bf16 %v11572_v15, %v11570_v14  ;;  %v11595_v26 = vld [vmem:[%s19521_s0 + $0x148] sm:$0xff]  ;;  %v1409_v30 = vpack.c.bf16 %v11613_v23, %v11611_v22 }
  0x14   :  { %11544 = vmatmul.mubr.msk.bf16.gmra.mrb[4].mxu1 %vm88_vm1, %v13901_v56  ;;  %1446 = vmatprep.subr.bf16.mxu0 %v1407_v62  ;;  %v13961_v17 = vsel %vm98_vm0, %v1631_v13, 0  ;;  %v11597_v27 = vld [vmem:[%s19521_s0 + $0x158] sm:$0xff]  ;;  %v1406_v29 = vpack.c.bf16 %v11608_v21, %v11606_v20  ;;  %v11594_v32 = vld [vmem:[%s19521_s0 + $0x140] sm:$0xff]  ;;  %v11596_v33 = vld [vmem:[%s19521_s0 + $0x150] sm:$0xff] }
  0x15   :  { %11568 = vmatmul.mubr.msk.bf16.gmra.mrb[4].mxu0 %vm88_vm1, %v13901_v56  ;;  %157 = vmatprep.mubr.bf16.mxu1 %v19529_v7  ;;  %v1184_v31 = vpack.c.bf16 %v11597_v27, %v11595_v26  ;;  %v11599_v34 = vld [vmem:[%s19521_s0 + $0x168] sm:$0xff]  ;;  %v11601_v35 = vld [vmem:[%s19521_s0 + $0x178] sm:$0x3f]  ;;  %v1183_v36 = vpack.c.bf16 %v11596_v33, %v11594_v32  ;;  %v11618_v41 = vld [vmem:[%s19521_s0 + $0x1c0] sm:$0xff] }
  0x16   :  { %606 = vmatprep.mubr.bf16.mxu0 %v19529_v7  ;;  %302 = vperm.xlu0 %13123, %v45_v8   ;;  %v11619_v37 = vld [vmem:[%s19521_s0 + $0x1c8] sm:$0xff]  ;;  %v11621_v38 = vld [vmem:[%s19521_s0 + $0x1d8] sm:$0xff]  ;;  %v1186_v39 = vpack.c.bf16 %v11601_v35, %v11599_v34  ;;  %v11620_v42 = vld [vmem:[%s19521_s0 + $0x1d0] sm:$0xff] }
  0x17   :  { %748 = vperm.xlu1 %13124, %v45_v8   ;;  %v1630_v40 = vpack.c.bf16 %v11621_v38, %v11619_v37  ;;  %v11623_v43 = vld [vmem:[%s19521_s0 + $0x1e8] sm:$0xff]  ;;  %v11625_v44 = vld [vmem:[%s19521_s0 + $0x1f8] sm:$0x3f]  ;;  %v1629_v45 = vpack.c.bf16 %v11620_v42, %v11618_v41 }
  0x18   :  { %v1632_v46 = vpack.c.bf16 %v11625_v44, %v11623_v43 }
  0x1a   :  { %971 = vperm.xlu0 %13123, %v45_v8  }
  0x1b   :  { %1194 = vperm.xlu1 %13124, %v45_v8  }
  0x1c   :  { %11545 = vmatmul.mubr.msk.bf16.gmra.mrb[8].mxu1 %vm88_vm1, %v13938_v5 }
  0x1d   :  { %11569 = vmatmul.mubr.msk.bf16.gmra.mrb[8].mxu0 %vm88_vm1, %v13938_v5  ;;  %363 = vmatprep.mubr.bf16.mxu1 %v19529_v7 }
  0x1e   :  { %1032 = vmatprep.mubr.bf16.mxu0 %v19529_v7  ;;  %1417 = vperm.xlu0 %13123, %v45_v8  }
  0x1f   :  { %1640 = vperm.xlu1 %13124, %v45_v8  }
  0x24   :  { %11555 = vmatmul.mubr.msk.bf16.vlgmr.msra.gmra.mrb[12].mxu1 %vm88_vm1, %v13832_v25 }
  0x25   :  { %11591 = vmatmul.mubr.msk.bf16.vlgmr.msra.gmra.mrb[12].mxu0 %vm88_vm1, %v13832_v25  ;;  %778 = vmatpush1.bf16.msra.mxu1 %v737_v24 }
  0x26   :  { %373 = vmatprep.mubr.bf16.mxu1 %v19529_v7  ;;  %1042 = vmatprep.mubr.bf16.mxu0 %v19529_v7 }
  0x27   :  { %11578 = vmatprep.subr.msk.bf16.mxu1 %vm98_vm0, %v740_v28  ;;  %1447 = vmatpush1.bf16.msra.mxu0 %v1406_v29 }
  0x28   :  { %11614 = vmatprep.subr.msk.bf16.mxu0 %vm98_vm0, %v1409_v30 }
  0x29   :  { %780 = vmatpush1.bf16.msra.mxu1 %v772_v10 }
  0x2a   :  { %1223 = vmatprep.subr.bf16.mxu1 %v1184_v31 }
  0x2b   :  { %1449 = vmatpush1.bf16.msra.mxu0 %v1441_v11 }
  0x2c   :  { %11556 = vmatmul.mubr.msk.bf16.gmra.mrb[16].mxu1 %vm88_vm1, %v13901_v56  ;;  %2234 = vmatprep.subr.bf16.mxu0 %v19529_v7 }
  0x2d   :  { %11592 = vmatmul.mubr.msk.bf16.gmra.mrb[16].mxu0 %vm88_vm1, %v13901_v56  ;;  %383 = vmatprep.mubr.bf16.mxu1 %v19529_v7 }
  0x2e   :  { %1052 = vmatprep.mubr.bf16.mxu0 %v19529_v7 }
  0x34   :  { %11557 = vmatmul.mubr.msk.bf16.gmra.mrb[20].mxu1 %vm88_vm1, %v13938_v5 }
  0x35   :  { %11593 = vmatmul.mubr.msk.bf16.gmra.mrb[20].mxu0 %vm88_vm1, %v13938_v5  ;;  %809 = vmatprep.mubr.bf16.mxu1 %v19529_v7 }
  0x36   :  { %1478 = vmatprep.mubr.bf16.mxu0 %v19529_v7 }
  0x3c   :  { %11579 = vmatmul.mubr.msk.bf16.vlgmr.msra.gmra.mrb[24].mxu1 %vm88_vm1, %v13832_v25 }
  0x3d   :  { %11615 = vmatmul.mubr.msk.bf16.vlgmr.msra.gmra.mrb[24].mxu0 %vm88_vm1, %v13832_v25  ;;  %1224 = vmatpush1.bf16.msra.mxu1 %v1183_v36 }
  0x3e   :  { %819 = vmatprep.mubr.bf16.mxu1 %v19529_v7  ;;  %11602 = vmatprep.subr.msk.bf16.mxu1 %vm98_vm0, %v1186_v39 }
  0x3f   :  { %1488 = vmatprep.mubr.bf16.mxu0 %v19529_v7 }
  0x41   :  { %1226 = vmatpush1.bf16.msra.mxu1 %v1218_v16 }
  0x42   :  { %1669 = vmatprep.subr.bf16.mxu1 %v1630_v40 }
  0x44   :  { %11580 = vmatmul.mubr.msk.bf16.gmra.mrb[28].mxu1 %vm88_vm1, %v13901_v56 }
  0x45   :  { %829 = vmatprep.mubr.bf16.mxu1 %v19529_v7  ;;  %11616 = vmatmul.mubr.msk.bf16.gmra.mrb[28].mxu0 %vm88_vm1, %v13901_v56 }
  0x46   :  { %1498 = vmatprep.mubr.bf16.mxu0 %v19529_v7 }
  0x4c   :  { %11581 = vmatmul.mubr.msk.bf16.gmra.mrb[32].mxu1 %vm88_vm1, %v13938_v5 }
  0x4d   :  { %1255 = vmatprep.mubr.bf16.mxu1 %v19529_v7  ;;  %11617 = vmatmul.mubr.msk.bf16.gmra.mrb[32].mxu0 %vm88_vm1, %v13938_v5 }
  0x54   :  { %11603 = vmatmul.mubr.msk.bf16.vlgmr.msra.gmra.mrb[36].mxu1 %vm88_vm1, %v13832_v25 }
  0x55   :  { %1670 = vmatpush1.bf16.msra.mxu1 %v1629_v45  ;;  %1265 = vmatprep.mubr.bf16.mxu1 %v19529_v7 }
  0x56   :  { %11626 = vmatprep.subr.msk.bf16.mxu1 %vm98_vm0, %v1632_v46 }
  0x59   :  { %1672 = vmatpush1.bf16.msra.mxu1 %v13961_v17 }
  0x5a   :  { %2367 = vmatprep.subr.bf16.mxu1 %v19529_v7 }
  0x5c   :  { %11604 = vmatmul.mubr.msk.bf16.gmra.mrb[40].mxu1 %vm88_vm1, %v13901_v56 }
  0x5d   :  { %1275 = vmatprep.mubr.bf16.mxu1 %v19529_v7 }
  0x64   :  { %11605 = vmatmul.mubr.msk.bf16.gmra.mrb[44].mxu1 %vm88_vm1, %v13938_v5 }
  0x65   :  { %1701 = vmatprep.mubr.bf16.mxu1 %v19529_v7 }
  0x6c   :  { %11627 = vmatmul.mubr.msk.bf16.vlgmr.msra.gmra.mrb[48].mxu1 %vm88_vm1, %v13832_v25 }
  0x6d   :  { %1711 = vmatprep.mubr.bf16.mxu1 %v19529_v7 }
  0x74   :  { %11628 = vmatmul.mubr.msk.bf16.gmra.mrb[52].mxu1 %vm88_vm1, %v13901_v56 }
  0x75   :  { %1721 = vmatprep.mubr.bf16.mxu1 %v19529_v7 }
  0x7c   :  { %11629 = vmatmul.mubr.msk.bf16.gmra.mrb[56].mxu1 %vm88_vm1, %v13938_v5 }
  0x90   :  { %v53_v47 = vpop.permute.xlu0 %52 }
  0x91   :  { %v526_v48 = vpop.permute.xlu1 %525 }
  0x95   :  { %v303_v14 = vpop.permute.xlu0 %302 }
  0x99   :  { %v972_v22 = vpop.permute.xlu0 %971 }
  0xdf   :  { %v139_v49 = vpop.f32.mrb[0].mxu1 }
  0xe0   :  { %v14080_v50 = vadd.f32 %v139_v49, %v53_v47  ;;  %v141_v51 = vpop.f32.mrb[1].mxu1  ;;  %v588_v52 = vpop.f32.mrb[0].mxu0 }
  0xe1   :  { %v14082_v53 = vadd.f32 %v141_v51, %v53_v47  ;;  %v14084_v25 = vpop.f32.mrb[2].mxu1  ;;  %v14086_v54 = vadd.f32 %v588_v52, %v526_v48  ;;  %v590_v55 = vpop.f32.mrb[1].mxu0 }
  0xe2   :  { %v14088_v56 = vpop.f32.mrb[3].mxu1  ;;  %v14090_v57 = vadd.f32 %v590_v55, %v526_v48  ;;  %v14092_v58 = vpop.f32.mrb[2].mxu0  ;;  %v19541_v60 = vmax.f32 %v14080_v50, 0.0 }
  0xe3   :  { %v19540_v59 = vmax.f32 %v14082_v53, 0.0  ;;  %v14096_v61 = vpop.f32.mrb[3].mxu0  ;;  %v19538_v63 = vmax.f32 %v14086_v54, 0.0 }
  0xe4   :  { %v19536_v62 = vmax.f32 %v14090_v57, 0.0 }
  0xe5   :  { %v177_v0 = vsel %vm176_vm2, %v19540_v59, 0.0 }
  0xe6   :  { %v178_v1 = vadd.f32 %v177_v0, %v19541_v60  ;;  %v625_v2 = vsel %vm176_vm2, %v19536_v62, 0.0 }
  0xe7   :  { %v14108_v3 = vpop.f32.mrb[4].mxu1  ;;  %v626_v5 = vadd.f32 %v625_v2, %v19538_v63 }
  0xe8   :  { %v14110_v4 = vpop.f32.mrb[5].mxu1  ;;  %179 = vadd.xlane.f32.xlu0 %v178_v1  ;;  %v14114_v6 = vpop.f32.mrb[4].mxu0 }
  0xe9   :  { %v14116_v8 = vpop.f32.mrb[6].mxu1  ;;  %v14118_v9 = vpop.f32.mrb[5].mxu0 }
  0xea   :  { %19600 = vst [vmem:[#allocation6_spill] sm:$0xff] %v14116_v8  ;;  %v14120_v10 = vpop.f32.mrb[7].mxu1  ;;  %v14122_v11 = vpop.f32.mrb[6].mxu0 }
  0xeb   :  { %19601 = vst [vmem:[#allocation7_spill] sm:$0xff] %v14120_v10  ;;  %19602 = vst [vmem:[#allocation8_spill] sm:$0xff] %v14122_v11  ;;  %v14124_v12 = vpop.f32.mrb[7].mxu0 }
  0xec   :  { %19603 = vst [vmem:[#allocation9_spill] sm:$0xff] %v14124_v12  ;;  %627 = vadd.xlane.f32.xlu0 %v626_v5 }
  0xef   :  { %v14126_v13 = vpop.f32.mrb[8].mxu1 }
  0xf0   :  { %19604 = vst [vmem:[#allocation10_spill] sm:$0xff] %v14126_v13  ;;  %v14128_v15 = vpop.f32.mrb[9].mxu1  ;;  %v14130_v16 = vpop.f32.mrb[8].mxu0 }
  0xf1   :  { %19605 = vst [vmem:[#allocation11_spill] sm:$0xff] %v14128_v15  ;;  %19606 = vst [vmem:[#allocation12_spill] sm:$0xff] %v14130_v16  ;;  %v163_v17 = vpop.f32.mrb[10].mxu1  ;;  %v14132_v18 = vpop.f32.mrb[9].mxu0 }
  0xf2   :  { %19607 = vst [vmem:[#allocation13_spill] sm:$0xff] %v14132_v18  ;;  %v164_v19 = vpop.f32.mrb[11].mxu1  ;;  %v612_v20 = vpop.f32.mrb[10].mxu0 }
  0xf3   :  { %v613_v21 = vpop.f32.mrb[11].mxu0  ;;  %v749_v20 = vpop.permute.xlu1 %748 }
  0xf4   :  { %v1418_v21 = vpop.permute.xlu0 %1417 }
  0xf7   :  { %v365_v23 = vpop.f32.mrb[12].mxu1 }
  0xf8   :  { %v14134_v24 = vadd.f32 %v365_v23, %v303_v14  ;;  %v367_v26 = vpop.f32.mrb[13].mxu1  ;;  %v1034_v27 = vpop.f32.mrb[12].mxu0 }
  0xf9   :  { %v14136_v28 = vadd.f32 %v367_v26, %v303_v14  ;;  %v14138_v29 = vpop.f32.mrb[14].mxu1  ;;  %v14140_v30 = vadd.f32 %v1034_v27, %v972_v22  ;;  %v1036_v31 = vpop.f32.mrb[13].mxu0 }
  0xfa   :  { %v14142_v32 = vpop.f32.mrb[15].mxu1  ;;  %v14144_v33 = vadd.f32 %v1036_v31, %v972_v22  ;;  %v14146_v34 = vpop.f32.mrb[14].mxu0  ;;  %v19534_v36 = vmax.f32 %v14134_v24, 0.0 }
  0xfb   :  { %v19533_v35 = vmax.f32 %v14136_v28, 0.0  ;;  %v14150_v37 = vpop.f32.mrb[15].mxu0  ;;  %v19532_v39 = vmax.f32 %v14140_v30, 0.0 }
  0xfc   :  { %v19531_v38 = vmax.f32 %v14144_v33, 0.0 }
  0xfd   :  { %v402_v40 = vsel %vm176_vm2, %v19533_v35, 0.0 }
  0xfe   :  { %v403_v41 = vadd.f32 %v402_v40, %v19534_v36  ;;  %v1071_v42 = vsel %vm176_vm2, %v19531_v38, 0.0 }
  0xff   :  { %v14162_v43 = vpop.f32.mrb[16].mxu1  ;;  %v1072_v45 = vadd.f32 %v1071_v42, %v19532_v39 }
 0x100   :  { %19608 = vst [vmem:[#allocation14_spill] sm:$0xff] %v14162_v43  ;;  %v14164_v44 = vpop.f32.mrb[17].mxu1  ;;  %404 = vadd.xlane.f32.xlu1 %v403_v41  ;;  %v14168_v46 = vpop.f32.mrb[16].mxu0 }
 0x101   :  { %19609 = vst [vmem:[#allocation15_spill] sm:$0xff] %v14164_v44  ;;  %19610 = vst [vmem:[#allocation16_spill] sm:$0xff] %v14168_v46  ;;  %v14170_v47 = vpop.f32.mrb[18].mxu1  ;;  %v14172_v48 = vpop.f32.mrb[17].mxu0 }
 0x102   :  { %19611 = vst [vmem:[#allocation17_spill] sm:$0xff] %v14170_v47  ;;  %19612 = vst [vmem:[#allocation18_spill] sm:$0xff] %v14172_v48  ;;  %v14174_v49 = vpop.f32.mrb[19].mxu1  ;;  %v14176_v51 = vpop.f32.mrb[18].mxu0 }
 0x103   :  { %19613 = vst [vmem:[#allocation19_spill] sm:$0xff] %v14174_v49  ;;  %19614 = vst [vmem:[#allocation20_spill] sm:$0xff] %v14176_v51  ;;  %v14178_v52 = vpop.f32.mrb[19].mxu0 }
 0x104   :  { %19615 = vst [vmem:[#allocation21_spill] sm:$0xff] %v14178_v52  ;;  %1073 = vadd.xlane.f32.xlu1 %v1072_v45 }
 0x107   :  { %v14180_v55 = vpop.f32.mrb[20].mxu1 }
 0x108   :  { %19616 = vst [vmem:[#allocation22_spill] sm:$0xff] %v14180_v55  ;;  %v14182_v0 = vpop.f32.mrb[21].mxu1  ;;  %v14184_v1 = vpop.f32.mrb[20].mxu0 }
 0x109   :  { %19617 = vst [vmem:[#allocation23_spill] sm:$0xff] %v14182_v0  ;;  %19618 = vst [vmem:[#allocation24_spill] sm:$0xff] %v14184_v1  ;;  %v389_v2 = vpop.f32.mrb[22].mxu1  ;;  %v14186_v5 = vpop.f32.mrb[21].mxu0 }
 0x10a   :  { %19619 = vst [vmem:[#allocation25_spill] sm:$0xff] %v14186_v5  ;;  %v390_v14 = vpop.f32.mrb[23].mxu1  ;;  %v1058_v17 = vpop.f32.mrb[22].mxu0 }
 0x10b   :  { %v1059_v19 = vpop.f32.mrb[23].mxu0 }
 0x10f   :  { %v811_v22 = vpop.f32.mrb[24].mxu1 }
 0x110   :  { %v1480_v23 = vpop.f32.mrb[24].mxu0  ;;  %v14188_v26 = vadd.f32 %v811_v22, %v749_v20  ;;  %v813_v27 = vpop.f32.mrb[25].mxu1 }
 0x111   :  { %v14190_v31 = vadd.f32 %v1480_v23, %v1418_v21  ;;  %v14192_v40 = vadd.f32 %v813_v27, %v749_v20  ;;  %v1482_v41 = vpop.f32.mrb[25].mxu0  ;;  %v14194_v42 = vpop.f32.mrb[26].mxu1 }
 0x112   :  { %v14196_v45 = vadd.f32 %v1482_v41, %v1418_v21  ;;  %v14198_v2 = vpop.f32.mrb[27].mxu1  ;;  %v14200_v14 = vpop.f32.mrb[26].mxu0  ;;  %v19539_v20 = vmax.f32 %v14188_v26, 0.0 }
 0x113   :  { %v19535_v17 = vmax.f32 %v14192_v40, 0.0  ;;  %v19542_v19 = vmax.f32 %v14190_v31, 0.0  ;;  %v14204_v22 = vpop.f32.mrb[27].mxu0 }
 0x114   :  { %v19537_v23 = vmax.f32 %v14196_v45, 0.0 }
 0x115   :  { %v848_v27 = vsel %vm176_vm2, %v19535_v17, 0.0 }
 0x116   :  { %v1517_v21 = vsel %vm176_vm2, %v19537_v23, 0.0  ;;  %v849_v41 = vadd.f32 %v848_v27, %v19539_v20  ;;  %v1195_v27 = vpop.permute.xlu1 %1194 }
 0x117   :  { %v14216_v7 = vpop.f32.mrb[28].mxu1  ;;  %v1518_v38 = vadd.f32 %v1517_v21, %v19542_v19 }
 0x118   :  { %19620 = vst [vmem:[#allocation26_spill] sm:$0xff] %v14216_v7  ;;  %v14220_v39 = vpop.f32.mrb[29].mxu1  ;;  %850 = vadd.xlane.f32.xlu0 %v849_v41 }
 0x119   :  { %19621 = vst [vmem:[#allocation27_spill] sm:$0xff] %v14220_v39  ;;  %1519 = vadd.xlane.f32.xlu1 %v1518_v38  ;;  %v14222_v35 = vpop.f32.mrb[30].mxu1 }
 0x11a   :  { %19622 = vst [vmem:[#allocation28_spill] sm:$0xff] %v14222_v35  ;;  %v14224_v36 = vpop.f32.mrb[31].mxu1  ;;  %v1641_v18 = vpop.permute.xlu1 %1640 }
 0x11b   :  { %19623 = vst [vmem:[#allocation29_spill] sm:$0xff] %v14224_v36 }
 0x11f   :  { %v14226_v17 = vpop.f32.mrb[32].mxu1 }
 0x120   :  { %19624 = vst [vmem:[#allocation30_spill] sm:$0xff] %v14226_v17  ;;  %v14228_v62 = vpop.f32.mrb[33].mxu1 }
 0x121   :  { %19625 = vst [vmem:[#allocation31_spill] sm:$0xff] %v14228_v62  ;;  %v835_v23 = vpop.f32.mrb[34].mxu1 }
 0x122   :  { %v836_v63 = vpop.f32.mrb[35].mxu1 }
 0x127   :  { %v1257_v20 = vpop.f32.mrb[36].mxu1 }
 0x128   :  { %v14230_v59 = vadd.f32 %v1257_v20, %v1195_v27  ;;  %v1259_v60 = vpop.f32.mrb[37].mxu1 }
 0x129   :  { %v14232_v21 = vadd.f32 %v1259_v60, %v1195_v27  ;;  %v14234_v19 = vpop.f32.mrb[38].mxu1 }
 0x12a   :  { %v14236_v38 = vpop.f32.mrb[39].mxu1  ;;  %v19544_v5 = vmax.f32 %v14230_v59, 0.0 }
 0x12b   :  { %v19543_v41 = vmax.f32 %v14232_v21, 0.0 }
 0x12d   :  { %v1294_v23 = vsel %vm176_vm2, %v19543_v41, 0.0 }
 0x12e   :  { %v1295_v63 = vadd.f32 %v1294_v23, %v19544_v5 }
 0x12f   :  { %v14245_v20 = vpop.f32.mrb[40].mxu1 }
 0x130   :  { %19626 = vst [vmem:[#allocation32_spill] sm:$0xff] %v14245_v20  ;;  %v14247_v1 = vpop.f32.mrb[41].mxu1  ;;  %1296 = vadd.xlane.f32.xlu0 %v1295_v63 }
 0x131   :  { %19627 = vst [vmem:[#allocation33_spill] sm:$0xff] %v14247_v1  ;;  %v14249_v60 = vpop.f32.mrb[42].mxu1 }
 0x132   :  { %19628 = vst [vmem:[#allocation34_spill] sm:$0xff] %v14249_v60  ;;  %v14251_v27 = vpop.f32.mrb[43].mxu1 }
 0x133   :  { %19629 = vst [vmem:[#allocation35_spill] sm:$0xff] %v14251_v27 }
 0x137   :  { %v14253_v0 = vpop.f32.mrb[44].mxu1 }
 0x138   :  { %19630 = vst [vmem:[#allocation36_spill] sm:$0xff] %v14253_v0  ;;  %v14255_v55 = vpop.f32.mrb[45].mxu1  ;;  %v19633_v0 = vmax.f32 %v14082_v53, 0.0 }
 0x139   :  { %19631 = vst [vmem:[#allocation37_spill] sm:$0xff] %v14255_v55  ;;  %v1281_v62 = vpop.f32.mrb[46].mxu1 }
 0x13a   :  { %v1282_v17 = vpop.f32.mrb[47].mxu1 }
 0x13f   :  { %v1703_v41 = vpop.f32.mrb[48].mxu1 }
 0x140   :  { %v14257_v16 = vadd.f32 %v1703_v41, %v1641_v18  ;;  %v1705_v23 = vpop.f32.mrb[49].mxu1 }
 0x141   :  { %v14259_v5 = vadd.f32 %v1705_v23, %v1641_v18  ;;  %v14261_v15 = vpop.f32.mrb[50].mxu1  ;;  %v19632_v18 = vmax.f32 %v14080_v50, 0.0  ;;  %v19635_v50 = vmax.f32 %v14090_v57, 0.0 }
 0x142   :  { %v14263_v63 = vpop.f32.mrb[51].mxu1  ;;  %v19546_v13 = vmax.f32 %v14257_v16, 0.0 }
 0x143   :  { %v19545_v52 = vmax.f32 %v14259_v5, 0.0 }
 0x145   :  { %v1740_v62 = vsel %vm176_vm2, %v19545_v52, 0.0 }
 0x146   :  { %v1741_v17 = vadd.f32 %v1740_v62, %v19546_v13  ;;  %v19634_v62 = vmax.f32 %v14086_v54, 0.0 }
 0x148   :  { %1742 = vadd.xlane.f32.xlu0 %v1741_v17 }
 0x175   :  { %v180_v41 = vpop.xlane.xlu0 %179 }
 0x176   :  { %v201_v55 = vmul.f32 0.004166667, %v180_v41 }
 0x178   :  { %v14274_v23 = vsub.f32 %v19632_v18, %v201_v55  ;;  %v14278_v51 = vsub.f32 %v19633_v0, %v201_v55 }
 0x179   :  { %v628_v27 = vpop.xlane.xlu0 %627 }
 0x17a   :  { %v646_v60 = vmul.f32 0.004166667, %v628_v27  ;;  %v216_v49 = vmul.f32 %v14274_v23, %v14274_v23  ;;  %v217_v52 = vmul.f32 %v14278_v51, %v14278_v51 }
 0x17c   :  { %v14286_v17 = vsub.f32 %v19634_v62, %v646_v60  ;;  %v14290_v41 = vsub.f32 %v19635_v50, %v646_v60  ;;  %v226_v53 = vsel %vm176_vm2, %v217_v52, 0.0 }
 0x17d   :  { %v227_v55 = vadd.f32 %v226_v53, %v216_v49 }
 0x17e   :  { %v661_v0 = vmul.f32 %v14286_v17, %v14286_v17  ;;  %v662_v27 = vmul.f32 %v14290_v41, %v14290_v41 }
 0x17f   :  { %228 = vadd.xlane.f32.xlu1 %v227_v55 }
 0x180   :  { %12 = vsyncpa [#allocation4], 0  ;;  %v671_v18 = vsel %vm176_vm2, %v662_v27, 0.0  ;;  %v19636_v57 = vmax.f32 %v14134_v24, 0.0  ;;  %v19637_v49 = vmax.f32 %v14136_v28, 0.0  ;;  %v19639_v24 = vmax.f32 %v14144_v33, 0.0 }
 0x181   :  { %v672_v54 = vadd.f32 %v671_v18, %v661_v0  ;;  %v19638_v0 = vmax.f32 %v14140_v30, 0.0  ;;  %vm193_vm3 = vcmask 1040384   ;;  %vm1941_vm4 = vcmask 1041408  }
 0x182   :  { %vm1944_vm5 = vcmask 1042432   ;;  %vm1947_vm6 = vcmask 1043456   ;;  %vm1950_vm7 = vcmask 1044480   ;;  %vm1953_vm8 = vcmask 1045504  }
 0x183   :  { %673 = vadd.xlane.f32.xlu1 %v672_v54  ;;  %vm195_vm9 = vcmask 909312   ;;  %vm11250_vm10 = vcmask 261120  }
 0x18d   :  { %v405_v62 = vpop.xlane.xlu1 %404 }
 0x18e   :  { %v423_v13 = vmul.f32 0.004166667, %v405_v62 }
 0x190   :  { %v14300_v60 = vsub.f32 %v19636_v57, %v423_v13  ;;  %v14304_v52 = vsub.f32 %v19637_v49, %v423_v13 }
 0x191   :  { %v1074_v50 = vpop.xlane.xlu1 %1073 }
 0x192   :  { %v1092_v53 = vmul.f32 0.004166667, %v1074_v50  ;;  %v438_v55 = vmul.f32 %v14300_v60, %v14300_v60  ;;  %v439_v27 = vmul.f32 %v14304_v52, %v14304_v52 }
 0x194   :  { %v14312_v18 = vsub.f32 %v19638_v0, %v1092_v53  ;;  %v14316_v54 = vsub.f32 %v19639_v24, %v1092_v53  ;;  %v448_v28 = vsel %vm176_vm2, %v439_v27, 0.0  ;;  %v19640_v53 = vmax.f32 %v14188_v26, 0.0 }
 0x195   :  { %v449_v13 = vadd.f32 %v448_v28, %v438_v55  ;;  %v19641_v55 = vmax.f32 %v14192_v40, 0.0  ;;  %v19642_v28 = vmax.f32 %v14190_v31, 0.0 }
 0x196   :  { %v1107_v62 = vmul.f32 %v14312_v18, %v14312_v18  ;;  %v1108_v57 = vmul.f32 %v14316_v54, %v14316_v54 }
 0x197   :  { %450 = vadd.xlane.f32.xlu0 %v449_v13  ;;  %v19643_v13 = vmax.f32 %v14196_v45, 0.0 }
 0x198   :  { %v1117_v49 = vsel %vm176_vm2, %v1108_v57, 0.0 }
 0x199   :  { %v1118_v50 = vadd.f32 %v1117_v49, %v1107_v62 }
 0x19b   :  { %1119 = vadd.xlane.f32.xlu1 %v1118_v50 }
 0x1a5   :  { %v851_v30 = vpop.xlane.xlu0 %850 }
 0x1a6   :  { %v1520_v0 = vpop.xlane.xlu1 %1519  ;;  %v869_v47 = vmul.f32 0.004166667, %v851_v30 }
 0x1a7   :  { %v1538_v33 = vmul.f32 0.004166667, %v1520_v0 }
 0x1a8   :  { %v14326_v24 = vsub.f32 %v19640_v53, %v869_v47  ;;  %v14330_v27 = vsub.f32 %v19641_v55, %v869_v47  ;;  %v19644_v53 = vmax.f32 %v14230_v59, 0.0  ;;  %v13128_v59 = vld [vmem:[%s19524_s3 + $0x78] sm:$0xff]  }
 0x1a9   :  { %v14334_v36 = vsub.f32 %v19642_v28, %v1538_v33  ;;  %v14338_v62 = vsub.f32 %v19643_v13, %v1538_v33  ;;  %v14353_v33 = vld [vmem:[%s19523_s2 + $0x8] sm:$0xff]  ;;  %v19645_v28 = vmax.f32 %v14232_v21, 0.0  ;;  %v13129_v21 = vld [vmem:[%s19524_s3] sm:$0xff]   ;;  %2235 = vmatpush1.bf16.msra.mxu0 %v13128_v59 }
 0x1aa   :  { %v884_v57 = vmul.f32 %v14326_v24, %v14326_v24  ;;  %v885_v26 = vmul.f32 %v14330_v27, %v14330_v27  ;;  %2368 = vmatpush1.bf16.msra.mxu1 %v13129_v21 }
 0x1ab   :  { %v1553_v49 = vmul.f32 %v14334_v36, %v14334_v36  ;;  %v1554_v47 = vmul.f32 %v14338_v62, %v14338_v62 }
 0x1ac   :  { %v894_v31 = vsel %vm176_vm2, %v885_v26, 0.0 }
 0x1ad   :  { %v1563_v40 = vsel %vm176_vm2, %v1554_v47, 0.0  ;;  %v895_v50 = vadd.f32 %v894_v31, %v884_v57  ;;  %v19646_v31 = vmov 0  }
 0x1ae   :  { %v1564_v45 = vadd.f32 %v1563_v40, %v1553_v49  ;;  %2236 = vmatprep.subr.bf16.mxu0 %v19646_v31  ;;  %2369 = vmatprep.subr.bf16.mxu1 %v19646_v31  ;;  %v13130_v40 = vld [vmem:[%s19524_s3 + $0x80] sm:$0xff]  }
 0x1af   :  { %896 = vadd.xlane.f32.xlu0 %v895_v50  ;;  %v13131_v50 = vld [vmem:[%s19524_s3 + $0x8] sm:$0xff]   ;;  %2237 = vmatpush1.bf16.msra.mxu0 %v13130_v40 }
 0x1b0   :  { %1565 = vadd.xlane.f32.xlu1 %v1564_v45  ;;  %2370 = vmatpush1.bf16.msra.mxu1 %v13131_v50  ;;  %v13136_v50 = vld [vmem:[%s19524_s3 + $0x98] sm:$0xff]  }
 0x1b1   :  { %2238 = vmatprep.subr.bf16.mxu0 %v19646_v31  ;;  %2371 = vmatprep.subr.bf16.mxu1 %v19646_v31 }
 0x1bd   :  { %v1297_v30 = vpop.xlane.xlu0 %1296 }
 0x1be   :  { %v1315_v0 = vmul.f32 0.004166667, %v1297_v30 }
 0x1c0   :  { %v14357_v55 = vsub.f32 %v19644_v53, %v1315_v0  ;;  %v14361_v13 = vsub.f32 %v19645_v28, %v1315_v0  ;;  %v13132_v0 = vld [vmem:[%s19524_s3 + $0x88] sm:$0xff]   ;;  %v13133_v53 = vld [vmem:[%s19524_s3 + $0x10] sm:$0xff]   ;;  %v19647_v28 = vmax.f32 %v14257_v16, 0.0 }
 0x1c1   :  { %57 = vperm.xlu1 %13124, %v14353_v33   ;;  %2239 = vmatpush1.bf16.msra.mxu0 %v13132_v0  ;;  %v13134_v16 = vld [vmem:[%s19524_s3 + $0x90] sm:$0xff]   ;;  %v13139_v0 = vld [vmem:[%s19524_s3 + $0x28] sm:$0xff]  }
 0x1c2   :  { %v1330_v57 = vmul.f32 %v14357_v55, %v14357_v55  ;;  %v1331_v26 = vmul.f32 %v14361_v13, %v14361_v13  ;;  %2372 = vmatpush1.bf16.msra.mxu1 %v13133_v53  ;;  %2240 = vmatprep.subr.bf16.mxu0 %v19646_v31  ;;  %v13140_v53 = vld [vmem:[%s19524_s3 + $0xa8] sm:$0xff]  }
 0x1c3   :  { %2373 = vmatprep.subr.bf16.mxu1 %v19646_v31 }
 0x1c4   :  { %v1340_v49 = vsel %vm176_vm2, %v1331_v26, 0.0  ;;  %v19648_v26 = vmax.f32 %v14259_v5, 0.0  ;;  %v13135_v5 = vld [vmem:[%s19524_s3 + $0x18] sm:$0xff]  }
 0x1c5   :  { %530 = vperm.xlu1 %13124, %v14353_v33   ;;  %v1341_v47 = vadd.f32 %v1340_v49, %v1330_v57  ;;  %2241 = vmatpush1.bf16.msra.mxu0 %v13134_v16  ;;  %v13145_v16 = vld [vmem:[%s19524_s3 + $0x40] sm:$0xff]  }
 0x1c6   :  { %2374 = vmatpush1.bf16.msra.mxu1 %v13135_v5  ;;  %2242 = vmatprep.subr.bf16.mxu0 %v19646_v31  ;;  %v13146_v5 = vld [vmem:[%s19524_s3 + $0xc0] sm:$0xff]  }
 0x1c7   :  { %1342 = vadd.xlane.f32.xlu0 %v1341_v47  ;;  %2375 = vmatprep.subr.bf16.mxu1 %v19646_v31 }
 0x1c9   :  { %753 = vperm.xlu1 %13124, %v14353_v33   ;;  %2243 = vmatpush1.bf16.msra.mxu0 %v13136_v50  ;;  %v13149_v50 = vld [vmem:[%s19524_s3 + $0x50] sm:$0xff]  }
 0x1ca   :  { %2244 = vmatprep.subr.bf16.mxu0 %v19646_v31 }
 0x1cd   :  { %1199 = vperm.xlu1 %13124, %v14353_v33  }
 0x1d1   :  { %1645 = vperm.xlu1 %13124, %v14353_v33  }
 0x1d5   :  { %v1743_v45 = vpop.xlane.xlu0 %1742 }
 0x1d6   :  { %v1761_v30 = vmul.f32 0.004166667, %v1743_v45  ;;  %v13137_v45 = vld [vmem:[%s19524_s3 + $0x20] sm:$0xff]  }
 0x1d7   :  { %2376 = vmatpush1.bf16.msra.mxu1 %v13137_v45  ;;  %v13150_v45 = vld [vmem:[%s19524_s3 + $0xd0] sm:$0xff]  }
 0x1d8   :  { %v14397_v57 = vsub.f32 %v19647_v28, %v1761_v30  ;;  %v14401_v49 = vsub.f32 %v19648_v26, %v1761_v30  ;;  %2377 = vmatprep.subr.bf16.mxu1 %v19646_v31  ;;  %v13138_v30 = vld [vmem:[%s19524_s3 + $0xa0] sm:$0xff]   ;;  %v13141_v28 = vld [vmem:[%s19524_s3 + $0x30] sm:$0xff]  }
 0x1d9   :  { %2245 = vmatpush1.bf16.msra.mxu0 %v13138_v30  ;;  %v13142_v26 = vld [vmem:[%s19524_s3 + $0xb0] sm:$0xff]   ;;  %v13151_v30 = vld [vmem:[%s19524_s3 + $0x58] sm:$0xff]  }
 0x1da   :  { %v1776_v47 = vmul.f32 %v14397_v57, %v14397_v57  ;;  %v1777_v59 = vmul.f32 %v14401_v49, %v14401_v49  ;;  %2246 = vmatprep.subr.bf16.mxu0 %v19646_v31 }
 0x1db   :  { %2378 = vmatpush1.bf16.msra.mxu1 %v13139_v0  ;;  %v13152_v0 = vld [vmem:[%s19524_s3 + $0xd8] sm:$0xff]  }
 0x1dc   :  { %v1786_v21 = vsel %vm176_vm2, %v1777_v59, 0.0  ;;  %2379 = vmatprep.subr.bf16.mxu1 %v19646_v31  ;;  %v13144_v59 = vld [vmem:[%s19524_s3 + $0xb8] sm:$0xff]  }
 0x1dd   :  { %v1787_v40 = vadd.f32 %v1786_v21, %v1776_v47  ;;  %2247 = vmatpush1.bf16.msra.mxu0 %v13140_v53  ;;  %v13143_v47 = vld [vmem:[%s19524_s3 + $0x38] sm:$0xff]   ;;  %v13147_v21 = vld [vmem:[%s19524_s3 + $0x48] sm:$0xff]   ;;  %v13153_v53 = vld [vmem:[%s19524_s3 + $0x60] sm:$0xff]  }
 0x1de   :  { %2248 = vmatprep.subr.bf16.mxu0 %v19646_v31 }
 0x1df   :  { %1788 = vadd.xlane.f32.xlu0 %v1787_v40  ;;  %2380 = vmatpush1.bf16.msra.mxu1 %v13141_v28  ;;  %v13148_v40 = vld [vmem:[%s19524_s3 + $0xc8] sm:$0xff]   ;;  %v13154_v28 = vld [vmem:[%s19524_s3 + $0xe0] sm:$0xff]  }
 0x1e0   :  { %2381 = vmatprep.subr.bf16.mxu1 %v19646_v31 }
 0x1e1   :  { %2249 = vmatpush1.bf16.msra.mxu0 %v13142_v26  ;;  %v13156_v26 = vld [vmem:[%s19524_s3 + $0xe8] sm:$0xff]  }
 0x1e2   :  { %2250 = vmatprep.subr.bf16.mxu0 %v19646_v31 }
 0x1e3   :  { %2382 = vmatpush1.bf16.msra.mxu1 %v13143_v47  ;;  %v13157_v47 = vld [vmem:[%s19524_s3 + $0x70] sm:$0xff]  }
 0x1e4   :  { %2383 = vmatprep.subr.bf16.mxu1 %v19646_v31 }
 0x1e5   :  { %2251 = vmatpush1.bf16.msra.mxu0 %v13144_v59 }
 0x1e6   :  { %2252 = vmatprep.subr.bf16.mxu0 %v19646_v31 }
 0x1e7   :  { %2384 = vmatpush1.bf16.msra.mxu1 %v13145_v16 }
 0x1e8   :  { %2385 = vmatprep.subr.bf16.mxu1 %v19646_v31 }
 0x1e9   :  { %2253 = vmatpush1.bf16.msra.mxu0 %v13146_v5 }
 0x1ea   :  { %2254 = vmatprep.subr.bf16.mxu0 %v19646_v31 }
 0x1eb   :  { %2386 = vmatpush1.bf16.msra.mxu1 %v13147_v21 }
 0x1ec   :  { %2387 = vmatprep.subr.bf16.mxu1 %v19646_v31 }
 0x1ed   :  { %2255 = vmatpush1.bf16.msra.mxu0 %v13148_v40 }
 0x1ee   :  { %2256 = vmatprep.subr.bf16.mxu0 %v19646_v31 }
 0x1ef   :  { %2388 = vmatpush1.bf16.msra.mxu1 %v13149_v50 }
 0x1f0   :  { %2389 = vmatprep.subr.bf16.mxu1 %v19646_v31 }
 0x1f1   :  { %2257 = vmatpush1.bf16.msra.mxu0 %v13150_v45 }
 0x1f2   :  { %2258 = vmatprep.subr.bf16.mxu0 %v19646_v31 }
 0x1f3   :  { %2390 = vmatpush1.bf16.msra.mxu1 %v13151_v30 }
 0x1f4   :  { %2391 = vmatprep.subr.bf16.mxu1 %v19646_v31 }
 0x1f5   :  { %307 = vperm.xlu0 %13123, %v14353_v33   ;;  %2259 = vmatpush1.bf16.msra.mxu0 %v13152_v0 }
 0x1f6   :  { %2260 = vmatprep.subr.bf16.mxu0 %v19646_v31 }
 0x1f7   :  { %2392 = vmatpush1.bf16.msra.mxu1 %v13153_v53 }
 0x1f8   :  { %2393 = vmatprep.subr.bf16.mxu1 %v19646_v31 }
 0x1f9   :  { %976 = vperm.xlu0 %13123, %v14353_v33   ;;  %2261 = vmatpush1.bf16.msra.mxu0 %v13154_v28 }
 0x1fa   :  { %2262 = vmatprep.subr.bf16.mxu0 %v19646_v31 }
 0x1fd   :  { %1422 = vperm.xlu0 %13123, %v14353_v33   ;;  %v13155_v33 = vld [vmem:[%s19524_s3 + $0x68] sm:$0xff]   ;;  %2263 = vmatpush1.bf16.msra.mxu0 %v13156_v26 }
 0x1fe   :  { %2394 = vmatpush1.bf16.msra.mxu1 %v13155_v33  ;;  %2651 = vmatprep.subr.bf16.mxu0 %v19646_v31 }
 0x1ff   :  { %2395 = vmatprep.subr.bf16.mxu1 %v19646_v31 }
 0x202   :  { %2396 = vmatpush1.bf16.msra.mxu1 %v13157_v47 }
 0x203   :  { %2936 = vmatprep.subr.bf16.mxu1 %v19646_v31 }
 0x20c   :  { %v229_v59 = vpop.xlane.xlu1 %228 }
 0x20d   :  { %v247_v16 = vmul.f32 0.004166667, %v229_v59 }
 0x20f   :  { %v252_v5 = vadd.f32 1e-05, %v247_v16 }
 0x210   :  { %v674_v21 = vpop.xlane.xlu1 %673 }
 0x211   :  { %13623 = vrsqrt.f32 %v252_v5  ;;  %v692_v40 = vmul.f32 0.004166667, %v674_v21 }
 0x213   :  { %v697_v50 = vadd.f32 1e-05, %v692_v40 }
 0x215   :  { %13625 = vrsqrt.f32 %v697_v50 }
 0x21b   :  { %v13624_v45 = vpop.eup %13623 }
 0x21c   :  { %v262_v30 = vmul.f32 %v13624_v45, %v14274_v23  ;;  %v263_v0 = vmul.f32 %v13624_v45, %v14278_v51 }
 0x21e   :  { %272 = vst [vmem:[#allocation2] sm:$0xff] %v262_v30  ;;  %273 = vst.msk [vmem:[#allocation2 + $0x8] sm:$0xff] %vm176_vm2, %v263_v0 }
 0x21f   :  { %v13626_v53 = vpop.eup %13625 }
 0x220   :  { %v707_v28 = vmul.f32 %v13626_v53, %v14286_v17  ;;  %v708_v33 = vmul.f32 %v13626_v53, %v14290_v41 }
 0x222   :  { %718 = vst [vmem:[#allocation2 + $0xa0] sm:$0xff] %v707_v28  ;;  %719 = vst.msk [vmem:[#allocation2 + $0xa8] sm:$0xff] %vm176_vm2, %v708_v33 }
 0x224   :  { %v451_v26 = vpop.xlane.xlu0 %450 }
 0x225   :  { %v469_v47 = vmul.f32 0.004166667, %v451_v26 }
 0x227   :  { %v474_v59 = vadd.f32 1e-05, %v469_v47 }
 0x228   :  { %v1120_v16 = vpop.xlane.xlu1 %1119 }
 0x229   :  { %13627 = vrsqrt.f32 %v474_v59  ;;  %v1138_v5 = vmul.f32 0.004166667, %v1120_v16 }
 0x22b   :  { %v1143_v23 = vadd.f32 1e-05, %v1138_v5 }
 0x22d   :  { %13629 = vrsqrt.f32 %v1143_v23 }
 0x233   :  { %v13628_v51 = vpop.eup %13627 }
 0x234   :  { %v484_v21 = vmul.f32 %v13628_v51, %v14300_v60  ;;  %v485_v40 = vmul.f32 %v13628_v51, %v14304_v52 }
 0x236   :  { %495 = vst [vmem:[#allocation2 + $0x50] sm:$0xff] %v484_v21  ;;  %496 = vst.msk [vmem:[#allocation2 + $0x58] sm:$0xff] %vm176_vm2, %v485_v40 }
 0x237   :  { %v13630_v17 = vpop.eup %13629 }
 0x238   :  { %v1153_v41 = vmul.f32 %v13630_v17, %v14312_v18  ;;  %v1154_v50 = vmul.f32 %v13630_v17, %v14316_v54 }
 0x23a   :  { %1164 = vst [vmem:[#allocation2 + $0x140] sm:$0xff] %v1153_v41  ;;  %1165 = vst.msk [vmem:[#allocation2 + $0x148] sm:$0xff] %vm176_vm2, %v1154_v50 }
 0x23c   :  { %v897_v45 = vpop.xlane.xlu0 %896 }
 0x23d   :  { %v1566_v30 = vpop.xlane.xlu1 %1565  ;;  %v915_v0 = vmul.f32 0.004166667, %v897_v45 }
 0x23e   :  { %v1584_v53 = vmul.f32 0.004166667, %v1566_v30 }
 0x23f   :  { %v920_v28 = vadd.f32 1e-05, %v915_v0 }
 0x240   :  { %v1589_v33 = vadd.f32 1e-05, %v1584_v53 }
 0x241   :  { %13631 = vrsqrt.f32 %v920_v28  ;;  %v58_v60 = vpop.permute.xlu1 %57  ;;  %v14646_v8 = vld [vmem:[#allocation2 + $0x142] ss:$8 sm:$0x3] }
 0x242   :  { %13633 = vrsqrt.f32 %v1589_v33  ;;  %v14522_v52 = vadd.f32 %v14084_v25, %v58_v60  ;;  %v14525_v26 = vadd.f32 %v14088_v56, %v58_v60 }
 0x244   :  { %v19556_v18 = vmax.f32 %v14522_v52, 0.0  ;;  %v19555_v54 = vmax.f32 %v14525_v26, 0.0 }
 0x245   :  { %v531_v47 = vpop.permute.xlu1 %530 }
 0x246   :  { %v14530_v59 = vadd.f32 %v14092_v58, %v531_v47  ;;  %v14533_v16 = vadd.f32 %v14096_v61, %v531_v47  ;;  %v181_v5 = vsel %vm176_vm2, %v19555_v54, 0.0 }
 0x247   :  { %v182_v25 = vadd.f32 %v181_v5, %v19556_v18  ;;  %v14629_v18 = vld [vmem:[#allocation2 + $0x140] ss:$8 sm:$0x3] }
 0x248   :  { %v19554_v56 = vmax.f32 %v14530_v59, 0.0  ;;  %v19553_v23 = vmax.f32 %v14533_v16, 0.0 }
 0x249   :  { %v754_v51 = vpop.permute.xlu1 %753  ;;  %183 = vadd.xlane.f32.xlu0 %v182_v25 }
 0x24a   :  { %v14543_v21 = vadd.f32 %v14194_v42, %v754_v51  ;;  %v14546_v58 = vadd.f32 %v14198_v2, %v754_v51  ;;  %v629_v61 = vsel %vm176_vm2, %v19553_v23, 0.0 }
 0x24b   :  { %v13632_v40 = vpop.eup %13631  ;;  %v630_v17 = vadd.f32 %v629_v61, %v19554_v56 }
 0x24c   :  { %v13634_v41 = vpop.eup %13633  ;;  %v930_v50 = vmul.f32 %v13632_v40, %v14326_v24  ;;  %v931_v45 = vmul.f32 %v13632_v40, %v14330_v27  ;;  %v19551_v30 = vmax.f32 %v14543_v21, 0.0  ;;  %v19552_v42 = vmax.f32 %v14546_v58, 0.0 }
 0x24d   :  { %v1599_v2 = vmul.f32 %v13634_v41, %v14334_v36  ;;  %v1600_v0 = vmul.f32 %v13634_v41, %v14338_v62  ;;  %v1200_v53 = vpop.permute.xlu1 %1199  ;;  %631 = vadd.xlane.f32.xlu0 %v630_v17  ;;  %v1852_v41 = vlaneseq }
 0x24e   :  { %941 = vst [vmem:[#allocation2 + $0xf0] sm:$0xff] %v930_v50  ;;  %942 = vst.msk [vmem:[#allocation2 + $0xf8] sm:$0xff] %vm176_vm2, %v931_v45  ;;  %v14561_v28 = vadd.f32 %v14234_v19, %v1200_v53  ;;  %v14564_v24 = vadd.f32 %v14236_v38, %v1200_v53  ;;  %v852_v27 = vsel %vm176_vm2, %v19552_v42, 0.0  ;;  %v14622_v42 = vld [vmem:[#allocation2 + $0x141] ss:$8 sm:$0x3] }
 0x24f   :  { %1610 = vst [vmem:[#allocation2 + $0x1e0] sm:$0xff] %v1599_v2  ;;  %1611 = vst.msk [vmem:[#allocation2 + $0x1e8] sm:$0xff] %vm176_vm2, %v1600_v0  ;;  %v853_v36 = vadd.f32 %v852_v27, %v19551_v30  ;;  %v1853_v0 = vshrl.u32 %v1852_v41, 7  ;;  %v1845_v41 = vld [vmem:[#allocation2 + $0xa0] ss:$8 sm:$0x3] }
 0x250   :  { %v19549_v62 = vmax.f32 %v14561_v28, 0.0  ;;  %v19550_v33 = vmax.f32 %v14564_v24, 0.0  ;;  %v14618_v30 = vld [vmem:[#allocation2 + $0xa3] ss:$8 sm:$0x3] }
 0x251   :  { %v1646_v60 = vpop.permute.xlu1 %1645  ;;  %854 = vadd.xlane.f32.xlu0 %v853_v36  ;;  %v14595_v53 = vsub.s32 0, %v1853_v0  ;;  %v14597_v27 = vsub.s32 1, %v1853_v0  ;;  %v1993_v36 = vld [vmem:[#allocation2 + $0x51] ss:$8 sm:$0x3] }
 0x252   :  { %v14575_v19 = vadd.f32 %v14261_v15, %v1646_v60  ;;  %v14578_v38 = vadd.f32 %v14263_v63, %v1646_v60  ;;  %v1298_v47 = vsel %vm176_vm2, %v19550_v33, 0.0  ;;  %v1991_v60 = vld [vmem:[#allocation2 + $0x1] ss:$8 sm:$0x3] }
 0x253   :  { %v1299_v5 = vadd.f32 %v1298_v47, %v19549_v62  ;;  %v1843_v47 = vld [vmem:[#allocation2] ss:$8 sm:$0x3]  ;;  %v14613_v62 = vld [vmem:[#allocation2 + $0x53] ss:$8 sm:$0x3]  ;;  %v1877_v11 = vrot.slane %v1845_v41, %v14595_v53  ;;  %v1881_v10 = vrot.slane %v1845_v41, %v14597_v27 }
 0x254   :  { %v19547_v25 = vmax.f32 %v14575_v19, 0.0  ;;  %v19548_v51 = vmax.f32 %v14578_v38, 0.0  ;;  %v1343_v61 = vpop.xlane.xlu0 %1342  ;;  %v1855_v0 = vrot.slane %v1843_v47, %v14595_v53  ;;  %v2727_v12 = vrot.slane %v14613_v62, %v14597_v27 }
 0x255   :  { %1300 = vadd.xlane.f32.xlu0 %v1299_v5  ;;  %v1361_v40 = vmul.f32 0.004166667, %v1343_v61  ;;  %v14599_v5 = vld [vmem:[#allocation2 + $0x2] ss:$8 sm:$0x3] }
 0x256   :  { %v1744_v15 = vsel %vm176_vm2, %v19548_v51, 0.0  ;;  %v14601_v61 = vld [vmem:[#allocation2 + $0x3] ss:$8 sm:$0x3] }
 0x257   :  { %v1366_v63 = vadd.f32 1e-05, %v1361_v40  ;;  %v1745_v17 = vadd.f32 %v1744_v15, %v19547_v25  ;;  %v2025_v15 = vrot.slane %v1993_v36, %v14597_v27  ;;  %v1859_v25 = vrot.slane %v1843_v47, %v14597_v27  ;;  %v14611_v51 = vld [vmem:[#allocation2 + $0x52] ss:$8 sm:$0x3] }
 0x258   :  { %v2442_v35 = vrot.slane %v14611_v51, %v14597_v27  ;;  %v1846_v46 = vld [vmem:[#allocation2 + $0xf0] ss:$8 sm:$0x3]  ;;  %v14665_v41 = vld [vmem:[#allocation2 + $0x1e1] ss:$8 sm:$0x3] }
 0x259   :  { %13635 = vrsqrt.f32 %v1366_v63  ;;  %1746 = vadd.xlane.f32.xlu0 %v1745_v17  ;;  %v1844_v63 = vld [vmem:[#allocation2 + $0x50] ss:$8 sm:$0x3] }
 0x25a   :  { %v1866_v56 = vrot.slane %v1844_v63, %v14595_v53 }
 0x263   :  { %v13636_v50 = vpop.eup %13635 }
 0x264   :  { %v1376_v45 = vmul.f32 %v13636_v50, %v14357_v55  ;;  %v1377_v2 = vmul.f32 %v13636_v50, %v14361_v13  ;;  %v1995_v55 = vld [vmem:[#allocation2 + $0xa1] ss:$8 sm:$0x3]  ;;  %v2021_v13 = vrot.slane %v1993_v36, %v14595_v53  ;;  %v14605_v50 = vld [vmem:[#allocation2 + $0xa2] ss:$8 sm:$0x3]  ;;  %v1870_v36 = vrot.slane %v1844_v63, %v14597_v27 }
 0x265   :  { %v2032_v47 = vrot.slane %v1995_v55, %v14595_v53  ;;  %v2036_v54 = vrot.slane %v1995_v55, %v14597_v27 }
 0x266   :  { %1387 = vst [vmem:[#allocation2 + $0x190] sm:$0xff] %v1376_v45  ;;  %1388 = vst.msk [vmem:[#allocation2 + $0x198] sm:$0xff] %vm176_vm2, %v1377_v2  ;;  %v2010_v45 = vrot.slane %v1991_v60, %v14595_v53  ;;  %v2014_v2 = vrot.slane %v1991_v60, %v14597_v27  ;;  %v2716_v60 = vrot.slane %v14601_v61, %v14597_v27 }
 0x268   :  { %v2095_v23 = vsel %vm193_vm3, %v2014_v2, %v2025_v15  ;;  %v2453_v15 = vrot.slane %v14605_v50, %v14597_v27 }
 0x269   :  { %v2097_v63 = vsel %vm1941_vm4, %v2095_v23, %v2036_v54  ;;  %v1939_v54 = vsel %vm193_vm3, %v1855_v0, %v1866_v56 }
 0x26c   :  { %v1789_v40 = vpop.xlane.xlu0 %1788 }
 0x26d   :  { %v1807_v17 = vmul.f32 0.004166667, %v1789_v40  ;;  %v2431_v40 = vrot.slane %v14599_v5, %v14597_v27  ;;  %v14708_v7 = vld [vmem:[#allocation2 + $0x192] ss:$8 sm:$0x3] }
 0x26f   :  { %v1812_v33 = vadd.f32 1e-05, %v1807_v17  ;;  %v2094_v17 = vsel %vm193_vm3, %v2010_v45, %v2021_v13  ;;  %v1997_v13 = vld [vmem:[#allocation2 + $0xf1] ss:$8 sm:$0x3]  ;;  %v1940_v45 = vsel %vm193_vm3, %v1859_v25, %v1870_v36  ;;  %v2512_v36 = vsel %vm193_vm3, %v2431_v40, %v2442_v35 }
 0x270   :  { %v2096_v2 = vsel %vm1941_vm4, %v2094_v17, %v2032_v47  ;;  %v14662_v47 = vld [vmem:[#allocation2 + $0x143] ss:$8 sm:$0x3]  ;;  %v2797_v17 = vsel %vm193_vm3, %v2716_v60, %v2727_v12  ;;  %v2043_v1 = vrot.slane %v1997_v13, %v14595_v53  ;;  %v2047_v55 = vrot.slane %v1997_v13, %v14597_v27  ;;  %v14677_v60 = vld [vmem:[#allocation2 + $0xf2] ss:$8 sm:$0x3] }
 0x271   :  { %13637 = vrsqrt.f32 %v1812_v33  ;;  %v2738_v33 = vrot.slane %v14618_v30, %v14597_v27  ;;  %v1943_v56 = vsel %vm1941_vm4, %v1940_v45, %v1881_v10  ;;  %v1892_v12 = vrot.slane %v1846_v46, %v14597_v27 }
 0x272   :  { %v1942_v40 = vsel %vm1941_vm4, %v1939_v54, %v1877_v11  ;;  %v2514_v13 = vsel %vm1941_vm4, %v2512_v36, %v2453_v15  ;;  %v2760_v10 = vrot.slane %v14662_v47, %v14597_v27  ;;  %v14694_v54 = vld [vmem:[#allocation2 + $0xf3] ss:$8 sm:$0x3]  ;;  %v1848_v11 = vld [vmem:[#allocation2 + $0x190] ss:$8 sm:$0x3] }
 0x273   :  { %v2799_v45 = vsel %vm1941_vm4, %v2797_v17, %v2738_v33  ;;  %v2001_v33 = vld [vmem:[#allocation2 + $0x191] ss:$8 sm:$0x3]  ;;  %v2098_v17 = vsel %vm1944_vm5, %v2096_v2, %v2043_v1  ;;  %v1946_v44 = vsel %vm1944_vm5, %v1943_v56, %v1892_v12  ;;  %v2464_v1 = vrot.slane %v14677_v60, %v14597_v27  ;;  %v14724_v56 = vld [vmem:[#allocation2 + $0x193] ss:$8 sm:$0x3] }
 0x274   :  { %v308_v48 = vpop.permute.xlu0 %307  ;;  %v1910_v12 = vrot.slane %v1848_v11, %v14595_v53 }
 0x275   :  { %v14656_v23 = vadd.f32 %v14138_v29, %v308_v48  ;;  %v14659_v25 = vadd.f32 %v14142_v32, %v308_v48  ;;  %v1888_v48 = vrot.slane %v1846_v46, %v14595_v53 }
 0x277   :  { %v19557_v35 = vmax.f32 %v14659_v25, 0.0  ;;  %v19649_v15 = vmax.f32 %v14656_v23, 0.0  ;;  %v1945_v43 = vsel %vm1944_vm5, %v1942_v40, %v1888_v48 }
 0x278   :  { %v977_v0 = vpop.permute.xlu0 %976 }
 0x279   :  { %v14684_v29 = vadd.f32 %v14146_v34, %v977_v0  ;;  %v14687_v32 = vadd.f32 %v14150_v37, %v977_v0  ;;  %v406_v46 = vsel %vm176_vm2, %v19557_v35, 0.0  ;;  %v2080_v34 = vrot.slane %v14665_v41, %v14597_v27 }
 0x27a   :  { %v407_v36 = vadd.f32 %v406_v46, %v19649_v15  ;;  %v2099_v37 = vsel %vm1944_vm5, %v2097_v63, %v2047_v55  ;;  %v2749_v55 = vrot.slane %v14694_v54, %v14597_v27 }
 0x27b   :  { %v13638_v0 = vpop.eup %13637  ;;  %v19559_v35 = vmax.f32 %v14684_v29, 0.0  ;;  %v19558_v20 = vmax.f32 %v14687_v32, 0.0 }
 0x27c   :  { %v1822_v46 = vmul.f32 %v13638_v0, %v14397_v57  ;;  %v1823_v15 = vmul.f32 %v13638_v0, %v14401_v49  ;;  %408 = vadd.xlane.f32.xlu1 %v407_v36  ;;  %v1423_v39 = vpop.permute.xlu0 %1422  ;;  %v2069_v49 = vrot.slane %v2001_v33, %v14597_v27  ;;  %v19650_v36 = vrot.slane %v14622_v42, %v14597_v27 }
 0x27d   :  { %v14715_v63 = vadd.f32 %v14200_v14, %v1423_v39  ;;  %v14718_v2 = vadd.f32 %v14204_v22, %v1423_v39  ;;  %v1075_v57 = vsel %vm176_vm2, %v19558_v20, 0.0  ;;  %v2065_v14 = vrot.slane %v2001_v33, %v14595_v53  ;;  %v1849_v33 = vld [vmem:[#allocation2 + $0x1e0] ss:$8 sm:$0x3] }
 0x27e   :  { %1833 = vst [vmem:[#allocation2 + $0x230] sm:$0xff] %v1822_v46  ;;  %1834 = vst.msk [vmem:[#allocation2 + $0x238] sm:$0xff] %vm176_vm2, %v1823_v15  ;;  %v1076_v48 = vadd.f32 %v1075_v57, %v19559_v35  ;;  %v1914_v39 = vrot.slane %v1848_v11, %v14597_v27  ;;  %v2101_v0 = vsel %vm1947_vm6, %v2099_v37, %v19650_v36  ;;  %v14742_v57 = vld [vmem:[#allocation2 + $0x1e2] ss:$8 sm:$0x3] }
 0x27f   :  { %v19560_v40 = vmax.f32 %v14718_v2, 0.0  ;;  %v19651_v46 = vrot.slane %v14622_v42, %v14595_v53  ;;  %v2486_v11 = vrot.slane %v14708_v7, %v14597_v27  ;;  %v2516_v20 = vsel %vm1944_vm5, %v2514_v13, %v2464_v1  ;;  %v14762_v1 = vld [vmem:[#allocation2 + $0x1e3] ss:$8 sm:$0x3] }
 0x280   :  { %1077 = vadd.xlane.f32.xlu1 %v1076_v48  ;;  %v2771_v35 = vrot.slane %v14724_v56, %v14597_v27  ;;  %v2801_v22 = vsel %vm1944_vm5, %v2799_v45, %v2749_v55  ;;  %v2103_v37 = vsel %vm1950_vm7, %v2101_v0, %v2069_v49  ;;  %v19653_v36 = vrot.slane %v14629_v18, %v14595_v53 }
 0x281   :  { %v2100_v15 = vsel %vm1947_vm6, %v2098_v17, %v19651_v46  ;;  %v1521_v42 = vsel %vm176_vm2, %v19560_v40, 0.0  ;;  %v19652_v17 = vrot.slane %v14629_v18, %v14597_v27  ;;  %v19654_v45 = vmax.f32 %v14715_v63, 0.0 }
 0x282   :  { %v1948_v13 = vsel %vm1947_vm6, %v1945_v43, %v19653_v36  ;;  %v2102_v40 = vsel %vm1950_vm7, %v2100_v15, %v2065_v14  ;;  %v1921_v0 = vrot.slane %v1849_v33, %v14595_v53  ;;  %v19655_v18 = vrot.slane %v14646_v8, %v14597_v27 }
 0x283   :  { %v1949_v48 = vsel %vm1947_vm6, %v1946_v44, %v19652_v17  ;;  %v1522_v55 = vadd.f32 %v1521_v42, %v19654_v45  ;;  %v1951_v49 = vsel %vm1950_vm7, %v1948_v13, %v1910_v12  ;;  %v1925_v44 = vrot.slane %v1849_v33, %v14597_v27 }
 0x284   :  { %v1952_v46 = vsel %vm1950_vm7, %v1949_v48, %v1914_v39  ;;  %v2518_v43 = vsel %vm1947_vm6, %v2516_v20, %v19655_v18  ;;  %v2803_v17 = vsel %vm1947_vm6, %v2801_v22, %v2760_v10  ;;  %v2497_v42 = vrot.slane %v14742_v57, %v14597_v27 }
 0x285   :  { %1523 = vadd.xlane.f32.xlu1 %v1522_v55  ;;  %v2520_v39 = vsel %vm1950_vm7, %v2518_v43, %v2486_v11  ;;  %v2782_v14 = vrot.slane %v14762_v1, %v14597_v27  ;;  %v2805_v12 = vsel %vm1950_vm7, %v2803_v17, %v2771_v35  ;;  %v2005_v15 = vld [vmem:[#allocation2 + $0x231] ss:$8 sm:$0x3]  ;;  %v2105_v33 = vsel %vm1953_vm8, %v2103_v37, %v2080_v34  ;;  %v1850_v48 = vld [vmem:[#allocation2 + $0x230] ss:$8 sm:$0x3] }
 0x286   :  { %v1955_v36 = vsel %vm1953_vm8, %v1952_v46, %v1925_v44  ;;  %v19656_v20 = vrot.slane %v14665_v41, %v14595_v53  ;;  %v1954_v22 = vsel %vm1953_vm8, %v1951_v49, %v1921_v0  ;;  %v2087_v11 = vrot.slane %v2005_v15, %v14595_v53  ;;  %v14793_v55 = vld [vmem:[#allocation2 + $0x232] ss:$8 sm:$0x3]  ;;  %v14795_v34 = vld [vmem:[#allocation2 + $0x233] ss:$8 sm:$0x3] }
 0x287   :  { %v2091_v13 = vrot.slane %v2005_v15, %v14597_v27  ;;  %v1932_v45 = vrot.slane %v1850_v48, %v14595_v53  ;;  %v1936_v35 = vrot.slane %v1850_v48, %v14597_v27  ;;  %v2508_v37 = vrot.slane %v14793_v55, %v14597_v27 }
 0x288   :  { %v2104_v10 = vsel %vm1953_vm8, %v2102_v40, %v19656_v20  ;;  %v2522_v41 = vsel %vm1953_vm8, %v2520_v39, %v2497_v42  ;;  %v2793_v40 = vrot.slane %v14795_v34, %v14597_v27  ;;  %v2807_v46 = vsel %vm1953_vm8, %v2805_v12, %v2782_v14  ;;  %v13158_v42 = vld [vmem:[%s19524_s3 + $0xf0] sm:$0xff]   ;;  %v13159_v39 = vld [vmem:[%s19524_s3 + $0x168] sm:$0xff]   ;;  %v13160_v20 = vld [vmem:[%s19524_s3 + $0xf8] sm:$0xff]  }
 0x289   :  { %v2107_v49 = vsel %vm98_vm0, %v2105_v33, %v2091_v13  ;;  %v1957_v0 = vsel %vm98_vm0, %v1955_v36, %v1936_v35  ;;  %v2106_v44 = vsel %vm98_vm0, %v2104_v10, %v2087_v11  ;;  %v1956_v18 = vsel %vm98_vm0, %v1954_v22, %v1932_v45  ;;  %v13161_v10 = vld [vmem:[%s19524_s3 + $0x170] sm:$0xff]   ;;  %v13162_v22 = vld [vmem:[%s19524_s3 + $0x100] sm:$0xff]   ;;  %v13163_v11 = vld [vmem:[%s19524_s3 + $0x178] sm:$0xff]  }
 0x28a   :  { %v2109_v43 = vpack.c.bf16 %v2107_v49, %v2107_v49  ;;  %v1959_v17 = vpack.c.bf16 %v1957_v0, %v1957_v0  ;;  %v2108_v15 = vpack.c.bf16 %v2106_v44, %v2106_v44  ;;  %v1958_v48 = vpack.c.bf16 %v1956_v18, %v1956_v18  ;;  %v13164_v13 = vld [vmem:[%s19524_s3 + $0x108] sm:$0xff]   ;;  %v13165_v45 = vld [vmem:[%s19524_s3 + $0x180] sm:$0xff]   ;;  %v13166_v35 = vld [vmem:[%s19524_s3 + $0x110] sm:$0xff]  }
 0x28b   :  { %v2524_v14 = vsel %vm98_vm0, %v2522_v41, %v2508_v37  ;;  %v2809_v12 = vsel %vm98_vm0, %v2807_v46, %v2793_v40  ;;  %v13167_v37 = vld [vmem:[%s19524_s3 + $0x188] sm:$0xff]   ;;  %v13168_v41 = vld [vmem:[%s19524_s3 + $0x118] sm:$0xff]   ;;  %v13169_v40 = vld [vmem:[%s19524_s3 + $0x190] sm:$0xff]  }
 0x28c   :  { %11675 = vmatprep.mubr.msk.bf16.mxu0 %vm176_vm2, %v2109_v43  ;;  %11691 = vmatprep.mubr.msk.bf16.mxu1 %vm176_vm2, %v1959_v17  ;;  %v2526_v33 = vpack.c.bf16 %v2524_v14, %v2524_v14  ;;  %v2811_v36 = vpack.c.bf16 %v2809_v12, %v2809_v12  ;;  %v13170_v46 = vld [vmem:[%s19524_s3 + $0x120] sm:$0xff]   ;;  %v13171_v49 = vld [vmem:[%s19524_s3 + $0x198] sm:$0xff]   ;;  %v13172_v0 = vld [vmem:[%s19524_s3 + $0x128] sm:$0xff]   ;;  %v2438_v12 = vrot.slane %v14611_v51, %v14595_v53 }
 0x28d   :  { %2267 = vmatmul.mubr.bf16.vlgmr.msra.gmra.mrb[36].mxu0 %v2108_v15  ;;  %2400 = vmatmul.mubr.bf16.vlgmr.msra.gmra.mrb[60].mxu1 %v1958_v48  ;;  %v13173_v44 = vld [vmem:[%s19524_s3 + $0x1a0] sm:$0xff]   ;;  %v13174_v18 = vld [vmem:[%s19524_s3 + $0x130] sm:$0xff]   ;;  %v13175_v43 = vld [vmem:[%s19524_s3 + $0x1a8] sm:$0xff]  }
 0x28e   :  { %2652 = vmatpush1.bf16.msra.mxu0 %v13158_v42  ;;  %2937 = vmatpush1.bf16.msra.mxu1 %v13159_v39  ;;  %v13176_v17 = vld [vmem:[%s19524_s3 + $0x138] sm:$0xff]   ;;  %v13177_v15 = vld [vmem:[%s19524_s3 + $0x1b0] sm:$0xff]   ;;  %v13178_v42 = vld [vmem:[%s19524_s3 + $0x140] sm:$0xff]  }
 0x28f   :  { %11737 = vmatprep.mubr.msk.bf16.mxu0 %vm176_vm2, %v2526_v33  ;;  %11783 = vmatprep.mubr.msk.bf16.mxu1 %vm176_vm2, %v2811_v36  ;;  %v14891_v48 = vld [vmem:[#allocation2 + $0x54] ss:$8 sm:$0x3]  ;;  %v14899_v14 = vld [vmem:[#allocation2 + $0x4] ss:$8 sm:$0x3] }
 0x290   :  { %2653 = vmatprep.subr.bf16.mxu0 %v19646_v31  ;;  %2938 = vmatprep.subr.bf16.mxu1 %v19646_v31  ;;  %v13179_v39 = vld [vmem:[%s19524_s3 + $0x1b8] sm:$0xff]   ;;  %v14905_v33 = vld [vmem:[#allocation2 + $0x5] ss:$8 sm:$0x3]  ;;  %v3001_v51 = vrot.slane %v14899_v14, %v14597_v27 }
 0x291   :  { %v14907_v36 = vld [vmem:[#allocation2 + $0x55] ss:$8 sm:$0x3] }
 0x292   :  { %2654 = vmatpush1.bf16.msra.mxu0 %v13160_v20  ;;  %2939 = vmatpush1.bf16.msra.mxu1 %v13161_v10  ;;  %v2723_v20 = vrot.slane %v14613_v62, %v14595_v53  ;;  %v3012_v10 = vrot.slane %v14891_v48, %v14597_v27  ;;  %v13180_v62 = vld [vmem:[%s19524_s3 + $0x148] sm:$0xff]  }
 0x293   :  { %2655 = vmatprep.subr.bf16.mxu0 %v19646_v31  ;;  %2940 = vmatprep.subr.bf16.mxu1 %v19646_v31 }
 0x296   :  { %2656 = vmatpush1.bf16.msra.mxu0 %v13162_v22  ;;  %2941 = vmatpush1.bf16.msra.mxu1 %v13163_v11  ;;  %v2427_v22 = vrot.slane %v14599_v5, %v14595_v53  ;;  %v2712_v11 = vrot.slane %v14601_v61, %v14595_v53  ;;  %v13181_v5 = vld [vmem:[%s19524_s3 + $0x1c0] sm:$0xff]   ;;  %v2449_v61 = vrot.slane %v14605_v50, %v14595_v53 }
 0x297   :  { %2657 = vmatprep.subr.bf16.mxu0 %v19646_v31  ;;  %2942 = vmatprep.subr.bf16.mxu1 %v19646_v31  ;;  %v2734_v50 = vrot.slane %v14618_v30, %v14595_v53  ;;  %v13183_v30 = vld [vmem:[%s19524_s3 + $0x1c8] sm:$0xff]  }
 0x29a   :  { %2658 = vmatpush1.bf16.msra.mxu0 %v13164_v13  ;;  %2943 = vmatpush1.bf16.msra.mxu1 %v13165_v45  ;;  %v14917_v13 = vld [vmem:[#allocation2 + $0xa4] ss:$8 sm:$0x3]  ;;  %v14919_v45 = vld [vmem:[#allocation2 + $0xf4] ss:$8 sm:$0x3] }
 0x29b   :  { %2659 = vmatprep.subr.bf16.mxu0 %v19646_v31  ;;  %2944 = vmatprep.subr.bf16.mxu1 %v19646_v31 }
 0x29e   :  { %2660 = vmatpush1.bf16.msra.mxu0 %v13166_v35  ;;  %2945 = vmatpush1.bf16.msra.mxu1 %v13167_v37  ;;  %v14931_v35 = vld [vmem:[#allocation2 + $0xa5] ss:$8 sm:$0x3]  ;;  %v3286_v37 = vrot.slane %v14905_v33, %v14597_v27 }
 0x29f   :  { %2661 = vmatprep.subr.bf16.mxu0 %v19646_v31  ;;  %2946 = vmatprep.subr.bf16.mxu1 %v19646_v31 }
 0x2a2   :  { %2662 = vmatpush1.bf16.msra.mxu0 %v13168_v41  ;;  %2947 = vmatpush1.bf16.msra.mxu1 %v13169_v40  ;;  %v3297_v41 = vrot.slane %v14907_v36, %v14597_v27  ;;  %v2460_v40 = vrot.slane %v14677_v60, %v14595_v53  ;;  %v13182_v60 = vld [vmem:[%s19524_s3 + $0x150] sm:$0xff]  }
 0x2a3   :  { %2663 = vmatprep.subr.bf16.mxu0 %v19646_v31  ;;  %2948 = vmatprep.subr.bf16.mxu1 %v19646_v31 }
 0x2a6   :  { %2664 = vmatpush1.bf16.msra.mxu0 %v13170_v46  ;;  %2949 = vmatpush1.bf16.msra.mxu1 %v13171_v49  ;;  %v2511_v46 = vsel %vm193_vm3, %v2427_v22, %v2438_v12  ;;  %v14944_v49 = vld [vmem:[#allocation2 + $0xf5] ss:$8 sm:$0x3] }
 0x2a7   :  { %2665 = vmatprep.subr.bf16.mxu0 %v19646_v31  ;;  %2950 = vmatprep.subr.bf16.mxu1 %v19646_v31  ;;  %v2513_v12 = vsel %vm1941_vm4, %v2511_v46, %v2449_v61  ;;  %v2767_v61 = vrot.slane %v14724_v56, %v14595_v53  ;;  %v13185_v56 = vld [vmem:[%s19524_s3 + $0x1d0] sm:$0xff]  }
 0x2a8   :  { %v2515_v22 = vsel %vm1944_vm5, %v2513_v12, %v2460_v40 }
 0x2aa   :  { %2666 = vmatpush1.bf16.msra.mxu0 %v13172_v0  ;;  %2951 = vmatpush1.bf16.msra.mxu1 %v13173_v44  ;;  %v2745_v0 = vrot.slane %v14694_v54, %v14595_v53  ;;  %v2796_v44 = vsel %vm193_vm3, %v2712_v11, %v2723_v20  ;;  %v2756_v54 = vrot.slane %v14662_v47, %v14595_v53  ;;  %v14969_v20 = vld [vmem:[#allocation2 + $0x194] ss:$8 sm:$0x3] }
 0x2ab   :  { %2667 = vmatprep.subr.bf16.mxu0 %v19646_v31  ;;  %2952 = vmatprep.subr.bf16.mxu1 %v19646_v31  ;;  %v3367_v47 = vsel %vm193_vm3, %v3286_v37, %v3297_v41  ;;  %v2798_v11 = vsel %vm1941_vm4, %v2796_v44, %v2734_v50  ;;  %v3056_v40 = vrot.slane %v14969_v20, %v14597_v27 }
 0x2ac   :  { %v2800_v37 = vsel %vm1944_vm5, %v2798_v11, %v2745_v0  ;;  %v2493_v0 = vrot.slane %v14742_v57, %v14595_v53  ;;  %v15016_v57 = vld [vmem:[#allocation2 + $0x235] ss:$8 sm:$0x3] }
 0x2ae   :  { %2668 = vmatpush1.bf16.msra.mxu0 %v13174_v18  ;;  %2953 = vmatpush1.bf16.msra.mxu1 %v13175_v43  ;;  %v3034_v18 = vrot.slane %v14919_v45, %v14597_v27  ;;  %v3082_v43 = vsel %vm193_vm3, %v3001_v51, %v3012_v10  ;;  %v14971_v10 = vld [vmem:[#allocation2 + $0x145] ss:$8 sm:$0x3] }
 0x2af   :  { %2669 = vmatprep.subr.bf16.mxu0 %v19646_v31  ;;  %2954 = vmatprep.subr.bf16.mxu1 %v19646_v31  ;;  %v3330_v50 = vrot.slane %v14971_v10, %v14597_v27 }
 0x2b2   :  { %2670 = vmatpush1.bf16.msra.mxu0 %v13176_v17  ;;  %2955 = vmatpush1.bf16.msra.mxu1 %v13177_v15  ;;  %v2471_v17 = vrot.slane %v14646_v8, %v14595_v53  ;;  %v14962_v15 = vld [vmem:[#allocation2 + $0x144] ss:$8 sm:$0x3]  ;;  %v3319_v8 = vrot.slane %v14944_v49, %v14597_v27 }
 0x2b3   :  { %2671 = vmatprep.subr.bf16.mxu0 %v19646_v31  ;;  %2956 = vmatprep.subr.bf16.mxu1 %v19646_v31  ;;  %v3045_v46 = vrot.slane %v14962_v15, %v14597_v27 }
 0x2b6   :  { %2672 = vmatpush1.bf16.msra.mxu0 %v13178_v42  ;;  %2957 = vmatpush1.bf16.msra.mxu1 %v13179_v39  ;;  %v3023_v42 = vrot.slane %v14917_v13, %v14597_v27  ;;  %v3308_v39 = vrot.slane %v14931_v35, %v14597_v27 }
 0x2b7   :  { %2673 = vmatprep.subr.bf16.mxu0 %v19646_v31  ;;  %2958 = vmatprep.subr.bf16.mxu1 %v19646_v31 }
 0x2b8   :  { %v3084_v51 = vsel %vm1941_vm4, %v3082_v43, %v3023_v42  ;;  %v3369_v44 = vsel %vm1941_vm4, %v3367_v47, %v3308_v39  ;;  %v15013_v39 = vld [vmem:[#allocation2 + $0x1e4] ss:$8 sm:$0x3]  ;;  %v2504_v47 = vrot.slane %v14793_v55, %v14595_v53 }
 0x2b9   :  { %v3086_v41 = vsel %vm1944_vm5, %v3084_v51, %v3034_v18  ;;  %v15004_v18 = vld [vmem:[#allocation2 + $0x234] ss:$8 sm:$0x3]  ;;  %v3371_v42 = vsel %vm1944_vm5, %v3369_v44, %v3319_v8  ;;  %v2789_v8 = vrot.slane %v14795_v34, %v14595_v53  ;;  %v15024_v44 = vld [vmem:[#allocation2 + $0x1e5] ss:$8 sm:$0x3] }
 0x2ba   :  { %2674 = vmatpush1.bf16.msra.mxu0 %v13180_v62  ;;  %2959 = vmatpush1.bf16.msra.mxu1 %v13181_v5  ;;  %v14981_v62 = vld [vmem:[#allocation2 + $0x195] ss:$8 sm:$0x3]  ;;  %v2482_v5 = vrot.slane %v14708_v7, %v14595_v53  ;;  %v3088_v12 = vsel %vm1947_vm6, %v3086_v41, %v3045_v46  ;;  %v13186_v55 = vld [vmem:[%s19524_s3 + $0x160] sm:$0xff]   ;;  %v15043_v41 = vpop.f32.mrb[28].mxu0  ;;  %v15045_v46 = vpop.f32.mrb[52].mxu1 }
 0x2bb   :  { %2675 = vmatprep.subr.bf16.mxu0 %v19646_v31  ;;  %2960 = vmatprep.subr.bf16.mxu1 %v19646_v31  ;;  %v13184_v7 = vld [vmem:[%s19524_s3 + $0x158] sm:$0xff]   ;;  %v3341_v43 = vrot.slane %v14981_v62, %v14597_v27  ;;  %19657 = vst [vmem:[#allocation38_spill] sm:$0xff] %v15043_v41  ;;  %19658 = vst [vmem:[#allocation39_spill] sm:$0xff] %v15045_v46  ;;  %v3326_v41 = vrot.slane %v14971_v10, %v14595_v53  ;;  %v15289_v10 = vld [vmem:[#allocation2 + $0x1e6] ss:$8 sm:$0x3] }
 0x2bc   :  { %v13187_v34 = vld [vmem:[%s19524_s3 + $0x1d8] sm:$0xff]  }
 0x2be   :  { %2676 = vmatpush1.bf16.msra.mxu0 %v13182_v60  ;;  %2961 = vmatpush1.bf16.msra.mxu1 %v13183_v30  ;;  %v2517_v60 = vsel %vm1947_vm6, %v2515_v22, %v2471_v17  ;;  %v2802_v30 = vsel %vm1947_vm6, %v2800_v37, %v2756_v54  ;;  %v2778_v17 = vrot.slane %v14762_v1, %v14595_v53 }
 0x2bf   :  { %2677 = vmatprep.subr.bf16.mxu0 %v19646_v31  ;;  %2962 = vmatprep.subr.bf16.mxu1 %v19646_v31  ;;  %v2519_v11 = vsel %vm1950_vm7, %v2517_v60, %v2482_v5  ;;  %v2804_v51 = vsel %vm1950_vm7, %v2802_v30, %v2767_v61  ;;  %v3078_v54 = vrot.slane %v15004_v18, %v14597_v27 }
 0x2c0   :  { %v3090_v22 = vsel %vm1950_vm7, %v3088_v12, %v3056_v40  ;;  %v3373_v37 = vsel %vm1947_vm6, %v3371_v42, %v3330_v50  ;;  %v3067_v1 = vrot.slane %v15013_v39, %v14597_v27  ;;  %v3363_v5 = vrot.slane %v15016_v57, %v14597_v27  ;;  %v15055_v42 = vpop.f32.mrb[53].mxu1 }
 0x2c1   :  { %v3375_v61 = vsel %vm1950_vm7, %v3373_v37, %v3341_v43  ;;  %v2521_v40 = vsel %vm1953_vm8, %v2519_v11, %v2493_v0  ;;  %v2806_v50 = vsel %vm1953_vm8, %v2804_v51, %v2778_v17  ;;  %19660 = vst [vmem:[#allocation41_spill] sm:$0xff] %v15055_v42  ;;  %v15062_v37 = vpop.f32.mrb[54].mxu1 }
 0x2c2   :  { %2678 = vmatpush1.bf16.msra.mxu0 %v13184_v7  ;;  %2963 = vmatpush1.bf16.msra.mxu1 %v13185_v56  ;;  %v3352_v7 = vrot.slane %v15024_v44, %v14597_v27  ;;  %v15053_v56 = vpop.f32.mrb[29].mxu0  ;;  %v2523_v43 = vsel %vm98_vm0, %v2521_v40, %v2504_v47  ;;  %v2808_v60 = vsel %vm98_vm0, %v2806_v50, %v2789_v8  ;;  %v15068_v17 = vpop.f32.mrb[55].mxu1  ;;  %v13188_v47 = vld [vmem:[%s19524_s3 + $0x1e0] sm:$0xff]  }
 0x2c3   :  { %2679 = vmatprep.subr.bf16.mxu0 %v19646_v31  ;;  %2964 = vmatprep.subr.bf16.mxu1 %v19646_v31  ;;  %19659 = vst [vmem:[#allocation40_spill] sm:$0xff] %v15053_v56  ;;  %v3092_v30 = vsel %vm1953_vm8, %v3090_v22, %v3067_v1  ;;  %v15060_v12 = vpop.f32.mrb[30].mxu0  ;;  %19662 = vst [vmem:[#allocation43_spill] sm:$0xff] %v15062_v37  ;;  %v15076_v1 = vpop.f32.mrb[56].mxu1  ;;  %v2525_v40 = vpack.c.bf16 %v2523_v43, %v2523_v43 }
 0x2c4   :  { %19661 = vst [vmem:[#allocation42_spill] sm:$0xff] %v15060_v12  ;;  %v3094_v0 = vsel %vm98_vm0, %v3092_v30, %v3078_v54  ;;  %v3377_v11 = vsel %vm1953_vm8, %v3375_v61, %v3352_v7  ;;  %v15066_v51 = vpop.f32.mrb[31].mxu0  ;;  %19664 = vst [vmem:[#allocation45_spill] sm:$0xff] %v15068_v17  ;;  %v2810_v54 = vpack.c.bf16 %v2808_v60, %v2808_v60  ;;  %v15085_v61 = vpop.f32.mrb[57].mxu1 }
 0x2c5   :  { %19663 = vst [vmem:[#allocation44_spill] sm:$0xff] %v15066_v51  ;;  %v3379_v8 = vsel %vm98_vm0, %v3377_v11, %v3363_v5  ;;  %v15074_v22 = vpop.f32.mrb[32].mxu0  ;;  %19666 = vst [vmem:[#allocation47_spill] sm:$0xff] %v15076_v1  ;;  %v3096_v50 = vpack.c.bf16 %v3094_v0, %v3094_v0  ;;  %v1727_v7 = vpop.f32.mrb[58].mxu1  ;;  %v13190_v11 = vld [vmem:[%s19524_s3 + $0x1e8] sm:$0xff]   ;;  %v13191_v0 = vld [vmem:[%s19524_s3 + $0x260] sm:$0xff]  }
 0x2c6   :  { %2680 = vmatpush1.bf16.msra.mxu0 %v13186_v55  ;;  %2965 = vmatpush1.bf16.msra.mxu1 %v13187_v34  ;;  %19665 = vst [vmem:[#allocation46_spill] sm:$0xff] %v15074_v22  ;;  %v13189_v55 = vld [vmem:[%s19524_s3 + $0x258] sm:$0xff]   ;;  %v15083_v34 = vpop.f32.mrb[33].mxu0  ;;  %19668 = vst [vmem:[#allocation49_spill] sm:$0xff] %v15085_v61  ;;  %v3381_v30 = vpack.c.bf16 %v3379_v8, %v3379_v8  ;;  %v1728_v60 = vpop.f32.mrb[59].mxu1  ;;  %v13193_v8 = vld [vmem:[%s19524_s3 + $0x268] sm:$0xff]   ;;  %v3304_v61 = vrot.slane %v14931_v35, %v14595_v53 }
 0x2c7   :  { %3221 = vmatprep.subr.bf16.mxu0 %v19646_v31  ;;  %3506 = vmatprep.subr.bf16.mxu1 %v19646_v31  ;;  %19667 = vst [vmem:[#allocation48_spill] sm:$0xff] %v15083_v34  ;;  %v1504_v5 = vpop.f32.mrb[34].mxu0  ;;  %v19670_v60 = vmax.f32 %v14525_v26, 0.0  ;;  %v15226_v34 = vld [vmem:[#allocation2 + $0xf6] ss:$8 sm:$0x3] }
 0x2c8   :  { %v1505_v43 = vpop.f32.mrb[35].mxu0  ;;  %v13197_v5 = vld [vmem:[%s19524_s3 + $0x278] sm:$0xff]   ;;  %v15243_v12 = vld [vmem:[#allocation2 + $0x146] ss:$8 sm:$0x3] }
 0x2c9   :  { %2684 = vmatmul.mubr.bf16.vlgmr.msra.gmra.mrb[40].mxu0 %v2525_v40  ;;  %2969 = vmatmul.mubr.bf16.vlgmr.msra.gmra.mrb[64].mxu1 %v2810_v54  ;;  %v13194_v40 = vld [vmem:[%s19524_s3 + $0x1f8] sm:$0xff]   ;;  %v13195_v54 = vld [vmem:[%s19524_s3 + $0x270] sm:$0xff]   ;;  %v13212_v35 = vld [vmem:[%s19524_s3 + $0x240] sm:$0xff]  }
 0x2ca   :  { %3222 = vmatpush1.bf16.msra.mxu0 %v13188_v47  ;;  %11829 = vmatprep.mubr.msk.bf16.mxu0 %vm176_vm2, %v3096_v50  ;;  %v13192_v47 = vld [vmem:[%s19524_s3 + $0x1f0] sm:$0xff]  }
 0x2cb   :  { %3507 = vmatpush1.bf16.msra.mxu1 %v13189_v55  ;;  %11875 = vmatprep.mubr.msk.bf16.mxu1 %vm176_vm2, %v3381_v30  ;;  %v13196_v55 = vld [vmem:[%s19524_s3 + $0x200] sm:$0xff]   ;;  %v19669_v30 = vmax.f32 %v14522_v52, 0.0  ;;  %v15238_v1 = vld [vmem:[#allocation2 + $0xf7] ss:$8 sm:$0x3] }
 0x2cc   :  { %3223 = vmatprep.subr.bf16.mxu0 %v19646_v31  ;;  %3508 = vmatprep.subr.bf16.mxu1 %v19646_v31  ;;  %v3889_v56 = vrot.slane %v15238_v1, %v14597_v27 }
 0x2ce   :  { %3224 = vmatpush1.bf16.msra.mxu0 %v13190_v11 }
 0x2cf   :  { %3509 = vmatpush1.bf16.msra.mxu1 %v13191_v0  ;;  %3225 = vmatprep.subr.bf16.mxu0 %v19646_v31  ;;  %v13198_v0 = vld [vmem:[%s19524_s3 + $0x208] sm:$0xff]  }
 0x2d0   :  { %3510 = vmatprep.subr.bf16.mxu1 %v19646_v31 }
 0x2d2   :  { %3226 = vmatpush1.bf16.msra.mxu0 %v13192_v47 }
 0x2d3   :  { %3511 = vmatpush1.bf16.msra.mxu1 %v13193_v8  ;;  %3227 = vmatprep.subr.bf16.mxu0 %v19646_v31  ;;  %v13199_v8 = vld [vmem:[%s19524_s3 + $0x280] sm:$0xff]  }
 0x2d4   :  { %3512 = vmatprep.subr.bf16.mxu1 %v19646_v31 }
 0x2d6   :  { %3228 = vmatpush1.bf16.msra.mxu0 %v13194_v40  ;;  %v184_v50 = vpop.xlane.xlu0 %183 }
 0x2d7   :  { %3513 = vmatpush1.bf16.msra.mxu1 %v13195_v54  ;;  %3229 = vmatprep.subr.bf16.mxu0 %v19646_v31  ;;  %v202_v7 = vmul.f32 0.004166667, %v184_v50  ;;  %v19671_v54 = vmax.f32 %v14530_v59, 0.0  ;;  %v19672_v50 = vmax.f32 %v14533_v16, 0.0  ;;  %v13201_v59 = vld [vmem:[%s19524_s3 + $0x288] sm:$0xff]  }
 0x2d8   :  { %3514 = vmatprep.subr.bf16.mxu1 %v19646_v31 }
 0x2d9   :  { %v15123_v43 = vsub.f32 %v19669_v30, %v202_v7  ;;  %v15127_v11 = vsub.f32 %v19670_v60, %v202_v7  ;;  %v13200_v30 = vld [vmem:[%s19524_s3 + $0x210] sm:$0xff]  }
 0x2da   :  { %3230 = vmatpush1.bf16.msra.mxu0 %v13196_v55  ;;  %v632_v47 = vpop.xlane.xlu0 %631 }
 0x2db   :  { %3515 = vmatpush1.bf16.msra.mxu1 %v13197_v5  ;;  %3231 = vmatprep.subr.bf16.mxu0 %v19646_v31  ;;  %v647_v52 = vmul.f32 0.004166667, %v632_v47  ;;  %v218_v26 = vmul.f32 %v15123_v43, %v15123_v43  ;;  %v219_v40 = vmul.f32 %v15127_v11, %v15127_v11 }
 0x2dc   :  { %3516 = vmatprep.subr.bf16.mxu1 %v19646_v31 }
 0x2dd   :  { %v15143_v55 = vsub.f32 %v19671_v54, %v647_v52  ;;  %v15147_v5 = vsub.f32 %v19672_v50, %v647_v52  ;;  %v230_v7 = vsel %vm176_vm2, %v219_v40, 0.0  ;;  %v13204_v40 = vld [vmem:[%s19524_s3 + $0x220] sm:$0xff]   ;;  %v13205_v54 = vld [vmem:[%s19524_s3 + $0x298] sm:$0xff]   ;;  %v13206_v50 = vld [vmem:[%s19524_s3 + $0x228] sm:$0xff]  }
 0x2de   :  { %3232 = vmatpush1.bf16.msra.mxu0 %v13198_v0  ;;  %v231_v60 = vadd.f32 %v230_v7, %v218_v26  ;;  %v13203_v26 = vld [vmem:[%s19524_s3 + $0x290] sm:$0xff]   ;;  %v13207_v7 = vld [vmem:[%s19524_s3 + $0x2a0] sm:$0xff]  }
 0x2df   :  { %3517 = vmatpush1.bf16.msra.mxu1 %v13199_v8  ;;  %3233 = vmatprep.subr.bf16.mxu0 %v19646_v31  ;;  %v663_v16 = vmul.f32 %v15143_v55, %v15143_v55  ;;  %v664_v0 = vmul.f32 %v15147_v5, %v15147_v5  ;;  %v13202_v8 = vld [vmem:[%s19524_s3 + $0x218] sm:$0xff]  }
 0x2e0   :  { %3518 = vmatprep.subr.bf16.mxu1 %v19646_v31  ;;  %232 = vadd.xlane.f32.xlu1 %v231_v60  ;;  %v13209_v60 = vld [vmem:[%s19524_s3 + $0x2a8] sm:$0xff]  }
 0x2e1   :  { %v675_v47 = vsel %vm176_vm2, %v664_v0, 0.0  ;;  %v15199_v0 = vld [vmem:[#allocation2 + $0x6] ss:$8 sm:$0x3] }
 0x2e2   :  { %3234 = vmatpush1.bf16.msra.mxu0 %v13200_v30  ;;  %v676_v52 = vadd.f32 %v675_v47, %v663_v16  ;;  %v13208_v30 = vld [vmem:[%s19524_s3 + $0x230] sm:$0xff]   ;;  %v3008_v16 = vrot.slane %v14891_v48, %v14595_v53 }
 0x2e3   :  { %3519 = vmatpush1.bf16.msra.mxu1 %v13201_v59  ;;  %3235 = vmatprep.subr.bf16.mxu0 %v19646_v31  ;;  %v15194_v59 = vld [vmem:[#allocation2 + $0x56] ss:$8 sm:$0x3]  ;;  %v15201_v47 = vld [vmem:[#allocation2 + $0x57] ss:$8 sm:$0x3] }
 0x2e4   :  { %3520 = vmatprep.subr.bf16.mxu1 %v19646_v31  ;;  %677 = vadd.xlane.f32.xlu1 %v676_v52  ;;  %v15205_v52 = vld [vmem:[#allocation2 + $0xa6] ss:$8 sm:$0x3]  ;;  %v3582_v48 = vrot.slane %v15194_v59, %v14597_v27 }
 0x2e6   :  { %3236 = vmatpush1.bf16.msra.mxu0 %v13202_v8  ;;  %v3293_v8 = vrot.slane %v14907_v36, %v14595_v53  ;;  %v13211_v36 = vld [vmem:[%s19524_s3 + $0x2b0] sm:$0xff]  }
 0x2e7   :  { %3521 = vmatpush1.bf16.msra.mxu1 %v13203_v26  ;;  %3237 = vmatprep.subr.bf16.mxu0 %v19646_v31  ;;  %v15207_v26 = vld [vmem:[#allocation2 + $0x7] ss:$8 sm:$0x3] }
 0x2e8   :  { %3522 = vmatprep.subr.bf16.mxu1 %v19646_v31 }
 0x2ea   :  { %3238 = vmatpush1.bf16.msra.mxu0 %v13204_v40  ;;  %v13210_v40 = vld [vmem:[%s19524_s3 + $0x238] sm:$0xff]  }
 0x2eb   :  { %3523 = vmatpush1.bf16.msra.mxu1 %v13205_v54  ;;  %3239 = vmatprep.subr.bf16.mxu0 %v19646_v31  ;;  %v2997_v54 = vrot.slane %v14899_v14, %v14595_v53  ;;  %v3867_v14 = vrot.slane %v15201_v47, %v14597_v27 }
 0x2ec   :  { %3524 = vmatprep.subr.bf16.mxu1 %v19646_v31 }
 0x2ed   :  { %v3081_v22 = vsel %vm193_vm3, %v2997_v54, %v3008_v16  ;;  %v3856_v16 = vrot.slane %v15207_v26, %v14597_v27  ;;  %v3041_v54 = vrot.slane %v14962_v15, %v14595_v53  ;;  %v15266_v15 = vld [vmem:[#allocation2 + $0x196] ss:$8 sm:$0x3] }
 0x2ee   :  { %3240 = vmatpush1.bf16.msra.mxu0 %v13206_v50  ;;  %v15216_v50 = vld [vmem:[#allocation2 + $0xa7] ss:$8 sm:$0x3] }
 0x2ef   :  { %3525 = vmatpush1.bf16.msra.mxu1 %v13207_v7  ;;  %3241 = vmatprep.subr.bf16.mxu0 %v19646_v31  ;;  %v3019_v7 = vrot.slane %v14917_v13, %v14595_v53  ;;  %v3571_v13 = vrot.slane %v15199_v0, %v14597_v27  ;;  %v3878_v17 = vrot.slane %v15216_v50, %v14597_v27 }
 0x2f0   :  { %3526 = vmatprep.subr.bf16.mxu1 %v19646_v31 }
 0x2f1   :  { %v3083_v37 = vsel %vm1941_vm4, %v3081_v22, %v3019_v7  ;;  %v15278_v22 = vld [vmem:[#allocation2 + $0x197] ss:$8 sm:$0x3]  ;;  %v3337_v7 = vrot.slane %v14981_v62, %v14595_v53 }
 0x2f2   :  { %3242 = vmatpush1.bf16.msra.mxu0 %v13208_v30  ;;  %v3282_v30 = vrot.slane %v14905_v33, %v14595_v53  ;;  %v3315_v33 = vrot.slane %v14944_v49, %v14595_v53  ;;  %v3604_v49 = vrot.slane %v15226_v34, %v14597_v27 }
 0x2f3   :  { %3527 = vmatpush1.bf16.msra.mxu1 %v13209_v60  ;;  %3243 = vmatprep.subr.bf16.mxu0 %v19646_v31  ;;  %v3030_v60 = vrot.slane %v14919_v45, %v14595_v53  ;;  %v3593_v45 = vrot.slane %v15205_v52, %v14597_v27 }
 0x2f4   :  { %3528 = vmatprep.subr.bf16.mxu1 %v19646_v31  ;;  %v3366_v51 = vsel %vm193_vm3, %v3282_v30, %v3293_v8  ;;  %v3652_v8 = vsel %vm193_vm3, %v3571_v13, %v3582_v48  ;;  %v15257_v30 = vld [vmem:[#allocation2 + $0x147] ss:$8 sm:$0x3]  ;;  %v3937_v48 = vsel %vm193_vm3, %v3856_v16, %v3867_v14  ;;  %v3615_v14 = vrot.slane %v15243_v12, %v14597_v27 }
 0x2f5   :  { %v3085_v13 = vsel %vm1944_vm5, %v3083_v37, %v3030_v60  ;;  %v3368_v42 = vsel %vm1941_vm4, %v3366_v51, %v3304_v61  ;;  %v3654_v16 = vsel %vm1941_vm4, %v3652_v8, %v3593_v45  ;;  %v3626_v37 = vrot.slane %v15266_v15, %v14597_v27  ;;  %v13215_v61 = vld [vmem:[%s19524_s3 + $0x2c0] sm:$0xff]  }
 0x2f6   :  { %3244 = vmatpush1.bf16.msra.mxu0 %v13210_v40  ;;  %v13213_v40 = vld [vmem:[%s19524_s3 + $0x2b8] sm:$0xff]   ;;  %v3370_v46 = vsel %vm1944_vm5, %v3368_v42, %v3315_v33  ;;  %v3656_v51 = vsel %vm1944_vm5, %v3654_v16, %v3604_v49  ;;  %v3900_v62 = vrot.slane %v15257_v30, %v14597_v27  ;;  %v3939_v42 = vsel %vm1941_vm4, %v3937_v48, %v3878_v17 }
 0x2f7   :  { %3529 = vmatpush1.bf16.msra.mxu1 %v13211_v36  ;;  %3245 = vmatprep.subr.bf16.mxu0 %v19646_v31  ;;  %v3052_v36 = vrot.slane %v14969_v20, %v14595_v53  ;;  %v13214_v20 = vld [vmem:[%s19524_s3 + $0x248] sm:$0xff]   ;;  %v3087_v60 = vsel %vm1947_vm6, %v3085_v13, %v3041_v54  ;;  %v15302_v33 = vld [vmem:[#allocation2 + $0x236] ss:$8 sm:$0x3]  ;;  %v3911_v45 = vrot.slane %v15278_v22, %v14597_v27 }
 0x2f8   :  { %3530 = vmatprep.subr.bf16.mxu1 %v19646_v31  ;;  %v3063_v17 = vrot.slane %v15013_v39, %v14595_v53  ;;  %v3074_v49 = vrot.slane %v15004_v18, %v14595_v53  ;;  %v15314_v54 = vld [vmem:[#allocation2 + $0x237] ss:$8 sm:$0x3]  ;;  %v3348_v48 = vrot.slane %v15024_v44, %v14595_v53  ;;  %v3658_v16 = vsel %vm1947_vm6, %v3656_v51, %v3615_v14  ;;  %v15322_v39 = vld [vmem:[#allocation2 + $0x1e7] ss:$8 sm:$0x3] }
 0x2f9   :  { %v3089_v8 = vsel %vm1950_vm7, %v3087_v60, %v3052_v36  ;;  %v13216_v18 = vld [vmem:[%s19524_s3 + $0x250] sm:$0xff]   ;;  %v3648_v44 = vrot.slane %v15302_v33, %v14597_v27  ;;  %v13217_v36 = vld [vmem:[%s19524_s3 + $0x2c8] sm:$0xff]   ;;  %v3933_v14 = vrot.slane %v15314_v54, %v14597_v27 }
 0x2fa   :  { %3246 = vmatpush1.bf16.msra.mxu0 %v13212_v35  ;;  %v3941_v35 = vsel %vm1944_vm5, %v3939_v42, %v3889_v56  ;;  %v3359_v56 = vrot.slane %v15016_v57, %v14595_v53  ;;  %v855_v42 = vpop.xlane.xlu0 %854 }
 0x2fb   :  { %3531 = vmatpush1.bf16.msra.mxu1 %v13213_v40  ;;  %3247 = vmatprep.subr.bf16.mxu0 %v19646_v31  ;;  %v3372_v40 = vsel %vm1947_vm6, %v3370_v46, %v3326_v41  ;;  %v3637_v41 = vrot.slane %v15289_v10, %v14597_v27  ;;  %v3660_v46 = vsel %vm1950_vm7, %v3658_v16, %v3626_v37  ;;  %v13220_v16 = vld [vmem:[%s19524_s3 + $0x2d8] sm:$0xff]  }
 0x2fc   :  { %3532 = vmatprep.subr.bf16.mxu1 %v19646_v31  ;;  %v3374_v13 = vsel %vm1950_vm7, %v3372_v40, %v3337_v7  ;;  %v3943_v57 = vsel %vm1947_vm6, %v3941_v35, %v3900_v62  ;;  %v3091_v7 = vsel %vm1953_vm8, %v3089_v8, %v3063_v17  ;;  %v3922_v62 = vrot.slane %v15322_v39, %v14597_v27  ;;  %v13218_v35 = vld [vmem:[%s19524_s3 + $0x2d0] sm:$0xff]   ;;  %v13219_v8 = vld [vmem:[%s19524_s3 + $0x348] sm:$0xff]  }
 0x2fd   :  { %v3093_v37 = vsel %vm98_vm0, %v3091_v7, %v3074_v49  ;;  %v3376_v51 = vsel %vm1953_vm8, %v3374_v13, %v3348_v48  ;;  %v3662_v60 = vsel %vm1953_vm8, %v3660_v46, %v3637_v41 }
 0x2fe   :  { %3248 = vmatpush1.bf16.msra.mxu0 %v13214_v20  ;;  %v3945_v20 = vsel %vm1950_vm7, %v3943_v57, %v3911_v45  ;;  %v3664_v45 = vsel %vm98_vm0, %v3662_v60, %v3648_v44  ;;  %v3095_v49 = vpack.c.bf16 %v3093_v37, %v3093_v37  ;;  %v1301_v41 = vpop.xlane.xlu0 %1300  ;;  %v13221_v44 = vld [vmem:[%s19524_s3 + $0x350] sm:$0xff]   ;;  %v13222_v57 = vld [vmem:[%s19524_s3 + $0x2e0] sm:$0xff]   ;;  %v19676_v60 = vmax.f32 %v14543_v21, 0.0 }
 0x2ff   :  { %3533 = vmatpush1.bf16.msra.mxu1 %v13215_v61  ;;  %3249 = vmatprep.subr.bf16.mxu0 %v19646_v31  ;;  %v3378_v61 = vsel %vm98_vm0, %v3376_v51, %v3359_v56  ;;  %v3947_v17 = vsel %vm1953_vm8, %v3945_v20, %v3922_v62  ;;  %v3666_v56 = vpack.c.bf16 %v3664_v45, %v3664_v45  ;;  %v13223_v20 = vld [vmem:[%s19524_s3 + $0x358] sm:$0xff]   ;;  %v1316_v37 = vmul.f32 0.004166667, %v1301_v41 }
 0x300   :  { %3534 = vmatprep.subr.bf16.mxu1 %v19646_v31  ;;  %v3949_v40 = vsel %vm98_vm0, %v3947_v17, %v3933_v14  ;;  %v3380_v48 = vpack.c.bf16 %v3378_v61, %v3378_v61  ;;  %v19674_v62 = vmax.f32 %v14656_v23, 0.0  ;;  %v13224_v17 = vld [vmem:[%s19524_s3 + $0x2e8] sm:$0xff]   ;;  %v13225_v23 = vld [vmem:[%s19524_s3 + $0x360] sm:$0xff]  }
 0x301   :  { %v3951_v13 = vpack.c.bf16 %v3949_v40, %v3949_v40  ;;  %v19677_v40 = vmax.f32 %v14564_v24, 0.0 }
 0x302   :  { %3250 = vmatpush1.bf16.msra.mxu0 %v13216_v18  ;;  %v870_v18 = vmul.f32 0.004166667, %v855_v42  ;;  %v1747_v51 = vpop.xlane.xlu0 %1746 }
 0x303   :  { %3535 = vmatpush1.bf16.msra.mxu1 %v13217_v36  ;;  %3791 = vmatprep.subr.bf16.mxu0 %v19646_v31  ;;  %v19673_v36 = vmax.f32 %v14546_v58, 0.0  ;;  %v19675_v58 = vmax.f32 %v14659_v25, 0.0 }
 0x304   :  { %4076 = vmatprep.subr.bf16.mxu1 %v19646_v31 }
 0x305   :  { %3254 = vmatmul.mubr.bf16.vlgmr.msra.gmra.mrb[44].mxu0 %v3095_v49  ;;  %v15374_v7 = vsub.f32 %v19673_v36, %v870_v18 }
 0x306   :  { %3539 = vmatmul.mubr.bf16.vlgmr.msra.gmra.mrb[68].mxu1 %v3380_v48  ;;  %3792 = vmatpush1.bf16.msra.mxu0 %v13218_v35  ;;  %v15391_v35 = vsub.f32 %v19676_v60, %v870_v18  ;;  %v15408_v48 = vsub.f32 %v19677_v40, %v1316_v37  ;;  %v19679_v18 = vmax.f32 %v14687_v32, 0.0 }
 0x307   :  { %11921 = vmatprep.mubr.msk.bf16.mxu0 %vm176_vm2, %v3666_v56  ;;  %4077 = vmatpush1.bf16.msra.mxu1 %v13219_v8  ;;  %v887_v8 = vmul.f32 %v15374_v7, %v15374_v7  ;;  %v1762_v56 = vmul.f32 0.004166667, %v1747_v51 }
 0x308   :  { %11967 = vmatprep.mubr.msk.bf16.mxu1 %vm176_vm2, %v3951_v13  ;;  %3793 = vmatprep.subr.bf16.mxu0 %v19646_v31  ;;  %v19678_v13 = vmax.f32 %v14684_v29, 0.0  ;;  %v886_v29 = vmul.f32 %v15391_v35, %v15391_v35  ;;  %v1333_v60 = vmul.f32 %v15408_v48, %v15408_v48 }
 0x309   :  { %4078 = vmatprep.subr.bf16.mxu1 %v19646_v31  ;;  %v409_v46 = vpop.xlane.xlu1 %408  ;;  %v898_v51 = vsel %vm176_vm2, %v887_v8, 0.0  ;;  %v13228_v8 = vld [vmem:[%s19524_s3 + $0x2f8] sm:$0xff]  }
 0x30a   :  { %3794 = vmatpush1.bf16.msra.mxu0 %v13220_v16  ;;  %v424_v14 = vmul.f32 0.004166667, %v409_v46  ;;  %v19680_v46 = vmax.f32 %v14561_v28, 0.0  ;;  %v13227_v28 = vld [vmem:[%s19524_s3 + $0x368] sm:$0xff]  }
 0x30b   :  { %4079 = vmatpush1.bf16.msra.mxu1 %v13221_v44  ;;  %3795 = vmatprep.subr.bf16.mxu0 %v19646_v31 }
 0x30c   :  { %4080 = vmatprep.subr.bf16.mxu1 %v19646_v31  ;;  %v15383_v42 = vsub.f32 %v19674_v62, %v424_v14  ;;  %v15387_v61 = vsub.f32 %v19675_v58, %v424_v14  ;;  %v13226_v14 = vld [vmem:[%s19524_s3 + $0x2f0] sm:$0xff]   ;;  %v19681_v62 = vmax.f32 %v14578_v38, 0.0 }
 0x30d   :  { %v1078_v45 = vpop.xlane.xlu1 %1077 }
 0x30e   :  { %3796 = vmatpush1.bf16.msra.mxu0 %v13222_v57  ;;  %v1093_v49 = vmul.f32 0.004166667, %v1078_v45  ;;  %v440_v25 = vmul.f32 %v15383_v42, %v15383_v42  ;;  %v441_v21 = vmul.f32 %v15387_v61, %v15387_v61  ;;  %v15422_v57 = vsub.f32 %v19680_v46, %v1316_v37 }
 0x30f   :  { %4081 = vmatpush1.bf16.msra.mxu1 %v13223_v20  ;;  %3797 = vmatprep.subr.bf16.mxu0 %v19646_v31  ;;  %v15440_v58 = vsub.f32 %v19681_v62, %v1762_v56  ;;  %v19682_v45 = vmax.f32 %v14715_v63, 0.0  ;;  %v19684_v63 = vmax.f32 %v14575_v19, 0.0  ;;  %v1344_v19 = vsel %vm176_vm2, %v1333_v60, 0.0  ;;  %v13234_v62 = vld [vmem:[%s19524_s3 + $0x310] sm:$0xff]   ;;  %v13235_v60 = vld [vmem:[%s19524_s3 + $0x388] sm:$0xff]  }
 0x310   :  { %4082 = vmatprep.subr.bf16.mxu1 %v19646_v31  ;;  %v15413_v16 = vsub.f32 %v19678_v13, %v1093_v49  ;;  %v15417_v41 = vsub.f32 %v19679_v18, %v1093_v49  ;;  %v452_v44 = vsel %vm176_vm2, %v441_v21, 0.0  ;;  %v19683_v49 = vmax.f32 %v14718_v2, 0.0  ;;  %v13229_v2 = vld [vmem:[%s19524_s3 + $0x370] sm:$0xff]  }
 0x311   :  { %v453_v36 = vadd.f32 %v452_v44, %v440_v25  ;;  %v899_v21 = vadd.f32 %v898_v51, %v886_v29  ;;  %v1332_v40 = vmul.f32 %v15422_v57, %v15422_v57  ;;  %v15461_v13 = vsub.f32 %v19684_v63, %v1762_v56  ;;  %v13231_v29 = vld [vmem:[%s19524_s3 + $0x378] sm:$0xff]   ;;  %v13233_v51 = vld [vmem:[%s19524_s3 + $0x380] sm:$0xff]   ;;  %v13240_v63 = vld [vmem:[%s19524_s3 + $0x328] sm:$0xff]  }
 0x312   :  { %3798 = vmatpush1.bf16.msra.mxu0 %v13224_v17  ;;  %v1524_v24 = vpop.xlane.xlu1 %1523  ;;  %v1109_v20 = vmul.f32 %v15413_v16, %v15413_v16  ;;  %v1110_v37 = vmul.f32 %v15417_v41, %v15417_v41  ;;  %v1779_v56 = vmul.f32 %v15440_v58, %v15440_v58 }
 0x313   :  { %4083 = vmatpush1.bf16.msra.mxu1 %v13225_v23  ;;  %v1539_v32 = vmul.f32 0.004166667, %v1524_v24  ;;  %3799 = vmatprep.subr.bf16.mxu0 %v19646_v31 }
 0x314   :  { %4084 = vmatprep.subr.bf16.mxu1 %v19646_v31  ;;  %454 = vadd.xlane.f32.xlu0 %v453_v36  ;;  %v1121_v25 = vsel %vm176_vm2, %v1110_v37, 0.0  ;;  %v13230_v36 = vld [vmem:[%s19524_s3 + $0x300] sm:$0xff]  }
 0x315   :  { %v15447_v17 = vsub.f32 %v19682_v45, %v1539_v32  ;;  %v15451_v23 = vsub.f32 %v19683_v49, %v1539_v32  ;;  %v1122_v38 = vadd.f32 %v1121_v25, %v1109_v20  ;;  %v1778_v32 = vmul.f32 %v15461_v13, %v15461_v13  ;;  %v13232_v20 = vld [vmem:[%s19524_s3 + $0x308] sm:$0xff]   ;;  %v13236_v45 = vld [vmem:[%s19524_s3 + $0x318] sm:$0xff]   ;;  %v13237_v49 = vld [vmem:[%s19524_s3 + $0x390] sm:$0xff]  }
 0x316   :  { %3800 = vmatpush1.bf16.msra.mxu0 %v13226_v14  ;;  %v1345_v14 = vadd.f32 %v1344_v19, %v1332_v40  ;;  %v13238_v25 = vld [vmem:[%s19524_s3 + $0x320] sm:$0xff]   ;;  %v3863_v40 = vrot.slane %v15201_v47, %v14595_v53  ;;  %v3600_v47 = vrot.slane %v15226_v34, %v14595_v53  ;;  %v3885_v19 = vrot.slane %v15238_v1, %v14595_v53 }
 0x317   :  { %4085 = vmatpush1.bf16.msra.mxu1 %v13227_v28  ;;  %3801 = vmatprep.subr.bf16.mxu0 %v19646_v31  ;;  %v1555_v18 = vmul.f32 %v15447_v17, %v15447_v17  ;;  %v1556_v44 = vmul.f32 %v15451_v23, %v15451_v23  ;;  %v1790_v28 = vsel %vm176_vm2, %v1779_v56, 0.0  ;;  %v3874_v34 = vrot.slane %v15216_v50, %v14595_v53 }
 0x318   :  { %4086 = vmatprep.subr.bf16.mxu1 %v19646_v31  ;;  %1123 = vadd.xlane.f32.xlu1 %v1122_v38  ;;  %v1791_v37 = vadd.f32 %v1790_v28, %v1778_v32  ;;  %v15517_v38 = vld [vmem:[%s19523_s2 + $0x10] sm:$0xff]  ;;  %v3622_v1 = vrot.slane %v15266_v15, %v14595_v53  ;;  %v3611_v50 = vrot.slane %v15243_v12, %v14595_v53  ;;  %v13244_v32 = vld [vmem:[%s19524_s3 + $0x338] sm:$0xff]  }
 0x319   :  { %900 = vadd.xlane.f32.xlu0 %v899_v21  ;;  %v1567_v46 = vsel %vm176_vm2, %v1556_v44, 0.0  ;;  %v13239_v21 = vld [vmem:[%s19524_s3 + $0x398] sm:$0xff]   ;;  %v3896_v15 = vrot.slane %v15257_v30, %v14595_v53  ;;  %v13245_v12 = vld [vmem:[%s19524_s3 + $0x3b0] sm:$0xff]  }
 0x31a   :  { %3802 = vmatpush1.bf16.msra.mxu0 %v13228_v8  ;;  %v1568_v24 = vadd.f32 %v1567_v46, %v1555_v18  ;;  %v3578_v8 = vrot.slane %v15194_v59, %v14595_v53  ;;  %v13241_v59 = vld [vmem:[%s19524_s3 + $0x3a0] sm:$0xff]   ;;  %v3852_v18 = vrot.slane %v15207_v26, %v14595_v53  ;;  %v13242_v26 = vld [vmem:[%s19524_s3 + $0x330] sm:$0xff]  }
 0x31b   :  { %4087 = vmatpush1.bf16.msra.mxu1 %v13229_v2  ;;  %3803 = vmatprep.subr.bf16.mxu0 %v19646_v31  ;;  %v3567_v2 = vrot.slane %v15199_v0, %v14595_v53  ;;  %v3589_v0 = vrot.slane %v15205_v52, %v14595_v53  ;;  %v13243_v52 = vld [vmem:[%s19524_s3 + $0x3a8] sm:$0xff]  }
 0x31c   :  { %4088 = vmatprep.subr.bf16.mxu1 %v19646_v31  ;;  %1569 = vadd.xlane.f32.xlu1 %v1568_v24  ;;  %v3936_v56 = vsel %vm193_vm3, %v3852_v18, %v3863_v40  ;;  %v13254_v18 = vld [vmem:[%s19524_s3 + $0x3d8] sm:$0xff]  }
 0x31d   :  { %1346 = vadd.xlane.f32.xlu0 %v1345_v14  ;;  %v3651_v44 = vsel %vm193_vm3, %v3567_v2, %v3578_v8  ;;  %v3907_v14 = vrot.slane %v15278_v22, %v14595_v53  ;;  %v3644_v22 = vrot.slane %v15302_v33, %v14595_v53  ;;  %v3918_v33 = vrot.slane %v15322_v39, %v14595_v53  ;;  %v13249_v8 = vld [vmem:[%s19524_s3 + $0x438] sm:$0xff]   ;;  %v13252_v2 = vld [vmem:[%s19524_s3 + $0x3d0] sm:$0xff]  }
 0x31e   :  { %3804 = vmatpush1.bf16.msra.mxu0 %v13230_v36  ;;  %v3653_v46 = vsel %vm1941_vm4, %v3651_v44, %v3589_v0  ;;  %v3938_v36 = vsel %vm1941_vm4, %v3936_v56, %v3874_v34  ;;  %v13256_v44 = vld [vmem:[%s19524_s3 + $0x3e0] sm:$0xff]   ;;  %v13257_v0 = vld [vmem:[%s19524_s3 + $0x458] sm:$0xff]   ;;  %v13261_v34 = vld [vmem:[%s19524_s3 + $0x468] sm:$0xff]  }
 0x31f   :  { %4089 = vmatpush1.bf16.msra.mxu1 %v13231_v29  ;;  %3805 = vmatprep.subr.bf16.mxu0 %v19646_v31  ;;  %v3655_v24 = vsel %vm1944_vm5, %v3653_v46, %v3600_v47  ;;  %v3940_v29 = vsel %vm1944_vm5, %v3938_v36, %v3885_v19  ;;  %v13255_v47 = vld [vmem:[%s19524_s3 + $0x450] sm:$0xff]   ;;  %v13258_v19 = vld [vmem:[%s19524_s3 + $0x3e8] sm:$0xff]   ;;  %v13259_v56 = vld [vmem:[%s19524_s3 + $0x460] sm:$0xff]  }
 0x320   :  { %4090 = vmatprep.subr.bf16.mxu1 %v19646_v31  ;;  %v3657_v28 = vsel %vm1947_vm6, %v3655_v24, %v3611_v50  ;;  %v3942_v30 = vsel %vm1947_vm6, %v3940_v29, %v3896_v15  ;;  %v13263_v46 = vld [vmem:[%s19524_s3 + $0x470] sm:$0xff]   ;;  %v13265_v24 = vld [vmem:[%s19524_s3 + $0x478] sm:$0xff]  }
 0x321   :  { %1792 = vadd.xlane.f32.xlu0 %v1791_v37  ;;  %v3633_v37 = vrot.slane %v15289_v10, %v14595_v53  ;;  %v13247_v10 = vld [vmem:[%s19524_s3 + $0x3b8] sm:$0xff]  }
 0x322   :  { %3806 = vmatpush1.bf16.msra.mxu0 %v13232_v20  ;;  %v3659_v20 = vsel %vm1950_vm7, %v3657_v28, %v3622_v1  ;;  %v13264_v1 = vld [vmem:[%s19524_s3 + $0x400] sm:$0xff]   ;;  %v13266_v28 = vld [vmem:[%s19524_s3 + $0x408] sm:$0xff]  }
 0x323   :  { %4091 = vmatpush1.bf16.msra.mxu1 %v13233_v51  ;;  %3807 = vmatprep.subr.bf16.mxu0 %v19646_v31  ;;  %v3929_v51 = vrot.slane %v15314_v54, %v14595_v53 }
 0x324   :  { %4092 = vmatprep.subr.bf16.mxu1 %v19646_v31 }
 0x326   :  { %3808 = vmatpush1.bf16.msra.mxu0 %v13234_v62  ;;  %v3944_v62 = vsel %vm1950_vm7, %v3942_v30, %v3907_v14  ;;  %v13267_v30 = vld [vmem:[%s19524_s3 + $0x480] sm:$0xff]  }
 0x327   :  { %4093 = vmatpush1.bf16.msra.mxu1 %v13235_v60  ;;  %3809 = vmatprep.subr.bf16.mxu0 %v19646_v31  ;;  %v13246_v60 = vld [vmem:[%s19524_s3 + $0x340] sm:$0xff]  }
 0x328   :  { %4094 = vmatprep.subr.bf16.mxu1 %v19646_v31 }
 0x32a   :  { %3810 = vmatpush1.bf16.msra.mxu0 %v13236_v45  ;;  %v3661_v45 = vsel %vm1953_vm8, %v3659_v20, %v3633_v37  ;;  %v13268_v37 = vld [vmem:[%s19524_s3 + $0x410] sm:$0xff]  }
 0x32b   :  { %4095 = vmatpush1.bf16.msra.mxu1 %v13237_v49  ;;  %3811 = vmatprep.subr.bf16.mxu0 %v19646_v31  ;;  %v3663_v54 = vsel %vm98_vm0, %v3661_v45, %v3644_v22  ;;  %v3946_v49 = vsel %vm1953_vm8, %v3944_v62, %v3918_v33  ;;  %v13270_v62 = vld [vmem:[%s19524_s3 + $0x418] sm:$0xff]  }
 0x32c   :  { %4096 = vmatprep.subr.bf16.mxu1 %v19646_v31  ;;  %v3948_v39 = vsel %vm98_vm0, %v3946_v49, %v3929_v51  ;;  %v13269_v51 = vld [vmem:[%s19524_s3 + $0x488] sm:$0xff]  }
 0x32d   :  { %62 = vperm.xlu1 %13124, %v15517_v38   ;;  %v3950_v40 = vpack.c.bf16 %v3948_v39, %v3948_v39 }
 0x32e   :  { %3812 = vmatpush1.bf16.msra.mxu0 %v13238_v25  ;;  %v13248_v25 = vld [vmem:[%s19524_s3 + $0x3c0] sm:$0xff]  }
 0x32f   :  { %4097 = vmatpush1.bf16.msra.mxu1 %v13239_v21  ;;  %3813 = vmatprep.subr.bf16.mxu0 %v19646_v31  ;;  %v3665_v21 = vpack.c.bf16 %v3663_v54, %v3663_v54  ;;  %v13273_v54 = vld [vmem:[%s19524_s3 + $0x498] sm:$0xff]  }
 0x330   :  { %4098 = vmatprep.subr.bf16.mxu1 %v19646_v31 }
 0x331   :  { %535 = vperm.xlu1 %13124, %v15517_v38  }
 0x332   :  { %3814 = vmatpush1.bf16.msra.mxu0 %v13240_v63  ;;  %v13250_v63 = vld [vmem:[%s19524_s3 + $0x3c8] sm:$0xff]  }
 0x333   :  { %4099 = vmatpush1.bf16.msra.mxu1 %v13241_v59  ;;  %3815 = vmatprep.subr.bf16.mxu0 %v19646_v31  ;;  %v13253_v59 = vld [vmem:[%s19524_s3 + $0x448] sm:$0xff]  }
 0x334   :  { %4100 = vmatprep.subr.bf16.mxu1 %v19646_v31 }
 0x335   :  { %758 = vperm.xlu1 %13124, %v15517_v38  }
 0x336   :  { %3816 = vmatpush1.bf16.msra.mxu0 %v13242_v26  ;;  %v13260_v26 = vld [vmem:[%s19524_s3 + $0x3f0] sm:$0xff]  }
 0x337   :  { %4101 = vmatpush1.bf16.msra.mxu1 %v13243_v52  ;;  %312 = vperm.xlu0 %13123, %v15517_v38   ;;  %v13262_v52 = vld [vmem:[%s19524_s3 + $0x3f8] sm:$0xff]  }
 0x338   :  { %3817 = vmatprep.subr.bf16.mxu0 %v19646_v31  ;;  %4102 = vmatprep.subr.bf16.mxu1 %v19646_v31 }
 0x339   :  { %1204 = vperm.xlu1 %13124, %v15517_v38  }
 0x33a   :  { %3818 = vmatpush1.bf16.msra.mxu0 %v13244_v32 }
 0x33b   :  { %4103 = vmatpush1.bf16.msra.mxu1 %v13245_v12  ;;  %981 = vperm.xlu0 %13123, %v15517_v38  }
 0x33c   :  { %3819 = vmatprep.subr.bf16.mxu0 %v19646_v31  ;;  %4104 = vmatprep.subr.bf16.mxu1 %v19646_v31 }
 0x33d   :  { %1650 = vperm.xlu1 %13124, %v15517_v38  }
 0x33e   :  { %3820 = vmatpush1.bf16.msra.mxu0 %v13246_v60  ;;  %v13271_v60 = vld [vmem:[%s19524_s3 + $0x490] sm:$0xff]  }
 0x33f   :  { %4105 = vmatpush1.bf16.msra.mxu1 %v13247_v10  ;;  %1427 = vperm.xlu0 %13123, %v15517_v38   ;;  %v13251_v38 = vld [vmem:[%s19524_s3 + $0x440] sm:$0xff]  }
 0x340   :  { %4361 = vmatprep.subr.bf16.mxu0 %v19646_v31  ;;  %4646 = vmatprep.subr.bf16.mxu1 %v19646_v31  ;;  %v13272_v10 = vld [vmem:[%s19524_s3 + $0x420] sm:$0xff]  }
 0x341   :  { %3824 = vmatmul.mubr.bf16.vlgmr.msra.gmra.mrb[48].mxu0 %v3665_v21 }
 0x342   :  { %4109 = vmatmul.mubr.bf16.vlgmr.msra.gmra.mrb[72].mxu1 %v3950_v40  ;;  %4362 = vmatpush1.bf16.msra.mxu0 %v13248_v25  ;;  %v13274_v25 = vld [vmem:[%s19524_s3 + $0x428] sm:$0xff]  }
 0x343   :  { %4647 = vmatpush1.bf16.msra.mxu1 %v13249_v8  ;;  %4363 = vmatprep.subr.bf16.mxu0 %v19646_v31  ;;  %v13275_v8 = vld [vmem:[%s19524_s3 + $0x4a0] sm:$0xff]  }
 0x344   :  { %4648 = vmatprep.subr.bf16.mxu1 %v19646_v31 }
 0x346   :  { %4364 = vmatpush1.bf16.msra.mxu0 %v13250_v63  ;;  %v13276_v63 = vld [vmem:[%s19524_s3 + $0x430] sm:$0xff]  }
 0x347   :  { %4649 = vmatpush1.bf16.msra.mxu1 %v13251_v38  ;;  %4365 = vmatprep.subr.bf16.mxu0 %v19646_v31  ;;  %v13277_v38 = vld [vmem:[%s19524_s3 + $0x4a8] sm:$0xff]  }
 0x348   :  { %4650 = vmatprep.subr.bf16.mxu1 %v19646_v31 }
 0x34a   :  { %4366 = vmatpush1.bf16.msra.mxu0 %v13252_v2 }
 0x34b   :  { %4651 = vmatpush1.bf16.msra.mxu1 %v13253_v59  ;;  %4367 = vmatprep.subr.bf16.mxu0 %v19646_v31 }
 0x34c   :  { %4652 = vmatprep.subr.bf16.mxu1 %v19646_v31 }
 0x34e   :  { %4368 = vmatpush1.bf16.msra.mxu0 %v13254_v18 }
 0x34f   :  { %4653 = vmatpush1.bf16.msra.mxu1 %v13255_v47  ;;  %4369 = vmatprep.subr.bf16.mxu0 %v19646_v31 }
 0x350   :  { %4654 = vmatprep.subr.bf16.mxu1 %v19646_v31 }
 0x352   :  { %4370 = vmatpush1.bf16.msra.mxu0 %v13256_v44 }
 0x353   :  { %4655 = vmatpush1.bf16.msra.mxu1 %v13257_v0  ;;  %4371 = vmatprep.subr.bf16.mxu0 %v19646_v31 }
 0x354   :  { %4656 = vmatprep.subr.bf16.mxu1 %v19646_v31 }
 0x356   :  { %4372 = vmatpush1.bf16.msra.mxu0 %v13258_v19 }
 0x357   :  { %4657 = vmatpush1.bf16.msra.mxu1 %v13259_v56  ;;  %4373 = vmatprep.subr.bf16.mxu0 %v19646_v31 }
 0x358   :  { %4658 = vmatprep.subr.bf16.mxu1 %v19646_v31 }
 0x35a   :  { %4374 = vmatpush1.bf16.msra.mxu0 %v13260_v26 }
 0x35b   :  { %4659 = vmatpush1.bf16.msra.mxu1 %v13261_v34  ;;  %4375 = vmatprep.subr.bf16.mxu0 %v19646_v31 }
 0x35c   :  { %4660 = vmatprep.subr.bf16.mxu1 %v19646_v31 }
 0x35e   :  { %4376 = vmatpush1.bf16.msra.mxu0 %v13262_v52 }
 0x35f   :  { %4661 = vmatpush1.bf16.msra.mxu1 %v13263_v46  ;;  %4377 = vmatprep.subr.bf16.mxu0 %v19646_v31 }
 0x360   :  { %v2268_v36 = vpop.f32.mrb[36].mxu0  ;;  %v2401_v50 = vpop.f32.mrb[60].mxu1  ;;  %4662 = vmatprep.subr.bf16.mxu1 %v19646_v31 }
 0x361   :  { %v15682_v14 = vadd.f32 %v2401_v50, %v2268_v36  ;;  %v2270_v29 = vpop.f32.mrb[37].mxu0  ;;  %v2403_v32 = vpop.f32.mrb[61].mxu1 }
 0x362   :  { %v2271_v15 = vpop.f32.mrb[38].mxu0  ;;  %v2404_v12 = vpop.f32.mrb[62].mxu1  ;;  %4378 = vmatpush1.bf16.msra.mxu0 %v13264_v1 }
 0x363   :  { %v2272_v22 = vpop.f32.mrb[39].mxu0  ;;  %v2405_v20 = vpop.f32.mrb[63].mxu1  ;;  %4663 = vmatpush1.bf16.msra.mxu1 %v13265_v24  ;;  %4379 = vmatprep.subr.bf16.mxu0 %v19646_v31 }
 0x364   :  { %4664 = vmatprep.subr.bf16.mxu1 %v19646_v31 }
 0x366   :  { %4380 = vmatpush1.bf16.msra.mxu0 %v13266_v28 }
 0x367   :  { %4665 = vmatpush1.bf16.msra.mxu1 %v13267_v30  ;;  %4381 = vmatprep.subr.bf16.mxu0 %v19646_v31 }
 0x368   :  { %4666 = vmatprep.subr.bf16.mxu1 %v19646_v31 }
 0x36a   :  { %4382 = vmatpush1.bf16.msra.mxu0 %v13268_v37 }
 0x36b   :  { %4667 = vmatpush1.bf16.msra.mxu1 %v13269_v51  ;;  %4383 = vmatprep.subr.bf16.mxu0 %v19646_v31 }
 0x36c   :  { %4668 = vmatprep.subr.bf16.mxu1 %v19646_v31 }
 0x36d   :  { %v233_v33 = vpop.xlane.xlu1 %232 }
 0x36e   :  { %4384 = vmatpush1.bf16.msra.mxu0 %v13270_v62  ;;  %v248_v45 = vmul.f32 0.004166667, %v233_v33 }
 0x36f   :  { %4669 = vmatpush1.bf16.msra.mxu1 %v13271_v60  ;;  %4385 = vmatprep.subr.bf16.mxu0 %v19646_v31 }
 0x370   :  { %4670 = vmatprep.subr.bf16.mxu1 %v19646_v31  ;;  %v253_v49 = vadd.f32 1e-05, %v248_v45 }
 0x371   :  { %v678_v39 = vpop.xlane.xlu1 %677 }
 0x372   :  { %4386 = vmatpush1.bf16.msra.mxu0 %v13272_v10  ;;  %13639 = vrsqrt.f32 %v253_v49  ;;  %v693_v21 = vmul.f32 0.004166667, %v678_v39 }
 0x373   :  { %4671 = vmatpush1.bf16.msra.mxu1 %v13273_v54  ;;  %4387 = vmatprep.subr.bf16.mxu0 %v19646_v31 }
 0x374   :  { %4672 = vmatprep.subr.bf16.mxu1 %v19646_v31  ;;  %v698_v40 = vadd.f32 1e-05, %v693_v21 }
 0x376   :  { %4388 = vmatpush1.bf16.msra.mxu0 %v13274_v25  ;;  %13641 = vrsqrt.f32 %v698_v40 }
 0x377   :  { %4673 = vmatpush1.bf16.msra.mxu1 %v13275_v8  ;;  %4389 = vmatprep.subr.bf16.mxu0 %v19646_v31 }
 0x378   :  { %4674 = vmatprep.subr.bf16.mxu1 %v19646_v31 }
 0x37a   :  { %4390 = vmatpush1.bf16.msra.mxu0 %v13276_v63 }
 0x37b   :  { %4675 = vmatpush1.bf16.msra.mxu1 %v13277_v38  ;;  %4931 = vmatprep.subr.bf16.mxu0 %v19646_v31 }
 0x37c   :  { %5216 = vmatprep.subr.bf16.mxu1 %v19646_v31  ;;  %v13640_v2 = vpop.eup %13639 }
 0x37d   :  { %v264_v59 = vmul.f32 %v13640_v2, %v15123_v43  ;;  %v265_v18 = vmul.f32 %v13640_v2, %v15127_v11 }
 0x37f   :  { %274 = vst [vmem:[#allocation2 + $0x10] sm:$0xff] %v264_v59  ;;  %275 = vst.msk [vmem:[#allocation2 + $0x18] sm:$0xff] %vm176_vm2, %v265_v18 }
 0x380   :  { %v13642_v47 = vpop.eup %13641 }
 0x381   :  { %v709_v44 = vmul.f32 %v13642_v47, %v15143_v55  ;;  %v710_v0 = vmul.f32 %v13642_v47, %v15147_v5 }
 0x383   :  { %720 = vst [vmem:[#allocation2 + $0xb0] sm:$0xff] %v709_v44  ;;  %721 = vst.msk [vmem:[#allocation2 + $0xb8] sm:$0xff] %vm176_vm2, %v710_v0 }
 0x386   :  { %v15749_v45 = vld [vmem:[#allocation2 + $0x10] ss:$8 sm:$0x3]  ;;  %v15751_v49 = vld [vmem:[#allocation2 + $0x11] ss:$8 sm:$0x3] }
 0x387   :  { %v15755_v8 = vld [vmem:[#allocation2 + $0x12] ss:$8 sm:$0x3]  ;;  %v15759_v38 = vld [vmem:[#allocation2 + $0x13] ss:$8 sm:$0x3] }
 0x38a   :  { %v15770_v47 = vld [vmem:[#allocation2 + $0xb0] ss:$8 sm:$0x3] }
 0x39c   :  { %v2685_v19 = vpop.f32.mrb[40].mxu0  ;;  %v2970_v56 = vpop.f32.mrb[64].mxu1 }
 0x39d   :  { %v2691_v26 = vadd.f32 %v2685_v19, %v15682_v14  ;;  %v2687_v34 = vpop.f32.mrb[41].mxu0  ;;  %v2972_v52 = vpop.f32.mrb[65].mxu1 }
 0x39e   :  { %v2688_v43 = vpop.f32.mrb[42].mxu0  ;;  %v2973_v46 = vpop.f32.mrb[66].mxu1  ;;  %v4711_v34 = vrot.slane %v15755_v8, %v14597_v27 }
 0x39f   :  { %v15741_v11 = vadd.f32 %v2970_v56, %v2691_v26  ;;  %v2689_v1 = vpop.f32.mrb[43].mxu0  ;;  %v2974_v24 = vpop.f32.mrb[67].mxu1  ;;  %v15783_v56 = vld [vmem:[#allocation2 + $0xb1] ss:$8 sm:$0x3]  ;;  %v4422_v26 = vrot.slane %v15751_v49, %v14595_v53 }
 0x3a0   :  { %v4163_v24 = vrot.slane %v15770_v47, %v14597_v27 }
 0x3a1   :  { %v455_v36 = vpop.xlane.xlu0 %454 }
 0x3a2   :  { %v470_v50 = vmul.f32 0.004166667, %v455_v36  ;;  %v4996_v36 = vrot.slane %v15759_v38, %v14597_v27 }
 0x3a4   :  { %v475_v55 = vadd.f32 1e-05, %v470_v50 }
 0x3a5   :  { %v1124_v29 = vpop.xlane.xlu1 %1123 }
 0x3a6   :  { %13643 = vrsqrt.f32 %v475_v55  ;;  %v1139_v5 = vmul.f32 0.004166667, %v1124_v29  ;;  %v901_v32 = vpop.xlane.xlu0 %900  ;;  %v19685_v29 = vld [vmem:[#allocation26_spill] sm:$0xff] }
 0x3a7   :  { %v916_v15 = vmul.f32 0.004166667, %v901_v32  ;;  %v19686_v32 = vld [vmem:[#allocation27_spill] sm:$0xff] }
 0x3a8   :  { %v1144_v12 = vadd.f32 1e-05, %v1139_v5 }
 0x3a9   :  { %v921_v28 = vadd.f32 1e-05, %v916_v15  ;;  %v1570_v22 = vpop.xlane.xlu1 %1569 }
 0x3aa   :  { %13645 = vrsqrt.f32 %v1144_v12  ;;  %v1585_v14 = vmul.f32 0.004166667, %v1570_v22  ;;  %v1347_v20 = vpop.xlane.xlu0 %1346 }
 0x3ab   :  { %13647 = vrsqrt.f32 %v921_v28  ;;  %v1362_v30 = vmul.f32 0.004166667, %v1347_v20  ;;  %v19688_v28 = vld [vmem:[#allocation15_spill] sm:$0xff] }
 0x3ac   :  { %v1590_v37 = vadd.f32 1e-05, %v1585_v14 }
 0x3ad   :  { %v1367_v51 = vadd.f32 1e-05, %v1362_v30  ;;  %v63_v62 = vpop.permute.xlu1 %62 }
 0x3ae   :  { %13649 = vrsqrt.f32 %v1590_v37  ;;  %v15744_v60 = vadd.f32 %v14108_v3, %v63_v62  ;;  %v15747_v33 = vadd.f32 %v14110_v4, %v63_v62  ;;  %v1793_v10 = vpop.xlane.xlu0 %1792 }
 0x3af   :  { %13651 = vrsqrt.f32 %v1367_v51  ;;  %v1808_v54 = vmul.f32 0.004166667, %v1793_v10  ;;  %v4159_v51 = vrot.slane %v15770_v47, %v14595_v53 }
 0x3b0   :  { %v13644_v39 = vpop.eup %13643  ;;  %v170_v25 = vmax.f32 %v15744_v60, 0.0  ;;  %v171_v21 = vmax.f32 %v15747_v33, 0.0  ;;  %v13337_v60 = vld [vmem:[%s19524_s3 + $0x688] sm:$0xff]  }
 0x3b1   :  { %v486_v3 = vmul.f32 %v13644_v39, %v15383_v42  ;;  %v487_v40 = vmul.f32 %v13644_v39, %v15387_v61  ;;  %v1813_v4 = vadd.f32 1e-05, %v1808_v54  ;;  %v536_v63 = vpop.permute.xlu1 %535  ;;  %v4141_v42 = vrot.slane %v15749_v45, %v14597_v27 }
 0x3b2   :  { %v15762_v2 = vadd.f32 %v14114_v6, %v536_v63  ;;  %v15765_v59 = vadd.f32 %v14118_v9, %v536_v63  ;;  %v185_v18 = vsel %vm176_vm2, %v171_v21, 0.0  ;;  %v4426_v9 = vrot.slane %v15751_v49, %v14597_v27 }
 0x3b3   :  { %497 = vst [vmem:[#allocation2 + $0x60] sm:$0xff] %v486_v3  ;;  %498 = vst.msk [vmem:[#allocation2 + $0x68] sm:$0xff] %vm176_vm2, %v487_v40  ;;  %13653 = vrsqrt.f32 %v1813_v4  ;;  %v186_v6 = vadd.f32 %v185_v18, %v170_v25  ;;  %v4137_v61 = vrot.slane %v15749_v45, %v14595_v53  ;;  %v19689_v18 = vld [vmem:[#allocation32_spill] sm:$0xff] }
 0x3b4   :  { %v13646_v44 = vpop.eup %13645  ;;  %v19574_v0 = vmax.f32 %v15762_v2, 0.0  ;;  %v19573_v19 = vmax.f32 %v15765_v59, 0.0 }
 0x3b5   :  { %v13648_v52 = vpop.eup %13647  ;;  %v1155_v43 = vmul.f32 %v13646_v44, %v15413_v16  ;;  %v1156_v46 = vmul.f32 %v13646_v44, %v15417_v41  ;;  %v759_v1 = vpop.permute.xlu1 %758  ;;  %187 = vadd.xlane.f32.xlu0 %v186_v6  ;;  %v19687_v41 = vld [vmem:[#allocation14_spill] sm:$0xff]  ;;  %v19690_v44 = vld [vmem:[#allocation33_spill] sm:$0xff] }
 0x3b6   :  { %v932_v50 = vmul.f32 %v13648_v52, %v15391_v35  ;;  %v933_v55 = vmul.f32 %v13648_v52, %v15374_v7  ;;  %v15798_v5 = vadd.f32 %v19685_v29, %v759_v1  ;;  %v15801_v15 = vadd.f32 %v19686_v32, %v759_v1  ;;  %v313_v16 = vpop.permute.xlu0 %312 }
 0x3b7   :  { %1166 = vst [vmem:[#allocation2 + $0x150] sm:$0xff] %v1155_v43  ;;  %1167 = vst.msk [vmem:[#allocation2 + $0x158] sm:$0xff] %vm176_vm2, %v1156_v46  ;;  %v15805_v12 = vadd.f32 %v19687_v41, %v313_v16  ;;  %v15808_v22 = vadd.f32 %v19688_v28, %v313_v16  ;;  %v633_v7 = vsel %vm176_vm2, %v19573_v19, 0.0  ;;  %v4448_v35 = vrot.slane %v15783_v56, %v14597_v27  ;;  %v19691_v46 = vld [vmem:[#allocation16_spill] sm:$0xff] }
 0x3b8   :  { %v13650_v14 = vpop.eup %13649  ;;  %943 = vst [vmem:[#allocation2 + $0x100] sm:$0xff] %v932_v50  ;;  %944 = vst.msk [vmem:[#allocation2 + $0x108] sm:$0xff] %vm176_vm2, %v933_v55  ;;  %v19571_v20 = vmax.f32 %v15798_v5, 0.0  ;;  %v19569_v30 = vmax.f32 %v15801_v15, 0.0  ;;  %v634_v37 = vadd.f32 %v633_v7, %v19574_v0 }
 0x3b9   :  { %v13652_v62 = vpop.eup %13651  ;;  %v1601_v10 = vmul.f32 %v13650_v14, %v15447_v17  ;;  %v1602_v54 = vmul.f32 %v13650_v14, %v15451_v23  ;;  %v19567_v39 = vmax.f32 %v15805_v12, 0.0  ;;  %v19561_v3 = vmax.f32 %v15808_v22, 0.0  ;;  %v1205_v40 = vpop.permute.xlu1 %1204 }
 0x3ba   :  { %v1378_v4 = vmul.f32 %v13652_v62, %v15422_v57  ;;  %v1379_v63 = vmul.f32 %v13652_v62, %v15408_v48  ;;  %v15829_v6 = vadd.f32 %v19689_v18, %v1205_v40  ;;  %v15832_v52 = vadd.f32 %v19690_v44, %v1205_v40  ;;  %635 = vadd.xlane.f32.xlu0 %v634_v37  ;;  %v982_v43 = vpop.permute.xlu0 %981  ;;  %v15834_v17 = vld [vmem:[#allocation2 + $0x60] ss:$8 sm:$0x3]  ;;  %v15836_v23 = vld [vmem:[#allocation2 + $0x61] ss:$8 sm:$0x3] }
 0x3bb   :  { %1612 = vst [vmem:[#allocation2 + $0x1f0] sm:$0xff] %v1601_v10  ;;  %1613 = vst.msk [vmem:[#allocation2 + $0x1f8] sm:$0xff] %vm176_vm2, %v1602_v54  ;;  %v15840_v1 = vadd.f32 %v19691_v46, %v982_v43  ;;  %v19692_v57 = vld [vmem:[#allocation18_spill] sm:$0xff]  ;;  %v856_v50 = vsel %vm176_vm2, %v19569_v30, 0.0  ;;  %v410_v55 = vsel %vm176_vm2, %v19561_v3, 0.0  ;;  %v4152_v62 = vrot.slane %v15834_v17, %v14597_v27  ;;  %v19694_v18 = vld [vmem:[#allocation41_spill] sm:$0xff] }
 0x3bc   :  { %v15843_v48 = vadd.f32 %v19692_v57, %v982_v43  ;;  %1389 = vst [vmem:[#allocation2 + $0x1a0] sm:$0xff] %v1378_v4  ;;  %1390 = vst.msk [vmem:[#allocation2 + $0x1a8] sm:$0xff] %vm176_vm2, %v1379_v63  ;;  %v19562_v29 = vmax.f32 %v15829_v6, 0.0  ;;  %v19566_v32 = vmax.f32 %v15832_v52, 0.0  ;;  %v857_v16 = vadd.f32 %v856_v50, %v19571_v20  ;;  %v19693_v4 = vld [vmem:[#allocation39_spill] sm:$0xff]  ;;  %v19695_v50 = vld [vmem:[#allocation38_spill] sm:$0xff] }
 0x3bd   :  { %v411_v41 = vadd.f32 %v410_v55, %v19567_v39  ;;  %v13654_v28 = vpop.eup %13653  ;;  %v19564_v7 = vmax.f32 %v15840_v1, 0.0  ;;  %v1651_v37 = vpop.permute.xlu1 %1650  ;;  %v4437_v10 = vrot.slane %v15836_v23, %v14597_v27  ;;  %v19696_v3 = vld [vmem:[#allocation40_spill] sm:$0xff] }
 0x3be   :  { %v19563_v14 = vmax.f32 %v15843_v48, 0.0  ;;  %v1824_v54 = vmul.f32 %v13654_v28, %v15461_v13  ;;  %v1825_v40 = vmul.f32 %v13654_v28, %v15440_v58  ;;  %v15867_v63 = vadd.f32 %v19693_v4, %v1651_v37  ;;  %858 = vadd.xlane.f32.xlu0 %v857_v16  ;;  %v1428_v43 = vpop.permute.xlu0 %1427  ;;  %v15872_v46 = vld [vmem:[#allocation2 + $0x150] ss:$8 sm:$0x3] }
 0x3bf   :  { %v15870_v44 = vadd.f32 %v19694_v18, %v1651_v37  ;;  %v15874_v57 = vld [vmem:[#allocation2 + $0x151] ss:$8 sm:$0x3]  ;;  %412 = vadd.xlane.f32.xlu1 %v411_v41  ;;  %v15877_v55 = vadd.f32 %v19695_v50, %v1428_v43  ;;  %v15880_v13 = vadd.f32 %v19696_v3, %v1428_v43  ;;  %v1302_v58 = vsel %vm176_vm2, %v19566_v32, 0.0 }
 0x3c0   :  { %v1079_v16 = vsel %vm176_vm2, %v19563_v14, 0.0  ;;  %v15888_v28 = vld [vmem:[#allocation2 + $0x100] ss:$8 sm:$0x3]  ;;  %1835 = vst [vmem:[#allocation2 + $0x240] sm:$0xff] %v1824_v54  ;;  %1836 = vst.msk [vmem:[#allocation2 + $0x248] sm:$0xff] %vm176_vm2, %v1825_v40  ;;  %v1303_v3 = vadd.f32 %v1302_v58, %v19562_v29  ;;  %v4185_v40 = vrot.slane %v15872_v46, %v14597_v27 }
 0x3c1   :  { %v19568_v41 = vmax.f32 %v15867_v63, 0.0  ;;  %v19565_v37 = vmax.f32 %v15870_v44, 0.0  ;;  %v1080_v4 = vadd.f32 %v1079_v16, %v19564_v7  ;;  %v15897_v18 = vld [vmem:[#allocation2 + $0x101] ss:$8 sm:$0x3]  ;;  %v19572_v43 = vmax.f32 %v15877_v55, 0.0 }
 0x3c2   :  { %v19570_v50 = vmax.f32 %v15880_v13, 0.0  ;;  %v4174_v54 = vrot.slane %v15888_v28, %v14597_v27  ;;  %1304 = vadd.xlane.f32.xlu0 %v1303_v3  ;;  %v15908_v29 = vld [vmem:[#allocation2 + $0x1f0] ss:$8 sm:$0x3]  ;;  %v4222_v16 = vsel %vm193_vm3, %v4141_v42, %v4152_v62  ;;  %v4459_v14 = vrot.slane %v15897_v18, %v14597_v27 }
 0x3c3   :  { %v1748_v58 = vsel %vm176_vm2, %v19565_v37, 0.0  ;;  %v4470_v7 = vrot.slane %v15874_v57, %v14597_v27  ;;  %1081 = vadd.xlane.f32.xlu1 %v1080_v4  ;;  %v4128_v32 = vld [vmem:[#allocation2 + $0x1a0] ss:$8 sm:$0x3]  ;;  %v4207_v39 = vrot.slane %v15908_v29, %v14597_v27  ;;  %v4224_v42 = vsel %vm1941_vm4, %v4222_v16, %v4163_v24 }
 0x3c4   :  { %v1749_v3 = vadd.f32 %v1748_v58, %v19568_v41  ;;  %v1525_v37 = vsel %vm176_vm2, %v19570_v50, 0.0  ;;  %v4196_v4 = vrot.slane %v4128_v32, %v14597_v27  ;;  %v4226_v58 = vsel %vm1944_vm5, %v4224_v42, %v4174_v54  ;;  %v15933_v41 = vld [vmem:[#allocation2 + $0x1a1] ss:$8 sm:$0x3] }
 0x3c5   :  { %v1526_v62 = vadd.f32 %v1525_v37, %v19572_v43  ;;  %v15935_v30 = vld [vmem:[#allocation2 + $0x1f1] ss:$8 sm:$0x3]  ;;  %v4507_v50 = vsel %vm193_vm3, %v4426_v9, %v4437_v10  ;;  %v4228_v20 = vsel %vm1947_vm6, %v4226_v58, %v4185_v40  ;;  %v4481_v24 = vrot.slane %v15933_v41, %v14597_v27 }
 0x3c6   :  { %v4492_v37 = vrot.slane %v15935_v30, %v14597_v27  ;;  %v4509_v54 = vsel %vm1941_vm4, %v4507_v50, %v4448_v35  ;;  %1750 = vadd.xlane.f32.xlu0 %v1749_v3  ;;  %v4230_v16 = vsel %vm1950_vm7, %v4228_v20, %v4196_v4  ;;  %v4148_v9 = vrot.slane %v15834_v17, %v14595_v53  ;;  %v15978_v3 = vld [vmem:[#allocation2 + $0xb2] ss:$8 sm:$0x3]  ;;  %v15987_v4 = vld [vmem:[#allocation2 + $0x62] ss:$8 sm:$0x3] }
 0x3c7   :  { %v4511_v42 = vsel %vm1944_vm5, %v4509_v54, %v4459_v14  ;;  %v4444_v10 = vrot.slane %v15783_v56, %v14595_v53  ;;  %1527 = vadd.xlane.f32.xlu1 %v1526_v62  ;;  %v4132_v40 = vld [vmem:[#allocation2 + $0x240] ss:$8 sm:$0x3]  ;;  %v4232_v58 = vsel %vm1953_vm8, %v4230_v16, %v4207_v39  ;;  %v15957_v43 = vld [vmem:[#allocation2 + $0x241] ss:$8 sm:$0x3]  ;;  %v4170_v35 = vrot.slane %v15888_v28, %v14595_v53 }
 0x3c8   :  { %v4513_v19 = vsel %vm1947_vm6, %v4511_v42, %v4470_v7  ;;  %v4181_v20 = vrot.slane %v15872_v46, %v14595_v53  ;;  %v4218_v14 = vrot.slane %v4132_v40, %v14597_v27  ;;  %v4503_v17 = vrot.slane %v15957_v43, %v14597_v27 }
 0x3c9   :  { %v4515_v56 = vsel %vm1950_vm7, %v4513_v19, %v4481_v24  ;;  %v4192_v50 = vrot.slane %v4128_v32, %v14595_v53  ;;  %v4203_v7 = vrot.slane %v15908_v29, %v14595_v53  ;;  %v4221_v28 = vsel %vm193_vm3, %v4137_v61, %v4148_v9 }
 0x3ca   :  { %v4517_v39 = vsel %vm1953_vm8, %v4515_v56, %v4492_v37  ;;  %v4433_v46 = vrot.slane %v15836_v23, %v14595_v53  ;;  %v4234_v62 = vsel %vm98_vm0, %v4232_v58, %v4218_v14  ;;  %v4214_v32 = vrot.slane %v4132_v40, %v14595_v53  ;;  %v15992_v37 = vld [vmem:[#allocation2 + $0x102] ss:$8 sm:$0x3]  ;;  %v16021_v14 = vld [vmem:[#allocation2 + $0x1f2] ss:$8 sm:$0x3] }
 0x3cb   :  { %v4519_v19 = vsel %vm98_vm0, %v4517_v39, %v4503_v17  ;;  %v4223_v29 = vsel %vm1941_vm4, %v4221_v28, %v4159_v51  ;;  %v4236_v45 = vpack.c.bf16 %v4234_v62, %v4234_v62  ;;  %v4455_v23 = vrot.slane %v15897_v18, %v14595_v53  ;;  %v15999_v51 = vld [vmem:[#allocation2 + $0x152] ss:$8 sm:$0x3]  ;;  %v16031_v39 = vld [vmem:[#allocation2 + $0x242] ss:$8 sm:$0x3] }
 0x3cc   :  { %v4521_v61 = vpack.c.bf16 %v4519_v19, %v4519_v19  ;;  %v4225_v24 = vsel %vm1944_vm5, %v4223_v29, %v4170_v35  ;;  %v4466_v16 = vrot.slane %v15874_v57, %v14595_v53  ;;  %v4477_v47 = vrot.slane %v15933_v41, %v14595_v53  ;;  %v13278_v57 = vld [vmem:[%s19524_s3 + $0x4b0] sm:$0xff]   ;;  %v16013_v41 = vld [vmem:[#allocation2 + $0x1a2] ss:$8 sm:$0x3] }
 0x3cd   :  { %v4227_v54 = vsel %vm1947_vm6, %v4225_v24, %v4181_v20  ;;  %v4733_v42 = vrot.slane %v15978_v3, %v14597_v27  ;;  %12013 = vmatprep.mubr.msk.bf16.mxu0 %vm176_vm2, %v4236_v45  ;;  %v4506_v9 = vsel %vm193_vm3, %v4422_v26, %v4433_v46  ;;  %v4722_v40 = vrot.slane %v15987_v4, %v14597_v27  ;;  %v16025_v26 = vld [vmem:[#allocation2 + $0x63] ss:$8 sm:$0x3]  ;;  %v16044_v62 = vld [vmem:[#allocation2 + $0xb3] ss:$8 sm:$0x3] }
 0x3ce   :  { %12059 = vmatprep.mubr.msk.bf16.mxu1 %vm176_vm2, %v4521_v61  ;;  %v4229_v18 = vsel %vm1950_vm7, %v4227_v54, %v4192_v50  ;;  %v4488_v35 = vrot.slane %v15935_v30, %v14595_v53  ;;  %v4508_v20 = vsel %vm1941_vm4, %v4506_v9, %v4444_v10  ;;  %v4744_v49 = vrot.slane %v15992_v37, %v14597_v27  ;;  %v16035_v10 = vld [vmem:[#allocation2 + $0x103] ss:$8 sm:$0x3]  ;;  %v16046_v19 = vld [vmem:[#allocation2 + $0x153] ss:$8 sm:$0x3] }
 0x3cf   :  { %v4231_v58 = vsel %vm1953_vm8, %v4229_v18, %v4203_v7  ;;  %v4499_v56 = vrot.slane %v15957_v43, %v14595_v53  ;;  %v4510_v50 = vsel %vm1944_vm5, %v4508_v20, %v4455_v23  ;;  %v4755_v30 = vrot.slane %v15999_v51, %v14597_v27  ;;  %v16052_v61 = vld [vmem:[#allocation2 + $0x1a3] ss:$8 sm:$0x3]  ;;  %v13280_v20 = vld [vmem:[%s19524_s3 + $0x4b8] sm:$0xff]  }
 0x3d0   :  { %v4233_v17 = vsel %vm98_vm0, %v4231_v58, %v4214_v32  ;;  %v4512_v28 = vsel %vm1947_vm6, %v4510_v50, %v4466_v16  ;;  %v4766_v46 = vrot.slane %v16013_v41, %v14597_v27  ;;  %v4792_v43 = vsel %vm193_vm3, %v4711_v34, %v4722_v40  ;;  %v16060_v16 = vld [vmem:[#allocation2 + $0x1f3] ss:$8 sm:$0x3]  ;;  %v13279_v18 = vld [vmem:[%s19524_s3 + $0x528] sm:$0xff]  }
 0x3d1   :  { %v4235_v7 = vpack.c.bf16 %v4233_v17, %v4233_v17  ;;  %v4514_v32 = vsel %vm1950_vm7, %v4512_v28, %v4477_v47  ;;  %v4777_v29 = vrot.slane %v16021_v14, %v14597_v27  ;;  %v4794_v45 = vsel %vm1941_vm4, %v4792_v43, %v4733_v42  ;;  %v16069_v40 = vld [vmem:[#allocation2 + $0x243] ss:$8 sm:$0x3] }
 0x3d2   :  { %v5007_v24 = vrot.slane %v16025_v26, %v14597_v27  ;;  %v4516_v23 = vsel %vm1953_vm8, %v4514_v32, %v4488_v35  ;;  %v4788_v34 = vrot.slane %v16031_v39, %v14597_v27  ;;  %v4796_v54 = vsel %vm1944_vm5, %v4794_v45, %v4744_v49  ;;  %v13282_v45 = vld [vmem:[%s19524_s3 + $0x4c0] sm:$0xff]  }
 0x3d3   :  { %4394 = vmatmul.mubr.bf16.vlgmr.msra.gmra.mrb[52].mxu0 %v4235_v7  ;;  %v5029_v47 = vrot.slane %v16035_v10, %v14597_v27  ;;  %v4518_v42 = vsel %vm98_vm0, %v4516_v23, %v4499_v56  ;;  %v4798_v9 = vsel %vm1947_vm6, %v4796_v54, %v4755_v30  ;;  %v5018_v58 = vrot.slane %v16044_v62, %v14597_v27 }
 0x3d4   :  { %4932 = vmatpush1.bf16.msra.mxu0 %v13278_v57  ;;  %v5040_v35 = vrot.slane %v16046_v19, %v14597_v27  ;;  %v4520_v49 = vpack.c.bf16 %v4518_v42, %v4518_v42  ;;  %v4800_v57 = vsel %vm1950_vm7, %v4798_v9, %v4766_v46  ;;  %v5051_v17 = vrot.slane %v16052_v61, %v14597_v27 }
 0x3d5   :  { %v5077_v56 = vsel %vm193_vm3, %v4996_v36, %v5007_v24  ;;  %4933 = vmatprep.subr.bf16.mxu0 %v19646_v31  ;;  %v4802_v50 = vsel %vm1953_vm8, %v4800_v57, %v4777_v29  ;;  %v5062_v30 = vrot.slane %v16060_v16, %v14597_v27  ;;  %v5073_v46 = vrot.slane %v16069_v40, %v14597_v27  ;;  %v13281_v29 = vld [vmem:[%s19524_s3 + $0x530] sm:$0xff]  }
 0x3d6   :  { %v5079_v7 = vsel %vm1941_vm4, %v5077_v56, %v5018_v58  ;;  %4679 = vmatmul.mubr.bf16.vlgmr.msra.gmra.mrb[76].mxu1 %v4520_v49  ;;  %v4804_v28 = vsel %vm98_vm0, %v4802_v50, %v4788_v34  ;;  %v13285_v50 = vld [vmem:[%s19524_s3 + $0x540] sm:$0xff]  }
 0x3d7   :  { %v5081_v43 = vsel %vm1944_vm5, %v5079_v7, %v5029_v47  ;;  %5217 = vmatpush1.bf16.msra.mxu1 %v13279_v18  ;;  %v4806_v32 = vpack.c.bf16 %v4804_v28, %v4804_v28  ;;  %v13287_v7 = vld [vmem:[%s19524_s3 + $0x548] sm:$0xff]   ;;  %v13288_v28 = vld [vmem:[%s19524_s3 + $0x4d8] sm:$0xff]  }
 0x3d8   :  { %v5083_v36 = vsel %vm1947_vm6, %v5081_v43, %v5040_v35  ;;  %4934 = vmatpush1.bf16.msra.mxu0 %v13280_v20  ;;  %5218 = vmatprep.subr.bf16.mxu1 %v19646_v31  ;;  %v3255_v23 = vpop.f32.mrb[44].mxu0  ;;  %v13283_v20 = vld [vmem:[%s19524_s3 + $0x538] sm:$0xff]   ;;  %v13290_v43 = vld [vmem:[%s19524_s3 + $0x4e0] sm:$0xff]  }
 0x3d9   :  { %v5085_v24 = vsel %vm1950_vm7, %v5083_v36, %v5051_v17  ;;  %4935 = vmatprep.subr.bf16.mxu0 %v19646_v31  ;;  %12105 = vmatprep.mubr.msk.bf16.mxu0 %vm176_vm2, %v4806_v32  ;;  %v3261_v54 = vadd.f32 %v3255_v23, %v15741_v11  ;;  %v3540_v47 = vpop.f32.mrb[68].mxu1  ;;  %v3257_v42 = vpop.f32.mrb[45].mxu0  ;;  %v13284_v11 = vld [vmem:[%s19524_s3 + $0x4c8] sm:$0xff]   ;;  %v13291_v32 = vld [vmem:[%s19524_s3 + $0x558] sm:$0xff]  }
 0x3da   :  { %v5087_v34 = vsel %vm1953_vm8, %v5085_v24, %v5062_v30  ;;  %v3542_v9 = vpop.f32.mrb[69].mxu1  ;;  %v3258_v58 = vpop.f32.mrb[46].mxu0  ;;  %v13286_v30 = vld [vmem:[%s19524_s3 + $0x4d0] sm:$0xff]   ;;  %v13292_v36 = vld [vmem:[%s19524_s3 + $0x4e8] sm:$0xff]   ;;  %v13296_v23 = vld [vmem:[%s19524_s3 + $0x4f8] sm:$0xff]   ;;  %v4718_v42 = vrot.slane %v15987_v4, %v14595_v53 }
 0x3db   :  { %v5089_v18 = vsel %vm98_vm0, %v5087_v34, %v5073_v46  ;;  %5219 = vmatpush1.bf16.msra.mxu1 %v13281_v29  ;;  %v16111_v49 = vadd.f32 %v3540_v47, %v3261_v54  ;;  %v3543_v57 = vpop.f32.mrb[70].mxu1  ;;  %v3259_v17 = vpop.f32.mrb[47].mxu0  ;;  %v13289_v46 = vld [vmem:[%s19524_s3 + $0x550] sm:$0xff]   ;;  %v13293_v29 = vld [vmem:[%s19524_s3 + $0x560] sm:$0xff]   ;;  %v13295_v24 = vld [vmem:[%s19524_s3 + $0x568] sm:$0xff]  }
 0x3dc   :  { %v5091_v35 = vpack.c.bf16 %v5089_v18, %v5089_v18  ;;  %4936 = vmatpush1.bf16.msra.mxu0 %v13282_v45  ;;  %5220 = vmatprep.subr.bf16.mxu1 %v19646_v31  ;;  %v3544_v56 = vpop.f32.mrb[71].mxu1  ;;  %v13294_v45 = vld [vmem:[%s19524_s3 + $0x4f0] sm:$0xff]   ;;  %v13298_v54 = vld [vmem:[%s19524_s3 + $0x500] sm:$0xff]   ;;  %v13299_v58 = vld [vmem:[%s19524_s3 + $0x578] sm:$0xff]   ;;  %v4707_v57 = vrot.slane %v15755_v8, %v14595_v53 }
 0x3dd   :  { %4937 = vmatprep.subr.bf16.mxu0 %v19646_v31  ;;  %v13297_v34 = vld [vmem:[%s19524_s3 + $0x570] sm:$0xff]   ;;  %v16175_v47 = vld [vmem:[#allocation2 + $0x64] ss:$8 sm:$0x3]  ;;  %v4992_v56 = vrot.slane %v15759_v38, %v14595_v53 }
 0x3de   :  { %12151 = vmatprep.mubr.msk.bf16.mxu1 %vm176_vm2, %v5091_v35  ;;  %v16179_v18 = vld [vmem:[#allocation2 + $0x14] ss:$8 sm:$0x3]  ;;  %v16181_v9 = vld [vmem:[#allocation2 + $0x15] ss:$8 sm:$0x3]  ;;  %v5292_v4 = vrot.slane %v16175_v47, %v14597_v27 }
 0x3df   :  { %5221 = vmatpush1.bf16.msra.mxu1 %v13283_v20  ;;  %v13300_v35 = vld [vmem:[%s19524_s3 + $0x508] sm:$0xff]   ;;  %v16189_v20 = vld [vmem:[#allocation2 + $0xb4] ss:$8 sm:$0x3]  ;;  %v5566_v8 = vrot.slane %v16181_v9, %v14597_v27  ;;  %v13301_v38 = vld [vmem:[%s19524_s3 + $0x580] sm:$0xff]  }
 0x3e0   :  { %4938 = vmatpush1.bf16.msra.mxu0 %v13284_v11  ;;  %5222 = vmatprep.subr.bf16.mxu1 %v19646_v31  ;;  %v16195_v11 = vld [vmem:[#allocation2 + $0x65] ss:$8 sm:$0x3]  ;;  %v16197_v17 = vld [vmem:[#allocation2 + $0xb5] ss:$8 sm:$0x3] }
 0x3e1   :  { %4939 = vmatprep.subr.bf16.mxu0 %v19646_v31 }
 0x3e3   :  { %5223 = vmatpush1.bf16.msra.mxu1 %v13285_v50  ;;  %v16203_v50 = vld [vmem:[#allocation2 + $0x104] ss:$8 sm:$0x3] }
 0x3e4   :  { %4940 = vmatpush1.bf16.msra.mxu0 %v13286_v30  ;;  %5224 = vmatprep.subr.bf16.mxu1 %v19646_v31  ;;  %v5281_v30 = vrot.slane %v16179_v18, %v14597_v27 }
 0x3e5   :  { %4941 = vmatprep.subr.bf16.mxu0 %v19646_v31 }
 0x3e7   :  { %5225 = vmatpush1.bf16.msra.mxu1 %v13287_v7  ;;  %v4729_v7 = vrot.slane %v15978_v3, %v14595_v53  ;;  %v5303_v3 = vrot.slane %v16189_v20, %v14597_v27 }
 0x3e8   :  { %4942 = vmatpush1.bf16.msra.mxu0 %v13288_v28  ;;  %5226 = vmatprep.subr.bf16.mxu1 %v19646_v31  ;;  %v4740_v28 = vrot.slane %v15992_v37, %v14595_v53  ;;  %v5577_v37 = vrot.slane %v16195_v11, %v14597_v27 }
 0x3e9   :  { %4943 = vmatprep.subr.bf16.mxu0 %v19646_v31 }
 0x3eb   :  { %5227 = vmatpush1.bf16.msra.mxu1 %v13289_v46  ;;  %v4791_v46 = vsel %vm193_vm3, %v4707_v57, %v4718_v42  ;;  %v16246_v42 = vld [vmem:[#allocation2 + $0x1a4] ss:$8 sm:$0x3]  ;;  %v5025_v57 = vrot.slane %v16035_v10, %v14595_v53 }
 0x3ec   :  { %4944 = vmatpush1.bf16.msra.mxu0 %v13290_v43  ;;  %5228 = vmatprep.subr.bf16.mxu1 %v19646_v31  ;;  %v5003_v43 = vrot.slane %v16025_v26, %v14595_v53  ;;  %v5588_v26 = vrot.slane %v16197_v17, %v14597_v27 }
 0x3ed   :  { %4945 = vmatprep.subr.bf16.mxu0 %v19646_v31 }
 0x3ef   :  { %5229 = vmatpush1.bf16.msra.mxu1 %v13291_v32  ;;  %v13302_v32 = vld [vmem:[%s19524_s3 + $0x510] sm:$0xff]  }
 0x3f0   :  { %4946 = vmatpush1.bf16.msra.mxu0 %v13292_v36  ;;  %5230 = vmatprep.subr.bf16.mxu1 %v19646_v31  ;;  %v5014_v36 = vrot.slane %v16044_v62, %v14595_v53  ;;  %v5362_v62 = vsel %vm193_vm3, %v5281_v30, %v5292_v4  ;;  %v5076_v4 = vsel %vm193_vm3, %v4992_v56, %v5003_v43 }
 0x3f1   :  { %4947 = vmatprep.subr.bf16.mxu0 %v19646_v31  ;;  %v5647_v56 = vsel %vm193_vm3, %v5566_v8, %v5577_v37  ;;  %v5336_v43 = vrot.slane %v16246_v42, %v14597_v27 }
 0x3f3   :  { %5231 = vmatpush1.bf16.msra.mxu1 %v13293_v29  ;;  %v4751_v29 = vrot.slane %v15999_v51, %v14595_v53  ;;  %v4793_v51 = vsel %vm1941_vm4, %v4791_v46, %v4729_v7  ;;  %v16263_v7 = vld [vmem:[#allocation2 + $0x155] ss:$8 sm:$0x3]  ;;  %v16270_v46 = vld [vmem:[#allocation2 + $0x1f4] ss:$8 sm:$0x3] }
 0x3f4   :  { %4948 = vmatpush1.bf16.msra.mxu0 %v13294_v45  ;;  %5232 = vmatprep.subr.bf16.mxu1 %v19646_v31  ;;  %v16232_v45 = vld [vmem:[#allocation2 + $0x154] ss:$8 sm:$0x3]  ;;  %v5347_v0 = vrot.slane %v16270_v46, %v14597_v27 }
 0x3f5   :  { %4949 = vmatprep.subr.bf16.mxu0 %v19646_v31  ;;  %v5325_v30 = vrot.slane %v16232_v45, %v14597_v27 }
 0x3f7   :  { %5233 = vmatpush1.bf16.msra.mxu1 %v13295_v24  ;;  %v5314_v24 = vrot.slane %v16203_v50, %v14597_v27 }
 0x3f8   :  { %4950 = vmatpush1.bf16.msra.mxu0 %v13296_v23  ;;  %5234 = vmatprep.subr.bf16.mxu1 %v19646_v31  ;;  %v16237_v23 = vld [vmem:[#allocation2 + $0x105] ss:$8 sm:$0x3] }
 0x3f9   :  { %4951 = vmatprep.subr.bf16.mxu0 %v19646_v31  ;;  %v5599_v10 = vrot.slane %v16237_v23, %v14597_v27 }
 0x3fb   :  { %5235 = vmatpush1.bf16.msra.mxu1 %v13297_v34  ;;  %v4762_v34 = vrot.slane %v16013_v41, %v14595_v53  ;;  %v13303_v41 = vld [vmem:[%s19524_s3 + $0x588] sm:$0xff]  }
 0x3fc   :  { %4952 = vmatpush1.bf16.msra.mxu0 %v13298_v54  ;;  %5236 = vmatprep.subr.bf16.mxu1 %v19646_v31  ;;  %v4773_v54 = vrot.slane %v16021_v14, %v14595_v53  ;;  %v13304_v14 = vld [vmem:[%s19524_s3 + $0x518] sm:$0xff]  }
 0x3fd   :  { %4953 = vmatprep.subr.bf16.mxu0 %v19646_v31 }
 0x3ff   :  { %5237 = vmatpush1.bf16.msra.mxu1 %v13299_v58  ;;  %v4784_v58 = vrot.slane %v16031_v39, %v14595_v53  ;;  %v5364_v39 = vsel %vm1941_vm4, %v5362_v62, %v5303_v3  ;;  %v16275_v3 = vld [vmem:[#allocation2 + $0x1a5] ss:$8 sm:$0x3] }
 0x400   :  { %4954 = vmatpush1.bf16.msra.mxu0 %v13300_v35  ;;  %5238 = vmatprep.subr.bf16.mxu1 %v19646_v31  ;;  %v4795_v35 = vsel %vm1944_vm5, %v4793_v51, %v4740_v28  ;;  %v5036_v28 = vrot.slane %v16046_v19, %v14595_v53  ;;  %v5366_v51 = vsel %vm1944_vm5, %v5364_v39, %v5314_v24 }
 0x401   :  { %4955 = vmatprep.subr.bf16.mxu0 %v19646_v31  ;;  %v4797_v8 = vsel %vm1947_vm6, %v4795_v35, %v4751_v29  ;;  %v5078_v19 = vsel %vm1941_vm4, %v5076_v4, %v5014_v36  ;;  %v5610_v24 = vrot.slane %v16263_v7, %v14597_v27  ;;  %v5649_v39 = vsel %vm1941_vm4, %v5647_v56, %v5588_v26  ;;  %v16293_v35 = vld [vmem:[#allocation2 + $0x1f5] ss:$8 sm:$0x3]  ;;  %v13306_v26 = vld [vmem:[%s19524_s3 + $0x520] sm:$0xff]  }
 0x402   :  { %v4799_v37 = vsel %vm1950_vm7, %v4797_v8, %v4762_v34  ;;  %v5080_v62 = vsel %vm1944_vm5, %v5078_v19, %v5025_v57  ;;  %v5368_v29 = vsel %vm1947_vm6, %v5366_v51, %v5325_v30  ;;  %v5651_v36 = vsel %vm1944_vm5, %v5649_v39, %v5599_v10  ;;  %v13305_v34 = vld [vmem:[%s19524_s3 + $0x590] sm:$0xff]   ;;  %v16309_v56 = vld [vmem:[#allocation2 + $0x245] ss:$8 sm:$0x3] }
 0x403   :  { %5239 = vmatpush1.bf16.msra.mxu1 %v13301_v38  ;;  %v5047_v38 = vrot.slane %v16052_v61, %v14595_v53  ;;  %v5621_v61 = vrot.slane %v16275_v3, %v14597_v27  ;;  %v5058_v57 = vrot.slane %v16060_v16, %v14595_v53  ;;  %v5370_v30 = vsel %vm1950_vm7, %v5368_v29, %v5336_v43 }
 0x404   :  { %4956 = vmatpush1.bf16.msra.mxu0 %v13302_v32  ;;  %5240 = vmatprep.subr.bf16.mxu1 %v19646_v31  ;;  %v16283_v32 = vld [vmem:[#allocation2 + $0x244] ss:$8 sm:$0x3]  ;;  %v5082_v10 = vsel %vm1947_vm6, %v5080_v62, %v5036_v28  ;;  %v5632_v43 = vrot.slane %v16293_v35, %v14597_v27  ;;  %v5653_v8 = vsel %vm1947_vm6, %v5651_v36, %v5610_v24 }
 0x405   :  { %4957 = vmatprep.subr.bf16.mxu0 %v19646_v31  ;;  %v5358_v4 = vrot.slane %v16283_v32, %v14597_v27  ;;  %v5084_v51 = vsel %vm1950_vm7, %v5082_v10, %v5047_v38  ;;  %v5372_v19 = vsel %vm1953_vm8, %v5370_v30, %v5347_v0  ;;  %v5643_v39 = vrot.slane %v16309_v56, %v14597_v27 }
 0x406   :  { %v5086_v38 = vsel %vm1953_vm8, %v5084_v51, %v5058_v57  ;;  %v13311_v57 = vld [vmem:[%s19524_s3 + $0x620] sm:$0xff]  }
 0x407   :  { %5241 = vmatpush1.bf16.msra.mxu1 %v13303_v41  ;;  %v4801_v41 = vsel %vm1953_vm8, %v4799_v37, %v4773_v54  ;;  %v5655_v54 = vsel %vm1950_vm7, %v5653_v8, %v5621_v61  ;;  %v5374_v28 = vsel %vm98_vm0, %v5372_v19, %v5358_v4  ;;  %v13309_v61 = vld [vmem:[%s19524_s3 + $0x618] sm:$0xff]   ;;  %v13312_v4 = vld [vmem:[%s19524_s3 + $0x5b0] sm:$0xff]  }
 0x408   :  { %4958 = vmatpush1.bf16.msra.mxu0 %v13304_v14  ;;  %5242 = vmatprep.subr.bf16.mxu1 %v19646_v31  ;;  %v5069_v14 = vrot.slane %v16069_v40, %v14595_v53  ;;  %v4803_v16 = vsel %vm98_vm0, %v4801_v41, %v4784_v58  ;;  %v13307_v40 = vld [vmem:[%s19524_s3 + $0x598] sm:$0xff]   ;;  %v13308_v58 = vld [vmem:[%s19524_s3 + $0x5a0] sm:$0xff]   ;;  %v5657_v62 = vsel %vm1953_vm8, %v5655_v54, %v5632_v43  ;;  %v13313_v43 = vld [vmem:[%s19524_s3 + $0x628] sm:$0xff]  }
 0x409   :  { %4959 = vmatprep.subr.bf16.mxu0 %v19646_v31  ;;  %v4805_v0 = vpack.c.bf16 %v4803_v16, %v4803_v16  ;;  %v5376_v24 = vpack.c.bf16 %v5374_v28, %v5374_v28  ;;  %v5659_v29 = vsel %vm98_vm0, %v5657_v62, %v5643_v39  ;;  %v13317_v28 = vld [vmem:[%s19524_s3 + $0x638] sm:$0xff]   ;;  %v13321_v62 = vld [vmem:[%s19524_s3 + $0x648] sm:$0xff]  }
 0x40a   :  { %v5088_v37 = vsel %vm98_vm0, %v5086_v38, %v5069_v14  ;;  %v13319_v38 = vld [vmem:[%s19524_s3 + $0x640] sm:$0xff]  }
 0x40b   :  { %5243 = vmatpush1.bf16.msra.mxu1 %v13305_v34  ;;  %v5090_v36 = vpack.c.bf16 %v5088_v37, %v5088_v37  ;;  %v13310_v34 = vld [vmem:[%s19524_s3 + $0x5a8] sm:$0xff]   ;;  %v13320_v37 = vld [vmem:[%s19524_s3 + $0x5d0] sm:$0xff]  }
 0x40c   :  { %4960 = vmatpush1.bf16.msra.mxu0 %v13306_v26  ;;  %5244 = vmatprep.subr.bf16.mxu1 %v19646_v31  ;;  %v5661_v26 = vpack.c.bf16 %v5659_v29, %v5659_v29  ;;  %v13323_v29 = vld [vmem:[%s19524_s3 + $0x650] sm:$0xff]  }
 0x40d   :  { %5501 = vmatprep.subr.bf16.mxu0 %v19646_v31 }
 0x40f   :  { %4964 = vmatmul.mubr.bf16.vlgmr.msra.gmra.mrb[56].mxu0 %v4805_v0  ;;  %5245 = vmatpush1.bf16.msra.mxu1 %v13307_v40  ;;  %v13315_v40 = vld [vmem:[%s19524_s3 + $0x630] sm:$0xff]   ;;  %v13318_v0 = vld [vmem:[%s19524_s3 + $0x5c8] sm:$0xff]  }
 0x410   :  { %5502 = vmatpush1.bf16.msra.mxu0 %v13308_v58  ;;  %5786 = vmatprep.subr.bf16.mxu1 %v19646_v31  ;;  %v13316_v58 = vld [vmem:[%s19524_s3 + $0x5c0] sm:$0xff]  }
 0x411   :  { %12197 = vmatprep.mubr.msk.bf16.mxu0 %vm176_vm2, %v5376_v24  ;;  %5503 = vmatprep.subr.bf16.mxu0 %v19646_v31  ;;  %v13322_v24 = vld [vmem:[%s19524_s3 + $0x5d8] sm:$0xff]  }
 0x412   :  { %5249 = vmatmul.mubr.bf16.vlgmr.msra.gmra.mrb[80].mxu1 %v5090_v36  ;;  %v13325_v36 = vld [vmem:[%s19524_s3 + $0x658] sm:$0xff]  }
 0x413   :  { %5787 = vmatpush1.bf16.msra.mxu1 %v13309_v61  ;;  %12243 = vmatprep.mubr.msk.bf16.mxu1 %vm176_vm2, %v5661_v26  ;;  %v13324_v61 = vld [vmem:[%s19524_s3 + $0x5e0] sm:$0xff]  }
 0x414   :  { %5788 = vmatprep.subr.bf16.mxu1 %v19646_v31  ;;  %5504 = vmatpush1.bf16.msra.mxu0 %v13310_v34  ;;  %v3825_v30 = vpop.f32.mrb[48].mxu0  ;;  %v13326_v34 = vld [vmem:[%s19524_s3 + $0x5e8] sm:$0xff]   ;;  %v13327_v26 = vld [vmem:[%s19524_s3 + $0x660] sm:$0xff]  }
 0x415   :  { %5505 = vmatprep.subr.bf16.mxu0 %v19646_v31  ;;  %v3831_v41 = vadd.f32 %v3825_v30, %v16111_v49  ;;  %v4110_v14 = vpop.f32.mrb[72].mxu1  ;;  %v3827_v10 = vpop.f32.mrb[49].mxu0  ;;  %v13314_v49 = vld [vmem:[%s19524_s3 + $0x5b8] sm:$0xff]   ;;  %v5277_v30 = vrot.slane %v16179_v18, %v14595_v53 }
 0x416   :  { %v4112_v16 = vpop.f32.mrb[73].mxu1  ;;  %v3828_v51 = vpop.f32.mrb[50].mxu0  ;;  %v5310_v10 = vrot.slane %v16203_v50, %v14595_v53  ;;  %v13330_v18 = vld [vmem:[%s19524_s3 + $0x5f8] sm:$0xff]  }
 0x417   :  { %5789 = vmatpush1.bf16.msra.mxu1 %v13311_v57  ;;  %v16361_v8 = vadd.f32 %v4110_v14, %v3831_v41  ;;  %v4113_v19 = vpop.f32.mrb[74].mxu1  ;;  %v3829_v39 = vpop.f32.mrb[51].mxu0  ;;  %v5288_v57 = vrot.slane %v16175_v47, %v14595_v53  ;;  %v16428_v41 = vld [vmem:[#allocation2 + $0x66] ss:$8 sm:$0x3] }
 0x418   :  { %5790 = vmatprep.subr.bf16.mxu1 %v19646_v31  ;;  %5506 = vmatpush1.bf16.msra.mxu0 %v13312_v4  ;;  %v4114_v54 = vpop.f32.mrb[75].mxu1  ;;  %v13328_v4 = vld [vmem:[%s19524_s3 + $0x5f0] sm:$0xff]   ;;  %v13329_v47 = vld [vmem:[%s19524_s3 + $0x668] sm:$0xff]   ;;  %v5573_v19 = vrot.slane %v16195_v11, %v14595_v53  ;;  %v5862_v50 = vrot.slane %v16428_v41, %v14597_v27 }
 0x419   :  { %5507 = vmatprep.subr.bf16.mxu0 %v19646_v31  ;;  %v16430_v14 = vld [vmem:[#allocation2 + $0x16] ss:$8 sm:$0x3]  ;;  %v5361_v16 = vsel %vm193_vm3, %v5277_v30, %v5288_v57  ;;  %v16438_v51 = vld [vmem:[#allocation2 + $0x67] ss:$8 sm:$0x3] }
 0x41a   :  { %v16450_v39 = vld [vmem:[#allocation2 + $0x17] ss:$8 sm:$0x3]  ;;  %v16455_v54 = vld [vmem:[#allocation2 + $0x106] ss:$8 sm:$0x3] }
 0x41b   :  { %5791 = vmatpush1.bf16.msra.mxu1 %v13313_v43  ;;  %v5299_v43 = vrot.slane %v16189_v20, %v14595_v53  ;;  %v5321_v20 = vrot.slane %v16232_v45, %v14595_v53  ;;  %v5332_v45 = vrot.slane %v16246_v42, %v14595_v53  ;;  %v16487_v42 = vld [vmem:[#allocation2 + $0x156] ss:$8 sm:$0x3]  ;;  %v16497_v57 = vld [vmem:[#allocation2 + $0x1a6] ss:$8 sm:$0x3] }
 0x41c   :  { %5792 = vmatprep.subr.bf16.mxu1 %v19646_v31  ;;  %5508 = vmatpush1.bf16.msra.mxu0 %v13314_v49  ;;  %v5562_v49 = vrot.slane %v16181_v9, %v14595_v53  ;;  %v6147_v9 = vrot.slane %v16438_v51, %v14597_v27 }
 0x41d   :  { %5509 = vmatprep.subr.bf16.mxu0 %v19646_v31  ;;  %v5363_v11 = vsel %vm1941_vm4, %v5361_v16, %v5299_v43  ;;  %v16506_v16 = vld [vmem:[#allocation2 + $0x157] ss:$8 sm:$0x3] }
 0x41f   :  { %5793 = vmatpush1.bf16.msra.mxu1 %v13315_v40  ;;  %v5851_v40 = vrot.slane %v16430_v14, %v14597_v27 }
 0x420   :  { %5794 = vmatprep.subr.bf16.mxu1 %v19646_v31  ;;  %5510 = vmatpush1.bf16.msra.mxu0 %v13316_v58  ;;  %v5584_v58 = vrot.slane %v16197_v17, %v14595_v53  ;;  %v5595_v17 = vrot.slane %v16237_v23, %v14595_v53 }
 0x421   :  { %5511 = vmatprep.subr.bf16.mxu0 %v19646_v31  ;;  %v5932_v23 = vsel %vm193_vm3, %v5851_v40, %v5862_v50  ;;  %v5895_v50 = vrot.slane %v16487_v42, %v14597_v27  ;;  %v13334_v40 = vld [vmem:[%s19524_s3 + $0x608] sm:$0xff]  }
 0x423   :  { %5795 = vmatpush1.bf16.msra.mxu1 %v13317_v28  ;;  %v16464_v28 = vld [vmem:[#allocation2 + $0xb6] ss:$8 sm:$0x3] }
 0x424   :  { %5796 = vmatprep.subr.bf16.mxu1 %v19646_v31  ;;  %5512 = vmatpush1.bf16.msra.mxu0 %v13318_v0  ;;  %v16466_v0 = vld [vmem:[#allocation2 + $0xb7] ss:$8 sm:$0x3] }
 0x425   :  { %5513 = vmatprep.subr.bf16.mxu0 %v19646_v31  ;;  %v6158_v30 = vrot.slane %v16466_v0, %v14597_v27 }
 0x427   :  { %5797 = vmatpush1.bf16.msra.mxu1 %v13319_v38  ;;  %v13331_v38 = vld [vmem:[%s19524_s3 + $0x670] sm:$0xff]  }
 0x428   :  { %5798 = vmatprep.subr.bf16.mxu1 %v19646_v31  ;;  %5514 = vmatpush1.bf16.msra.mxu0 %v13320_v37  ;;  %v5365_v37 = vsel %vm1944_vm5, %v5363_v11, %v5310_v10  ;;  %v5617_v10 = vrot.slane %v16275_v3, %v14595_v53  ;;  %v16526_v11 = vld [vmem:[#allocation2 + $0x1f6] ss:$8 sm:$0x3] }
 0x429   :  { %5515 = vmatprep.subr.bf16.mxu0 %v19646_v31 }
 0x42b   :  { %5799 = vmatpush1.bf16.msra.mxu1 %v13321_v62  ;;  %v16478_v62 = vld [vmem:[#allocation2 + $0x107] ss:$8 sm:$0x3] }
 0x42c   :  { %5800 = vmatprep.subr.bf16.mxu1 %v19646_v31  ;;  %5516 = vmatpush1.bf16.msra.mxu0 %v13322_v24  ;;  %v6136_v24 = vrot.slane %v16450_v39, %v14597_v27 }
 0x42d   :  { %5517 = vmatprep.subr.bf16.mxu0 %v19646_v31 }
 0x42f   :  { %5801 = vmatpush1.bf16.msra.mxu1 %v13323_v29  ;;  %v13332_v29 = vld [vmem:[%s19524_s3 + $0x600] sm:$0xff]  }
 0x430   :  { %5802 = vmatprep.subr.bf16.mxu1 %v19646_v31  ;;  %5518 = vmatpush1.bf16.msra.mxu0 %v13324_v61  ;;  %v5646_v61 = vsel %vm193_vm3, %v5562_v49, %v5573_v19  ;;  %v16519_v49 = vld [vmem:[#allocation2 + $0x1a7] ss:$8 sm:$0x3] }
 0x431   :  { %5519 = vmatprep.subr.bf16.mxu0 %v19646_v31  ;;  %v5648_v19 = vsel %vm1941_vm4, %v5646_v61, %v5584_v58  ;;  %v5906_v58 = vrot.slane %v16497_v57, %v14597_v27 }
 0x433   :  { %5803 = vmatpush1.bf16.msra.mxu1 %v13325_v36  ;;  %v5884_v36 = vrot.slane %v16455_v54, %v14597_v27 }
 0x434   :  { %5804 = vmatprep.subr.bf16.mxu1 %v19646_v31  ;;  %5520 = vmatpush1.bf16.msra.mxu0 %v13326_v34  ;;  %v5343_v34 = vrot.slane %v16270_v46, %v14595_v53  ;;  %v6169_v46 = vrot.slane %v16478_v62, %v14597_v27 }
 0x435   :  { %5521 = vmatprep.subr.bf16.mxu0 %v19646_v31 }
 0x437   :  { %5805 = vmatpush1.bf16.msra.mxu1 %v13327_v26  ;;  %v5606_v26 = vrot.slane %v16263_v7, %v14595_v53  ;;  %v6217_v7 = vsel %vm193_vm3, %v6136_v24, %v6147_v9 }
 0x438   :  { %5806 = vmatprep.subr.bf16.mxu1 %v19646_v31  ;;  %5522 = vmatpush1.bf16.msra.mxu0 %v13328_v4  ;;  %v5873_v4 = vrot.slane %v16464_v28, %v14597_v27  ;;  %v6219_v24 = vsel %vm1941_vm4, %v6217_v7, %v6158_v30  ;;  %v16556_v7 = vld [vmem:[#allocation2 + $0x247] ss:$8 sm:$0x3] }
 0x439   :  { %5523 = vmatprep.subr.bf16.mxu0 %v19646_v31 }
 0x43a   :  { %v5934_v3 = vsel %vm1941_vm4, %v5932_v23, %v5873_v4  ;;  %v16544_v23 = vld [vmem:[#allocation2 + $0x1f7] ss:$8 sm:$0x3]  ;;  %v13335_v4 = vld [vmem:[%s19524_s3 + $0x680] sm:$0xff]  }
 0x43b   :  { %5807 = vmatpush1.bf16.msra.mxu1 %v13329_v47  ;;  %v5367_v47 = vsel %vm1947_vm6, %v5365_v37, %v5321_v20  ;;  %v5650_v20 = vsel %vm1944_vm5, %v5648_v19, %v5595_v17  ;;  %v5936_v9 = vsel %vm1944_vm5, %v5934_v3, %v5884_v36  ;;  %v16536_v37 = vld [vmem:[#allocation2 + $0x246] ss:$8 sm:$0x3]  ;;  %v6180_v17 = vrot.slane %v16506_v16, %v14597_v27 }
 0x43c   :  { %5808 = vmatprep.subr.bf16.mxu1 %v19646_v31  ;;  %5524 = vmatpush1.bf16.msra.mxu0 %v13330_v18  ;;  %v13333_v18 = vld [vmem:[%s19524_s3 + $0x678] sm:$0xff]   ;;  %v5369_v43 = vsel %vm1950_vm7, %v5367_v47, %v5332_v45  ;;  %v5628_v45 = vrot.slane %v16293_v35, %v14595_v53  ;;  %v5639_v36 = vrot.slane %v16309_v56, %v14595_v53 }
 0x43d   :  { %5525 = vmatprep.subr.bf16.mxu0 %v19646_v31  ;;  %v5371_v61 = vsel %vm1953_vm8, %v5369_v43, %v5343_v34  ;;  %v6221_v35 = vsel %vm1944_vm5, %v6219_v24, %v6169_v46  ;;  %v5652_v30 = vsel %vm1947_vm6, %v5650_v20, %v5606_v26  ;;  %v5917_v34 = vrot.slane %v16526_v11, %v14597_v27  ;;  %v13336_v46 = vld [vmem:[%s19524_s3 + $0x610] sm:$0xff]  }
 0x43e   :  { %v5938_v56 = vsel %vm1947_vm6, %v5936_v9, %v5895_v50  ;;  %v5928_v43 = vrot.slane %v16536_v37, %v14597_v27  ;;  %v6202_v3 = vrot.slane %v16544_v23, %v14597_v27  ;;  %v6213_v20 = vrot.slane %v16556_v7, %v14597_v27 }
 0x43f   :  { %5809 = vmatpush1.bf16.msra.mxu1 %v13331_v38  ;;  %v5354_v38 = vrot.slane %v16283_v32, %v14595_v53  ;;  %v6191_v32 = vrot.slane %v16519_v49, %v14597_v27  ;;  %v5940_v26 = vsel %vm1950_vm7, %v5938_v56, %v5906_v58 }
 0x440   :  { %5810 = vmatprep.subr.bf16.mxu1 %v19646_v31  ;;  %5526 = vmatpush1.bf16.msra.mxu0 %v13332_v29  ;;  %v5942_v33 = vsel %vm1953_vm8, %v5940_v26, %v5917_v34  ;;  %v19698_v34 = vmax.f32 %v15765_v59, 0.0 }
 0x441   :  { %5527 = vmatprep.subr.bf16.mxu0 %v19646_v31  ;;  %v5944_v24 = vsel %vm98_vm0, %v5942_v33, %v5928_v43 }
 0x442   :  { %v188_v29 = vpop.xlane.xlu0 %187 }
 0x443   :  { %5811 = vmatpush1.bf16.msra.mxu1 %v13333_v18  ;;  %v203_v47 = vmul.f32 0.004166667, %v188_v29  ;;  %v5654_v18 = vsel %vm1950_vm7, %v5652_v30, %v5617_v10  ;;  %v6223_v10 = vsel %vm1947_vm6, %v6221_v35, %v6180_v17  ;;  %v13338_v17 = vld [vmem:[%s19524_s3 + $0x690] sm:$0xff]  }
 0x444   :  { %5812 = vmatprep.subr.bf16.mxu1 %v19646_v31  ;;  %5528 = vmatpush1.bf16.msra.mxu0 %v13334_v40  ;;  %v5373_v40 = vsel %vm98_vm0, %v5371_v61, %v5354_v38  ;;  %v6225_v58 = vsel %vm1950_vm7, %v6223_v10, %v6191_v32  ;;  %v5656_v38 = vsel %vm1953_vm8, %v5654_v18, %v5628_v45  ;;  %v19697_v45 = vmax.f32 %v15762_v2, 0.0  ;;  %v13339_v18 = vld [vmem:[%s19524_s3 + $0x708] sm:$0xff]   ;;  %v13340_v2 = vld [vmem:[%s19524_s3 + $0x698] sm:$0xff]  }
 0x445   :  { %5529 = vmatprep.subr.bf16.mxu0 %v19646_v31  ;;  %v16569_v19 = vsub.f32 %v170_v25, %v203_v47  ;;  %v16573_v50 = vsub.f32 %v171_v21, %v203_v47  ;;  %v5375_v61 = vpack.c.bf16 %v5373_v40, %v5373_v40  ;;  %v5658_v32 = vsel %vm98_vm0, %v5656_v38, %v5639_v36  ;;  %v13341_v38 = vld [vmem:[%s19524_s3 + $0x710] sm:$0xff]  }
 0x446   :  { %v6227_v35 = vsel %vm1953_vm8, %v6225_v58, %v6202_v3  ;;  %v5946_v36 = vpack.c.bf16 %v5944_v24, %v5944_v24  ;;  %v5660_v26 = vpack.c.bf16 %v5658_v32, %v5658_v32  ;;  %v13342_v32 = vld [vmem:[%s19524_s3 + $0x6a0] sm:$0xff]  }
 0x447   :  { %5813 = vmatpush1.bf16.msra.mxu1 %v13335_v4  ;;  %v636_v25 = vpop.xlane.xlu0 %635  ;;  %v220_v21 = vmul.f32 %v16569_v19, %v16569_v19  ;;  %v221_v9 = vmul.f32 %v16573_v50, %v16573_v50  ;;  %v6229_v47 = vsel %vm98_vm0, %v6227_v35, %v6213_v20 }
 0x448   :  { %5814 = vmatprep.subr.bf16.mxu1 %v19646_v31  ;;  %5530 = vmatpush1.bf16.msra.mxu0 %v13336_v46  ;;  %v648_v29 = vmul.f32 0.004166667, %v636_v25  ;;  %v6231_v20 = vpack.c.bf16 %v6229_v47, %v6229_v47  ;;  %v19700_v25 = vmax.f32 %v15801_v15, 0.0 }
 0x449   :  { %6071 = vmatprep.subr.bf16.mxu0 %v19646_v31  ;;  %v234_v4 = vsel %vm176_vm2, %v221_v9, 0.0 }
 0x44a   :  { %v16603_v30 = vsub.f32 %v19697_v45, %v648_v29  ;;  %v16607_v56 = vsub.f32 %v19698_v34, %v648_v29  ;;  %v235_v46 = vadd.f32 %v234_v4, %v220_v21  ;;  %v19703_v34 = vmax.f32 %v15832_v52, 0.0 }
 0x44b   :  { %5815 = vmatpush1.bf16.msra.mxu1 %v13337_v60  ;;  %5534 = vmatmul.mubr.bf16.vlgmr.msra.gmra.mrb[60].mxu0 %v5375_v61  ;;  %v859_v43 = vpop.xlane.xlu0 %858  ;;  %v19699_v60 = vmax.f32 %v15798_v5, 0.0  ;;  %v19702_v5 = vmax.f32 %v15808_v22, 0.0 }
 0x44c   :  { %6356 = vmatprep.subr.bf16.mxu1 %v19646_v31  ;;  %6072 = vmatpush1.bf16.msra.mxu0 %v13338_v17  ;;  %v413_v59 = vpop.xlane.xlu1 %412  ;;  %v871_v3 = vmul.f32 0.004166667, %v859_v43  ;;  %v665_v10 = vmul.f32 %v16603_v30, %v16603_v30  ;;  %v666_v40 = vmul.f32 %v16607_v56, %v16607_v56  ;;  %v19701_v17 = vmax.f32 %v15805_v12, 0.0 }
 0x44d   :  { %12289 = vmatprep.mubr.msk.bf16.mxu0 %vm176_vm2, %v5946_v36  ;;  %6073 = vmatprep.subr.bf16.mxu0 %v19646_v31  ;;  %v425_v58 = vmul.f32 0.004166667, %v413_v59  ;;  %v13343_v36 = vld [vmem:[%s19524_s3 + $0x718] sm:$0xff]  }
 0x44e   :  { %5819 = vmatmul.mubr.bf16.vlgmr.msra.gmra.mrb[84].mxu1 %v5660_v26  ;;  %v16624_v33 = vsub.f32 %v19699_v60, %v871_v3  ;;  %v16628_v21 = vsub.f32 %v19700_v25, %v871_v3  ;;  %236 = vadd.xlane.f32.xlu1 %v235_v46  ;;  %v679_v9 = vsel %vm176_vm2, %v666_v40, 0.0  ;;  %v19705_v26 = vmax.f32 %v15843_v48, 0.0 }
 0x44f   :  { %6357 = vmatpush1.bf16.msra.mxu1 %v13339_v18  ;;  %12335 = vmatprep.mubr.msk.bf16.mxu1 %vm176_vm2, %v6231_v20  ;;  %v16637_v24 = vsub.f32 %v19701_v17, %v425_v58  ;;  %v16641_v29 = vsub.f32 %v19702_v5, %v425_v58  ;;  %v1305_v15 = vpop.xlane.xlu0 %1304  ;;  %v680_v61 = vadd.f32 %v679_v9, %v665_v10  ;;  %v19704_v18 = vmax.f32 %v15840_v1, 0.0  ;;  %v13344_v1 = vld [vmem:[%s19524_s3 + $0x6a8] sm:$0xff]  }
 0x450   :  { %6358 = vmatprep.subr.bf16.mxu1 %v19646_v31  ;;  %6074 = vmatpush1.bf16.msra.mxu0 %v13340_v2  ;;  %v1082_v35 = vpop.xlane.xlu1 %1081  ;;  %v1317_v4 = vmul.f32 0.004166667, %v1305_v15  ;;  %v889_v12 = vmul.f32 %v16628_v21, %v16628_v21  ;;  %v888_v52 = vmul.f32 %v16624_v33, %v16624_v33  ;;  %v19706_v10 = vmax.f32 %v15829_v6, 0.0  ;;  %v13345_v15 = vld [vmem:[%s19524_s3 + $0x720] sm:$0xff]  }
 0x451   :  { %6075 = vmatprep.subr.bf16.mxu0 %v19646_v31  ;;  %v1094_v47 = vmul.f32 0.004166667, %v1082_v35  ;;  %v442_v22 = vmul.f32 %v16637_v24, %v16637_v24  ;;  %v443_v45 = vmul.f32 %v16641_v29, %v16641_v29  ;;  %v19707_v17 = vmax.f32 %v15870_v44, 0.0 }
 0x452   :  { %v16656_v46 = vsub.f32 %v19703_v34, %v1317_v4  ;;  %681 = vadd.xlane.f32.xlu1 %v680_v61  ;;  %v16675_v40 = vsub.f32 %v19706_v10, %v1317_v4  ;;  %v902_v60 = vsel %vm176_vm2, %v889_v12, 0.0  ;;  %v19708_v61 = vmax.f32 %v15877_v55, 0.0  ;;  %v13346_v55 = vld [vmem:[%s19524_s3 + $0x6b0] sm:$0xff]  }
 0x453   :  { %6359 = vmatpush1.bf16.msra.mxu1 %v13341_v38  ;;  %v16663_v43 = vsub.f32 %v19704_v18, %v1094_v47  ;;  %v16667_v2 = vsub.f32 %v19705_v26, %v1094_v47  ;;  %v1751_v59 = vpop.xlane.xlu0 %1750  ;;  %v456_v3 = vsel %vm176_vm2, %v443_v45, 0.0  ;;  %v19709_v35 = vmax.f32 %v15880_v13, 0.0  ;;  %v13347_v26 = vld [vmem:[%s19524_s3 + $0x728] sm:$0xff]  }
 0x454   :  { %6360 = vmatprep.subr.bf16.mxu1 %v19646_v31  ;;  %6076 = vmatpush1.bf16.msra.mxu0 %v13342_v32  ;;  %v1528_v48 = vpop.xlane.xlu1 %1527  ;;  %v1763_v20 = vmul.f32 0.004166667, %v1751_v59  ;;  %v457_v58 = vadd.f32 %v456_v3, %v442_v22  ;;  %v1335_v38 = vmul.f32 %v16656_v46, %v16656_v46  ;;  %v903_v47 = vadd.f32 %v902_v60, %v888_v52  ;;  %v13348_v3 = vld [vmem:[%s19524_s3 + $0x6b8] sm:$0xff]  }
 0x455   :  { %6077 = vmatprep.subr.bf16.mxu0 %v19646_v31  ;;  %v1540_v25 = vmul.f32 0.004166667, %v1528_v48  ;;  %v1111_v9 = vmul.f32 %v16663_v43, %v16663_v43  ;;  %v1112_v6 = vmul.f32 %v16667_v2, %v16667_v2  ;;  %v19710_v44 = vmax.f32 %v15867_v63, 0.0 }
 0x456   :  { %v16690_v5 = vsub.f32 %v19707_v17, %v1763_v20  ;;  %458 = vadd.xlane.f32.xlu0 %v457_v58  ;;  %v1334_v13 = vmul.f32 %v16675_v40, %v16675_v40  ;;  %v1348_v63 = vsel %vm176_vm2, %v1335_v38, 0.0  ;;  %v13350_v58 = vld [vmem:[%s19524_s3 + $0x6c0] sm:$0xff]   ;;  %v13354_v38 = vld [vmem:[%s19524_s3 + $0x6d0] sm:$0xff]   ;;  %v13355_v17 = vld [vmem:[%s19524_s3 + $0x748] sm:$0xff]  }
 0x457   :  { %6361 = vmatpush1.bf16.msra.mxu1 %v13343_v36  ;;  %v16697_v32 = vsub.f32 %v19708_v61, %v1540_v25  ;;  %v16701_v4 = vsub.f32 %v19709_v35, %v1540_v25  ;;  %v1125_v12 = vsel %vm176_vm2, %v1112_v6, 0.0  ;;  %v16707_v22 = vsub.f32 %v19710_v44, %v1763_v20  ;;  %v13349_v20 = vld [vmem:[%s19524_s3 + $0x730] sm:$0xff]   ;;  %v13351_v25 = vld [vmem:[%s19524_s3 + $0x738] sm:$0xff]   ;;  %v13353_v6 = vld [vmem:[%s19524_s3 + $0x740] sm:$0xff]  }
 0x458   :  { %6362 = vmatprep.subr.bf16.mxu1 %v19646_v31  ;;  %6078 = vmatpush1.bf16.msra.mxu0 %v13344_v1  ;;  %v1126_v45 = vadd.f32 %v1125_v12, %v1111_v9  ;;  %v1781_v18 = vmul.f32 %v16690_v5, %v16690_v5  ;;  %v1349_v10 = vadd.f32 %v1348_v63, %v1334_v13  ;;  %v13352_v9 = vld [vmem:[%s19524_s3 + $0x6c8] sm:$0xff]   ;;  %v16768_v61 = vld [vmem:[%s19523_s2 + $0x18] sm:$0xff]  ;;  %v13357_v35 = vld [vmem:[%s19524_s3 + $0x750] sm:$0xff]  }
 0x459   :  { %6079 = vmatprep.subr.bf16.mxu0 %v19646_v31  ;;  %v1557_v34 = vmul.f32 %v16697_v32, %v16697_v32  ;;  %v1558_v36 = vmul.f32 %v16701_v4, %v16701_v4  ;;  %v1780_v1 = vmul.f32 %v16707_v22, %v16707_v22  ;;  %v13358_v12 = vld [vmem:[%s19524_s3 + $0x6e0] sm:$0xff]   ;;  %v13359_v44 = vld [vmem:[%s19524_s3 + $0x758] sm:$0xff]   ;;  %v5880_v13 = vrot.slane %v16455_v54, %v14595_v53 }
 0x45a   :  { %1127 = vadd.xlane.f32.xlu1 %v1126_v45  ;;  %904 = vadd.xlane.f32.xlu0 %v903_v47  ;;  %v1794_v48 = vsel %vm176_vm2, %v1781_v18, 0.0  ;;  %v5858_v47 = vrot.slane %v16428_v41, %v14595_v53  ;;  %v5847_v45 = vrot.slane %v16430_v14, %v14595_v53  ;;  %v6143_v41 = vrot.slane %v16438_v51, %v14595_v53  ;;  %v13362_v51 = vld [vmem:[%s19524_s3 + $0x6f0] sm:$0xff]  }
 0x45b   :  { %6363 = vmatpush1.bf16.msra.mxu1 %v13345_v15  ;;  %v1571_v59 = vsel %vm176_vm2, %v1558_v36, 0.0  ;;  %v1795_v60 = vadd.f32 %v1794_v48, %v1780_v1  ;;  %v13356_v15 = vld [vmem:[%s19524_s3 + $0x6d8] sm:$0xff]   ;;  %v13361_v36 = vld [vmem:[%s19524_s3 + $0x760] sm:$0xff]   ;;  %v5869_v14 = vrot.slane %v16464_v28, %v14595_v53  ;;  %v6132_v63 = vrot.slane %v16450_v39, %v14595_v53 }
 0x45c   :  { %6364 = vmatprep.subr.bf16.mxu1 %v19646_v31  ;;  %6080 = vmatpush1.bf16.msra.mxu0 %v13346_v55  ;;  %v1572_v52 = vadd.f32 %v1571_v59, %v1557_v34  ;;  %v13360_v55 = vld [vmem:[%s19524_s3 + $0x6e8] sm:$0xff]   ;;  %v5931_v34 = vsel %vm193_vm3, %v5847_v45, %v5858_v47  ;;  %v5891_v54 = vrot.slane %v16487_v42, %v14595_v53  ;;  %v13371_v47 = vld [vmem:[%s19524_s3 + $0x800] sm:$0xff]   ;;  %v13374_v45 = vld [vmem:[%s19524_s3 + $0x798] sm:$0xff]  }
 0x45d   :  { %6081 = vmatprep.subr.bf16.mxu0 %v19646_v31  ;;  %v5933_v18 = vsel %vm1941_vm4, %v5931_v34, %v5869_v14  ;;  %v6165_v28 = vrot.slane %v16478_v62, %v14595_v53  ;;  %v6216_v39 = vsel %vm193_vm3, %v6132_v63, %v6143_v41  ;;  %v13363_v42 = vld [vmem:[%s19524_s3 + $0x768] sm:$0xff]   ;;  %v13364_v62 = vld [vmem:[%s19524_s3 + $0x6f8] sm:$0xff]   ;;  %v6187_v1 = vrot.slane %v16519_v49, %v14595_v53  ;;  %v13366_v49 = vld [vmem:[%s19524_s3 + $0x700] sm:$0xff]  }
 0x45e   :  { %1573 = vadd.xlane.f32.xlu1 %v1572_v52  ;;  %1350 = vadd.xlane.f32.xlu0 %v1349_v10  ;;  %v5935_v59 = vsel %vm1944_vm5, %v5933_v18, %v5880_v13  ;;  %v13375_v41 = vld [vmem:[%s19524_s3 + $0x810] sm:$0xff]   ;;  %v13376_v13 = vld [vmem:[%s19524_s3 + $0x7a0] sm:$0xff]   ;;  %v13377_v34 = vld [vmem:[%s19524_s3 + $0x818] sm:$0xff]  }
 0x45f   :  { %6365 = vmatpush1.bf16.msra.mxu1 %v13347_v26  ;;  %v5902_v26 = vrot.slane %v16497_v57, %v14595_v53  ;;  %v5913_v57 = vrot.slane %v16526_v11, %v14595_v53  ;;  %v5937_v10 = vsel %vm1947_vm6, %v5935_v59, %v5891_v54  ;;  %v13379_v14 = vld [vmem:[%s19524_s3 + $0x820] sm:$0xff]   ;;  %v13380_v63 = vld [vmem:[%s19524_s3 + $0x7b0] sm:$0xff]   ;;  %v13382_v54 = vld [vmem:[%s19524_s3 + $0x7b8] sm:$0xff]  }
 0x460   :  { %6366 = vmatprep.subr.bf16.mxu1 %v19646_v31  ;;  %6082 = vmatpush1.bf16.msra.mxu0 %v13348_v3  ;;  %v6154_v3 = vrot.slane %v16466_v0, %v14595_v53  ;;  %v6176_v0 = vrot.slane %v16506_v16, %v14595_v53  ;;  %v13365_v16 = vld [vmem:[%s19524_s3 + $0x770] sm:$0xff]  }
 0x461   :  { %6083 = vmatprep.subr.bf16.mxu0 %v19646_v31  ;;  %v5939_v11 = vsel %vm1950_vm7, %v5937_v10, %v5902_v26  ;;  %v13383_v18 = vld [vmem:[%s19524_s3 + $0x830] sm:$0xff]  }
 0x462   :  { %1796 = vadd.xlane.f32.xlu0 %v1795_v60  ;;  %v6218_v52 = vsel %vm1941_vm4, %v6216_v39, %v6154_v3  ;;  %v5941_v60 = vsel %vm1953_vm8, %v5939_v11, %v5913_v57  ;;  %v13386_v57 = vld [vmem:[%s19524_s3 + $0x7c8] sm:$0xff]  }
 0x463   :  { %6367 = vmatpush1.bf16.msra.mxu1 %v13349_v20  ;;  %v6220_v48 = vsel %vm1944_vm5, %v6218_v52, %v6165_v28  ;;  %v5924_v20 = vrot.slane %v16536_v37, %v14595_v53  ;;  %v13384_v28 = vld [vmem:[%s19524_s3 + $0x7c0] sm:$0xff]   ;;  %v13389_v11 = vld [vmem:[%s19524_s3 + $0x848] sm:$0xff]  }
 0x464   :  { %6368 = vmatprep.subr.bf16.mxu1 %v19646_v31  ;;  %6084 = vmatpush1.bf16.msra.mxu0 %v13350_v58  ;;  %v6198_v58 = vrot.slane %v16544_v23, %v14595_v53  ;;  %v6222_v37 = vsel %vm1947_vm6, %v6220_v48, %v6176_v0  ;;  %v13367_v23 = vld [vmem:[%s19524_s3 + $0x778] sm:$0xff]  }
 0x465   :  { %6085 = vmatprep.subr.bf16.mxu0 %v19646_v31 }
 0x467   :  { %6369 = vmatpush1.bf16.msra.mxu1 %v13351_v25  ;;  %v6209_v25 = vrot.slane %v16556_v7, %v14595_v53 }
 0x468   :  { %6370 = vmatprep.subr.bf16.mxu1 %v19646_v31  ;;  %6086 = vmatpush1.bf16.msra.mxu0 %v13352_v9  ;;  %v6224_v9 = vsel %vm1950_vm7, %v6222_v37, %v6187_v1  ;;  %v13387_v1 = vld [vmem:[%s19524_s3 + $0x840] sm:$0xff]   ;;  %v13393_v37 = vld [vmem:[%s19524_s3 + $0x858] sm:$0xff]  }
 0x469   :  { %6087 = vmatprep.subr.bf16.mxu0 %v19646_v31 }
 0x46b   :  { %6371 = vmatpush1.bf16.msra.mxu1 %v13353_v6  ;;  %v5943_v6 = vsel %vm98_vm0, %v5941_v60, %v5924_v20  ;;  %v13388_v20 = vld [vmem:[%s19524_s3 + $0x7d0] sm:$0xff]   ;;  %v13394_v60 = vld [vmem:[%s19524_s3 + $0x7e8] sm:$0xff]  }
 0x46c   :  { %6372 = vmatprep.subr.bf16.mxu1 %v19646_v31  ;;  %6088 = vmatpush1.bf16.msra.mxu0 %v13354_v38  ;;  %v6226_v38 = vsel %vm1953_vm8, %v6224_v9, %v6198_v58  ;;  %v13392_v58 = vld [vmem:[%s19524_s3 + $0x7e0] sm:$0xff]   ;;  %v13396_v9 = vld [vmem:[%s19524_s3 + $0x7f0] sm:$0xff]  }
 0x46d   :  { %6089 = vmatprep.subr.bf16.mxu0 %v19646_v31  ;;  %v6228_v7 = vsel %vm98_vm0, %v6226_v38, %v6209_v25  ;;  %v13395_v25 = vld [vmem:[%s19524_s3 + $0x860] sm:$0xff]  }
 0x46f   :  { %6373 = vmatpush1.bf16.msra.mxu1 %v13355_v17  ;;  %67 = vperm.xlu1 %13124, %v16768_v61   ;;  %v13368_v17 = vld [vmem:[%s19524_s3 + $0x780] sm:$0xff]  }
 0x470   :  { %6374 = vmatprep.subr.bf16.mxu1 %v19646_v31  ;;  %6090 = vmatpush1.bf16.msra.mxu0 %v13356_v15  ;;  %v5945_v15 = vpack.c.bf16 %v5943_v6, %v5943_v6  ;;  %v13397_v6 = vld [vmem:[%s19524_s3 + $0x868] sm:$0xff]  }
 0x471   :  { %6091 = vmatprep.subr.bf16.mxu0 %v19646_v31 }
 0x473   :  { %6375 = vmatpush1.bf16.msra.mxu1 %v13357_v35  ;;  %540 = vperm.xlu1 %13124, %v16768_v61   ;;  %v6230_v35 = vpack.c.bf16 %v6228_v7, %v6228_v7 }
 0x474   :  { %6376 = vmatprep.subr.bf16.mxu1 %v19646_v31  ;;  %6092 = vmatpush1.bf16.msra.mxu0 %v13358_v12  ;;  %v13370_v12 = vld [vmem:[%s19524_s3 + $0x788] sm:$0xff]  }
 0x475   :  { %6093 = vmatprep.subr.bf16.mxu0 %v19646_v31 }
 0x477   :  { %6377 = vmatpush1.bf16.msra.mxu1 %v13359_v44  ;;  %763 = vperm.xlu1 %13124, %v16768_v61   ;;  %v13372_v44 = vld [vmem:[%s19524_s3 + $0x790] sm:$0xff]  }
 0x478   :  { %6378 = vmatprep.subr.bf16.mxu1 %v19646_v31  ;;  %6094 = vmatpush1.bf16.msra.mxu0 %v13360_v55  ;;  %v13373_v55 = vld [vmem:[%s19524_s3 + $0x808] sm:$0xff]  }
 0x479   :  { %6095 = vmatprep.subr.bf16.mxu0 %v19646_v31  ;;  %317 = vperm.xlu0 %13123, %v16768_v61  }
 0x47b   :  { %6379 = vmatpush1.bf16.msra.mxu1 %v13361_v36  ;;  %1209 = vperm.xlu1 %13124, %v16768_v61   ;;  %v13378_v36 = vld [vmem:[%s19524_s3 + $0x7a8] sm:$0xff]  }
 0x47c   :  { %6380 = vmatprep.subr.bf16.mxu1 %v19646_v31  ;;  %6096 = vmatpush1.bf16.msra.mxu0 %v13362_v51  ;;  %v13381_v51 = vld [vmem:[%s19524_s3 + $0x828] sm:$0xff]  }
 0x47d   :  { %6097 = vmatprep.subr.bf16.mxu0 %v19646_v31  ;;  %986 = vperm.xlu0 %13123, %v16768_v61  }
 0x47f   :  { %6381 = vmatpush1.bf16.msra.mxu1 %v13363_v42  ;;  %1655 = vperm.xlu1 %13124, %v16768_v61   ;;  %v13385_v42 = vld [vmem:[%s19524_s3 + $0x838] sm:$0xff]  }
 0x480   :  { %6382 = vmatprep.subr.bf16.mxu1 %v19646_v31  ;;  %6098 = vmatpush1.bf16.msra.mxu0 %v13364_v62 }
 0x481   :  { %6099 = vmatprep.subr.bf16.mxu0 %v19646_v31  ;;  %1432 = vperm.xlu0 %13123, %v16768_v61   ;;  %v13369_v61 = vld [vmem:[%s19524_s3 + $0x7f8] sm:$0xff]  }
 0x483   :  { %6383 = vmatpush1.bf16.msra.mxu1 %v13365_v16  ;;  %v13390_v16 = vld [vmem:[%s19524_s3 + $0x7d8] sm:$0xff]  }
 0x484   :  { %6384 = vmatprep.subr.bf16.mxu1 %v19646_v31  ;;  %6100 = vmatpush1.bf16.msra.mxu0 %v13366_v49  ;;  %v13391_v49 = vld [vmem:[%s19524_s3 + $0x850] sm:$0xff]  }
 0x485   :  { %6641 = vmatprep.subr.bf16.mxu0 %v19646_v31 }
 0x487   :  { %6385 = vmatpush1.bf16.msra.mxu1 %v13367_v23  ;;  %6104 = vmatmul.mubr.bf16.vlgmr.msra.gmra.mrb[64].mxu0 %v5945_v15 }
 0x488   :  { %6926 = vmatprep.subr.bf16.mxu1 %v19646_v31  ;;  %6642 = vmatpush1.bf16.msra.mxu0 %v13368_v17 }
 0x489   :  { %6643 = vmatprep.subr.bf16.mxu0 %v19646_v31 }
 0x48a   :  { %6389 = vmatmul.mubr.bf16.vlgmr.msra.gmra.mrb[88].mxu1 %v6230_v35 }
 0x48b   :  { %6927 = vmatpush1.bf16.msra.mxu1 %v13369_v61 }
 0x48c   :  { %6928 = vmatprep.subr.bf16.mxu1 %v19646_v31  ;;  %6644 = vmatpush1.bf16.msra.mxu0 %v13370_v12 }
 0x48d   :  { %6645 = vmatprep.subr.bf16.mxu0 %v19646_v31 }
 0x48f   :  { %6929 = vmatpush1.bf16.msra.mxu1 %v13371_v47 }
 0x490   :  { %6930 = vmatprep.subr.bf16.mxu1 %v19646_v31  ;;  %6646 = vmatpush1.bf16.msra.mxu0 %v13372_v44 }
 0x491   :  { %6647 = vmatprep.subr.bf16.mxu0 %v19646_v31 }
 0x493   :  { %6931 = vmatpush1.bf16.msra.mxu1 %v13373_v55 }
 0x494   :  { %6932 = vmatprep.subr.bf16.mxu1 %v19646_v31  ;;  %6648 = vmatpush1.bf16.msra.mxu0 %v13374_v45 }
 0x495   :  { %6649 = vmatprep.subr.bf16.mxu0 %v19646_v31 }
 0x497   :  { %6933 = vmatpush1.bf16.msra.mxu1 %v13375_v41 }
 0x498   :  { %6934 = vmatprep.subr.bf16.mxu1 %v19646_v31  ;;  %6650 = vmatpush1.bf16.msra.mxu0 %v13376_v13 }
 0x499   :  { %6651 = vmatprep.subr.bf16.mxu0 %v19646_v31 }
 0x49b   :  { %6935 = vmatpush1.bf16.msra.mxu1 %v13377_v34 }
 0x49c   :  { %6936 = vmatprep.subr.bf16.mxu1 %v19646_v31  ;;  %6652 = vmatpush1.bf16.msra.mxu0 %v13378_v36 }
 0x49d   :  { %6653 = vmatprep.subr.bf16.mxu0 %v19646_v31 }
 0x49f   :  { %6937 = vmatpush1.bf16.msra.mxu1 %v13379_v14 }
 0x4a0   :  { %6938 = vmatprep.subr.bf16.mxu1 %v19646_v31  ;;  %6654 = vmatpush1.bf16.msra.mxu0 %v13380_v63 }
 0x4a1   :  { %6655 = vmatprep.subr.bf16.mxu0 %v19646_v31 }
 0x4a3   :  { %6939 = vmatpush1.bf16.msra.mxu1 %v13381_v51 }
 0x4a4   :  { %6940 = vmatprep.subr.bf16.mxu1 %v19646_v31  ;;  %6656 = vmatpush1.bf16.msra.mxu0 %v13382_v54 }
 0x4a5   :  { %6657 = vmatprep.subr.bf16.mxu0 %v19646_v31 }
 0x4a6   :  { %v4395_v39 = vpop.f32.mrb[52].mxu0 }
 0x4a7   :  { %v4401_v26 = vadd.f32 %v4395_v39, %v16361_v8  ;;  %v4397_v59 = vpop.f32.mrb[53].mxu0  ;;  %6941 = vmatpush1.bf16.msra.mxu1 %v13383_v18 }
 0x4a8   :  { %v4398_v3 = vpop.f32.mrb[54].mxu0  ;;  %6942 = vmatprep.subr.bf16.mxu1 %v19646_v31  ;;  %6658 = vmatpush1.bf16.msra.mxu0 %v13384_v28 }
 0x4a9   :  { %v4399_v62 = vpop.f32.mrb[55].mxu0  ;;  %v4680_v0 = vpop.f32.mrb[76].mxu1  ;;  %6659 = vmatprep.subr.bf16.mxu0 %v19646_v31 }
 0x4aa   :  { %v4686_v52 = vadd.f32 %v4680_v0, %v4401_v26  ;;  %v4682_v8 = vpop.f32.mrb[77].mxu1 }
 0x4ab   :  { %v4683_v10 = vpop.f32.mrb[78].mxu1  ;;  %6943 = vmatpush1.bf16.msra.mxu1 %v13385_v42 }
 0x4ac   :  { %v4684_v48 = vpop.f32.mrb[79].mxu1  ;;  %6944 = vmatprep.subr.bf16.mxu1 %v19646_v31  ;;  %6660 = vmatpush1.bf16.msra.mxu0 %v13386_v57 }
 0x4ad   :  { %6661 = vmatprep.subr.bf16.mxu0 %v19646_v31 }
 0x4af   :  { %6945 = vmatpush1.bf16.msra.mxu1 %v13387_v1 }
 0x4b0   :  { %6946 = vmatprep.subr.bf16.mxu1 %v19646_v31  ;;  %6662 = vmatpush1.bf16.msra.mxu0 %v13388_v20 }
 0x4b1   :  { %6663 = vmatprep.subr.bf16.mxu0 %v19646_v31 }
 0x4b3   :  { %6947 = vmatpush1.bf16.msra.mxu1 %v13389_v11 }
 0x4b4   :  { %6948 = vmatprep.subr.bf16.mxu1 %v19646_v31  ;;  %6664 = vmatpush1.bf16.msra.mxu0 %v13390_v16 }
 0x4b5   :  { %6665 = vmatprep.subr.bf16.mxu0 %v19646_v31 }
 0x4b7   :  { %6949 = vmatpush1.bf16.msra.mxu1 %v13391_v49  ;;  %v19712_v49 = vld [vmem:[#allocation7_spill] sm:$0xff] }
 0x4b8   :  { %6950 = vmatprep.subr.bf16.mxu1 %v19646_v31  ;;  %6666 = vmatpush1.bf16.msra.mxu0 %v13392_v58 }
 0x4b9   :  { %6667 = vmatprep.subr.bf16.mxu0 %v19646_v31 }
 0x4bb   :  { %6951 = vmatpush1.bf16.msra.mxu1 %v13393_v37 }
 0x4bc   :  { %6952 = vmatprep.subr.bf16.mxu1 %v19646_v31  ;;  %6668 = vmatpush1.bf16.msra.mxu0 %v13394_v60 }
 0x4bd   :  { %6669 = vmatprep.subr.bf16.mxu0 %v19646_v31 }
 0x4bf   :  { %6953 = vmatpush1.bf16.msra.mxu1 %v13395_v25 }
 0x4c0   :  { %6954 = vmatprep.subr.bf16.mxu1 %v19646_v31  ;;  %6670 = vmatpush1.bf16.msra.mxu0 %v13396_v9 }
 0x4c1   :  { %7211 = vmatprep.subr.bf16.mxu0 %v19646_v31 }
 0x4c3   :  { %6955 = vmatpush1.bf16.msra.mxu1 %v13397_v6 }
 0x4c4   :  { %7496 = vmatprep.subr.bf16.mxu1 %v19646_v31 }
 0x4db   :  { %v237_v23 = vpop.xlane.xlu1 %236 }
 0x4dc   :  { %v249_v38 = vmul.f32 0.004166667, %v237_v23 }
 0x4de   :  { %v254_v17 = vadd.f32 1e-05, %v249_v38 }
 0x4df   :  { %v682_v15 = vpop.xlane.xlu1 %681 }
 0x4e0   :  { %13655 = vrsqrt.f32 %v254_v17  ;;  %v694_v7 = vmul.f32 0.004166667, %v682_v15  ;;  %v19713_v17 = vld [vmem:[#allocation8_spill] sm:$0xff] }
 0x4e2   :  { %v4965_v61 = vpop.f32.mrb[56].mxu0  ;;  %v699_v47 = vadd.f32 1e-05, %v694_v7  ;;  %v19714_v7 = vld [vmem:[#allocation9_spill] sm:$0xff] }
 0x4e3   :  { %v4971_v35 = vadd.f32 %v4965_v61, %v4686_v52  ;;  %v4967_v12 = vpop.f32.mrb[57].mxu0  ;;  %v459_v55 = vpop.xlane.xlu0 %458 }
 0x4e4   :  { %v4968_v44 = vpop.f32.mrb[58].mxu0  ;;  %13657 = vrsqrt.f32 %v699_v47  ;;  %v471_v41 = vmul.f32 0.004166667, %v459_v55 }
 0x4e5   :  { %v4969_v45 = vpop.f32.mrb[59].mxu0  ;;  %v5250_v13 = vpop.f32.mrb[80].mxu1 }
 0x4e6   :  { %v16992_v34 = vadd.f32 %v5250_v13, %v4971_v35  ;;  %v5252_v36 = vpop.f32.mrb[81].mxu1  ;;  %v476_v14 = vadd.f32 1e-05, %v471_v41 }
 0x4e7   :  { %v5253_v63 = vpop.f32.mrb[82].mxu1  ;;  %v1128_v51 = vpop.xlane.xlu1 %1127 }
 0x4e8   :  { %v5254_v54 = vpop.f32.mrb[83].mxu1  ;;  %13659 = vrsqrt.f32 %v476_v14  ;;  %v1140_v18 = vmul.f32 0.004166667, %v1128_v51  ;;  %v905_v28 = vpop.xlane.xlu0 %904 }
 0x4e9   :  { %v917_v39 = vmul.f32 0.004166667, %v905_v28  ;;  %v19715_v28 = vld [vmem:[#allocation28_spill] sm:$0xff] }
 0x4ea   :  { %v13656_v26 = vpop.eup %13655  ;;  %v1145_v59 = vadd.f32 1e-05, %v1140_v18 }
 0x4eb   :  { %v266_v3 = vmul.f32 %v13656_v26, %v16569_v19  ;;  %v267_v42 = vmul.f32 %v13656_v26, %v16573_v50  ;;  %v922_v62 = vadd.f32 1e-05, %v917_v39  ;;  %v1574_v57 = vpop.xlane.xlu1 %1573  ;;  %v19711_v50 = vld [vmem:[#allocation6_spill] sm:$0xff]  ;;  %v19716_v26 = vld [vmem:[#allocation29_spill] sm:$0xff] }
 0x4ec   :  { %13661 = vrsqrt.f32 %v1145_v59  ;;  %v1586_v0 = vmul.f32 0.004166667, %v1574_v57  ;;  %v1351_v52 = vpop.xlane.xlu0 %1350 }
 0x4ed   :  { %276 = vst [vmem:[#allocation2 + $0x20] sm:$0xff] %v266_v3  ;;  %277 = vst.msk [vmem:[#allocation2 + $0x28] sm:$0xff] %vm176_vm2, %v267_v42  ;;  %13663 = vrsqrt.f32 %v922_v62  ;;  %v1363_v8 = vmul.f32 0.004166667, %v1351_v52  ;;  %v19717_v42 = vld [vmem:[#allocation17_spill] sm:$0xff] }
 0x4ee   :  { %v13658_v10 = vpop.eup %13657  ;;  %v1591_v1 = vadd.f32 1e-05, %v1586_v0 }
 0x4ef   :  { %v711_v48 = vmul.f32 %v13658_v10, %v16603_v30  ;;  %v712_v20 = vmul.f32 %v13658_v10, %v16607_v56  ;;  %v1368_v11 = vadd.f32 1e-05, %v1363_v8  ;;  %v68_v19 = vpop.permute.xlu1 %67 }
 0x4f0   :  { %13665 = vrsqrt.f32 %v1591_v1  ;;  %v17000_v16 = vadd.f32 %v19711_v50, %v68_v19  ;;  %v17003_v58 = vadd.f32 %v19712_v49, %v68_v19  ;;  %v1797_v37 = vpop.xlane.xlu0 %1796 }
 0x4f1   :  { %722 = vst [vmem:[#allocation2 + $0xc0] sm:$0xff] %v711_v48  ;;  %723 = vst.msk [vmem:[#allocation2 + $0xc8] sm:$0xff] %vm176_vm2, %v712_v20  ;;  %13667 = vrsqrt.f32 %v1368_v11  ;;  %v1809_v60 = vmul.f32 0.004166667, %v1797_v37 }
 0x4f2   :  { %v13660_v25 = vpop.eup %13659  ;;  %v172_v30 = vmax.f32 %v17000_v16, 0.0  ;;  %v173_v56 = vmax.f32 %v17003_v58, 0.0  ;;  %v13458_v16 = vld [vmem:[%s19524_s3 + $0xa50] sm:$0xff]  }
 0x4f3   :  { %v488_v9 = vmul.f32 %v13660_v25, %v16637_v24  ;;  %v489_v6 = vmul.f32 %v13660_v25, %v16641_v29  ;;  %v1814_v23 = vadd.f32 1e-05, %v1809_v60  ;;  %v541_v38 = vpop.permute.xlu1 %540 }
 0x4f4   :  { %v17011_v15 = vadd.f32 %v19713_v17, %v541_v38  ;;  %v17014_v61 = vadd.f32 %v19714_v7, %v541_v38  ;;  %v189_v35 = vsel %vm176_vm2, %v173_v56, 0.0  ;;  %v17019_v12 = vld [vmem:[#allocation2 + $0x20] ss:$8 sm:$0x3]  ;;  %v19721_v7 = vld [vmem:[#allocation20_spill] sm:$0xff] }
 0x4f5   :  { %499 = vst [vmem:[#allocation2 + $0x70] sm:$0xff] %v488_v9  ;;  %500 = vst.msk [vmem:[#allocation2 + $0x78] sm:$0xff] %vm176_vm2, %v489_v6  ;;  %13669 = vrsqrt.f32 %v1814_v23  ;;  %v190_v24 = vadd.f32 %v189_v35, %v172_v30  ;;  %v17024_v29 = vld [vmem:[#allocation2 + $0x21] ss:$8 sm:$0x3]  ;;  %v6421_v45 = vrot.slane %v17019_v12, %v14597_v27  ;;  %v6417_v51 = vrot.slane %v17019_v12, %v14595_v53  ;;  %v19720_v23 = vld [vmem:[#allocation35_spill] sm:$0xff] }
 0x4f6   :  { %v13662_v47 = vpop.eup %13661  ;;  %v621_v44 = vmax.f32 %v17011_v15, 0.0  ;;  %v622_v55 = vmax.f32 %v17014_v61, 0.0  ;;  %v6706_v63 = vrot.slane %v17024_v29, %v14597_v27  ;;  %v19719_v9 = vld [vmem:[#allocation34_spill] sm:$0xff] }
 0x4f7   :  { %v13664_v41 = vpop.eup %13663  ;;  %v1157_v13 = vmul.f32 %v13662_v47, %v16663_v43  ;;  %v1158_v36 = vmul.f32 %v13662_v47, %v16667_v2  ;;  %v764_v14 = vpop.permute.xlu1 %763  ;;  %191 = vadd.xlane.f32.xlu0 %v190_v24  ;;  %v13459_v15 = vld [vmem:[%s19524_s3 + $0xac8] sm:$0xff]  }
 0x4f8   :  { %v934_v54 = vmul.f32 %v13664_v41, %v16624_v33  ;;  %v935_v18 = vmul.f32 %v13664_v41, %v16628_v21  ;;  %v17039_v39 = vadd.f32 %v19715_v28, %v764_v14  ;;  %v17042_v59 = vadd.f32 %v19716_v26, %v764_v14  ;;  %v318_v43 = vpop.permute.xlu0 %317  ;;  %v17044_v2 = vld [vmem:[#allocation2 + $0xc0] ss:$8 sm:$0x3]  ;;  %v17046_v3 = vld [vmem:[#allocation2 + $0xc1] ss:$8 sm:$0x3] }
 0x4f9   :  { %1168 = vst [vmem:[#allocation2 + $0x160] sm:$0xff] %v1157_v13  ;;  %1169 = vst.msk [vmem:[#allocation2 + $0x168] sm:$0xff] %vm176_vm2, %v1158_v36  ;;  %v17050_v62 = vadd.f32 %v19717_v42, %v318_v43  ;;  %v19718_v33 = vld [vmem:[#allocation19_spill] sm:$0xff]  ;;  %v637_v21 = vsel %vm176_vm2, %v622_v55, 0.0  ;;  %v6443_v0 = vrot.slane %v17044_v2, %v14597_v27  ;;  %v6728_v48 = vrot.slane %v17046_v3, %v14597_v27 }
 0x4fa   :  { %v17053_v57 = vadd.f32 %v19718_v33, %v318_v43  ;;  %v13666_v52 = vpop.eup %13665  ;;  %945 = vst [vmem:[#allocation2 + $0x110] sm:$0xff] %v934_v54  ;;  %946 = vst.msk [vmem:[#allocation2 + $0x118] sm:$0xff] %vm176_vm2, %v935_v18  ;;  %v19586_v8 = vmax.f32 %v17039_v39, 0.0  ;;  %v19585_v10 = vmax.f32 %v17042_v59, 0.0  ;;  %v638_v1 = vadd.f32 %v637_v21, %v621_v44 }
 0x4fb   :  { %v13668_v20 = vpop.eup %13667  ;;  %v1603_v11 = vmul.f32 %v13666_v52, %v16697_v32  ;;  %v1604_v19 = vmul.f32 %v13666_v52, %v16701_v4  ;;  %v19584_v50 = vmax.f32 %v17050_v62, 0.0  ;;  %v1210_v37 = vpop.permute.xlu1 %1209  ;;  %v19723_v52 = vld [vmem:[#allocation43_spill] sm:$0xff] }
 0x4fc   :  { %v19583_v49 = vmax.f32 %v17053_v57, 0.0  ;;  %v1380_v60 = vmul.f32 %v13668_v20, %v16675_v40  ;;  %v1381_v25 = vmul.f32 %v13668_v20, %v16656_v46  ;;  %v17074_v6 = vadd.f32 %v19719_v9, %v1210_v37  ;;  %639 = vadd.xlane.f32.xlu0 %v638_v1  ;;  %v987_v17 = vpop.permute.xlu0 %986  ;;  %v17079_v32 = vld [vmem:[#allocation2 + $0x70] ss:$8 sm:$0x3]  ;;  %v19722_v40 = vld [vmem:[#allocation21_spill] sm:$0xff] }
 0x4fd   :  { %v17077_v38 = vadd.f32 %v19720_v23, %v1210_v37  ;;  %v17081_v4 = vld [vmem:[#allocation2 + $0x71] ss:$8 sm:$0x3]  ;;  %1614 = vst [vmem:[#allocation2 + $0x200] sm:$0xff] %v1603_v11  ;;  %1615 = vst.msk [vmem:[#allocation2 + $0x208] sm:$0xff] %vm176_vm2, %v1604_v19  ;;  %v17085_v35 = vadd.f32 %v19721_v7, %v987_v17  ;;  %v17088_v46 = vadd.f32 %v19722_v40, %v987_v17  ;;  %v860_v24 = vsel %vm176_vm2, %v19585_v10, 0.0 }
 0x4fe   :  { %v414_v47 = vsel %vm176_vm2, %v19583_v49, 0.0  ;;  %1391 = vst [vmem:[#allocation2 + $0x1b0] sm:$0xff] %v1380_v60  ;;  %1392 = vst.msk [vmem:[#allocation2 + $0x1b8] sm:$0xff] %vm176_vm2, %v1381_v25  ;;  %v19577_v41 = vmax.f32 %v17074_v6, 0.0  ;;  %v861_v36 = vadd.f32 %v860_v24, %v19586_v8  ;;  %v6432_v43 = vrot.slane %v17079_v32, %v14597_v27  ;;  %v19724_v20 = vld [vmem:[#allocation45_spill] sm:$0xff]  ;;  %v19725_v25 = vld [vmem:[#allocation42_spill] sm:$0xff] }
 0x4ff   :  { %v19582_v13 = vmax.f32 %v17077_v38, 0.0  ;;  %v415_v14 = vadd.f32 %v414_v47, %v19584_v50  ;;  %v13670_v54 = vpop.eup %13669  ;;  %v19581_v18 = vmax.f32 %v17085_v35, 0.0  ;;  %v19579_v28 = vmax.f32 %v17088_v46, 0.0  ;;  %v1656_v26 = vpop.permute.xlu1 %1655  ;;  %v19726_v23 = vld [vmem:[#allocation44_spill] sm:$0xff] }
 0x500   :  { %v6717_v42 = vrot.slane %v17081_v4, %v14597_v27  ;;  %v1826_v33 = vmul.f32 %v13670_v54, %v16707_v22  ;;  %v1827_v21 = vmul.f32 %v13670_v54, %v16690_v5  ;;  %v17112_v1 = vadd.f32 %v19723_v52, %v1656_v26  ;;  %862 = vadd.xlane.f32.xlu0 %v861_v36  ;;  %v1433_v19 = vpop.permute.xlu0 %1432  ;;  %v17117_v37 = vld [vmem:[#allocation2 + $0x160] ss:$8 sm:$0x3]  ;;  %v17119_v60 = vld [vmem:[#allocation2 + $0x161] ss:$8 sm:$0x3] }
 0x501   :  { %v17115_v11 = vadd.f32 %v19724_v20, %v1656_v26  ;;  %416 = vadd.xlane.f32.xlu1 %v415_v14  ;;  %v17122_v9 = vadd.f32 %v19725_v25, %v1433_v19  ;;  %v17125_v22 = vadd.f32 %v19726_v23, %v1433_v19  ;;  %v1306_v5 = vsel %vm176_vm2, %v19582_v13, 0.0  ;;  %v17133_v7 = vld [vmem:[#allocation2 + $0x110] ss:$8 sm:$0x3] }
 0x502   :  { %v1083_v17 = vsel %vm176_vm2, %v19579_v28, 0.0  ;;  %1837 = vst [vmem:[#allocation2 + $0x250] sm:$0xff] %v1826_v33  ;;  %1838 = vst.msk [vmem:[#allocation2 + $0x258] sm:$0xff] %vm176_vm2, %v1827_v21  ;;  %v19576_v40 = vmax.f32 %v17112_v1, 0.0  ;;  %v1307_v47 = vadd.f32 %v1306_v5, %v19577_v41  ;;  %v6454_v33 = vrot.slane %v17133_v7, %v14597_v27 }
 0x503   :  { %v19575_v24 = vmax.f32 %v17115_v11, 0.0  ;;  %v1084_v36 = vadd.f32 %v1083_v17, %v19581_v18  ;;  %v17142_v14 = vld [vmem:[#allocation2 + $0x111] ss:$8 sm:$0x3]  ;;  %v19580_v54 = vmax.f32 %v17122_v9, 0.0  ;;  %v19578_v26 = vmax.f32 %v17125_v22, 0.0 }
 0x504   :  { %v6465_v21 = vrot.slane %v17117_v37, %v14597_v27  ;;  %1308 = vadd.xlane.f32.xlu0 %v1307_v47  ;;  %v17153_v20 = vld [vmem:[#allocation2 + $0x200] ss:$8 sm:$0x3]  ;;  %v6502_v19 = vsel %vm193_vm3, %v6421_v45, %v6432_v43  ;;  %v6739_v25 = vrot.slane %v17142_v14, %v14597_v27  ;;  %v6750_v23 = vrot.slane %v17119_v60, %v14597_v27  ;;  %v17180_v41 = vld [vmem:[#allocation2 + $0x201] ss:$8 sm:$0x3] }
 0x505   :  { %v1752_v52 = vsel %vm176_vm2, %v19575_v24, 0.0  ;;  %1085 = vadd.xlane.f32.xlu1 %v1084_v36  ;;  %v1529_v17 = vsel %vm176_vm2, %v19578_v26, 0.0  ;;  %v6408_v47 = vld [vmem:[#allocation2 + $0x1b0] ss:$8 sm:$0x3]  ;;  %v6487_v24 = vrot.slane %v17153_v20, %v14597_v27  ;;  %v6504_v45 = vsel %vm1941_vm4, %v6502_v19, %v6443_v0 }
 0x506   :  { %v1753_v5 = vadd.f32 %v1752_v52, %v19576_v40  ;;  %v1530_v43 = vadd.f32 %v1529_v17, %v19580_v54  ;;  %v6476_v36 = vrot.slane %v6408_v47, %v14597_v27  ;;  %v6506_v52 = vsel %vm1944_vm5, %v6504_v45, %v6454_v33  ;;  %v17178_v40 = vld [vmem:[#allocation2 + $0x1b1] ss:$8 sm:$0x3]  ;;  %v17232_v12 = vld [vmem:[#allocation2 + $0x72] ss:$8 sm:$0x3] }
 0x507   :  { %v6787_v26 = vsel %vm193_vm3, %v6706_v63, %v6717_v42  ;;  %v6508_v28 = vsel %vm1947_vm6, %v6506_v52, %v6465_v21  ;;  %v6761_v0 = vrot.slane %v17178_v40, %v14597_v27  ;;  %v6772_v19 = vrot.slane %v17180_v41, %v14597_v27  ;;  %v17513_v10 = vld [vmem:[#allocation2 + $0x165] ss:$8 sm:$0x3] }
 0x508   :  { %v6789_v33 = vsel %vm1941_vm4, %v6787_v26, %v6728_v48  ;;  %1754 = vadd.xlane.f32.xlu0 %v1753_v5  ;;  %v6510_v17 = vsel %vm1950_vm7, %v6508_v28, %v6476_v36  ;;  %v6428_v63 = vrot.slane %v17079_v32, %v14595_v53  ;;  %v6702_v42 = vrot.slane %v17024_v29, %v14595_v53  ;;  %v17223_v5 = vld [vmem:[#allocation2 + $0x22] ss:$8 sm:$0x3] }
 0x509   :  { %v6791_v45 = vsel %vm1944_vm5, %v6789_v33, %v6739_v25  ;;  %1531 = vadd.xlane.f32.xlu1 %v1530_v43  ;;  %v6412_v21 = vld [vmem:[#allocation2 + $0x250] ss:$8 sm:$0x3]  ;;  %v6512_v52 = vsel %vm1953_vm8, %v6510_v17, %v6487_v24  ;;  %v17202_v54 = vld [vmem:[#allocation2 + $0x251] ss:$8 sm:$0x3]  ;;  %v6439_v48 = vrot.slane %v17044_v2, %v14595_v53  ;;  %v6450_v28 = vrot.slane %v17133_v7, %v14595_v53 }
 0x50a   :  { %v6793_v18 = vsel %vm1947_vm6, %v6791_v45, %v6750_v23  ;;  %v6498_v26 = vrot.slane %v6412_v21, %v14597_v27  ;;  %v6783_v32 = vrot.slane %v17202_v54, %v14597_v27  ;;  %v6461_v24 = vrot.slane %v17117_v37, %v14595_v53  ;;  %v17239_v45 = vld [vmem:[#allocation2 + $0x112] ss:$8 sm:$0x3]  ;;  %v17511_v50 = vld [vmem:[#allocation2 + $0x254] ss:$8 sm:$0x3] }
 0x50b   :  { %v6795_v29 = vsel %vm1950_vm7, %v6793_v18, %v6761_v0  ;;  %v6472_v23 = vrot.slane %v6408_v47, %v14595_v53  ;;  %v6483_v2 = vrot.slane %v17153_v20, %v14595_v53  ;;  %v6501_v7 = vsel %vm193_vm3, %v6417_v51, %v6428_v63 }
 0x50c   :  { %v6797_v25 = vsel %vm1953_vm8, %v6795_v29, %v6772_v19  ;;  %v6514_v43 = vsel %vm98_vm0, %v6512_v52, %v6498_v26  ;;  %v6503_v37 = vsel %vm1941_vm4, %v6501_v7, %v6439_v48  ;;  %v6713_v36 = vrot.slane %v17081_v4, %v14595_v53  ;;  %v17253_v52 = vld [vmem:[#allocation2 + $0xc2] ss:$8 sm:$0x3]  ;;  %v17261_v29 = vld [vmem:[#allocation2 + $0x1b2] ss:$8 sm:$0x3] }
 0x50d   :  { %v6799_v18 = vsel %vm98_vm0, %v6797_v25, %v6783_v32  ;;  %v6516_v47 = vpack.c.bf16 %v6514_v43, %v6514_v43  ;;  %v6494_v20 = vrot.slane %v6412_v21, %v14595_v53  ;;  %v6505_v19 = vsel %vm1944_vm5, %v6503_v37, %v6450_v28  ;;  %v17255_v48 = vld [vmem:[#allocation2 + $0x162] ss:$8 sm:$0x3] }
 0x50e   :  { %v6801_v0 = vpack.c.bf16 %v6799_v18, %v6799_v18  ;;  %v6507_v51 = vsel %vm1947_vm6, %v6505_v19, %v6461_v24  ;;  %v6724_v33 = vrot.slane %v17046_v3, %v14595_v53  ;;  %v6735_v17 = vrot.slane %v17142_v14, %v14595_v53  ;;  %v13398_v14 = vld [vmem:[%s19524_s3 + $0x870] sm:$0xff]   ;;  %v17290_v19 = vld [vmem:[#allocation2 + $0xc3] ss:$8 sm:$0x3] }
 0x50f   :  { %v6991_v4 = vrot.slane %v17223_v5, %v14597_v27  ;;  %12381 = vmatprep.mubr.msk.bf16.mxu0 %vm176_vm2, %v6516_v47  ;;  %v6509_v63 = vsel %vm1950_vm7, %v6507_v51, %v6472_v23  ;;  %v6746_v21 = vrot.slane %v17119_v60, %v14595_v53  ;;  %v6757_v3 = vrot.slane %v17178_v40, %v14595_v53  ;;  %v17265_v40 = vld [vmem:[#allocation2 + $0x73] ss:$8 sm:$0x3]  ;;  %v17278_v18 = vld [vmem:[#allocation2 + $0x252] ss:$8 sm:$0x3] }
 0x510   :  { %12427 = vmatprep.mubr.msk.bf16.mxu1 %vm176_vm2, %v6801_v0  ;;  %v6511_v28 = vsel %vm1953_vm8, %v6509_v63, %v6483_v2  ;;  %v6768_v26 = vrot.slane %v17180_v41, %v14595_v53  ;;  %v6786_v32 = vsel %vm193_vm3, %v6702_v42, %v6713_v36  ;;  %v7002_v60 = vrot.slane %v17232_v12, %v14597_v27  ;;  %v17271_v2 = vld [vmem:[#allocation2 + $0x202] ss:$8 sm:$0x3]  ;;  %v17275_v42 = vld [vmem:[#allocation2 + $0x23] ss:$8 sm:$0x3] }
 0x511   :  { %v6513_v24 = vsel %vm98_vm0, %v6511_v28, %v6494_v20  ;;  %v6779_v25 = vrot.slane %v17202_v54, %v14595_v53  ;;  %v6788_v23 = vsel %vm1941_vm4, %v6786_v32, %v6724_v33  ;;  %v7024_v41 = vrot.slane %v17239_v45, %v14597_v27  ;;  %v17284_v36 = vld [vmem:[#allocation2 + $0x113] ss:$8 sm:$0x3]  ;;  %v17292_v51 = vld [vmem:[#allocation2 + $0x163] ss:$8 sm:$0x3] }
 0x512   :  { %v6515_v7 = vpack.c.bf16 %v6513_v24, %v6513_v24  ;;  %v6790_v43 = vsel %vm1944_vm5, %v6788_v23, %v6735_v17  ;;  %v7013_v37 = vrot.slane %v17253_v52, %v14597_v27  ;;  %v7035_v54 = vrot.slane %v17255_v48, %v14597_v27  ;;  %v17300_v28 = vld [vmem:[#allocation2 + $0x1b3] ss:$8 sm:$0x3]  ;;  %v17308_v23 = vld [vmem:[#allocation2 + $0x203] ss:$8 sm:$0x3] }
 0x513   :  { %v6792_v47 = vsel %vm1947_vm6, %v6790_v43, %v6746_v21  ;;  %v7046_v0 = vrot.slane %v17261_v29, %v14597_v27  ;;  %v7072_v20 = vsel %vm193_vm3, %v6991_v4, %v7002_v60  ;;  %v7287_v33 = vrot.slane %v17265_v40, %v14597_v27 }
 0x514   :  { %6674 = vmatmul.mubr.bf16.vlgmr.msra.gmra.mrb[68].mxu0 %v6515_v7  ;;  %v6794_v17 = vsel %vm1950_vm7, %v6792_v47, %v6757_v3  ;;  %v7057_v63 = vrot.slane %v17271_v2, %v14597_v27  ;;  %v7074_v21 = vsel %vm1941_vm4, %v7072_v20, %v7013_v37  ;;  %v7276_v4 = vrot.slane %v17275_v42, %v14597_v27  ;;  %v13400_v7 = vld [vmem:[%s19524_s3 + $0x878] sm:$0xff]  }
 0x515   :  { %v6796_v32 = vsel %vm1953_vm8, %v6794_v17, %v6768_v26  ;;  %7212 = vmatpush1.bf16.msra.mxu0 %v13398_v14  ;;  %v7068_v60 = vrot.slane %v17278_v18, %v14597_v27  ;;  %v7076_v24 = vsel %vm1944_vm5, %v7074_v21, %v7024_v41  ;;  %v7309_v3 = vrot.slane %v17284_v36, %v14597_v27  ;;  %v13399_v14 = vld [vmem:[%s19524_s3 + $0x8e8] sm:$0xff]   ;;  %v17320_v37 = vld [vmem:[#allocation2 + $0x253] ss:$8 sm:$0x3] }
 0x516   :  { %v6798_v43 = vsel %vm98_vm0, %v6796_v32, %v6779_v25  ;;  %v7078_v26 = vsel %vm1947_vm6, %v7076_v24, %v7035_v54  ;;  %v7298_v41 = vrot.slane %v17290_v19, %v14597_v27  ;;  %v7320_v47 = vrot.slane %v17292_v51, %v14597_v27  ;;  %7213 = vmatprep.subr.bf16.mxu0 %v19646_v31 }
 0x517   :  { %v6800_v20 = vpack.c.bf16 %v6798_v43, %v6798_v43  ;;  %v7080_v17 = vsel %vm1950_vm7, %v7078_v26, %v7046_v0  ;;  %v7331_v25 = vrot.slane %v17300_v28, %v14597_v27  ;;  %v7357_v21 = vsel %vm193_vm3, %v7276_v4, %v7287_v33  ;;  %v13402_v33 = vld [vmem:[%s19524_s3 + $0x880] sm:$0xff]   ;;  %v13401_v26 = vld [vmem:[%s19524_s3 + $0x8f0] sm:$0xff]  }
 0x518   :  { %v7082_v54 = vsel %vm1953_vm8, %v7080_v17, %v7057_v63  ;;  %v7342_v32 = vrot.slane %v17308_v23, %v14597_v27  ;;  %v7359_v24 = vsel %vm1941_vm4, %v7357_v21, %v7298_v41  ;;  %v7353_v43 = vrot.slane %v17320_v37, %v14597_v27  ;;  %v13403_v41 = vld [vmem:[%s19524_s3 + $0x8f8] sm:$0xff]  }
 0x519   :  { %6959 = vmatmul.mubr.bf16.vlgmr.msra.gmra.mrb[92].mxu1 %v6800_v20  ;;  %v7084_v13 = vsel %vm98_vm0, %v7082_v54, %v7068_v60  ;;  %v7361_v0 = vsel %vm1944_vm5, %v7359_v24, %v7309_v3  ;;  %7214 = vmatpush1.bf16.msra.mxu0 %v13400_v7  ;;  %v7316_v49 = vrot.slane %v17292_v51, %v14595_v53 }
 0x51a   :  { %7497 = vmatpush1.bf16.msra.mxu1 %v13399_v14  ;;  %v7086_v63 = vpack.c.bf16 %v7084_v13, %v7084_v13  ;;  %v7363_v4 = vsel %vm1947_vm6, %v7361_v0, %v7320_v47  ;;  %7215 = vmatprep.subr.bf16.mxu0 %v19646_v31  ;;  %v13404_v13 = vld [vmem:[%s19524_s3 + $0x888] sm:$0xff]   ;;  %v13405_v0 = vld [vmem:[%s19524_s3 + $0x900] sm:$0xff]  }
 0x51b   :  { %v7365_v60 = vsel %vm1950_vm7, %v7363_v4, %v7331_v25  ;;  %7498 = vmatprep.subr.bf16.mxu1 %v19646_v31  ;;  %v13407_v4 = vld [vmem:[%s19524_s3 + $0x908] sm:$0xff]  }
 0x51c   :  { %12473 = vmatprep.mubr.msk.bf16.mxu0 %vm176_vm2, %v7086_v63  ;;  %v7367_v3 = vsel %vm1953_vm8, %v7365_v60, %v7342_v32  ;;  %v13406_v32 = vld [vmem:[%s19524_s3 + $0x890] sm:$0xff]   ;;  %v13408_v63 = vld [vmem:[%s19524_s3 + $0x898] sm:$0xff]  }
 0x51d   :  { %v7369_v7 = vsel %vm98_vm0, %v7367_v3, %v7353_v43  ;;  %7216 = vmatpush1.bf16.msra.mxu0 %v13402_v33  ;;  %v13409_v60 = vld [vmem:[%s19524_s3 + $0x910] sm:$0xff]   ;;  %v13412_v3 = vld [vmem:[%s19524_s3 + $0x8a8] sm:$0xff]  }
 0x51e   :  { %v7371_v14 = vpack.c.bf16 %v7369_v7, %v7369_v7  ;;  %7499 = vmatpush1.bf16.msra.mxu1 %v13401_v26  ;;  %v5535_v47 = vpop.f32.mrb[60].mxu0  ;;  %7217 = vmatprep.subr.bf16.mxu0 %v19646_v31  ;;  %v13410_v26 = vld [vmem:[%s19524_s3 + $0x8a0] sm:$0xff]   ;;  %v13411_v7 = vld [vmem:[%s19524_s3 + $0x918] sm:$0xff]  }
 0x51f   :  { %7500 = vmatprep.subr.bf16.mxu1 %v19646_v31  ;;  %v5541_v20 = vadd.f32 %v5535_v47, %v16992_v34  ;;  %v5537_v17 = vpop.f32.mrb[61].mxu0  ;;  %v13415_v47 = vld [vmem:[%s19524_s3 + $0x928] sm:$0xff]  }
 0x520   :  { %12519 = vmatprep.mubr.msk.bf16.mxu1 %vm176_vm2, %v7371_v14  ;;  %v5538_v25 = vpop.f32.mrb[62].mxu0  ;;  %v13413_v14 = vld [vmem:[%s19524_s3 + $0x920] sm:$0xff]   ;;  %v17415_v17 = vld [vmem:[#allocation2 + $0x74] ss:$8 sm:$0x3] }
 0x521   :  { %v5820_v21 = vpop.f32.mrb[84].mxu1  ;;  %7218 = vmatpush1.bf16.msra.mxu0 %v13404_v13  ;;  %v5539_v54 = vpop.f32.mrb[63].mxu0  ;;  %v13414_v13 = vld [vmem:[%s19524_s3 + $0x8b0] sm:$0xff]  }
 0x522   :  { %7501 = vmatpush1.bf16.msra.mxu1 %v13403_v41  ;;  %v17365_v24 = vadd.f32 %v5820_v21, %v5541_v20  ;;  %v5822_v43 = vpop.f32.mrb[85].mxu1  ;;  %7219 = vmatprep.subr.bf16.mxu0 %v19646_v31  ;;  %v13416_v41 = vld [vmem:[%s19524_s3 + $0x8b8] sm:$0xff]   ;;  %v13418_v20 = vld [vmem:[%s19524_s3 + $0x8c0] sm:$0xff]   ;;  %v13417_v25 = vld [vmem:[%s19524_s3 + $0x930] sm:$0xff]   ;;  %v6998_v21 = vrot.slane %v17232_v12, %v14595_v53 }
 0x523   :  { %7502 = vmatprep.subr.bf16.mxu1 %v19646_v31  ;;  %v5823_v34 = vpop.f32.mrb[86].mxu1  ;;  %v17424_v54 = vld [vmem:[#allocation2 + $0x24] ss:$8 sm:$0x3]  ;;  %v7572_v43 = vrot.slane %v17415_v17, %v14597_v27 }
 0x524   :  { %v5824_v33 = vpop.f32.mrb[87].mxu1  ;;  %v13420_v34 = vld [vmem:[%s19524_s3 + $0x8c8] sm:$0xff]   ;;  %v17436_v12 = vld [vmem:[#allocation2 + $0x114] ss:$8 sm:$0x3] }
 0x525   :  { %7220 = vmatpush1.bf16.msra.mxu0 %v13406_v32  ;;  %v6987_v32 = vrot.slane %v17223_v5, %v14595_v53  ;;  %v7020_v5 = vrot.slane %v17239_v45, %v14595_v53  ;;  %v7031_v45 = vrot.slane %v17255_v48, %v14595_v53  ;;  %v7272_v48 = vrot.slane %v17275_v42, %v14595_v53 }
 0x526   :  { %7503 = vmatpush1.bf16.msra.mxu1 %v13405_v0  ;;  %7221 = vmatprep.subr.bf16.mxu0 %v19646_v31  ;;  %v13419_v0 = vld [vmem:[%s19524_s3 + $0x938] sm:$0xff]  }
 0x527   :  { %7504 = vmatprep.subr.bf16.mxu1 %v19646_v31  ;;  %v7071_v33 = vsel %vm193_vm3, %v6987_v32, %v6998_v21  ;;  %v13421_v21 = vld [vmem:[%s19524_s3 + $0x940] sm:$0xff]   ;;  %v7053_v32 = vrot.slane %v17271_v2, %v14595_v53 }
 0x529   :  { %7222 = vmatpush1.bf16.msra.mxu0 %v13408_v63  ;;  %v17442_v63 = vld [vmem:[#allocation2 + $0xc4] ss:$8 sm:$0x3] }
 0x52a   :  { %7505 = vmatpush1.bf16.msra.mxu1 %v13407_v4  ;;  %7223 = vmatprep.subr.bf16.mxu0 %v19646_v31  ;;  %v7561_v4 = vrot.slane %v17424_v54, %v14597_v27 }
 0x52b   :  { %7506 = vmatprep.subr.bf16.mxu1 %v19646_v31 }
 0x52d   :  { %7224 = vmatpush1.bf16.msra.mxu0 %v13410_v26  ;;  %v17446_v26 = vld [vmem:[#allocation2 + $0x75] ss:$8 sm:$0x3] }
 0x52e   :  { %7507 = vmatpush1.bf16.msra.mxu1 %v13409_v60  ;;  %7225 = vmatprep.subr.bf16.mxu0 %v19646_v31  ;;  %v7009_v60 = vrot.slane %v17253_v52, %v14595_v53  ;;  %v13422_v52 = vld [vmem:[%s19524_s3 + $0x8d0] sm:$0xff]  }
 0x52f   :  { %7508 = vmatprep.subr.bf16.mxu1 %v19646_v31 }
 0x531   :  { %7226 = vmatpush1.bf16.msra.mxu0 %v13412_v3  ;;  %v7283_v3 = vrot.slane %v17265_v40, %v14595_v53  ;;  %v7073_v40 = vsel %vm1941_vm4, %v7071_v33, %v7009_v60  ;;  %v17492_v60 = vld [vmem:[#allocation2 + $0xc5] ss:$8 sm:$0x3] }
 0x532   :  { %7509 = vmatpush1.bf16.msra.mxu1 %v13411_v7  ;;  %7227 = vmatprep.subr.bf16.mxu0 %v19646_v31  ;;  %v7042_v7 = vrot.slane %v17261_v29, %v14595_v53  ;;  %v17470_v29 = vld [vmem:[#allocation2 + $0x1b4] ss:$8 sm:$0x3]  ;;  %v7075_v42 = vsel %vm1944_vm5, %v7073_v40, %v7020_v5  ;;  %v7064_v5 = vrot.slane %v17278_v18, %v14595_v53  ;;  %v17503_v40 = vld [vmem:[#allocation2 + $0x204] ss:$8 sm:$0x3] }
 0x533   :  { %7510 = vmatprep.subr.bf16.mxu1 %v19646_v31 }
 0x535   :  { %7228 = vmatpush1.bf16.msra.mxu0 %v13414_v13  ;;  %v17457_v13 = vld [vmem:[#allocation2 + $0x164] ss:$8 sm:$0x3] }
 0x536   :  { %7511 = vmatpush1.bf16.msra.mxu1 %v13413_v14  ;;  %7229 = vmatprep.subr.bf16.mxu0 %v19646_v31  ;;  %v7594_v14 = vrot.slane %v17436_v12, %v14597_v27  ;;  %v7605_v33 = vrot.slane %v17457_v13, %v14597_v27 }
 0x537   :  { %7512 = vmatprep.subr.bf16.mxu1 %v19646_v31 }
 0x539   :  { %7230 = vmatpush1.bf16.msra.mxu0 %v13416_v41  ;;  %v7642_v41 = vsel %vm193_vm3, %v7561_v4, %v7572_v43  ;;  %v7305_v43 = vrot.slane %v17284_v36, %v14595_v53  ;;  %v13424_v36 = vld [vmem:[%s19524_s3 + $0x8d8] sm:$0xff]  }
 0x53a   :  { %7513 = vmatpush1.bf16.msra.mxu1 %v13415_v47  ;;  %7231 = vmatprep.subr.bf16.mxu0 %v19646_v31  ;;  %v17462_v47 = vld [vmem:[#allocation2 + $0x25] ss:$8 sm:$0x3] }
 0x53b   :  { %7514 = vmatprep.subr.bf16.mxu1 %v19646_v31  ;;  %v7846_v2 = vrot.slane %v17462_v47, %v14597_v27 }
 0x53d   :  { %7232 = vmatpush1.bf16.msra.mxu0 %v13418_v20  ;;  %v7583_v20 = vrot.slane %v17442_v63, %v14597_v27 }
 0x53e   :  { %7515 = vmatpush1.bf16.msra.mxu1 %v13417_v25  ;;  %7233 = vmatprep.subr.bf16.mxu0 %v19646_v31  ;;  %v7857_v25 = vrot.slane %v17446_v26, %v14597_v27 }
 0x53f   :  { %7516 = vmatprep.subr.bf16.mxu1 %v19646_v31  ;;  %v7644_v4 = vsel %vm1941_vm4, %v7642_v41, %v7583_v20  ;;  %v7616_v41 = vrot.slane %v17470_v29, %v14597_v27  ;;  %v7077_v20 = vsel %vm1947_vm6, %v7075_v42, %v7031_v45  ;;  %v7327_v45 = vrot.slane %v17300_v28, %v14595_v53 }
 0x540   :  { %v7868_v42 = vrot.slane %v17492_v60, %v14597_v27  ;;  %v7638_v28 = vrot.slane %v17511_v50, %v14597_v27 }
 0x541   :  { %7234 = vmatpush1.bf16.msra.mxu0 %v13420_v34  ;;  %v17485_v34 = vld [vmem:[#allocation2 + $0x115] ss:$8 sm:$0x3] }
 0x542   :  { %7517 = vmatpush1.bf16.msra.mxu1 %v13419_v0  ;;  %7235 = vmatprep.subr.bf16.mxu0 %v19646_v31  ;;  %v7356_v0 = vsel %vm193_vm3, %v7272_v48, %v7283_v3  ;;  %v7294_v3 = vrot.slane %v17290_v19, %v14595_v53  ;;  %v7646_v48 = vsel %vm1944_vm5, %v7644_v4, %v7594_v14  ;;  %v13423_v14 = vld [vmem:[%s19524_s3 + $0x948] sm:$0xff]  }
 0x543   :  { %7518 = vmatprep.subr.bf16.mxu1 %v19646_v31  ;;  %v7879_v18 = vrot.slane %v17485_v34, %v14597_v27  ;;  %v7927_v19 = vsel %vm193_vm3, %v7846_v2, %v7857_v25  ;;  %v7079_v25 = vsel %vm1950_vm7, %v7077_v20, %v7042_v7  ;;  %v7627_v4 = vrot.slane %v17503_v40, %v14597_v27  ;;  %v13426_v7 = vld [vmem:[%s19524_s3 + $0x8e0] sm:$0xff]  }
 0x544   :  { %v7358_v51 = vsel %vm1941_vm4, %v7356_v0, %v7294_v3  ;;  %v7648_v2 = vsel %vm1947_vm6, %v7646_v48, %v7605_v33  ;;  %v7890_v3 = vrot.slane %v17513_v10, %v14597_v27  ;;  %v7929_v8 = vsel %vm1941_vm4, %v7927_v19, %v7868_v42  ;;  %v17556_v19 = vld [vmem:[#allocation2 + $0x255] ss:$8 sm:$0x3] }
 0x545   :  { %7236 = vmatpush1.bf16.msra.mxu0 %v13422_v52  ;;  %v17525_v52 = vld [vmem:[#allocation2 + $0x1b5] ss:$8 sm:$0x3]  ;;  %v7650_v0 = vsel %vm1950_vm7, %v7648_v2, %v7616_v41  ;;  %v7931_v48 = vsel %vm1944_vm5, %v7929_v8, %v7879_v18  ;;  %v7338_v20 = vrot.slane %v17308_v23, %v14595_v53  ;;  %v7349_v8 = vrot.slane %v17320_v37, %v14595_v53 }
 0x546   :  { %7519 = vmatpush1.bf16.msra.mxu1 %v13421_v21  ;;  %7237 = vmatprep.subr.bf16.mxu0 %v19646_v31  ;;  %v7360_v21 = vsel %vm1944_vm5, %v7358_v51, %v7305_v43  ;;  %v17544_v43 = vld [vmem:[#allocation2 + $0x205] ss:$8 sm:$0x3]  ;;  %v7901_v33 = vrot.slane %v17525_v52, %v14597_v27  ;;  %v13425_v41 = vld [vmem:[%s19524_s3 + $0x950] sm:$0xff]   ;;  %v7923_v37 = vrot.slane %v17556_v19, %v14597_v27 }
 0x547   :  { %7520 = vmatprep.subr.bf16.mxu1 %v19646_v31  ;;  %v7362_v18 = vsel %vm1947_vm6, %v7360_v21, %v7316_v49  ;;  %v7912_v23 = vrot.slane %v17544_v43, %v14597_v27 }
 0x548   :  { %v7364_v42 = vsel %vm1950_vm7, %v7362_v18, %v7327_v45  ;;  %v13427_v45 = vld [vmem:[%s19524_s3 + $0x958] sm:$0xff]  }
 0x549   :  { %7238 = vmatpush1.bf16.msra.mxu0 %v13424_v36  ;;  %v7081_v36 = vsel %vm1953_vm8, %v7079_v25, %v7053_v32  ;;  %v7933_v25 = vsel %vm1947_vm6, %v7931_v48, %v7890_v3 }
 0x54a   :  { %7521 = vmatpush1.bf16.msra.mxu1 %v13423_v14  ;;  %7239 = vmatprep.subr.bf16.mxu0 %v19646_v31  ;;  %v7083_v51 = vsel %vm98_vm0, %v7081_v36, %v7064_v5  ;;  %v7652_v14 = vsel %vm1953_vm8, %v7650_v0, %v7627_v4  ;;  %v13428_v5 = vld [vmem:[%s19524_s3 + $0x960] sm:$0xff]   ;;  %v7935_v49 = vsel %vm1950_vm7, %v7933_v25, %v7901_v33  ;;  %v13429_v33 = vld [vmem:[%s19524_s3 + $0x9d8] sm:$0xff]   ;;  %v13432_v36 = vld [vmem:[%s19524_s3 + $0x970] sm:$0xff]  }
 0x54b   :  { %7522 = vmatprep.subr.bf16.mxu1 %v19646_v31  ;;  %v7654_v32 = vsel %vm98_vm0, %v7652_v14, %v7638_v28  ;;  %v7085_v21 = vpack.c.bf16 %v7083_v51, %v7083_v51  ;;  %v7366_v4 = vsel %vm1953_vm8, %v7364_v42, %v7338_v20  ;;  %v7937_v0 = vsel %vm1953_vm8, %v7935_v49, %v7912_v23  ;;  %v13431_v20 = vld [vmem:[%s19524_s3 + $0x9e0] sm:$0xff]   ;;  %v13434_v51 = vld [vmem:[%s19524_s3 + $0x978] sm:$0xff]  }
 0x54c   :  { %v7656_v2 = vpack.c.bf16 %v7654_v32, %v7654_v32  ;;  %v7368_v28 = vsel %vm98_vm0, %v7366_v4, %v7349_v8  ;;  %v7939_v3 = vsel %vm98_vm0, %v7937_v0, %v7923_v37  ;;  %v13433_v8 = vld [vmem:[%s19524_s3 + $0x9e8] sm:$0xff]   ;;  %v13439_v0 = vld [vmem:[%s19524_s3 + $0xa00] sm:$0xff]  }
 0x54d   :  { %7240 = vmatpush1.bf16.msra.mxu0 %v13426_v7  ;;  %v13430_v7 = vld [vmem:[%s19524_s3 + $0x968] sm:$0xff]   ;;  %v7370_v48 = vpack.c.bf16 %v7368_v28, %v7368_v28  ;;  %v13440_v28 = vld [vmem:[%s19524_s3 + $0x990] sm:$0xff]  }
 0x54e   :  { %7523 = vmatpush1.bf16.msra.mxu1 %v13425_v41  ;;  %7781 = vmatprep.subr.bf16.mxu0 %v19646_v31  ;;  %v7941_v41 = vpack.c.bf16 %v7939_v3, %v7939_v3  ;;  %v13438_v4 = vld [vmem:[%s19524_s3 + $0x988] sm:$0xff]   ;;  %v13442_v3 = vld [vmem:[%s19524_s3 + $0x998] sm:$0xff]  }
 0x54f   :  { %7524 = vmatprep.subr.bf16.mxu1 %v19646_v31 }
 0x550   :  { %7244 = vmatmul.mubr.bf16.vlgmr.msra.gmra.mrb[72].mxu0 %v7085_v21 }
 0x551   :  { %7782 = vmatpush1.bf16.msra.mxu0 %v13428_v5  ;;  %12565 = vmatprep.mubr.msk.bf16.mxu0 %vm176_vm2, %v7656_v2  ;;  %v13436_v5 = vld [vmem:[%s19524_s3 + $0x980] sm:$0xff]   ;;  %v13437_v2 = vld [vmem:[%s19524_s3 + $0x9f8] sm:$0xff]  }
 0x552   :  { %7525 = vmatpush1.bf16.msra.mxu1 %v13427_v45  ;;  %7783 = vmatprep.subr.bf16.mxu0 %v19646_v31  ;;  %v13435_v45 = vld [vmem:[%s19524_s3 + $0x9f0] sm:$0xff]  }
 0x553   :  { %8066 = vmatprep.subr.bf16.mxu1 %v19646_v31 }
 0x555   :  { %7529 = vmatmul.mubr.bf16.vlgmr.msra.gmra.mrb[96].mxu1 %v7370_v48  ;;  %7784 = vmatpush1.bf16.msra.mxu0 %v13430_v7  ;;  %v13441_v7 = vld [vmem:[%s19524_s3 + $0xa08] sm:$0xff]   ;;  %v13443_v48 = vld [vmem:[%s19524_s3 + $0xa10] sm:$0xff]  }
 0x556   :  { %8067 = vmatpush1.bf16.msra.mxu1 %v13429_v33  ;;  %12611 = vmatprep.mubr.msk.bf16.mxu1 %vm176_vm2, %v7941_v41  ;;  %v13444_v33 = vld [vmem:[%s19524_s3 + $0x9a0] sm:$0xff]   ;;  %v13446_v41 = vld [vmem:[%s19524_s3 + $0x9a8] sm:$0xff]  }
 0x557   :  { %8068 = vmatprep.subr.bf16.mxu1 %v19646_v31  ;;  %7785 = vmatprep.subr.bf16.mxu0 %v19646_v31 }
 0x559   :  { %7786 = vmatpush1.bf16.msra.mxu0 %v13432_v36  ;;  %v13445_v36 = vld [vmem:[%s19524_s3 + $0xa18] sm:$0xff]  }
 0x55a   :  { %8069 = vmatpush1.bf16.msra.mxu1 %v13431_v20  ;;  %v6105_v18 = vpop.f32.mrb[64].mxu0  ;;  %7787 = vmatprep.subr.bf16.mxu0 %v19646_v31  ;;  %v13448_v20 = vld [vmem:[%s19524_s3 + $0x9b0] sm:$0xff]  }
 0x55b   :  { %8070 = vmatprep.subr.bf16.mxu1 %v19646_v31  ;;  %v6111_v14 = vadd.f32 %v6105_v18, %v17365_v24  ;;  %v6107_v42 = vpop.f32.mrb[65].mxu0  ;;  %v13447_v18 = vld [vmem:[%s19524_s3 + $0xa20] sm:$0xff]  }
 0x55c   :  { %v6108_v32 = vpop.f32.mrb[66].mxu0  ;;  %v17675_v42 = vld [vmem:[#allocation2 + $0x26] ss:$8 sm:$0x3] }
 0x55d   :  { %v6390_v23 = vpop.f32.mrb[88].mxu1  ;;  %7788 = vmatpush1.bf16.msra.mxu0 %v13434_v51  ;;  %v6109_v25 = vpop.f32.mrb[67].mxu0  ;;  %v7568_v51 = vrot.slane %v17415_v17, %v14595_v53  ;;  %v13449_v17 = vld [vmem:[%s19524_s3 + $0xa28] sm:$0xff]  }
 0x55e   :  { %8071 = vmatpush1.bf16.msra.mxu1 %v13433_v8  ;;  %v17614_v37 = vadd.f32 %v6390_v23, %v6111_v14  ;;  %v6392_v49 = vpop.f32.mrb[89].mxu1  ;;  %7789 = vmatprep.subr.bf16.mxu0 %v19646_v31  ;;  %v17666_v8 = vld [vmem:[#allocation2 + $0x76] ss:$8 sm:$0x3]  ;;  %v7557_v14 = vrot.slane %v17424_v54, %v14595_v53  ;;  %v7590_v25 = vrot.slane %v17436_v12, %v14595_v53 }
 0x55f   :  { %8072 = vmatprep.subr.bf16.mxu1 %v19646_v31  ;;  %v6393_v24 = vpop.f32.mrb[90].mxu1  ;;  %v8142_v32 = vrot.slane %v17666_v8, %v14597_v27  ;;  %v13450_v23 = vld [vmem:[%s19524_s3 + $0x9b8] sm:$0xff]   ;;  %v7579_v49 = vrot.slane %v17442_v63, %v14595_v53  ;;  %v7601_v12 = vrot.slane %v17457_v13, %v14595_v53  ;;  %v13452_v13 = vld [vmem:[%s19524_s3 + $0x9c0] sm:$0xff]  }
 0x560   :  { %v6394_v21 = vpop.f32.mrb[91].mxu1  ;;  %v17688_v54 = vld [vmem:[#allocation2 + $0x116] ss:$8 sm:$0x3]  ;;  %v8131_v24 = vrot.slane %v17675_v42, %v14597_v27 }
 0x561   :  { %7790 = vmatpush1.bf16.msra.mxu0 %v13436_v5  ;;  %v7641_v5 = vsel %vm193_vm3, %v7557_v14, %v7568_v51  ;;  %v17697_v21 = vld [vmem:[#allocation2 + $0x77] ss:$8 sm:$0x3]  ;;  %v7875_v51 = vrot.slane %v17485_v34, %v14595_v53 }
 0x562   :  { %8073 = vmatpush1.bf16.msra.mxu1 %v13435_v45  ;;  %7791 = vmatprep.subr.bf16.mxu0 %v19646_v31  ;;  %v17693_v45 = vld [vmem:[#allocation2 + $0xc6] ss:$8 sm:$0x3]  ;;  %v7643_v63 = vsel %vm1941_vm4, %v7641_v5, %v7579_v49 }
 0x563   :  { %8074 = vmatprep.subr.bf16.mxu1 %v19646_v31  ;;  %v17753_v5 = vld [vmem:[#allocation2 + $0x206] ss:$8 sm:$0x3] }
 0x565   :  { %7792 = vmatpush1.bf16.msra.mxu0 %v13438_v4  ;;  %v7853_v4 = vrot.slane %v17446_v26, %v14595_v53  ;;  %v7645_v26 = vsel %vm1944_vm5, %v7643_v63, %v7590_v25  ;;  %v7864_v25 = vrot.slane %v17492_v60, %v14595_v53  ;;  %v7897_v63 = vrot.slane %v17525_v52, %v14595_v53 }
 0x566   :  { %8075 = vmatpush1.bf16.msra.mxu1 %v13437_v2  ;;  %7793 = vmatprep.subr.bf16.mxu0 %v19646_v31  ;;  %v7612_v2 = vrot.slane %v17470_v29, %v14595_v53  ;;  %v7842_v29 = vrot.slane %v17462_v47, %v14595_v53  ;;  %v7634_v47 = vrot.slane %v17511_v50, %v14595_v53  ;;  %v13454_v50 = vld [vmem:[%s19524_s3 + $0x9c8] sm:$0xff]  }
 0x567   :  { %8076 = vmatprep.subr.bf16.mxu1 %v19646_v31  ;;  %v7647_v34 = vsel %vm1947_vm6, %v7645_v26, %v7601_v12  ;;  %v17764_v12 = vld [vmem:[#allocation2 + $0x167] ss:$8 sm:$0x3] }
 0x568   :  { %v7926_v14 = vsel %vm193_vm3, %v7842_v29, %v7853_v4  ;;  %v7886_v4 = vrot.slane %v17513_v10, %v14595_v53  ;;  %v7649_v10 = vsel %vm1950_vm7, %v7647_v34, %v7612_v2  ;;  %v8460_v34 = vrot.slane %v17764_v12, %v14597_v27 }
 0x569   :  { %7794 = vmatpush1.bf16.msra.mxu0 %v13440_v28  ;;  %v17707_v28 = vld [vmem:[#allocation2 + $0x166] ss:$8 sm:$0x3]  ;;  %v7928_v52 = vsel %vm1941_vm4, %v7926_v14, %v7864_v25 }
 0x56a   :  { %8077 = vmatpush1.bf16.msra.mxu1 %v13439_v0  ;;  %7795 = vmatprep.subr.bf16.mxu0 %v19646_v31  ;;  %v8164_v0 = vrot.slane %v17688_v54, %v14597_v27 }
 0x56b   :  { %8078 = vmatprep.subr.bf16.mxu1 %v19646_v31 }
 0x56d   :  { %7796 = vmatpush1.bf16.msra.mxu0 %v13442_v3  ;;  %v8212_v3 = vsel %vm193_vm3, %v8131_v24, %v8142_v32  ;;  %v8175_v32 = vrot.slane %v17707_v28, %v14597_v27 }
 0x56e   :  { %8079 = vmatpush1.bf16.msra.mxu1 %v13441_v7  ;;  %7797 = vmatprep.subr.bf16.mxu0 %v19646_v31  ;;  %v17712_v7 = vld [vmem:[#allocation2 + $0x27] ss:$8 sm:$0x3] }
 0x56f   :  { %8080 = vmatprep.subr.bf16.mxu1 %v19646_v31 }
 0x571   :  { %7798 = vmatpush1.bf16.msra.mxu0 %v13444_v33  ;;  %v17720_v33 = vld [vmem:[#allocation2 + $0x1b6] ss:$8 sm:$0x3] }
 0x572   :  { %8081 = vmatpush1.bf16.msra.mxu1 %v13443_v48  ;;  %7799 = vmatprep.subr.bf16.mxu0 %v19646_v31  ;;  %v8153_v48 = vrot.slane %v17693_v45, %v14597_v27  ;;  %v8186_v49 = vrot.slane %v17720_v33, %v14597_v27 }
 0x573   :  { %8082 = vmatprep.subr.bf16.mxu1 %v19646_v31 }
 0x575   :  { %7800 = vmatpush1.bf16.msra.mxu0 %v13446_v41  ;;  %v8427_v41 = vrot.slane %v17697_v21, %v14597_v27 }
 0x576   :  { %8083 = vmatpush1.bf16.msra.mxu1 %v13445_v36  ;;  %7801 = vmatprep.subr.bf16.mxu0 %v19646_v31  ;;  %v13451_v36 = vld [vmem:[%s19524_s3 + $0xa30] sm:$0xff]  }
 0x577   :  { %8084 = vmatprep.subr.bf16.mxu1 %v19646_v31 }
 0x579   :  { %7802 = vmatpush1.bf16.msra.mxu0 %v13448_v20  ;;  %v7623_v20 = vrot.slane %v17503_v40, %v14595_v53  ;;  %v8416_v40 = vrot.slane %v17712_v7, %v14597_v27 }
 0x57a   :  { %8085 = vmatpush1.bf16.msra.mxu1 %v13447_v18  ;;  %7803 = vmatprep.subr.bf16.mxu0 %v19646_v31  ;;  %v17736_v18 = vld [vmem:[#allocation2 + $0x117] ss:$8 sm:$0x3] }
 0x57b   :  { %8086 = vmatprep.subr.bf16.mxu1 %v19646_v31  ;;  %v8449_v60 = vrot.slane %v17736_v18, %v14597_v27  ;;  %v8497_v26 = vsel %vm193_vm3, %v8416_v40, %v8427_v41  ;;  %v7930_v41 = vsel %vm1944_vm5, %v7928_v52, %v7875_v51  ;;  %v7651_v52 = vsel %vm1953_vm8, %v7649_v10, %v7623_v20  ;;  %v17809_v10 = vld [vmem:[#allocation2 + $0x257] ss:$8 sm:$0x3] }
 0x57c   :  { %v7932_v20 = vsel %vm1947_vm6, %v7930_v41, %v7886_v4  ;;  %v8493_v58 = vrot.slane %v17809_v10, %v14597_v27 }
 0x57d   :  { %7804 = vmatpush1.bf16.msra.mxu0 %v13450_v23  ;;  %v17743_v23 = vld [vmem:[#allocation2 + $0xc7] ss:$8 sm:$0x3] }
 0x57e   :  { %8087 = vmatpush1.bf16.msra.mxu1 %v13449_v17  ;;  %7805 = vmatprep.subr.bf16.mxu0 %v19646_v31  ;;  %v8214_v17 = vsel %vm1941_vm4, %v8212_v3, %v8153_v48  ;;  %v17762_v3 = vld [vmem:[#allocation2 + $0x256] ss:$8 sm:$0x3]  ;;  %v8438_v29 = vrot.slane %v17743_v23, %v14597_v27  ;;  %v7908_v48 = vrot.slane %v17544_v43, %v14595_v53 }
 0x57f   :  { %8088 = vmatprep.subr.bf16.mxu1 %v19646_v31  ;;  %v8216_v24 = vsel %vm1944_vm5, %v8214_v17, %v8164_v0  ;;  %v13453_v0 = vld [vmem:[%s19524_s3 + $0xa38] sm:$0xff]   ;;  %v8208_v14 = vrot.slane %v17762_v3, %v14597_v27  ;;  %v13456_v43 = vld [vmem:[%s19524_s3 + $0x9d0] sm:$0xff]  }
 0x580   :  { %v8218_v17 = vsel %vm1947_vm6, %v8216_v24, %v8175_v32  ;;  %v8499_v25 = vsel %vm1941_vm4, %v8497_v26, %v8438_v29  ;;  %v17796_v32 = vld [vmem:[#allocation2 + $0x207] ss:$8 sm:$0x3]  ;;  %v7919_v29 = vrot.slane %v17556_v19, %v14595_v53 }
 0x581   :  { %7806 = vmatpush1.bf16.msra.mxu0 %v13452_v13  ;;  %v17775_v13 = vld [vmem:[#allocation2 + $0x1b7] ss:$8 sm:$0x3]  ;;  %v8220_v40 = vsel %vm1950_vm7, %v8218_v17, %v8186_v49  ;;  %v8501_v49 = vsel %vm1944_vm5, %v8499_v25, %v8449_v60  ;;  %v13455_v26 = vld [vmem:[%s19524_s3 + $0xa40] sm:$0xff]   ;;  %v7934_v17 = vsel %vm1950_vm7, %v7932_v20, %v7897_v63  ;;  %v8482_v4 = vrot.slane %v17796_v32, %v14597_v27 }
 0x582   :  { %8089 = vmatpush1.bf16.msra.mxu1 %v13451_v36  ;;  %7807 = vmatprep.subr.bf16.mxu0 %v19646_v31  ;;  %v8197_v36 = vrot.slane %v17753_v5, %v14597_v27  ;;  %v8471_v24 = vrot.slane %v17775_v13, %v14597_v27  ;;  %v8503_v41 = vsel %vm1947_vm6, %v8501_v49, %v8460_v34 }
 0x583   :  { %8090 = vmatprep.subr.bf16.mxu1 %v19646_v31 }
 0x584   :  { %v192_v2 = vpop.xlane.xlu0 %191 }
 0x585   :  { %7808 = vmatpush1.bf16.msra.mxu0 %v13454_v50  ;;  %v204_v51 = vmul.f32 0.004166667, %v192_v2  ;;  %v7653_v50 = vsel %vm98_vm0, %v7651_v52, %v7634_v47  ;;  %v8222_v47 = vsel %vm1953_vm8, %v8220_v40, %v8197_v36  ;;  %v13457_v2 = vld [vmem:[%s19524_s3 + $0xa48] sm:$0xff]   ;;  %v7936_v40 = vsel %vm1953_vm8, %v7934_v17, %v7908_v48 }
 0x586   :  { %8091 = vmatpush1.bf16.msra.mxu1 %v13453_v0  ;;  %7809 = vmatprep.subr.bf16.mxu0 %v19646_v31  ;;  %v8224_v19 = vsel %vm98_vm0, %v8222_v47, %v8208_v14  ;;  %v7655_v14 = vpack.c.bf16 %v7653_v50, %v7653_v50  ;;  %v7938_v25 = vsel %vm98_vm0, %v7936_v40, %v7919_v29  ;;  %v13460_v50 = vld [vmem:[%s19524_s3 + $0xa58] sm:$0xff]   ;;  %v13461_v40 = vld [vmem:[%s19524_s3 + $0xad0] sm:$0xff]  }
 0x587   :  { %8092 = vmatprep.subr.bf16.mxu1 %v19646_v31  ;;  %v17814_v60 = vsub.f32 %v172_v30, %v204_v51  ;;  %v17818_v0 = vsub.f32 %v173_v56, %v204_v51  ;;  %v8505_v30 = vsel %vm1950_vm7, %v8503_v41, %v8471_v24  ;;  %v7940_v17 = vpack.c.bf16 %v7938_v25, %v7938_v25 }
 0x588   :  { %v8507_v52 = vsel %vm1953_vm8, %v8505_v30, %v8482_v4  ;;  %v19727_v4 = vmax.f32 %v17039_v39, 0.0  ;;  %v13462_v39 = vld [vmem:[%s19524_s3 + $0xa60] sm:$0xff]  }
 0x589   :  { %7810 = vmatpush1.bf16.msra.mxu0 %v13456_v43  ;;  %v640_v56 = vpop.xlane.xlu0 %639  ;;  %v222_v63 = vmul.f32 %v17814_v60, %v17814_v60  ;;  %v223_v36 = vmul.f32 %v17818_v0, %v17818_v0  ;;  %v8226_v43 = vpack.c.bf16 %v8224_v19, %v8224_v19 }
 0x58a   :  { %8093 = vmatpush1.bf16.msra.mxu1 %v13455_v26  ;;  %8351 = vmatprep.subr.bf16.mxu0 %v19646_v31  ;;  %v649_v34 = vmul.f32 0.004166667, %v640_v56  ;;  %v8509_v26 = vsel %vm98_vm0, %v8507_v52, %v8493_v58  ;;  %v19729_v56 = vmax.f32 %v17050_v62, 0.0  ;;  %v19731_v52 = vmax.f32 %v17077_v38, 0.0 }
 0x58b   :  { %8094 = vmatprep.subr.bf16.mxu1 %v19646_v31  ;;  %v238_v51 = vsel %vm176_vm2, %v223_v36, 0.0  ;;  %v8511_v19 = vpack.c.bf16 %v8509_v26, %v8509_v26  ;;  %v19730_v36 = vmax.f32 %v17053_v57, 0.0  ;;  %v19732_v26 = vmax.f32 %v17085_v35, 0.0  ;;  %v13463_v35 = vld [vmem:[%s19524_s3 + $0xad8] sm:$0xff]  }
 0x58c   :  { %7814 = vmatmul.mubr.bf16.vlgmr.msra.gmra.mrb[76].mxu0 %v7655_v14  ;;  %v17847_v24 = vsub.f32 %v621_v44, %v649_v34  ;;  %v17851_v48 = vsub.f32 %v622_v55, %v649_v34  ;;  %v239_v49 = vadd.f32 %v238_v51, %v222_v63 }
 0x58d   :  { %8352 = vmatpush1.bf16.msra.mxu0 %v13458_v16  ;;  %12657 = vmatprep.mubr.msk.bf16.mxu0 %vm176_vm2, %v8226_v43  ;;  %v863_v29 = vpop.xlane.xlu0 %862  ;;  %v19728_v16 = vmax.f32 %v17042_v59, 0.0 }
 0x58e   :  { %8095 = vmatpush1.bf16.msra.mxu1 %v13457_v2  ;;  %8353 = vmatprep.subr.bf16.mxu0 %v19646_v31  ;;  %v417_v61 = vpop.xlane.xlu1 %416  ;;  %v872_v44 = vmul.f32 0.004166667, %v863_v29  ;;  %v667_v55 = vmul.f32 %v17847_v24, %v17847_v24  ;;  %v668_v20 = vmul.f32 %v17851_v48, %v17851_v48  ;;  %v19733_v29 = vmax.f32 %v17088_v46, 0.0 }
 0x58f   :  { %8636 = vmatprep.subr.bf16.mxu1 %v19646_v31  ;;  %v426_v47 = vmul.f32 0.004166667, %v417_v61  ;;  %240 = vadd.xlane.f32.xlu1 %v239_v49  ;;  %v13464_v61 = vld [vmem:[%s19524_s3 + $0xa68] sm:$0xff]  }
 0x590   :  { %v17869_v41 = vsub.f32 %v19727_v4, %v872_v44  ;;  %v17873_v58 = vsub.f32 %v19728_v16, %v872_v44  ;;  %v683_v30 = vsel %vm176_vm2, %v668_v20, 0.0  ;;  %v19734_v20 = vmax.f32 %v17074_v6, 0.0 }
 0x591   :  { %8099 = vmatmul.mubr.bf16.vlgmr.msra.gmra.mrb[100].mxu1 %v7940_v17  ;;  %8354 = vmatpush1.bf16.msra.mxu0 %v13460_v50  ;;  %v17878_v63 = vsub.f32 %v19729_v56, %v426_v47  ;;  %v17882_v2 = vsub.f32 %v19730_v36, %v426_v47  ;;  %v1309_v14 = vpop.xlane.xlu0 %1308  ;;  %v684_v59 = vadd.f32 %v683_v30, %v667_v55  ;;  %v19735_v36 = vmax.f32 %v17115_v11, 0.0  ;;  %v13465_v11 = vld [vmem:[%s19524_s3 + $0xae0] sm:$0xff]  }
 0x592   :  { %8637 = vmatpush1.bf16.msra.mxu1 %v13459_v15  ;;  %12703 = vmatprep.mubr.msk.bf16.mxu1 %vm176_vm2, %v8511_v19  ;;  %v1086_v62 = vpop.xlane.xlu1 %1085  ;;  %v1318_v34 = vmul.f32 0.004166667, %v1309_v14  ;;  %v891_v57 = vmul.f32 %v17873_v58, %v17873_v58  ;;  %v890_v38 = vmul.f32 %v17869_v41, %v17869_v41  ;;  %v19736_v14 = vmax.f32 %v17122_v9, 0.0 }
 0x593   :  { %8638 = vmatprep.subr.bf16.mxu1 %v19646_v31  ;;  %8355 = vmatprep.subr.bf16.mxu0 %v19646_v31  ;;  %v1095_v25 = vmul.f32 0.004166667, %v1086_v62  ;;  %v444_v43 = vmul.f32 %v17878_v63, %v17878_v63  ;;  %v445_v51 = vmul.f32 %v17882_v2, %v17882_v2  ;;  %v19738_v9 = vmax.f32 %v17112_v1, 0.0 }
 0x594   :  { %v17901_v49 = vsub.f32 %v19731_v52, %v1318_v34  ;;  %685 = vadd.xlane.f32.xlu1 %v684_v59  ;;  %v17922_v46 = vsub.f32 %v19734_v20, %v1318_v34  ;;  %v906_v4 = vsel %vm176_vm2, %v891_v57, 0.0  ;;  %v13466_v34 = vld [vmem:[%s19524_s3 + $0xa70] sm:$0xff]  }
 0x595   :  { %8356 = vmatpush1.bf16.msra.mxu0 %v13462_v39  ;;  %v17905_v50 = vsub.f32 %v19732_v26, %v1095_v25  ;;  %v17909_v15 = vsub.f32 %v19733_v29, %v1095_v25  ;;  %v1755_v44 = vpop.xlane.xlu0 %1754  ;;  %v460_v55 = vsel %vm176_vm2, %v445_v51, 0.0  ;;  %v907_v25 = vadd.f32 %v906_v4, %v890_v38 }
 0x596   :  { %8639 = vmatpush1.bf16.msra.mxu1 %v13461_v40  ;;  %8357 = vmatprep.subr.bf16.mxu0 %v19646_v31  ;;  %v1532_v17 = vpop.xlane.xlu1 %1531  ;;  %v1764_v47 = vmul.f32 0.004166667, %v1755_v44  ;;  %v461_v19 = vadd.f32 %v460_v55, %v444_v43  ;;  %v1337_v6 = vmul.f32 %v17901_v49, %v17901_v49  ;;  %v19737_v40 = vmax.f32 %v17125_v22, 0.0  ;;  %v13467_v55 = vld [vmem:[%s19524_s3 + $0xae8] sm:$0xff]  }
 0x597   :  { %8640 = vmatprep.subr.bf16.mxu1 %v19646_v31  ;;  %v1541_v16 = vmul.f32 0.004166667, %v1532_v17  ;;  %v1113_v30 = vmul.f32 %v17905_v50, %v17905_v50  ;;  %v1114_v56 = vmul.f32 %v17909_v15, %v17909_v15  ;;  %v1336_v51 = vmul.f32 %v17922_v46, %v17922_v46 }
 0x598   :  { %v17935_v39 = vsub.f32 %v19735_v36, %v1764_v47  ;;  %462 = vadd.xlane.f32.xlu0 %v461_v19  ;;  %v17954_v43 = vsub.f32 %v19738_v9, %v1764_v47  ;;  %v1352_v29 = vsel %vm176_vm2, %v1337_v6, 0.0  ;;  %v13470_v47 = vld [vmem:[%s19524_s3 + $0xa80] sm:$0xff]   ;;  %v13469_v19 = vld [vmem:[%s19524_s3 + $0xaf0] sm:$0xff]   ;;  %v13476_v36 = vld [vmem:[%s19524_s3 + $0xa98] sm:$0xff]  }
 0x599   :  { %8358 = vmatpush1.bf16.msra.mxu0 %v13464_v61  ;;  %v17939_v59 = vsub.f32 %v19736_v14, %v1541_v16  ;;  %v17943_v62 = vsub.f32 %v19737_v40, %v1541_v16  ;;  %v1129_v57 = vsel %vm176_vm2, %v1114_v56, 0.0  ;;  %v13468_v61 = vld [vmem:[%s19524_s3 + $0xa78] sm:$0xff]   ;;  %v13472_v16 = vld [vmem:[%s19524_s3 + $0xa88] sm:$0xff]   ;;  %v13474_v56 = vld [vmem:[%s19524_s3 + $0xa90] sm:$0xff]  }
 0x59a   :  { %8641 = vmatpush1.bf16.msra.mxu1 %v13463_v35  ;;  %8359 = vmatprep.subr.bf16.mxu0 %v19646_v31  ;;  %v1130_v22 = vadd.f32 %v1129_v57, %v1113_v30  ;;  %v1783_v1 = vmul.f32 %v17935_v39, %v17935_v39  ;;  %v1353_v35 = vadd.f32 %v1352_v29, %v1336_v51  ;;  %v13471_v30 = vld [vmem:[%s19524_s3 + $0xaf8] sm:$0xff]   ;;  %v13473_v6 = vld [vmem:[%s19524_s3 + $0xb00] sm:$0xff]   ;;  %v13475_v14 = vld [vmem:[%s19524_s3 + $0xb08] sm:$0xff]  }
 0x59b   :  { %8642 = vmatprep.subr.bf16.mxu1 %v19646_v31  ;;  %v1559_v52 = vmul.f32 %v17939_v59, %v17939_v59  ;;  %v1560_v26 = vmul.f32 %v17943_v62, %v17943_v62  ;;  %v1782_v20 = vmul.f32 %v17954_v43, %v17954_v43  ;;  %v49_v40 = vld [vmem:[%s19523_s2 + $0x20] sm:$0x1]  ;;  %v13477_v57 = vld [vmem:[%s19524_s3 + $0xb10] sm:$0xff]   ;;  %v13480_v9 = vld [vmem:[%s19524_s3 + $0xaa8] sm:$0xff]   ;;  %v8149_v29 = vrot.slane %v17693_v45, %v14595_v53 }
 0x59c   :  { %1131 = vadd.xlane.f32.xlu1 %v1130_v22  ;;  %908 = vadd.xlane.f32.xlu0 %v907_v25  ;;  %v1798_v17 = vsel %vm176_vm2, %v1783_v1, 0.0  ;;  %v522_v25 = vld [vmem:[%s19523_s2 + $0x20] sm:$0x1]  ;;  %v8127_v22 = vrot.slane %v17675_v42, %v14595_v53  ;;  %v13479_v51 = vld [vmem:[%s19524_s3 + $0xb18] sm:$0xff]   ;;  %v8423_v1 = vrot.slane %v17697_v21, %v14595_v53  ;;  %v8171_v21 = vrot.slane %v17707_v28, %v14595_v53 }
 0x59d   :  { %8360 = vmatpush1.bf16.msra.mxu0 %v13466_v34  ;;  %v1575_v44 = vsel %vm176_vm2, %v1560_v26, 0.0  ;;  %v1799_v4 = vadd.f32 %v1798_v17, %v1782_v20  ;;  %v13478_v34 = vld [vmem:[%s19524_s3 + $0xaa0] sm:$0xff]   ;;  %v8445_v28 = vrot.slane %v17736_v18, %v14595_v53 }
 0x59e   :  { %8643 = vmatpush1.bf16.msra.mxu1 %v13465_v11  ;;  %8361 = vmatprep.subr.bf16.mxu0 %v19646_v31  ;;  %v1576_v38 = vadd.f32 %v1575_v44, %v1559_v52  ;;  %v8138_v11 = vrot.slane %v17666_v8, %v14595_v53  ;;  %v745_v8 = vld [vmem:[%s19523_s2 + $0x20] sm:$0x1]  ;;  %v8160_v52 = vrot.slane %v17688_v54, %v14595_v53 }
 0x59f   :  { %8644 = vmatprep.subr.bf16.mxu1 %v19646_v31  ;;  %v299_v42 = vld [vmem:[%s19523_s2 + $0x20] sm:$0x1] }
 0x5a0   :  { %1577 = vadd.xlane.f32.xlu1 %v1576_v38  ;;  %1354 = vadd.xlane.f32.xlu0 %v1353_v35  ;;  %v8211_v26 = vsel %vm193_vm3, %v8127_v22, %v8138_v11  ;;  %v13481_v54 = vld [vmem:[%s19524_s3 + $0xb20] sm:$0xff]   ;;  %v8182_v38 = vrot.slane %v17720_v33, %v14595_v53  ;;  %v8434_v33 = vrot.slane %v17743_v23, %v14595_v53 }
 0x5a1   :  { %8362 = vmatpush1.bf16.msra.mxu0 %v13468_v61  ;;  %v13482_v61 = vld [vmem:[%s19524_s3 + $0xab0] sm:$0xff]   ;;  %v1191_v45 = vld [vmem:[%s19523_s2 + $0x20] sm:$0x1]  ;;  %v8213_v44 = vsel %vm1941_vm4, %v8211_v26, %v8149_v29  ;;  %v13494_v29 = vld [vmem:[%s19524_s3 + $0xb58] sm:$0xff]  }
 0x5a2   :  { %8645 = vmatpush1.bf16.msra.mxu1 %v13467_v55  ;;  %8363 = vmatprep.subr.bf16.mxu0 %v19646_v31  ;;  %v8412_v55 = vrot.slane %v17712_v7, %v14595_v53  ;;  %v8215_v35 = vsel %vm1944_vm5, %v8213_v44, %v8160_v52  ;;  %v968_v20 = vld [vmem:[%s19523_s2 + $0x20] sm:$0x1]  ;;  %v13484_v7 = vld [vmem:[%s19524_s3 + $0xab8] sm:$0xff]   ;;  %v13492_v26 = vld [vmem:[%s19524_s3 + $0xb50] sm:$0xff]  }
 0x5a3   :  { %8646 = vmatprep.subr.bf16.mxu1 %v19646_v31  ;;  %v1637_v18 = vld [vmem:[%s19523_s2 + $0x20] sm:$0x1]  ;;  %v13500_v44 = vld [vmem:[%s19524_s3 + $0xb70] sm:$0xff]  }
 0x5a4   :  { %1800 = vadd.xlane.f32.xlu0 %v1799_v4  ;;  %v8496_v17 = vsel %vm193_vm3, %v8412_v55, %v8423_v1  ;;  %v8204_v4 = vrot.slane %v17762_v3, %v14595_v53  ;;  %v13488_v11 = vld [vmem:[%s19524_s3 + $0xb40] sm:$0xff]   ;;  %v13493_v1 = vld [vmem:[%s19524_s3 + $0xbc8] sm:$0xff]  }
 0x5a5   :  { %8364 = vmatpush1.bf16.msra.mxu0 %v13470_v47  ;;  %v13483_v47 = vld [vmem:[%s19524_s3 + $0xb28] sm:$0xff]   ;;  %v13499_v55 = vld [vmem:[%s19524_s3 + $0xbe0] sm:$0xff]  }
 0x5a6   :  { %8647 = vmatpush1.bf16.msra.mxu1 %v13469_v19  ;;  %8365 = vmatprep.subr.bf16.mxu0 %v19646_v31  ;;  %v8193_v19 = vrot.slane %v17753_v5, %v14595_v53  ;;  %v8467_v5 = vrot.slane %v17775_v13, %v14595_v53 }
 0x5a7   :  { %8648 = vmatprep.subr.bf16.mxu1 %v19646_v31 }
 0x5a9   :  { %8366 = vmatpush1.bf16.msra.mxu0 %v13472_v16  ;;  %v8217_v16 = vsel %vm1947_vm6, %v8215_v35, %v8171_v21  ;;  %v13497_v21 = vld [vmem:[%s19524_s3 + $0xbd8] sm:$0xff]   ;;  %v13501_v35 = vld [vmem:[%s19524_s3 + $0xbe8] sm:$0xff]  }
 0x5aa   :  { %8649 = vmatpush1.bf16.msra.mxu1 %v13471_v30  ;;  %8367 = vmatprep.subr.bf16.mxu0 %v19646_v31  ;;  %v8219_v23 = vsel %vm1950_vm7, %v8217_v16, %v8182_v38  ;;  %v8456_v30 = vrot.slane %v17764_v12, %v14595_v53  ;;  %v13485_v12 = vld [vmem:[%s19524_s3 + $0xb30] sm:$0xff]   ;;  %v13502_v38 = vld [vmem:[%s19524_s3 + $0xb78] sm:$0xff]  }
 0x5ab   :  { %8650 = vmatprep.subr.bf16.mxu1 %v19646_v31 }
 0x5ad   :  { %8368 = vmatpush1.bf16.msra.mxu0 %v13474_v56  ;;  %v8498_v56 = vsel %vm1941_vm4, %v8496_v17, %v8434_v33 }
 0x5ae   :  { %8651 = vmatpush1.bf16.msra.mxu1 %v13473_v6  ;;  %8369 = vmatprep.subr.bf16.mxu0 %v19646_v31  ;;  %v1414_v6 = vld [vmem:[%s19523_s2 + $0x20] sm:$0x1]  ;;  %v8500_v3 = vsel %vm1944_vm5, %v8498_v56, %v8445_v28  ;;  %v13503_v28 = vld [vmem:[%s19524_s3 + $0xbf0] sm:$0xff]  }
 0x5af   :  { %8652 = vmatprep.subr.bf16.mxu1 %v19646_v31 }
 0x5b1   :  { %8370 = vmatpush1.bf16.msra.mxu0 %v13476_v36  ;;  %72 = vperm.xlu1 %13124, %v49_v40   ;;  %v13486_v36 = vld [vmem:[%s19524_s3 + $0xac0] sm:$0xff]   ;;  %v8478_v40 = vrot.slane %v17796_v32, %v14595_v53 }
 0x5b2   :  { %8653 = vmatpush1.bf16.msra.mxu1 %v13475_v14  ;;  %8371 = vmatprep.subr.bf16.mxu0 %v19646_v31  ;;  %v8221_v14 = vsel %vm1953_vm8, %v8219_v23, %v8193_v19 }
 0x5b3   :  { %8654 = vmatprep.subr.bf16.mxu1 %v19646_v31  ;;  %v8223_v13 = vsel %vm98_vm0, %v8221_v14, %v8204_v4  ;;  %v13505_v4 = vld [vmem:[%s19524_s3 + $0xbf8] sm:$0xff]   ;;  %v13511_v14 = vld [vmem:[%s19524_s3 + $0xc10] sm:$0xff]  }
 0x5b4   :  { %v8225_v22 = vpack.c.bf16 %v8223_v13, %v8223_v13  ;;  %v13514_v13 = vld [vmem:[%s19524_s3 + $0xba8] sm:$0xff]  }
 0x5b5   :  { %8372 = vmatpush1.bf16.msra.mxu0 %v13478_v34  ;;  %545 = vperm.xlu1 %13124, %v522_v25   ;;  %v8502_v34 = vsel %vm1947_vm6, %v8500_v3, %v8456_v30  ;;  %v13508_v30 = vld [vmem:[%s19524_s3 + $0xb90] sm:$0xff]   ;;  %v13510_v3 = vld [vmem:[%s19524_s3 + $0xb98] sm:$0xff]  }
 0x5b6   :  { %8655 = vmatpush1.bf16.msra.mxu1 %v13477_v57  ;;  %8373 = vmatprep.subr.bf16.mxu0 %v19646_v31  ;;  %v8489_v57 = vrot.slane %v17809_v10, %v14595_v53  ;;  %v8504_v25 = vsel %vm1950_vm7, %v8502_v34, %v8467_v5  ;;  %v13516_v34 = vld [vmem:[%s19524_s3 + $0xbb0] sm:$0xff]  }
 0x5b7   :  { %8656 = vmatprep.subr.bf16.mxu1 %v19646_v31  ;;  %v8506_v32 = vsel %vm1953_vm8, %v8504_v25, %v8478_v40  ;;  %v13513_v40 = vld [vmem:[%s19524_s3 + $0xc18] sm:$0xff]   ;;  %v13517_v25 = vld [vmem:[%s19524_s3 + $0xc28] sm:$0xff]  }
 0x5b8   :  { %v8508_v10 = vsel %vm98_vm0, %v8506_v32, %v8489_v57  ;;  %v13515_v57 = vld [vmem:[%s19524_s3 + $0xc20] sm:$0xff]  }
 0x5b9   :  { %8374 = vmatpush1.bf16.msra.mxu0 %v13480_v9  ;;  %768 = vperm.xlu1 %13124, %v745_v8   ;;  %v13487_v9 = vld [vmem:[%s19524_s3 + $0xb38] sm:$0xff]   ;;  %v8510_v52 = vpack.c.bf16 %v8508_v10, %v8508_v10 }
 0x5ba   :  { %8657 = vmatpush1.bf16.msra.mxu1 %v13479_v51  ;;  %8375 = vmatprep.subr.bf16.mxu0 %v19646_v31  ;;  %v13490_v51 = vld [vmem:[%s19524_s3 + $0xb48] sm:$0xff]   ;;  %v13489_v8 = vld [vmem:[%s19524_s3 + $0xbb8] sm:$0xff]  }
 0x5bb   :  { %8658 = vmatprep.subr.bf16.mxu1 %v19646_v31  ;;  %322 = vperm.xlu0 %13123, %v299_v42   ;;  %v13491_v42 = vld [vmem:[%s19524_s3 + $0xbc0] sm:$0xff]  }
 0x5bd   :  { %8376 = vmatpush1.bf16.msra.mxu0 %v13482_v61  ;;  %1214 = vperm.xlu1 %13124, %v1191_v45   ;;  %v13496_v61 = vld [vmem:[%s19524_s3 + $0xb60] sm:$0xff]   ;;  %v13498_v45 = vld [vmem:[%s19524_s3 + $0xb68] sm:$0xff]  }
 0x5be   :  { %8659 = vmatpush1.bf16.msra.mxu1 %v13481_v54  ;;  %8377 = vmatprep.subr.bf16.mxu0 %v19646_v31  ;;  %v13495_v54 = vld [vmem:[%s19524_s3 + $0xbd0] sm:$0xff]  }
 0x5bf   :  { %8660 = vmatprep.subr.bf16.mxu1 %v19646_v31  ;;  %991 = vperm.xlu0 %13123, %v968_v20   ;;  %v13504_v20 = vld [vmem:[%s19524_s3 + $0xb80] sm:$0xff]  }
 0x5c1   :  { %8378 = vmatpush1.bf16.msra.mxu0 %v13484_v7  ;;  %1660 = vperm.xlu1 %13124, %v1637_v18   ;;  %v13506_v18 = vld [vmem:[%s19524_s3 + $0xb88] sm:$0xff]  }
 0x5c2   :  { %8661 = vmatpush1.bf16.msra.mxu1 %v13483_v47  ;;  %8379 = vmatprep.subr.bf16.mxu0 %v19646_v31 }
 0x5c3   :  { %8662 = vmatprep.subr.bf16.mxu1 %v19646_v31  ;;  %1437 = vperm.xlu0 %13123, %v1414_v6   ;;  %v13507_v6 = vld [vmem:[%s19524_s3 + $0xc00] sm:$0xff]  }
 0x5c5   :  { %8380 = vmatpush1.bf16.msra.mxu0 %v13486_v36  ;;  %v13509_v36 = vld [vmem:[%s19524_s3 + $0xc08] sm:$0xff]  }
 0x5c6   :  { %8663 = vmatpush1.bf16.msra.mxu1 %v13485_v12  ;;  %8921 = vmatprep.subr.bf16.mxu0 %v19646_v31  ;;  %v13512_v12 = vld [vmem:[%s19524_s3 + $0xba0] sm:$0xff]  }
 0x5c7   :  { %8664 = vmatprep.subr.bf16.mxu1 %v19646_v31 }
 0x5c8   :  { %8384 = vmatmul.mubr.bf16.vlgmr.msra.gmra.mrb[80].mxu0 %v8225_v22 }
 0x5c9   :  { %8922 = vmatpush1.bf16.msra.mxu0 %v13488_v11 }
 0x5ca   :  { %8665 = vmatpush1.bf16.msra.mxu1 %v13487_v9  ;;  %8923 = vmatprep.subr.bf16.mxu0 %v19646_v31 }
 0x5cb   :  { %9206 = vmatprep.subr.bf16.mxu1 %v19646_v31 }
 0x5cd   :  { %8669 = vmatmul.mubr.bf16.vlgmr.msra.gmra.mrb[104].mxu1 %v8510_v52  ;;  %8924 = vmatpush1.bf16.msra.mxu0 %v13490_v51 }
 0x5ce   :  { %9207 = vmatpush1.bf16.msra.mxu1 %v13489_v8  ;;  %8925 = vmatprep.subr.bf16.mxu0 %v19646_v31 }
 0x5cf   :  { %9208 = vmatprep.subr.bf16.mxu1 %v19646_v31 }
 0x5d1   :  { %8926 = vmatpush1.bf16.msra.mxu0 %v13492_v26 }
 0x5d2   :  { %9209 = vmatpush1.bf16.msra.mxu1 %v13491_v42  ;;  %8927 = vmatprep.subr.bf16.mxu0 %v19646_v31 }
 0x5d3   :  { %9210 = vmatprep.subr.bf16.mxu1 %v19646_v31 }
 0x5d5   :  { %8928 = vmatpush1.bf16.msra.mxu0 %v13494_v29 }
 0x5d6   :  { %9211 = vmatpush1.bf16.msra.mxu1 %v13493_v1  ;;  %8929 = vmatprep.subr.bf16.mxu0 %v19646_v31 }
 0x5d7   :  { %9212 = vmatprep.subr.bf16.mxu1 %v19646_v31 }
 0x5d9   :  { %8930 = vmatpush1.bf16.msra.mxu0 %v13496_v61 }
 0x5da   :  { %9213 = vmatpush1.bf16.msra.mxu1 %v13495_v54  ;;  %8931 = vmatprep.subr.bf16.mxu0 %v19646_v31 }
 0x5db   :  { %9214 = vmatprep.subr.bf16.mxu1 %v19646_v31 }
 0x5dd   :  { %8932 = vmatpush1.bf16.msra.mxu0 %v13498_v45 }
 0x5de   :  { %9215 = vmatpush1.bf16.msra.mxu1 %v13497_v21  ;;  %8933 = vmatprep.subr.bf16.mxu0 %v19646_v31 }
 0x5df   :  { %9216 = vmatprep.subr.bf16.mxu1 %v19646_v31 }
 0x5e1   :  { %8934 = vmatpush1.bf16.msra.mxu0 %v13500_v44 }
 0x5e2   :  { %9217 = vmatpush1.bf16.msra.mxu1 %v13499_v55  ;;  %8935 = vmatprep.subr.bf16.mxu0 %v19646_v31 }
 0x5e3   :  { %9218 = vmatprep.subr.bf16.mxu1 %v19646_v31 }
 0x5e5   :  { %8936 = vmatpush1.bf16.msra.mxu0 %v13502_v38 }
 0x5e6   :  { %9219 = vmatpush1.bf16.msra.mxu1 %v13501_v35  ;;  %8937 = vmatprep.subr.bf16.mxu0 %v19646_v31 }
 0x5e7   :  { %v6675_v17 = vpop.f32.mrb[68].mxu0  ;;  %9220 = vmatprep.subr.bf16.mxu1 %v19646_v31 }
 0x5e8   :  { %v6681_v7 = vadd.f32 %v6675_v17, %v17614_v37  ;;  %v6677_v33 = vpop.f32.mrb[69].mxu0 }
 0x5e9   :  { %v6678_v47 = vpop.f32.mrb[70].mxu0  ;;  %8938 = vmatpush1.bf16.msra.mxu0 %v13504_v20 }
 0x5ea   :  { %v6679_v19 = vpop.f32.mrb[71].mxu0  ;;  %9221 = vmatpush1.bf16.msra.mxu1 %v13503_v28  ;;  %8939 = vmatprep.subr.bf16.mxu0 %v19646_v31 }
 0x5eb   :  { %9222 = vmatprep.subr.bf16.mxu1 %v19646_v31 }
 0x5ec   :  { %v6960_v16 = vpop.f32.mrb[92].mxu1 }
 0x5ed   :  { %v6966_v23 = vadd.f32 %v6960_v16, %v6681_v7  ;;  %v6962_v37 = vpop.f32.mrb[93].mxu1  ;;  %8940 = vmatpush1.bf16.msra.mxu0 %v13506_v18 }
 0x5ee   :  { %v6963_v56 = vpop.f32.mrb[94].mxu1  ;;  %9223 = vmatpush1.bf16.msra.mxu1 %v13505_v4  ;;  %8941 = vmatprep.subr.bf16.mxu0 %v19646_v31 }
 0x5ef   :  { %v6964_v5 = vpop.f32.mrb[95].mxu1  ;;  %9224 = vmatprep.subr.bf16.mxu1 %v19646_v31 }
 0x5f1   :  { %8942 = vmatpush1.bf16.msra.mxu0 %v13508_v30 }
 0x5f2   :  { %9225 = vmatpush1.bf16.msra.mxu1 %v13507_v6  ;;  %8943 = vmatprep.subr.bf16.mxu0 %v19646_v31 }
 0x5f3   :  { %9226 = vmatprep.subr.bf16.mxu1 %v19646_v31 }
 0x5f5   :  { %8944 = vmatpush1.bf16.msra.mxu0 %v13510_v3 }
 0x5f6   :  { %9227 = vmatpush1.bf16.msra.mxu1 %v13509_v36  ;;  %8945 = vmatprep.subr.bf16.mxu0 %v19646_v31 }
 0x5f7   :  { %9228 = vmatprep.subr.bf16.mxu1 %v19646_v31 }
 0x5f9   :  { %8946 = vmatpush1.bf16.msra.mxu0 %v13512_v12  ;;  %v19740_v12 = vld [vmem:[#allocation11_spill] sm:$0xff] }
 0x5fa   :  { %9229 = vmatpush1.bf16.msra.mxu1 %v13511_v14  ;;  %8947 = vmatprep.subr.bf16.mxu0 %v19646_v31 }
 0x5fb   :  { %9230 = vmatprep.subr.bf16.mxu1 %v19646_v31 }
 0x5fd   :  { %8948 = vmatpush1.bf16.msra.mxu0 %v13514_v13 }
 0x5fe   :  { %9231 = vmatpush1.bf16.msra.mxu1 %v13513_v40  ;;  %8949 = vmatprep.subr.bf16.mxu0 %v19646_v31 }
 0x5ff   :  { %9232 = vmatprep.subr.bf16.mxu1 %v19646_v31 }
 0x601   :  { %8950 = vmatpush1.bf16.msra.mxu0 %v13516_v34 }
 0x602   :  { %9233 = vmatpush1.bf16.msra.mxu1 %v13515_v57  ;;  %9491 = vmatprep.subr.bf16.mxu0 %v19646_v31 }
 0x603   :  { %9234 = vmatprep.subr.bf16.mxu1 %v19646_v31 }
 0x606   :  { %9235 = vmatpush1.bf16.msra.mxu1 %v13517_v25 }
 0x607   :  { %9776 = vmatprep.subr.bf16.mxu1 %v19646_v31 }
 0x61c   :  { %v241_v11 = vpop.xlane.xlu1 %240 }
 0x61d   :  { %v250_v9 = vmul.f32 0.004166667, %v241_v11 }
 0x61f   :  { %v255_v22 = vadd.f32 1e-05, %v250_v9 }
 0x621   :  { %13671 = vrsqrt.f32 %v255_v22  ;;  %v686_v32 = vpop.xlane.xlu1 %685 }
 0x622   :  { %v695_v10 = vmul.f32 0.004166667, %v686_v32 }
 0x623   :  { %v7245_v51 = vpop.f32.mrb[72].mxu0 }
 0x624   :  { %v7251_v8 = vadd.f32 %v7245_v51, %v6966_v23  ;;  %v7247_v52 = vpop.f32.mrb[73].mxu0  ;;  %v700_v26 = vadd.f32 1e-05, %v695_v10  ;;  %v19741_v51 = vld [vmem:[#allocation12_spill] sm:$0xff] }
 0x625   :  { %v7248_v42 = vpop.f32.mrb[74].mxu0  ;;  %v463_v29 = vpop.xlane.xlu0 %462  ;;  %v19742_v52 = vld [vmem:[#allocation13_spill] sm:$0xff] }
 0x626   :  { %13673 = vrsqrt.f32 %v700_v26  ;;  %v7249_v1 = vpop.f32.mrb[75].mxu0  ;;  %v472_v61 = vmul.f32 0.004166667, %v463_v29 }
 0x628   :  { %v7530_v54 = vpop.f32.mrb[96].mxu1  ;;  %v477_v45 = vadd.f32 1e-05, %v472_v61 }
 0x629   :  { %v18248_v21 = vadd.f32 %v7530_v54, %v7251_v8  ;;  %v7532_v44 = vpop.f32.mrb[97].mxu1  ;;  %v1132_v55 = vpop.xlane.xlu1 %1131 }
 0x62a   :  { %v7533_v38 = vpop.f32.mrb[98].mxu1  ;;  %13675 = vrsqrt.f32 %v477_v45  ;;  %v1141_v35 = vmul.f32 0.004166667, %v1132_v55  ;;  %v909_v20 = vpop.xlane.xlu0 %908 }
 0x62b   :  { %v13672_v28 = vpop.eup %13671  ;;  %v7534_v17 = vpop.f32.mrb[99].mxu1  ;;  %v918_v7 = vmul.f32 0.004166667, %v909_v20 }
 0x62c   :  { %v268_v33 = vmul.f32 %v13672_v28, %v17814_v60  ;;  %v269_v47 = vmul.f32 %v13672_v28, %v17818_v0  ;;  %v1146_v18 = vadd.f32 1e-05, %v1141_v35  ;;  %v19739_v0 = vld [vmem:[#allocation10_spill] sm:$0xff] }
 0x62d   :  { %v923_v19 = vadd.f32 1e-05, %v918_v7  ;;  %v1578_v4 = vpop.xlane.xlu1 %1577 }
 0x62e   :  { %278 = vst [vmem:[#allocation2 + $0x30] sm:$0xff] %v268_v33  ;;  %279 = vst.msk [vmem:[#allocation2 + $0x38] sm:$0xff] %vm176_vm2, %v269_v47  ;;  %13677 = vrsqrt.f32 %v1146_v18  ;;  %v1587_v16 = vmul.f32 0.004166667, %v1578_v4  ;;  %v1355_v23 = vpop.xlane.xlu0 %1354  ;;  %v19743_v33 = vld [vmem:[#allocation30_spill] sm:$0xff]  ;;  %v19746_v4 = vld [vmem:[#allocation23_spill] sm:$0xff] }
 0x62f   :  { %13679 = vrsqrt.f32 %v923_v19  ;;  %v1364_v37 = vmul.f32 0.004166667, %v1355_v23 }
 0x630   :  { %v13674_v30 = vpop.eup %13673  ;;  %v1592_v56 = vadd.f32 1e-05, %v1587_v16 }
 0x631   :  { %v713_v6 = vmul.f32 %v13674_v30, %v17847_v24  ;;  %v714_v5 = vmul.f32 %v13674_v30, %v17851_v48  ;;  %v1369_v60 = vadd.f32 1e-05, %v1364_v37  ;;  %v73_v3 = vpop.permute.xlu1 %72 }
 0x632   :  { %13681 = vrsqrt.f32 %v1592_v56  ;;  %v18256_v36 = vadd.f32 %v19739_v0, %v73_v3  ;;  %v18259_v14 = vadd.f32 %v19740_v12, %v73_v3  ;;  %v1801_v13 = vpop.xlane.xlu0 %1800 }
 0x633   :  { %724 = vst [vmem:[#allocation2 + $0xd0] sm:$0xff] %v713_v6  ;;  %725 = vst.msk [vmem:[#allocation2 + $0xd8] sm:$0xff] %vm176_vm2, %v714_v5  ;;  %13683 = vrsqrt.f32 %v1369_v60  ;;  %v1810_v40 = vmul.f32 0.004166667, %v1801_v13 }
 0x634   :  { %v13676_v34 = vpop.eup %13675  ;;  %v174_v24 = vmax.f32 %v18256_v36, 0.0  ;;  %v175_v48 = vmax.f32 %v18259_v14, 0.0 }
 0x635   :  { %v490_v57 = vmul.f32 %v13676_v34, %v17878_v63  ;;  %v491_v25 = vmul.f32 %v13676_v34, %v17882_v2  ;;  %v1815_v11 = vadd.f32 1e-05, %v1810_v40  ;;  %v546_v9 = vpop.permute.xlu1 %545  ;;  %v18266_v22 = vld [vmem:[#allocation2 + $0x30] ss:$8 sm:$0x3] }
 0x636   :  { %v194_v32 = vsel %vm193_vm3, %v174_v24, 0.0  ;;  %v196_v10 = vsel %vm195_vm9, %v175_v48, 0.0  ;;  %v18275_v8 = vadd.f32 %v19741_v51, %v546_v9  ;;  %v18278_v26 = vadd.f32 %v19742_v52, %v546_v9  ;;  %v18280_v63 = vld [vmem:[#allocation2 + $0x31] ss:$8 sm:$0x3] }
 0x637   :  { %501 = vst [vmem:[#allocation2 + $0x80] sm:$0xff] %v490_v57  ;;  %502 = vst.msk [vmem:[#allocation2 + $0x88] sm:$0xff] %vm176_vm2, %v491_v25  ;;  %13685 = vrsqrt.f32 %v1815_v11  ;;  %v197_v2 = vadd.f32 %v196_v10, %v194_v32  ;;  %v8701_v61 = vrot.slane %v18266_v22, %v14597_v27  ;;  %v8986_v38 = vrot.slane %v18280_v63, %v14597_v27 }
 0x638   :  { %v13678_v42 = vpop.eup %13677  ;;  %v623_v29 = vmax.f32 %v18275_v8, 0.0  ;;  %v19599_v1 = vmax.f32 %v18278_v26, 0.0  ;;  %v8697_v35 = vrot.slane %v18266_v22, %v14595_v53  ;;  %v8982_v5 = vrot.slane %v18280_v63, %v14595_v53 }
 0x639   :  { %v13680_v54 = vpop.eup %13679  ;;  %v1159_v45 = vmul.f32 %v13678_v42, %v17905_v50  ;;  %v1160_v44 = vmul.f32 %v13678_v42, %v17909_v15  ;;  %v769_v55 = vpop.permute.xlu1 %768  ;;  %198 = vadd.xlane.f32.xlu0 %v197_v2  ;;  %v19749_v2 = vld [vmem:[#allocation24_spill] sm:$0xff] }
 0x63a   :  { %v936_v20 = vmul.f32 %v13680_v54, %v17869_v41  ;;  %v937_v28 = vmul.f32 %v13680_v54, %v17873_v58  ;;  %v641_v17 = vsel %vm193_vm3, %v623_v29, 0.0  ;;  %v642_v50 = vsel %vm195_vm9, %v19599_v1, 0.0  ;;  %v323_v15 = vpop.permute.xlu0 %322  ;;  %v18301_v7 = vld [vmem:[#allocation2 + $0xd0] ss:$8 sm:$0x3]  ;;  %v19745_v58 = vld [vmem:[#allocation22_spill] sm:$0xff] }
 0x63b   :  { %1170 = vst [vmem:[#allocation2 + $0x170] sm:$0xff] %v1159_v45  ;;  %1171 = vst.msk [vmem:[#allocation2 + $0x178] sm:$0xff] %vm176_vm2, %v1160_v44  ;;  %v18305_v47 = vadd.f32 %v19743_v33, %v769_v55  ;;  %v19744_v41 = vld [vmem:[#allocation31_spill] sm:$0xff]  ;;  %v18311_v19 = vadd.f32 %v19745_v58, %v323_v15  ;;  %v18314_v16 = vadd.f32 %v19746_v4, %v323_v15  ;;  %v19750_v54 = vld [vmem:[#allocation25_spill] sm:$0xff] }
 0x63c   :  { %v18308_v18 = vadd.f32 %v19744_v41, %v769_v55  ;;  %v18316_v23 = vld [vmem:[#allocation2 + $0xd1] ss:$8 sm:$0x3]  ;;  %v13682_v37 = vpop.eup %13681  ;;  %947 = vst [vmem:[#allocation2 + $0x120] sm:$0xff] %v936_v20  ;;  %948 = vst.msk [vmem:[#allocation2 + $0x128] sm:$0xff] %vm176_vm2, %v937_v28  ;;  %v643_v30 = vadd.f32 %v642_v50, %v641_v17  ;;  %v8723_v56 = vrot.slane %v18301_v7, %v14597_v27 }
 0x63d   :  { %v9008_v6 = vrot.slane %v18316_v23, %v14597_v27  ;;  %v13684_v60 = vpop.eup %13683  ;;  %v1605_v3 = vmul.f32 %v13682_v37, %v17939_v59  ;;  %v1606_v0 = vmul.f32 %v13682_v37, %v17943_v62  ;;  %v19596_v12 = vmax.f32 %v18305_v47, 0.0  ;;  %v1215_v40 = vpop.permute.xlu1 %1214 }
 0x63e   :  { %v19595_v13 = vmax.f32 %v18308_v18, 0.0  ;;  %v1382_v34 = vmul.f32 %v13684_v60, %v17922_v46  ;;  %v1383_v57 = vmul.f32 %v13684_v60, %v17901_v49  ;;  %v19598_v25 = vmax.f32 %v18311_v19, 0.0  ;;  %644 = vadd.xlane.f32.xlu0 %v643_v30  ;;  %v992_v9 = vpop.permute.xlu0 %991  ;;  %v19747_v46 = vld [vmem:[#allocation36_spill] sm:$0xff]  ;;  %v19748_v49 = vld [vmem:[#allocation37_spill] sm:$0xff] }
 0x63f   :  { %v19597_v11 = vmax.f32 %v18314_v16, 0.0  ;;  %1616 = vst [vmem:[#allocation2 + $0x210] sm:$0xff] %v1605_v3  ;;  %1617 = vst.msk [vmem:[#allocation2 + $0x218] sm:$0xff] %vm176_vm2, %v1606_v0  ;;  %v864_v59 = vsel %vm193_vm3, %v19596_v12, 0.0  ;;  %v18341_v32 = vadd.f32 %v19747_v46, %v1215_v40  ;;  %v18344_v10 = vadd.f32 %v19748_v49, %v1215_v40  ;;  %v19751_v0 = vld [vmem:[#allocation47_spill] sm:$0xff]  ;;  %v19754_v46 = vld [vmem:[#allocation48_spill] sm:$0xff] }
 0x640   :  { %v865_v62 = vsel %vm195_vm9, %v19595_v13, 0.0  ;;  %1393 = vst [vmem:[#allocation2 + $0x1c0] sm:$0xff] %v1382_v34  ;;  %1394 = vst.msk [vmem:[#allocation2 + $0x1c8] sm:$0xff] %vm176_vm2, %v1383_v57  ;;  %v418_v51 = vsel %vm193_vm3, %v19598_v25, 0.0  ;;  %v18354_v42 = vadd.f32 %v19749_v2, %v992_v9  ;;  %v18357_v45 = vadd.f32 %v19750_v54, %v992_v9 }
 0x641   :  { %v419_v52 = vsel %vm195_vm9, %v19597_v11, 0.0  ;;  %v13686_v44 = vpop.eup %13685  ;;  %v19590_v55 = vmax.f32 %v18341_v32, 0.0  ;;  %v19589_v20 = vmax.f32 %v18344_v10, 0.0  ;;  %v1661_v28 = vpop.permute.xlu1 %1660  ;;  %v866_v17 = vadd.f32 %v865_v62, %v864_v59  ;;  %v18361_v15 = vld [vmem:[#allocation2 + $0x80] ss:$8 sm:$0x3] }
 0x642   :  { %v420_v50 = vadd.f32 %v419_v52, %v418_v51  ;;  %v1828_v33 = vmul.f32 %v13686_v44, %v17954_v43  ;;  %v1829_v41 = vmul.f32 %v13686_v44, %v17935_v39  ;;  %v19594_v58 = vmax.f32 %v18354_v42, 0.0  ;;  %v1438_v37 = vpop.permute.xlu0 %1437  ;;  %v18367_v30 = vld [vmem:[#allocation2 + $0x170] ss:$8 sm:$0x3]  ;;  %v19752_v43 = vld [vmem:[#allocation49_spill] sm:$0xff]  ;;  %v19753_v59 = vld [vmem:[#allocation46_spill] sm:$0xff] }
 0x643   :  { %v19592_v4 = vmax.f32 %v18357_v45, 0.0  ;;  %v1310_v60 = vsel %vm193_vm3, %v19590_v55, 0.0  ;;  %v1311_v3 = vsel %vm195_vm9, %v19589_v20, 0.0  ;;  %v18376_v40 = vadd.f32 %v19751_v0, %v1661_v28  ;;  %867 = vadd.xlane.f32.xlu0 %v866_v17  ;;  %v18381_v34 = vld [vmem:[#allocation2 + $0x120] ss:$8 sm:$0x3] }
 0x644   :  { %v18379_v39 = vadd.f32 %v19752_v43, %v1661_v28  ;;  %421 = vadd.xlane.f32.xlu1 %v420_v50  ;;  %1839 = vst [vmem:[#allocation2 + $0x260] sm:$0xff] %v1828_v33  ;;  %1840 = vst.msk [vmem:[#allocation2 + $0x268] sm:$0xff] %vm176_vm2, %v1829_v41  ;;  %v1087_v57 = vsel %vm193_vm3, %v19594_v58, 0.0  ;;  %v18391_v62 = vadd.f32 %v19753_v59, %v1438_v37  ;;  %v18396_v51 = vld [vmem:[#allocation2 + $0x81] ss:$8 sm:$0x3] }
 0x645   :  { %v1088_v9 = vsel %vm195_vm9, %v19592_v4, 0.0  ;;  %v18394_v49 = vadd.f32 %v19754_v46, %v1438_v37  ;;  %v18398_v52 = vld [vmem:[#allocation2 + $0x121] ss:$8 sm:$0x3]  ;;  %v19587_v2 = vmax.f32 %v18376_v40, 0.0  ;;  %v1312_v44 = vadd.f32 %v1311_v3, %v1310_v60 }
 0x646   :  { %v19588_v54 = vmax.f32 %v18379_v39, 0.0  ;;  %v1089_v28 = vadd.f32 %v1088_v9, %v1087_v57  ;;  %v18402_v17 = vld [vmem:[#allocation2 + $0x171] ss:$8 sm:$0x3]  ;;  %v19591_v50 = vmax.f32 %v18391_v62, 0.0  ;;  %v8712_v37 = vrot.slane %v18361_v15, %v14597_v27 }
 0x647   :  { %v19593_v33 = vmax.f32 %v18394_v49, 0.0  ;;  %v18406_v41 = vld [vmem:[#allocation2 + $0x210] ss:$8 sm:$0x3]  ;;  %v8719_v0 = vrot.slane %v18301_v7, %v14595_v53  ;;  %v1756_v43 = vsel %vm193_vm3, %v19587_v2, 0.0  ;;  %1313 = vadd.xlane.f32.xlu0 %v1312_v44  ;;  %v8734_v57 = vrot.slane %v18381_v34, %v14597_v27 }
 0x648   :  { %v1757_v60 = vsel %vm195_vm9, %v19588_v54, 0.0  ;;  %1090 = vadd.xlane.f32.xlu1 %v1089_v28  ;;  %v8688_v3 = vld [vmem:[#allocation2 + $0x1c0] ss:$8 sm:$0x3]  ;;  %v8745_v9 = vrot.slane %v18367_v30, %v14597_v27  ;;  %v1533_v59 = vsel %vm193_vm3, %v19591_v50, 0.0  ;;  %v8782_v20 = vsel %vm193_vm3, %v8701_v61, %v8712_v37 }
 0x649   :  { %v1534_v46 = vsel %vm195_vm9, %v19593_v33, 0.0  ;;  %v1758_v2 = vadd.f32 %v1757_v60, %v1756_v43  ;;  %v8756_v54 = vrot.slane %v8688_v3, %v14597_v27  ;;  %v18429_v44 = vld [vmem:[#allocation2 + $0x1c1] ss:$8 sm:$0x3]  ;;  %v8997_v50 = vrot.slane %v18396_v51, %v14597_v27 }
 0x64a   :  { %v1535_v28 = vadd.f32 %v1534_v46, %v1533_v59  ;;  %v18435_v55 = vld [vmem:[#allocation2 + $0x211] ss:$8 sm:$0x3]  ;;  %v9019_v4 = vrot.slane %v18398_v52, %v14597_v27  ;;  %v8767_v43 = vrot.slane %v18406_v41, %v14597_v27  ;;  %v8784_v60 = vsel %vm1941_vm4, %v8782_v20, %v8723_v56  ;;  %v18784_v11 = vld [vmem:[#allocation2 + $0x1c5] ss:$8 sm:$0x3] }
 0x64b   :  { %v9030_v59 = vrot.slane %v18402_v17, %v14597_v27  ;;  %v9041_v61 = vrot.slane %v18429_v44, %v14597_v27  ;;  %1759 = vadd.xlane.f32.xlu0 %v1758_v2  ;;  %v8692_v37 = vld [vmem:[#allocation2 + $0x260] ss:$8 sm:$0x3]  ;;  %v8786_v46 = vsel %vm1944_vm5, %v8784_v60, %v8734_v57  ;;  %v18452_v33 = vld [vmem:[#allocation2 + $0x261] ss:$8 sm:$0x3]  ;;  %v9067_v7 = vsel %vm193_vm3, %v8986_v38, %v8997_v50 }
 0x64c   :  { %1536 = vadd.xlane.f32.xlu1 %v1535_v28  ;;  %v8708_v56 = vrot.slane %v18361_v15, %v14595_v53  ;;  %v8778_v20 = vrot.slane %v8692_v37, %v14597_v27  ;;  %v8788_v58 = vsel %vm1947_vm6, %v8786_v46, %v8745_v9  ;;  %v9052_v2 = vrot.slane %v18435_v55, %v14597_v27 }
 0x64d   :  { %v9069_v57 = vsel %vm1941_vm4, %v9067_v7, %v9008_v6  ;;  %v8790_v28 = vsel %vm1950_vm7, %v8788_v58, %v8756_v54  ;;  %v9063_v38 = vrot.slane %v18452_v33, %v14597_v27  ;;  %v8730_v15 = vrot.slane %v18381_v34, %v14595_v53 }
 0x64e   :  { %v9071_v50 = vsel %vm1944_vm5, %v9069_v57, %v9019_v4  ;;  %v8792_v9 = vsel %vm1953_vm8, %v8790_v28, %v8767_v43  ;;  %v8741_v46 = vrot.slane %v18367_v30, %v14595_v53  ;;  %v8752_v13 = vrot.slane %v8688_v3, %v14595_v53  ;;  %v18491_v3 = vld [vmem:[#allocation2 + $0x32] ss:$8 sm:$0x3] }
 0x64f   :  { %v9073_v60 = vsel %vm1947_vm6, %v9071_v50, %v9030_v59  ;;  %v8794_v6 = vsel %vm98_vm0, %v8792_v9, %v8778_v20  ;;  %v8763_v54 = vrot.slane %v18406_v41, %v14595_v53  ;;  %v8781_v4 = vsel %vm193_vm3, %v8697_v35, %v8708_v56  ;;  %v18498_v35 = vld [vmem:[#allocation2 + $0x82] ss:$8 sm:$0x3]  ;;  %v13518_v28 = vld [vmem:[%s19524_s3 + $0xc30] sm:$0xff]  }
 0x650   :  { %v9075_v58 = vsel %vm1950_vm7, %v9073_v60, %v9041_v61  ;;  %v8796_v34 = vpack.c.bf16 %v8794_v6, %v8794_v6  ;;  %v8783_v59 = vsel %vm1941_vm4, %v8781_v4, %v8719_v0  ;;  %v8993_v30 = vrot.slane %v18396_v51, %v14595_v53  ;;  %v18539_v6 = vld [vmem:[#allocation2 + $0x212] ss:$8 sm:$0x3] }
 0x651   :  { %v9077_v43 = vsel %vm1953_vm8, %v9075_v58, %v9052_v2  ;;  %v8774_v7 = vrot.slane %v8692_v37, %v14595_v53  ;;  %v8785_v41 = vsel %vm1944_vm5, %v8783_v59, %v8730_v15  ;;  %v9015_v22 = vrot.slane %v18398_v52, %v14595_v53  ;;  %v18506_v2 = vld [vmem:[#allocation2 + $0x122] ss:$8 sm:$0x3]  ;;  %v18533_v15 = vld [vmem:[#allocation2 + $0x83] ss:$8 sm:$0x3] }
 0x652   :  { %v9079_v61 = vsel %vm98_vm0, %v9077_v43, %v9063_v38  ;;  %12749 = vmatprep.mubr.msk.bf16.mxu0 %vm176_vm2, %v8796_v34  ;;  %v8787_v0 = vsel %vm1947_vm6, %v8785_v41, %v8741_v46  ;;  %v9004_v51 = vrot.slane %v18316_v23, %v14595_v53  ;;  %v9026_v20 = vrot.slane %v18402_v17, %v14595_v53  ;;  %v18518_v23 = vld [vmem:[#allocation2 + $0xd2] ss:$8 sm:$0x3]  ;;  %v18543_v58 = vld [vmem:[#allocation2 + $0x33] ss:$8 sm:$0x3] }
 0x653   :  { %v9081_v56 = vpack.c.bf16 %v9079_v61, %v9079_v61  ;;  %v8789_v37 = vsel %vm1950_vm7, %v8787_v0, %v8752_v13  ;;  %v9037_v52 = vrot.slane %v18429_v44, %v14595_v53  ;;  %v9066_v57 = vsel %vm193_vm3, %v8982_v5, %v8993_v30  ;;  %v18520_v38 = vld [vmem:[#allocation2 + $0x172] ss:$8 sm:$0x3]  ;;  %v18529_v44 = vld [vmem:[#allocation2 + $0x1c2] ss:$8 sm:$0x3] }
 0x654   :  { %v9271_v17 = vrot.slane %v18491_v3, %v14597_v27  ;;  %v8791_v13 = vsel %vm1953_vm8, %v8789_v37, %v8763_v54  ;;  %v9048_v63 = vrot.slane %v18435_v55, %v14595_v53  ;;  %v9068_v5 = vsel %vm1941_vm4, %v9066_v57, %v9004_v51  ;;  %v18546_v34 = vld [vmem:[#allocation2 + $0x262] ss:$8 sm:$0x3]  ;;  %v18552_v59 = vld [vmem:[#allocation2 + $0x123] ss:$8 sm:$0x3] }
 0x655   :  { %12795 = vmatprep.mubr.msk.bf16.mxu1 %vm176_vm2, %v9081_v56  ;;  %v9282_v50 = vrot.slane %v18498_v35, %v14597_v27  ;;  %v8793_v9 = vsel %vm98_vm0, %v8791_v13, %v8774_v7  ;;  %v9059_v60 = vrot.slane %v18452_v33, %v14595_v53  ;;  %v9070_v46 = vsel %vm1944_vm5, %v9068_v5, %v9015_v22  ;;  %v18558_v41 = vld [vmem:[#allocation2 + $0xd3] ss:$8 sm:$0x3]  ;;  %v18568_v37 = vld [vmem:[#allocation2 + $0x1c3] ss:$8 sm:$0x3] }
 0x656   :  { %v9304_v55 = vrot.slane %v18506_v2, %v14597_v27  ;;  %v8795_v54 = vpack.c.bf16 %v8793_v9, %v8793_v9  ;;  %v9072_v4 = vsel %vm1947_vm6, %v9070_v46, %v9026_v20  ;;  %v9293_v43 = vrot.slane %v18518_v23, %v14597_v27  ;;  %v18560_v22 = vld [vmem:[#allocation2 + $0x173] ss:$8 sm:$0x3]  ;;  %v18587_v46 = vld [vmem:[#allocation2 + $0x263] ss:$8 sm:$0x3] }
 0x657   :  { %v9315_v33 = vrot.slane %v18520_v38, %v14597_v27  ;;  %v9074_v30 = vsel %vm1950_vm7, %v9072_v4, %v9037_v52  ;;  %v9326_v61 = vrot.slane %v18529_v44, %v14597_v27  ;;  %v9352_v7 = vsel %vm193_vm3, %v9271_v17, %v9282_v50  ;;  %v13519_v17 = vld [vmem:[%s19524_s3 + $0xca8] sm:$0xff]   ;;  %v18579_v5 = vld [vmem:[#allocation2 + $0x213] ss:$8 sm:$0x3] }
 0x658   :  { %v9567_v56 = vrot.slane %v18533_v15, %v14597_v27  ;;  %8954 = vmatmul.mubr.bf16.vlgmr.msra.gmra.mrb[84].mxu0 %v8795_v54  ;;  %v9076_v0 = vsel %vm1953_vm8, %v9074_v30, %v9048_v63  ;;  %v9337_v51 = vrot.slane %v18539_v6, %v14597_v27  ;;  %v9354_v20 = vsel %vm1941_vm4, %v9352_v7, %v9293_v43  ;;  %v13520_v9 = vld [vmem:[%s19524_s3 + $0xc38] sm:$0xff]  }
 0x659   :  { %v9556_v52 = vrot.slane %v18543_v58, %v14597_v27  ;;  %v9078_v57 = vsel %vm98_vm0, %v9076_v0, %v9059_v60  ;;  %9492 = vmatpush1.bf16.msra.mxu0 %v13518_v28  ;;  %v9348_v13 = vrot.slane %v18546_v34, %v14597_v27  ;;  %v9356_v63 = vsel %vm1944_vm5, %v9354_v20, %v9304_v55 }
 0x65a   :  { %v9589_v50 = vrot.slane %v18552_v59, %v14597_v27  ;;  %v9080_v60 = vpack.c.bf16 %v9078_v57, %v9078_v57  ;;  %v9358_v28 = vsel %vm1947_vm6, %v9356_v63, %v9315_v33  ;;  %v9578_v54 = vrot.slane %v18558_v41, %v14597_v27  ;;  %9493 = vmatprep.subr.bf16.mxu0 %v19646_v31 }
 0x65b   :  { %v9600_v55 = vrot.slane %v18560_v22, %v14597_v27  ;;  %v9360_v4 = vsel %vm1950_vm7, %v9358_v28, %v9326_v61  ;;  %v9611_v43 = vrot.slane %v18568_v37, %v14597_v27  ;;  %v9637_v30 = vsel %vm193_vm3, %v9556_v52, %v9567_v56  ;;  %v13521_v56 = vld [vmem:[%s19524_s3 + $0xcb0] sm:$0xff]  }
 0x65c   :  { %9239 = vmatmul.mubr.bf16.vlgmr.msra.gmra.mrb[108].mxu1 %v9080_v60  ;;  %v9362_v33 = vsel %vm1953_vm8, %v9360_v4, %v9337_v51  ;;  %v9622_v7 = vrot.slane %v18579_v5, %v14597_v27  ;;  %v9639_v0 = vsel %vm1941_vm4, %v9637_v30, %v9578_v54  ;;  %v9633_v57 = vrot.slane %v18587_v46, %v14597_v27  ;;  %v13522_v51 = vld [vmem:[%s19524_s3 + $0xc40] sm:$0xff]   ;;  %v13523_v54 = vld [vmem:[%s19524_s3 + $0xcb8] sm:$0xff]   ;;  %v13524_v4 = vld [vmem:[%s19524_s3 + $0xc48] sm:$0xff]  }
 0x65d   :  { %9777 = vmatpush1.bf16.msra.mxu1 %v13519_v17  ;;  %v9364_v20 = vsel %vm98_vm0, %v9362_v33, %v9348_v13  ;;  %v9641_v61 = vsel %vm1944_vm5, %v9639_v0, %v9589_v50  ;;  %9494 = vmatpush1.bf16.msra.mxu0 %v13520_v9  ;;  %v13525_v0 = vld [vmem:[%s19524_s3 + $0xcc0] sm:$0xff]  }
 0x65e   :  { %v9366_v52 = vpack.c.bf16 %v9364_v20, %v9364_v20  ;;  %v9643_v63 = vsel %vm1947_vm6, %v9641_v61, %v9600_v55  ;;  %9778 = vmatprep.subr.bf16.mxu1 %v19646_v31  ;;  %9495 = vmatprep.subr.bf16.mxu0 %v19646_v31  ;;  %v13526_v20 = vld [vmem:[%s19524_s3 + $0xc50] sm:$0xff]  }
 0x65f   :  { %v9645_v17 = vsel %vm1950_vm7, %v9643_v63, %v9611_v43  ;;  %v7815_v13 = vpop.f32.mrb[76].mxu0  ;;  %v13530_v63 = vld [vmem:[%s19524_s3 + $0xc60] sm:$0xff]  }
 0x660   :  { %12841 = vmatprep.mubr.msk.bf16.mxu0 %vm176_vm2, %v9366_v52  ;;  %v9647_v50 = vsel %vm1953_vm8, %v9645_v17, %v9622_v7  ;;  %v7821_v9 = vadd.f32 %v7815_v13, %v18248_v21  ;;  %v7817_v60 = vpop.f32.mrb[77].mxu0  ;;  %v13529_v52 = vld [vmem:[%s19524_s3 + $0xcd0] sm:$0xff]   ;;  %v13531_v17 = vld [vmem:[%s19524_s3 + $0xcd8] sm:$0xff]   ;;  %v13532_v13 = vld [vmem:[%s19524_s3 + $0xc68] sm:$0xff]  }
 0x661   :  { %v9649_v28 = vsel %vm98_vm0, %v9647_v50, %v9633_v57  ;;  %9779 = vmatpush1.bf16.msra.mxu1 %v13521_v56  ;;  %9496 = vmatpush1.bf16.msra.mxu0 %v13522_v51  ;;  %v7818_v55 = vpop.f32.mrb[78].mxu0  ;;  %v13527_v56 = vld [vmem:[%s19524_s3 + $0xcc8] sm:$0xff]   ;;  %v13528_v51 = vld [vmem:[%s19524_s3 + $0xc58] sm:$0xff]   ;;  %v13533_v50 = vld [vmem:[%s19524_s3 + $0xce0] sm:$0xff]  }
 0x662   :  { %v9651_v43 = vpack.c.bf16 %v9649_v28, %v9649_v28  ;;  %9780 = vmatprep.subr.bf16.mxu1 %v19646_v31  ;;  %9497 = vmatprep.subr.bf16.mxu0 %v19646_v31  ;;  %v7819_v21 = vpop.f32.mrb[79].mxu0  ;;  %v13535_v60 = vld [vmem:[%s19524_s3 + $0xce8] sm:$0xff]   ;;  %v13536_v28 = vld [vmem:[%s19524_s3 + $0xc78] sm:$0xff]   ;;  %v13537_v55 = vld [vmem:[%s19524_s3 + $0xcf0] sm:$0xff]  }
 0x663   :  { %v18691_v21 = vld [vmem:[#allocation2 + $0x84] ss:$8 sm:$0x3] }
 0x664   :  { %12887 = vmatprep.mubr.msk.bf16.mxu1 %vm176_vm2, %v9651_v43  ;;  %v8100_v30 = vpop.f32.mrb[100].mxu1  ;;  %v9267_v43 = vrot.slane %v18491_v3, %v14595_v53  ;;  %v9289_v3 = vrot.slane %v18518_v23, %v14595_v53  ;;  %v18719_v23 = vld [vmem:[#allocation2 + $0xd4] ss:$8 sm:$0x3] }
 0x665   :  { %9781 = vmatpush1.bf16.msra.mxu1 %v13523_v54  ;;  %v18629_v33 = vadd.f32 %v8100_v30, %v7821_v9  ;;  %v8102_v7 = vpop.f32.mrb[101].mxu1  ;;  %9498 = vmatpush1.bf16.msra.mxu0 %v13524_v4  ;;  %v13534_v9 = vld [vmem:[%s19524_s3 + $0xc70] sm:$0xff]   ;;  %v9278_v54 = vrot.slane %v18498_v35, %v14595_v53  ;;  %v13538_v4 = vld [vmem:[%s19524_s3 + $0xc80] sm:$0xff]   ;;  %v9300_v35 = vrot.slane %v18506_v2, %v14595_v53 }
 0x666   :  { %9782 = vmatprep.subr.bf16.mxu1 %v19646_v31  ;;  %v8103_v57 = vpop.f32.mrb[102].mxu1  ;;  %9499 = vmatprep.subr.bf16.mxu0 %v19646_v31  ;;  %v18696_v7 = vld [vmem:[#allocation2 + $0x34] ss:$8 sm:$0x3]  ;;  %v9852_v2 = vrot.slane %v18691_v21, %v14597_v27 }
 0x667   :  { %v8104_v61 = vpop.f32.mrb[103].mxu1  ;;  %v9351_v30 = vsel %vm193_vm3, %v9267_v43, %v9278_v54  ;;  %v18708_v57 = vld [vmem:[#allocation2 + $0x85] ss:$8 sm:$0x3] }
 0x668   :  { %v18712_v61 = vld [vmem:[#allocation2 + $0x124] ss:$8 sm:$0x3]  ;;  %v18740_v54 = vld [vmem:[#allocation2 + $0x174] ss:$8 sm:$0x3] }
 0x669   :  { %9783 = vmatpush1.bf16.msra.mxu1 %v13525_v0  ;;  %9500 = vmatpush1.bf16.msra.mxu0 %v13526_v20  ;;  %v13539_v0 = vld [vmem:[%s19524_s3 + $0xcf8] sm:$0xff]   ;;  %v13540_v20 = vld [vmem:[%s19524_s3 + $0xc88] sm:$0xff]  }
 0x66a   :  { %9784 = vmatprep.subr.bf16.mxu1 %v19646_v31  ;;  %9501 = vmatprep.subr.bf16.mxu0 %v19646_v31  ;;  %v18751_v43 = vld [vmem:[#allocation2 + $0x1c4] ss:$8 sm:$0x3] }
 0x66d   :  { %9785 = vmatpush1.bf16.msra.mxu1 %v13527_v56  ;;  %9502 = vmatpush1.bf16.msra.mxu0 %v13528_v51  ;;  %v9311_v56 = vrot.slane %v18520_v38, %v14595_v53  ;;  %v9353_v51 = vsel %vm1941_vm4, %v9351_v30, %v9289_v3  ;;  %v13542_v38 = vld [vmem:[%s19524_s3 + $0xc90] sm:$0xff]   ;;  %v9585_v3 = vrot.slane %v18552_v59, %v14595_v53 }
 0x66e   :  { %9786 = vmatprep.subr.bf16.mxu1 %v19646_v31  ;;  %9503 = vmatprep.subr.bf16.mxu0 %v19646_v31 }
 0x671   :  { %9787 = vmatpush1.bf16.msra.mxu1 %v13529_v52  ;;  %9504 = vmatpush1.bf16.msra.mxu0 %v13530_v63  ;;  %v9563_v52 = vrot.slane %v18533_v15, %v14595_v53  ;;  %v9841_v63 = vrot.slane %v18696_v7, %v14597_v27  ;;  %v9333_v15 = vrot.slane %v18539_v6, %v14595_v53 }
 0x672   :  { %9788 = vmatprep.subr.bf16.mxu1 %v19646_v31  ;;  %9505 = vmatprep.subr.bf16.mxu0 %v19646_v31  ;;  %v9344_v6 = vrot.slane %v18546_v34, %v14595_v53 }
 0x675   :  { %9789 = vmatpush1.bf16.msra.mxu1 %v13531_v17  ;;  %9506 = vmatpush1.bf16.msra.mxu0 %v13532_v13  ;;  %v18723_v17 = vld [vmem:[#allocation2 + $0x35] ss:$8 sm:$0x3]  ;;  %v13541_v13 = vld [vmem:[%s19524_s3 + $0xd00] sm:$0xff]  }
 0x676   :  { %9790 = vmatprep.subr.bf16.mxu1 %v19646_v31  ;;  %9507 = vmatprep.subr.bf16.mxu0 %v19646_v31  ;;  %v10126_v30 = vrot.slane %v18723_v17, %v14597_v27 }
 0x679   :  { %9791 = vmatpush1.bf16.msra.mxu1 %v13533_v50  ;;  %9508 = vmatpush1.bf16.msra.mxu0 %v13534_v9  ;;  %v9322_v50 = vrot.slane %v18529_v44, %v14595_v53  ;;  %v9355_v9 = vsel %vm1944_vm5, %v9353_v51, %v9300_v35  ;;  %v9922_v44 = vsel %vm193_vm3, %v9841_v63, %v9852_v2  ;;  %v18755_v35 = vld [vmem:[#allocation2 + $0xd5] ss:$8 sm:$0x3]  ;;  %v13543_v2 = vld [vmem:[%s19524_s3 + $0xd08] sm:$0xff]  }
 0x67a   :  { %9792 = vmatprep.subr.bf16.mxu1 %v19646_v31  ;;  %9509 = vmatprep.subr.bf16.mxu0 %v19646_v31  ;;  %v13544_v51 = vld [vmem:[%s19524_s3 + $0xc98] sm:$0xff]   ;;  %v9885_v63 = vrot.slane %v18740_v54, %v14597_v27 }
 0x67d   :  { %9793 = vmatpush1.bf16.msra.mxu1 %v13535_v60  ;;  %9510 = vmatpush1.bf16.msra.mxu0 %v13536_v28  ;;  %v10137_v60 = vrot.slane %v18708_v57, %v14597_v27  ;;  %v9552_v28 = vrot.slane %v18543_v58, %v14595_v53  ;;  %v9863_v58 = vrot.slane %v18719_v23, %v14597_v27 }
 0x67e   :  { %9794 = vmatprep.subr.bf16.mxu1 %v19646_v31  ;;  %9511 = vmatprep.subr.bf16.mxu0 %v19646_v31 }
 0x67f   :  { %v9636_v34 = vsel %vm193_vm3, %v9552_v28, %v9563_v52  ;;  %v18779_v52 = vld [vmem:[#allocation2 + $0x214] ss:$8 sm:$0x3]  ;;  %v9896_v28 = vrot.slane %v18751_v43, %v14597_v27 }
 0x681   :  { %9795 = vmatpush1.bf16.msra.mxu1 %v13537_v55  ;;  %9512 = vmatpush1.bf16.msra.mxu0 %v13538_v4  ;;  %v9874_v55 = vrot.slane %v18712_v61, %v14597_v27  ;;  %v18745_v4 = vld [vmem:[#allocation2 + $0x125] ss:$8 sm:$0x3] }
 0x682   :  { %9796 = vmatprep.subr.bf16.mxu1 %v19646_v31  ;;  %9513 = vmatprep.subr.bf16.mxu0 %v19646_v31  ;;  %v10159_v59 = vrot.slane %v18745_v4, %v14597_v27 }
 0x685   :  { %9797 = vmatpush1.bf16.msra.mxu1 %v13539_v0  ;;  %9514 = vmatpush1.bf16.msra.mxu0 %v13540_v20  ;;  %v9357_v0 = vsel %vm1947_vm6, %v9355_v9, %v9311_v56  ;;  %v9574_v20 = vrot.slane %v18558_v41, %v14595_v53  ;;  %v9924_v56 = vsel %vm1941_vm4, %v9922_v44, %v9863_v58  ;;  %v18774_v9 = vld [vmem:[#allocation2 + $0x175] ss:$8 sm:$0x3]  ;;  %v18794_v58 = vld [vmem:[#allocation2 + $0x264] ss:$8 sm:$0x3] }
 0x686   :  { %9798 = vmatprep.subr.bf16.mxu1 %v19646_v31  ;;  %9515 = vmatprep.subr.bf16.mxu0 %v19646_v31  ;;  %v10207_v41 = vsel %vm193_vm3, %v10126_v30, %v10137_v60  ;;  %v9926_v12 = vsel %vm1944_vm5, %v9924_v56, %v9874_v55  ;;  %v10148_v44 = vrot.slane %v18755_v35, %v14597_v27 }
 0x687   :  { %v9359_v60 = vsel %vm1950_vm7, %v9357_v0, %v9322_v50  ;;  %v9607_v55 = vrot.slane %v18568_v37, %v14595_v53  ;;  %v10170_v56 = vrot.slane %v18774_v9, %v14597_v27  ;;  %v9907_v50 = vrot.slane %v18779_v52, %v14597_v27  ;;  %v13545_v37 = vld [vmem:[%s19524_s3 + $0xd10] sm:$0xff]  }
 0x688   :  { %v10209_v25 = vsel %vm1941_vm4, %v10207_v41, %v10148_v44  ;;  %v9928_v0 = vsel %vm1947_vm6, %v9926_v12, %v9885_v63  ;;  %v9361_v41 = vsel %vm1953_vm8, %v9359_v60, %v9333_v15  ;;  %v9918_v12 = vrot.slane %v18794_v58, %v14597_v27  ;;  %v18820_v44 = vld [vmem:[#allocation2 + $0x265] ss:$8 sm:$0x3] }
 0x689   :  { %9799 = vmatpush1.bf16.msra.mxu1 %v13541_v13  ;;  %9516 = vmatpush1.bf16.msra.mxu0 %v13542_v38  ;;  %v9596_v13 = vrot.slane %v18560_v22, %v14595_v53  ;;  %v9638_v38 = vsel %vm1941_vm4, %v9636_v34, %v9574_v20  ;;  %v18805_v22 = vld [vmem:[#allocation2 + $0x215] ss:$8 sm:$0x3]  ;;  %v10181_v20 = vrot.slane %v18784_v11, %v14597_v27 }
 0x68a   :  { %9800 = vmatprep.subr.bf16.mxu1 %v19646_v31  ;;  %9517 = vmatprep.subr.bf16.mxu0 %v19646_v31  ;;  %v9640_v30 = vsel %vm1944_vm5, %v9638_v38, %v9585_v3  ;;  %v10211_v34 = vsel %vm1944_vm5, %v10209_v25, %v10159_v59  ;;  %v13546_v3 = vld [vmem:[%s19524_s3 + $0xca0] sm:$0xff]   ;;  %v9930_v63 = vsel %vm1950_vm7, %v9928_v0, %v9896_v28 }
 0x68b   :  { %v9618_v25 = vrot.slane %v18579_v5, %v14595_v53  ;;  %v9363_v15 = vsel %vm98_vm0, %v9361_v41, %v9344_v6  ;;  %v10192_v28 = vrot.slane %v18805_v22, %v14597_v27  ;;  %v10213_v60 = vsel %vm1947_vm6, %v10211_v34, %v10170_v56  ;;  %v13548_v6 = vld [vmem:[%s19524_s3 + $0xd20] sm:$0xff]   ;;  %v13550_v41 = vld [vmem:[%s19524_s3 + $0xd28] sm:$0xff]  }
 0x68c   :  { %v9932_v38 = vsel %vm1953_vm8, %v9930_v63, %v9907_v50  ;;  %v10203_v0 = vrot.slane %v18820_v44, %v14597_v27  ;;  %v10215_v5 = vsel %vm1950_vm7, %v10213_v60, %v10181_v20  ;;  %v13551_v63 = vld [vmem:[%s19524_s3 + $0xda0] sm:$0xff]   ;;  %v13554_v60 = vld [vmem:[%s19524_s3 + $0xd38] sm:$0xff]  }
 0x68d   :  { %9801 = vmatpush1.bf16.msra.mxu1 %v13543_v2  ;;  %9518 = vmatpush1.bf16.msra.mxu0 %v13544_v51  ;;  %v9629_v2 = vrot.slane %v18587_v46, %v14595_v53  ;;  %v9642_v51 = vsel %vm1947_vm6, %v9640_v30, %v9596_v13  ;;  %v13547_v46 = vld [vmem:[%s19524_s3 + $0xd18] sm:$0xff]   ;;  %v9934_v13 = vsel %vm98_vm0, %v9932_v38, %v9918_v12 }
 0x68e   :  { %9802 = vmatprep.subr.bf16.mxu1 %v19646_v31  ;;  %9519 = vmatprep.subr.bf16.mxu0 %v19646_v31  ;;  %v9644_v59 = vsel %vm1950_vm7, %v9642_v51, %v9607_v55  ;;  %v9365_v55 = vpack.c.bf16 %v9363_v15, %v9363_v15  ;;  %v10217_v50 = vsel %vm1953_vm8, %v10215_v5, %v10192_v28 }
 0x68f   :  { %v9646_v30 = vsel %vm1953_vm8, %v9644_v59, %v9618_v25  ;;  %v9936_v20 = vpack.c.bf16 %v9934_v13, %v9934_v13  ;;  %v10219_v34 = vsel %vm98_vm0, %v10217_v50, %v10203_v0  ;;  %v13552_v25 = vld [vmem:[%s19524_s3 + $0xd30] sm:$0xff]   ;;  %v13553_v59 = vld [vmem:[%s19524_s3 + $0xda8] sm:$0xff]   ;;  %v13556_v13 = vld [vmem:[%s19524_s3 + $0xd40] sm:$0xff]  }
 0x690   :  { %v9648_v56 = vsel %vm98_vm0, %v9646_v30, %v9629_v2  ;;  %v10221_v12 = vpack.c.bf16 %v10219_v34, %v10219_v34  ;;  %v13557_v30 = vld [vmem:[%s19524_s3 + $0xdb8] sm:$0xff]   ;;  %v13559_v50 = vld [vmem:[%s19524_s3 + $0xdc0] sm:$0xff]   ;;  %v13561_v34 = vld [vmem:[%s19524_s3 + $0xdc8] sm:$0xff]  }
 0x691   :  { %9803 = vmatpush1.bf16.msra.mxu1 %v13545_v37  ;;  %9520 = vmatpush1.bf16.msra.mxu0 %v13546_v3  ;;  %v13549_v37 = vld [vmem:[%s19524_s3 + $0xd98] sm:$0xff]   ;;  %v9650_v3 = vpack.c.bf16 %v9648_v56, %v9648_v56  ;;  %v13558_v56 = vld [vmem:[%s19524_s3 + $0xd48] sm:$0xff]  }
 0x692   :  { %9804 = vmatprep.subr.bf16.mxu1 %v19646_v31  ;;  %10061 = vmatprep.subr.bf16.mxu0 %v19646_v31 }
 0x694   :  { %9524 = vmatmul.mubr.bf16.vlgmr.msra.gmra.mrb[88].mxu0 %v9365_v55 }
 0x695   :  { %9805 = vmatpush1.bf16.msra.mxu1 %v13547_v46  ;;  %10062 = vmatpush1.bf16.msra.mxu0 %v13548_v6  ;;  %v13555_v46 = vld [vmem:[%s19524_s3 + $0xdb0] sm:$0xff]  }
 0x696   :  { %10346 = vmatprep.subr.bf16.mxu1 %v19646_v31  ;;  %12933 = vmatprep.mubr.msk.bf16.mxu0 %vm176_vm2, %v9936_v20  ;;  %v13560_v20 = vld [vmem:[%s19524_s3 + $0xd50] sm:$0xff]  }
 0x697   :  { %10063 = vmatprep.subr.bf16.mxu0 %v19646_v31 }
 0x698   :  { %9809 = vmatmul.mubr.bf16.vlgmr.msra.gmra.mrb[112].mxu1 %v9650_v3  ;;  %v13563_v3 = vld [vmem:[%s19524_s3 + $0xdd0] sm:$0xff]  }
 0x699   :  { %10347 = vmatpush1.bf16.msra.mxu1 %v13549_v37  ;;  %12979 = vmatprep.mubr.msk.bf16.mxu1 %vm176_vm2, %v10221_v12  ;;  %v13562_v37 = vld [vmem:[%s19524_s3 + $0xd58] sm:$0xff]  }
 0x69a   :  { %10348 = vmatprep.subr.bf16.mxu1 %v19646_v31  ;;  %10064 = vmatpush1.bf16.msra.mxu0 %v13550_v41  ;;  %v13564_v41 = vld [vmem:[%s19524_s3 + $0xd60] sm:$0xff]   ;;  %v13565_v12 = vld [vmem:[%s19524_s3 + $0xdd8] sm:$0xff]  }
 0x69b   :  { %10065 = vmatprep.subr.bf16.mxu0 %v19646_v31  ;;  %v8385_v2 = vpop.f32.mrb[80].mxu0 }
 0x69c   :  { %v8391_v51 = vadd.f32 %v8385_v2, %v18629_v33  ;;  %v8387_v15 = vpop.f32.mrb[81].mxu0  ;;  %v13567_v2 = vld [vmem:[%s19524_s3 + $0xde0] sm:$0xff]  }
 0x69d   :  { %10349 = vmatpush1.bf16.msra.mxu1 %v13551_v63  ;;  %v8388_v28 = vpop.f32.mrb[82].mxu0  ;;  %v13566_v63 = vld [vmem:[%s19524_s3 + $0xd68] sm:$0xff]   ;;  %v13568_v15 = vld [vmem:[%s19524_s3 + $0xd70] sm:$0xff]  }
 0x69e   :  { %10350 = vmatprep.subr.bf16.mxu1 %v19646_v31  ;;  %10066 = vmatpush1.bf16.msra.mxu0 %v13552_v25  ;;  %v8389_v38 = vpop.f32.mrb[83].mxu0  ;;  %v9848_v25 = vrot.slane %v18691_v21, %v14595_v53  ;;  %v18942_v21 = vld [vmem:[#allocation2 + $0x36] ss:$8 sm:$0x3] }
 0x69f   :  { %10067 = vmatprep.subr.bf16.mxu0 %v19646_v31  ;;  %v18944_v28 = vld [vmem:[#allocation2 + $0x87] ss:$8 sm:$0x3] }
 0x6a0   :  { %v8670_v0 = vpop.f32.mrb[104].mxu1 }
 0x6a1   :  { %10351 = vmatpush1.bf16.msra.mxu1 %v13553_v59  ;;  %v18878_v33 = vadd.f32 %v8670_v0, %v8391_v51  ;;  %v8672_v5 = vpop.f32.mrb[105].mxu1  ;;  %v18933_v51 = vld [vmem:[#allocation2 + $0x86] ss:$8 sm:$0x3]  ;;  %v9837_v59 = vrot.slane %v18696_v7, %v14595_v53  ;;  %v10133_v0 = vrot.slane %v18708_v57, %v14595_v53  ;;  %v9859_v7 = vrot.slane %v18719_v23, %v14595_v53  ;;  %v13570_v57 = vld [vmem:[%s19524_s3 + $0xd78] sm:$0xff]  }
 0x6a2   :  { %10352 = vmatprep.subr.bf16.mxu1 %v19646_v31  ;;  %v8673_v6 = vpop.f32.mrb[106].mxu1  ;;  %10068 = vmatpush1.bf16.msra.mxu0 %v13554_v60  ;;  %v13569_v60 = vld [vmem:[%s19524_s3 + $0xde8] sm:$0xff]   ;;  %v10422_v5 = vrot.slane %v18933_v51, %v14597_v27  ;;  %v10411_v23 = vrot.slane %v18942_v21, %v14597_v27 }
 0x6a3   :  { %v8674_v55 = vpop.f32.mrb[107].mxu1  ;;  %10069 = vmatprep.subr.bf16.mxu0 %v19646_v31  ;;  %v9921_v38 = vsel %vm193_vm3, %v9837_v59, %v9848_v25  ;;  %v18958_v6 = vld [vmem:[#allocation2 + $0x126] ss:$8 sm:$0x3] }
 0x6a4   :  { %v10122_v55 = vrot.slane %v18723_v17, %v14595_v53  ;;  %v10155_v17 = vrot.slane %v18745_v4, %v14595_v53  ;;  %v13571_v4 = vld [vmem:[%s19524_s3 + $0xdf0] sm:$0xff]  }
 0x6a5   :  { %10353 = vmatpush1.bf16.msra.mxu1 %v13555_v46  ;;  %v9870_v46 = vrot.slane %v18712_v61, %v14595_v53  ;;  %v10707_v61 = vrot.slane %v18944_v28, %v14597_v27 }
 0x6a6   :  { %10354 = vmatprep.subr.bf16.mxu1 %v19646_v31  ;;  %10070 = vmatpush1.bf16.msra.mxu0 %v13556_v13  ;;  %v18960_v13 = vld [vmem:[#allocation2 + $0x37] ss:$8 sm:$0x3] }
 0x6a7   :  { %10071 = vmatprep.subr.bf16.mxu0 %v19646_v31 }
 0x6a9   :  { %10355 = vmatpush1.bf16.msra.mxu1 %v13557_v30  ;;  %v18968_v30 = vld [vmem:[#allocation2 + $0xd6] ss:$8 sm:$0x3] }
 0x6aa   :  { %10356 = vmatprep.subr.bf16.mxu1 %v19646_v31  ;;  %10072 = vmatpush1.bf16.msra.mxu0 %v13558_v56  ;;  %v9881_v56 = vrot.slane %v18740_v54, %v14595_v53  ;;  %v18990_v54 = vld [vmem:[#allocation2 + $0xd7] ss:$8 sm:$0x3]  ;;  %v10433_v59 = vrot.slane %v18968_v30, %v14597_v27 }
 0x6ab   :  { %10073 = vmatprep.subr.bf16.mxu0 %v19646_v31 }
 0x6ad   :  { %10357 = vmatpush1.bf16.msra.mxu1 %v13559_v50  ;;  %v9892_v50 = vrot.slane %v18751_v43, %v14595_v53  ;;  %v10696_v43 = vrot.slane %v18960_v13, %v14597_v27 }
 0x6ae   :  { %10358 = vmatprep.subr.bf16.mxu1 %v19646_v31  ;;  %10074 = vmatpush1.bf16.msra.mxu0 %v13560_v20  ;;  %v9923_v20 = vsel %vm1941_vm4, %v9921_v38, %v9859_v7  ;;  %v19012_v38 = vld [vmem:[#allocation2 + $0x177] ss:$8 sm:$0x3] }
 0x6af   :  { %10075 = vmatprep.subr.bf16.mxu0 %v19646_v31  ;;  %v9925_v25 = vsel %vm1944_vm5, %v9923_v20, %v9870_v46 }
 0x6b1   :  { %10359 = vmatpush1.bf16.msra.mxu1 %v13561_v34  ;;  %v18982_v34 = vld [vmem:[#allocation2 + $0x127] ss:$8 sm:$0x3] }
 0x6b2   :  { %10360 = vmatprep.subr.bf16.mxu1 %v19646_v31  ;;  %10076 = vmatpush1.bf16.msra.mxu0 %v13562_v37  ;;  %v10206_v37 = vsel %vm193_vm3, %v10122_v55, %v10133_v0  ;;  %v10777_v0 = vsel %vm193_vm3, %v10696_v43, %v10707_v61  ;;  %v13573_v55 = vld [vmem:[%s19524_s3 + $0xdf8] sm:$0xff]   ;;  %v9927_v43 = vsel %vm1947_vm6, %v9925_v25, %v9881_v56 }
 0x6b3   :  { %10077 = vmatprep.subr.bf16.mxu0 %v19646_v31  ;;  %v19050_v56 = vld [vmem:[#allocation2 + $0x217] ss:$8 sm:$0x3] }
 0x6b5   :  { %10361 = vmatpush1.bf16.msra.mxu1 %v13563_v3  ;;  %v18985_v3 = vld [vmem:[#allocation2 + $0x176] ss:$8 sm:$0x3] }
 0x6b6   :  { %10362 = vmatprep.subr.bf16.mxu1 %v19646_v31  ;;  %10078 = vmatpush1.bf16.msra.mxu0 %v13564_v41  ;;  %v10444_v41 = vrot.slane %v18958_v6, %v14597_v27  ;;  %v10455_v7 = vrot.slane %v18985_v3, %v14597_v27 }
 0x6b7   :  { %10079 = vmatprep.subr.bf16.mxu0 %v19646_v31 }
 0x6b9   :  { %10363 = vmatpush1.bf16.msra.mxu1 %v13565_v12  ;;  %v10492_v12 = vsel %vm193_vm3, %v10411_v23, %v10422_v5  ;;  %v10177_v23 = vrot.slane %v18784_v11, %v14595_v53  ;;  %v10740_v11 = vrot.slane %v19012_v38, %v14597_v27 }
 0x6ba   :  { %10364 = vmatprep.subr.bf16.mxu1 %v19646_v31  ;;  %10080 = vmatpush1.bf16.msra.mxu0 %v13566_v63  ;;  %v9903_v63 = vrot.slane %v18779_v52, %v14595_v53  ;;  %v10166_v52 = vrot.slane %v18774_v9, %v14595_v53  ;;  %v10494_v46 = vsel %vm1941_vm4, %v10492_v12, %v10433_v59  ;;  %v19040_v59 = vld [vmem:[#allocation2 + $0x266] ss:$8 sm:$0x3] }
 0x6bb   :  { %10081 = vmatprep.subr.bf16.mxu0 %v19646_v31  ;;  %v10718_v9 = vrot.slane %v18990_v54, %v14597_v27  ;;  %v9914_v12 = vrot.slane %v18794_v58, %v14595_v53  ;;  %v9929_v58 = vsel %vm1950_vm7, %v9927_v43, %v9892_v50  ;;  %v10488_v43 = vrot.slane %v19040_v59, %v14597_v27 }
 0x6bc   :  { %v9931_v36 = vsel %vm1953_vm8, %v9929_v58, %v9903_v63 }
 0x6bd   :  { %10365 = vmatpush1.bf16.msra.mxu1 %v13567_v2  ;;  %v10144_v2 = vrot.slane %v18755_v35, %v14595_v53  ;;  %v10729_v35 = vrot.slane %v18982_v34, %v14597_v27 }
 0x6be   :  { %10366 = vmatprep.subr.bf16.mxu1 %v19646_v31  ;;  %10082 = vmatpush1.bf16.msra.mxu0 %v13568_v15  ;;  %v19002_v15 = vld [vmem:[#allocation2 + $0x1c6] ss:$8 sm:$0x3] }
 0x6bf   :  { %10083 = vmatprep.subr.bf16.mxu0 %v19646_v31  ;;  %v10208_v5 = vsel %vm1941_vm4, %v10206_v37, %v10144_v2  ;;  %v10466_v20 = vrot.slane %v19002_v15, %v14597_v27  ;;  %v10496_v37 = vsel %vm1944_vm5, %v10494_v46, %v10444_v41  ;;  %v19038_v2 = vld [vmem:[#allocation2 + $0x216] ss:$8 sm:$0x3]  ;;  %v13574_v41 = vld [vmem:[%s19524_s3 + $0xd88] sm:$0xff]  }
 0x6c0   :  { %v10210_v61 = vsel %vm1944_vm5, %v10208_v5, %v10155_v17  ;;  %v10779_v17 = vsel %vm1941_vm4, %v10777_v0, %v10718_v9  ;;  %v10498_v9 = vsel %vm1947_vm6, %v10496_v37, %v10455_v7  ;;  %v10477_v50 = vrot.slane %v19038_v2, %v14597_v27 }
 0x6c1   :  { %10367 = vmatpush1.bf16.msra.mxu1 %v13569_v60  ;;  %v13572_v60 = vld [vmem:[%s19524_s3 + $0xd80] sm:$0xff]   ;;  %v10781_v5 = vsel %vm1944_vm5, %v10779_v17, %v10729_v35  ;;  %v10212_v46 = vsel %vm1947_vm6, %v10210_v61, %v10166_v52  ;;  %v10500_v35 = vsel %vm1950_vm7, %v10498_v9, %v10466_v20  ;;  %v10199_v20 = vrot.slane %v18820_v44, %v14595_v53 }
 0x6c2   :  { %10368 = vmatprep.subr.bf16.mxu1 %v19646_v31  ;;  %10084 = vmatpush1.bf16.msra.mxu0 %v13570_v57  ;;  %v19022_v57 = vld [vmem:[#allocation2 + $0x1c7] ss:$8 sm:$0x3]  ;;  %v10214_v1 = vsel %vm1950_vm7, %v10212_v46, %v10177_v23  ;;  %v10762_v23 = vrot.slane %v19050_v56, %v14597_v27  ;;  %v10783_v61 = vsel %vm1947_vm6, %v10781_v5, %v10740_v11 }
 0x6c3   :  { %10085 = vmatprep.subr.bf16.mxu0 %v19646_v31  ;;  %v10751_v25 = vrot.slane %v19022_v57, %v14597_v27  ;;  %v19066_v17 = vld [vmem:[#allocation2 + $0x267] ss:$8 sm:$0x3] }
 0x6c4   :  { %v10773_v37 = vrot.slane %v19066_v17, %v14597_v27 }
 0x6c5   :  { %10369 = vmatpush1.bf16.msra.mxu1 %v13571_v4 }
 0x6c6   :  { %10370 = vmatprep.subr.bf16.mxu1 %v19646_v31  ;;  %10086 = vmatpush1.bf16.msra.mxu0 %v13572_v60  ;;  %v199_v4 = vpop.xlane.xlu0 %198  ;;  %v10188_v60 = vrot.slane %v18805_v22, %v14595_v53  ;;  %v13575_v22 = vld [vmem:[%s19524_s3 + $0xe00] sm:$0xff]  }
 0x6c7   :  { %10087 = vmatprep.subr.bf16.mxu0 %v19646_v31  ;;  %v205_v0 = vmul.f32 0.004166667, %v199_v4  ;;  %v10502_v4 = vsel %vm1953_vm8, %v10500_v35, %v10477_v50 }
 0x6c8   :  { %v10216_v63 = vsel %vm1953_vm8, %v10214_v1, %v10188_v60  ;;  %v10504_v5 = vsel %vm98_vm0, %v10502_v4, %v10488_v43  ;;  %v13578_v1 = vld [vmem:[%s19524_s3 + $0xe10] sm:$0xff]   ;;  %v19755_v60 = vmax.f32 %v18278_v26, 0.0  ;;  %v19757_v4 = vmax.f32 %v18314_v16, 0.0 }
 0x6c9   :  { %10371 = vmatpush1.bf16.msra.mxu1 %v13573_v55  ;;  %v19073_v52 = vsub.f32 %v174_v24, %v205_v0  ;;  %v19077_v7 = vsub.f32 %v175_v48, %v205_v0  ;;  %v13576_v55 = vld [vmem:[%s19524_s3 + $0xd90] sm:$0xff]   ;;  %v10785_v24 = vsel %vm1950_vm7, %v10783_v61, %v10751_v25  ;;  %v13577_v25 = vld [vmem:[%s19524_s3 + $0xe08] sm:$0xff]   ;;  %v10218_v35 = vsel %vm98_vm0, %v10216_v63, %v10199_v20  ;;  %v13580_v20 = vld [vmem:[%s19524_s3 + $0xe18] sm:$0xff]  }
 0x6ca   :  { %10372 = vmatprep.subr.bf16.mxu1 %v19646_v31  ;;  %10088 = vmatpush1.bf16.msra.mxu0 %v13574_v41  ;;  %v9933_v41 = vsel %vm98_vm0, %v9931_v36, %v9914_v12  ;;  %v10787_v44 = vsel %vm1953_vm8, %v10785_v24, %v10762_v23  ;;  %v10506_v26 = vpack.c.bf16 %v10504_v5, %v10504_v5 }
 0x6cb   :  { %10089 = vmatprep.subr.bf16.mxu0 %v19646_v31  ;;  %v224_v14 = vmul.f32 %v19073_v52, %v19073_v52  ;;  %v225_v48 = vmul.f32 %v19077_v7, %v19077_v7  ;;  %v645_v11 = vpop.xlane.xlu0 %644  ;;  %v9935_v43 = vpack.c.bf16 %v9933_v41, %v9933_v41  ;;  %v19756_v41 = vmax.f32 %v18311_v19, 0.0  ;;  %v13581_v19 = vld [vmem:[%s19524_s3 + $0xe90] sm:$0xff]  }
 0x6cc   :  { %v650_v58 = vmul.f32 0.004166667, %v645_v11 }
 0x6cd   :  { %10373 = vmatpush1.bf16.msra.mxu1 %v13575_v22  ;;  %v242_v0 = vsel %vm193_vm3, %v224_v14, 0.0  ;;  %v243_v46 = vsel %vm195_vm9, %v225_v48, 0.0  ;;  %v10789_v22 = vsel %vm98_vm0, %v10787_v44, %v10773_v37  ;;  %v10220_v14 = vpack.c.bf16 %v10218_v35, %v10218_v35  ;;  %v13582_v35 = vld [vmem:[%s19524_s3 + $0xe20] sm:$0xff]  }
 0x6ce   :  { %10374 = vmatprep.subr.bf16.mxu1 %v19646_v31  ;;  %10090 = vmatpush1.bf16.msra.mxu0 %v13576_v55  ;;  %v19113_v12 = vsub.f32 %v623_v29, %v650_v58  ;;  %v19117_v9 = vsub.f32 %v19755_v60, %v650_v58  ;;  %v244_v50 = vadd.f32 %v243_v46, %v242_v0  ;;  %v13579_v55 = vld [vmem:[%s19524_s3 + $0xe88] sm:$0xff]   ;;  %v19759_v44 = vmax.f32 %v18308_v18, 0.0 }
 0x6cf   :  { %10631 = vmatprep.subr.bf16.mxu0 %v19646_v31  ;;  %v10791_v48 = vpack.c.bf16 %v10789_v22, %v10789_v22 }
 0x6d0   :  { %v669_v23 = vmul.f32 %v19113_v12, %v19113_v12  ;;  %v670_v8 = vmul.f32 %v19117_v9, %v19117_v9  ;;  %v868_v61 = vpop.xlane.xlu0 %867  ;;  %245 = vadd.xlane.f32.xlu1 %v244_v50 }
 0x6d1   :  { %v422_v29 = vpop.xlane.xlu1 %421  ;;  %10375 = vmatpush1.bf16.msra.mxu1 %v13577_v25  ;;  %10094 = vmatmul.mubr.bf16.vlgmr.msra.gmra.mrb[92].mxu0 %v9935_v43  ;;  %v873_v24 = vmul.f32 0.004166667, %v868_v61  ;;  %v19758_v25 = vmax.f32 %v18305_v47, 0.0 }
 0x6d2   :  { %v427_v36 = vmul.f32 0.004166667, %v422_v29  ;;  %10916 = vmatprep.subr.bf16.mxu1 %v19646_v31  ;;  %10632 = vmatpush1.bf16.msra.mxu0 %v13578_v1  ;;  %v687_v37 = vsel %vm193_vm3, %v669_v23, 0.0  ;;  %v688_v11 = vsel %vm195_vm9, %v670_v8, 0.0  ;;  %v19760_v23 = vmax.f32 %v18354_v42, 0.0 }
 0x6d3   :  { %13025 = vmatprep.mubr.msk.bf16.mxu0 %vm176_vm2, %v10506_v26  ;;  %10633 = vmatprep.subr.bf16.mxu0 %v19646_v31  ;;  %v19147_v5 = vsub.f32 %v19758_v25, %v873_v24  ;;  %v19151_v0 = vsub.f32 %v19759_v44, %v873_v24  ;;  %v689_v60 = vadd.f32 %v688_v11, %v687_v37  ;;  %v19761_v29 = vmax.f32 %v18357_v45, 0.0  ;;  %v13583_v45 = vld [vmem:[%s19524_s3 + $0xe98] sm:$0xff]   ;;  %v13584_v44 = vld [vmem:[%s19524_s3 + $0xe28] sm:$0xff]  }
 0x6d4   :  { %v19139_v63 = vsub.f32 %v19756_v41, %v427_v36  ;;  %v19143_v58 = vsub.f32 %v19757_v4, %v427_v36  ;;  %10379 = vmatmul.mubr.bf16.vlgmr.msra.gmra.mrb[116].mxu1 %v10220_v14  ;;  %v1314_v1 = vpop.xlane.xlu0 %1313  ;;  %v19762_v36 = vmax.f32 %v18341_v32, 0.0  ;;  %v19763_v14 = vmax.f32 %v18344_v10, 0.0 }
 0x6d5   :  { %v1091_v46 = vpop.xlane.xlu1 %1090  ;;  %10917 = vmatpush1.bf16.msra.mxu1 %v13579_v55  ;;  %13071 = vmatprep.mubr.msk.bf16.mxu1 %vm176_vm2, %v10791_v48  ;;  %v892_v18 = vmul.f32 %v19147_v5, %v19147_v5  ;;  %v893_v43 = vmul.f32 %v19151_v0, %v19151_v0  ;;  %v1319_v22 = vmul.f32 0.004166667, %v1314_v1 }
 0x6d6   :  { %v446_v47 = vmul.f32 %v19139_v63, %v19139_v63  ;;  %v447_v16 = vmul.f32 %v19143_v58, %v19143_v58  ;;  %v1096_v50 = vmul.f32 0.004166667, %v1091_v46  ;;  %10918 = vmatprep.subr.bf16.mxu1 %v19646_v31  ;;  %10634 = vmatpush1.bf16.msra.mxu0 %v13580_v20 }
 0x6d7   :  { %10635 = vmatprep.subr.bf16.mxu0 %v19646_v31  ;;  %690 = vadd.xlane.f32.xlu1 %v689_v60  ;;  %v19182_v24 = vsub.f32 %v19762_v36, %v1319_v22  ;;  %v19186_v48 = vsub.f32 %v19763_v14, %v1319_v22  ;;  %v910_v46 = vsel %vm193_vm3, %v892_v18, 0.0  ;;  %v911_v1 = vsel %vm195_vm9, %v893_v43, 0.0 }
 0x6d8   :  { %v19172_v8 = vsub.f32 %v19760_v23, %v1096_v50  ;;  %v19176_v61 = vsub.f32 %v19761_v29, %v1096_v50  ;;  %v464_v26 = vsel %vm193_vm3, %v446_v47, 0.0  ;;  %v465_v55 = vsel %vm195_vm9, %v447_v16, 0.0  ;;  %v1760_v20 = vpop.xlane.xlu0 %1759  ;;  %v13586_v29 = vld [vmem:[%s19524_s3 + $0xe30] sm:$0xff]  }
 0x6d9   :  { %v1537_v42 = vpop.xlane.xlu1 %1536  ;;  %v466_v37 = vadd.f32 %v465_v55, %v464_v26  ;;  %10919 = vmatpush1.bf16.msra.mxu1 %v13581_v19  ;;  %v1765_v4 = vmul.f32 0.004166667, %v1760_v20  ;;  %v1338_v10 = vmul.f32 %v19182_v24, %v19182_v24  ;;  %v1339_v25 = vmul.f32 %v19186_v48, %v19186_v48 }
 0x6da   :  { %v1115_v11 = vmul.f32 %v19172_v8, %v19172_v8  ;;  %v1116_v32 = vmul.f32 %v19176_v61, %v19176_v61  ;;  %v1542_v41 = vmul.f32 0.004166667, %v1537_v42  ;;  %10920 = vmatprep.subr.bf16.mxu1 %v19646_v31  ;;  %10636 = vmatpush1.bf16.msra.mxu0 %v13582_v35  ;;  %v19764_v60 = vmax.f32 %v18391_v62, 0.0  ;;  %v13585_v62 = vld [vmem:[%s19524_s3 + $0xea0] sm:$0xff]  }
 0x6db   :  { %10637 = vmatprep.subr.bf16.mxu0 %v19646_v31  ;;  %v19765_v47 = vmax.f32 %v18394_v49, 0.0  ;;  %v19766_v50 = vmax.f32 %v18376_v40, 0.0  ;;  %v19767_v22 = vmax.f32 %v18379_v39, 0.0  ;;  %467 = vadd.xlane.f32.xlu0 %v466_v37  ;;  %v912_v55 = vadd.f32 %v911_v1, %v910_v46  ;;  %v13591_v1 = vld [vmem:[%s19524_s3 + $0xeb8] sm:$0xff]  }
 0x6dc   :  { %v19208_v19 = vsub.f32 %v19764_v60, %v1542_v41  ;;  %v1133_v18 = vsel %vm193_vm3, %v1115_v11, 0.0  ;;  %v1134_v43 = vsel %vm195_vm9, %v1116_v32, 0.0  ;;  %v1356_v36 = vsel %vm193_vm3, %v1338_v10, 0.0  ;;  %v13587_v11 = vld [vmem:[%s19524_s3 + $0xea8] sm:$0xff]   ;;  %v13588_v32 = vld [vmem:[%s19524_s3 + $0xe38] sm:$0xff]  }
 0x6dd   :  { %v19212_v16 = vsub.f32 %v19765_v47, %v1542_v41  ;;  %v19216_v35 = vsub.f32 %v19766_v50, %v1765_v4  ;;  %v19220_v23 = vsub.f32 %v19767_v22, %v1765_v4  ;;  %10921 = vmatpush1.bf16.msra.mxu1 %v13583_v45  ;;  %v1135_v26 = vadd.f32 %v1134_v43, %v1133_v18  ;;  %v13592_v60 = vld [vmem:[%s19524_s3 + $0xe48] sm:$0xff]   ;;  %v13593_v47 = vld [vmem:[%s19524_s3 + $0xec0] sm:$0xff]   ;;  %v13594_v50 = vld [vmem:[%s19524_s3 + $0xe50] sm:$0xff]  }
 0x6de   :  { %v1561_v49 = vmul.f32 %v19208_v19, %v19208_v19  ;;  %10922 = vmatprep.subr.bf16.mxu1 %v19646_v31  ;;  %10638 = vmatpush1.bf16.msra.mxu0 %v13584_v44  ;;  %v1357_v37 = vsel %vm195_vm9, %v1339_v25, 0.0  ;;  %v13589_v25 = vld [vmem:[%s19524_s3 + $0xeb0] sm:$0xff]   ;;  %v13590_v44 = vld [vmem:[%s19524_s3 + $0xe40] sm:$0xff]   ;;  %v13595_v22 = vld [vmem:[%s19524_s3 + $0xec8] sm:$0xff]  }
 0x6df   :  { %v1562_v40 = vmul.f32 %v19212_v16, %v19212_v16  ;;  %v1784_v39 = vmul.f32 %v19216_v35, %v19216_v35  ;;  %v1785_v14 = vmul.f32 %v19220_v23, %v19220_v23  ;;  %10639 = vmatprep.subr.bf16.mxu0 %v19646_v31  ;;  %1136 = vadd.xlane.f32.xlu1 %v1135_v26  ;;  %v13596_v18 = vld [vmem:[%s19524_s3 + $0xe58] sm:$0xff]   ;;  %v13597_v43 = vld [vmem:[%s19524_s3 + $0xed0] sm:$0xff]  }
 0x6e0   :  { %v1579_v42 = vsel %vm193_vm3, %v1561_v49, 0.0  ;;  %913 = vadd.xlane.f32.xlu0 %v912_v55  ;;  %v1358_v41 = vadd.f32 %v1357_v37, %v1356_v36  ;;  %v10418_v49 = vrot.slane %v18933_v51, %v14595_v53  ;;  %v10703_v51 = vrot.slane %v18944_v28, %v14595_v53  ;;  %v13601_v36 = vld [vmem:[%s19524_s3 + $0xee0] sm:$0xff]   ;;  %v13602_v28 = vld [vmem:[%s19524_s3 + $0xe70] sm:$0xff]  }
 0x6e1   :  { %v1580_v20 = vsel %vm195_vm9, %v1562_v40, 0.0  ;;  %10923 = vmatpush1.bf16.msra.mxu1 %v13585_v62  ;;  %v1802_v4 = vsel %vm193_vm3, %v1784_v39, 0.0  ;;  %v1803_v10 = vsel %vm195_vm9, %v1785_v14, 0.0  ;;  %v13598_v62 = vld [vmem:[%s19524_s3 + $0xe60] sm:$0xff]   ;;  %v13599_v40 = vld [vmem:[%s19524_s3 + $0xed8] sm:$0xff]   ;;  %v13600_v39 = vld [vmem:[%s19524_s3 + $0xe68] sm:$0xff]   ;;  %v10440_v26 = vrot.slane %v18958_v6, %v14595_v53 }
 0x6e2   :  { %v1581_v45 = vadd.f32 %v1580_v20, %v1579_v42  ;;  %10924 = vmatprep.subr.bf16.mxu1 %v19646_v31  ;;  %10640 = vmatpush1.bf16.msra.mxu0 %v13586_v29  ;;  %v1804_v46 = vadd.f32 %v1803_v10, %v1802_v4  ;;  %v10407_v29 = vrot.slane %v18942_v21, %v14595_v53 }
 0x6e3   :  { %10641 = vmatprep.subr.bf16.mxu0 %v19646_v31  ;;  %v10429_v14 = vrot.slane %v18968_v30, %v14595_v53  ;;  %v10692_v21 = vrot.slane %v18960_v13, %v14595_v53  ;;  %v10451_v6 = vrot.slane %v18985_v3, %v14595_v53  ;;  %v10725_v30 = vrot.slane %v18982_v34, %v14595_v53  ;;  %v13603_v3 = vld [vmem:[%s19524_s3 + $0xee8] sm:$0xff]   ;;  %v13604_v34 = vld [vmem:[%s19524_s3 + $0xe78] sm:$0xff]  }
 0x6e4   :  { %1582 = vadd.xlane.f32.xlu1 %v1581_v45  ;;  %1359 = vadd.xlane.f32.xlu0 %v1358_v41  ;;  %v10491_v55 = vsel %vm193_vm3, %v10407_v29, %v10418_v49  ;;  %v10462_v13 = vrot.slane %v19002_v15, %v14595_v53  ;;  %v10714_v45 = vrot.slane %v18990_v54, %v14595_v53  ;;  %v13611_v49 = vld [vmem:[%s19524_s3 + $0xf18] sm:$0xff]   ;;  %v13614_v29 = vld [vmem:[%s19524_s3 + $0xf30] sm:$0xff]  }
 0x6e5   :  { %10925 = vmatpush1.bf16.msra.mxu1 %v13587_v11  ;;  %v10493_v42 = vsel %vm1941_vm4, %v10491_v55, %v10429_v14  ;;  %v10776_v20 = vsel %vm193_vm3, %v10692_v21, %v10703_v51  ;;  %v10736_v15 = vrot.slane %v19012_v38, %v14595_v53  ;;  %v10473_v54 = vrot.slane %v19038_v2, %v14595_v53  ;;  %v13605_v38 = vld [vmem:[%s19524_s3 + $0xef0] sm:$0xff]   ;;  %v13606_v2 = vld [vmem:[%s19524_s3 + $0xe80] sm:$0xff]   ;;  %v13615_v51 = vld [vmem:[%s19524_s3 + $0xf38] sm:$0xff]  }
 0x6e6   :  { %10926 = vmatprep.subr.bf16.mxu1 %v19646_v31  ;;  %10642 = vmatpush1.bf16.msra.mxu0 %v13588_v32  ;;  %v10495_v37 = vsel %vm1944_vm5, %v10493_v42, %v10440_v26  ;;  %v10778_v11 = vsel %vm1941_vm4, %v10776_v20, %v10714_v45  ;;  %v10747_v41 = vrot.slane %v19022_v57, %v14595_v53  ;;  %v13616_v26 = vld [vmem:[%s19524_s3 + $0xf40] sm:$0xff]   ;;  %v13619_v45 = vld [vmem:[%s19524_s3 + $0xf58] sm:$0xff]  }
 0x6e7   :  { %10643 = vmatprep.subr.bf16.mxu0 %v19646_v31  ;;  %v10497_v32 = vsel %vm1947_vm6, %v10495_v37, %v10451_v6  ;;  %v10780_v4 = vsel %vm1944_vm5, %v10778_v11, %v10725_v30  ;;  %v10484_v10 = vrot.slane %v19040_v59, %v14595_v53  ;;  %v10758_v57 = vrot.slane %v19050_v56, %v14595_v53  ;;  %v13617_v6 = vld [vmem:[%s19524_s3 + $0xf48] sm:$0xff]  }
 0x6e8   :  { %1805 = vadd.xlane.f32.xlu0 %v1804_v46  ;;  %v10769_v46 = vrot.slane %v19066_v17, %v14595_v53 }
 0x6e9   :  { %10927 = vmatpush1.bf16.msra.mxu1 %v13589_v25  ;;  %v10499_v25 = vsel %vm1950_vm7, %v10497_v32, %v10462_v13 }
 0x6ea   :  { %10928 = vmatprep.subr.bf16.mxu1 %v19646_v31  ;;  %10644 = vmatpush1.bf16.msra.mxu0 %v13590_v44  ;;  %v10782_v44 = vsel %vm1947_vm6, %v10780_v4, %v10736_v15  ;;  %v10501_v59 = vsel %vm1953_vm8, %v10499_v25, %v10473_v54  ;;  %v13622_v15 = vld [vmem:[%s19524_s3 + $0xf70] sm:$0xff]  }
 0x6eb   :  { %10645 = vmatprep.subr.bf16.mxu0 %v19646_v31 }
 0x6ed   :  { %10929 = vmatpush1.bf16.msra.mxu1 %v13591_v1  ;;  %v10784_v1 = vsel %vm1950_vm7, %v10782_v44, %v10747_v41 }
 0x6ee   :  { %10930 = vmatprep.subr.bf16.mxu1 %v19646_v31  ;;  %10646 = vmatpush1.bf16.msra.mxu0 %v13592_v60  ;;  %v10503_v60 = vsel %vm98_vm0, %v10501_v59, %v10484_v10  ;;  %v10786_v56 = vsel %vm1953_vm8, %v10784_v1, %v10758_v57 }
 0x6ef   :  { %10647 = vmatprep.subr.bf16.mxu0 %v19646_v31  ;;  %v10788_v17 = vsel %vm98_vm0, %v10786_v56, %v10769_v46 }
 0x6f1   :  { %10931 = vmatpush1.bf16.msra.mxu1 %v13593_v47  ;;  %v13607_v47 = vld [vmem:[%s19524_s3 + $0xef8] sm:$0xff]  }
 0x6f2   :  { %10932 = vmatprep.subr.bf16.mxu1 %v19646_v31  ;;  %10648 = vmatpush1.bf16.msra.mxu0 %v13594_v50  ;;  %v13608_v50 = vld [vmem:[%s19524_s3 + $0xf00] sm:$0xff]  }
 0x6f3   :  { %10649 = vmatprep.subr.bf16.mxu0 %v19646_v31 }
 0x6f5   :  { %10933 = vmatpush1.bf16.msra.mxu1 %v13595_v22  ;;  %v10505_v22 = vpack.c.bf16 %v10503_v60, %v10503_v60 }
 0x6f6   :  { %10934 = vmatprep.subr.bf16.mxu1 %v19646_v31  ;;  %10650 = vmatpush1.bf16.msra.mxu0 %v13596_v18  ;;  %v10790_v18 = vpack.c.bf16 %v10788_v17, %v10788_v17 }
 0x6f7   :  { %10651 = vmatprep.subr.bf16.mxu0 %v19646_v31 }
 0x6f9   :  { %10935 = vmatpush1.bf16.msra.mxu1 %v13597_v43  ;;  %v13609_v43 = vld [vmem:[%s19524_s3 + $0xf08] sm:$0xff]  }
 0x6fa   :  { %10936 = vmatprep.subr.bf16.mxu1 %v19646_v31  ;;  %10652 = vmatpush1.bf16.msra.mxu0 %v13598_v62  ;;  %v13610_v62 = vld [vmem:[%s19524_s3 + $0xf10] sm:$0xff]  }
 0x6fb   :  { %10653 = vmatprep.subr.bf16.mxu0 %v19646_v31 }
 0x6fd   :  { %10937 = vmatpush1.bf16.msra.mxu1 %v13599_v40  ;;  %v13612_v40 = vld [vmem:[%s19524_s3 + $0xf20] sm:$0xff]  }
 0x6fe   :  { %10938 = vmatprep.subr.bf16.mxu1 %v19646_v31  ;;  %10654 = vmatpush1.bf16.msra.mxu0 %v13600_v39  ;;  %v13613_v39 = vld [vmem:[%s19524_s3 + $0xf28] sm:$0xff]  }
 0x6ff   :  { %10655 = vmatprep.subr.bf16.mxu0 %v19646_v31 }
 0x701   :  { %10939 = vmatpush1.bf16.msra.mxu1 %v13601_v36 }
 0x702   :  { %10940 = vmatprep.subr.bf16.mxu1 %v19646_v31  ;;  %10656 = vmatpush1.bf16.msra.mxu0 %v13602_v28 }
 0x703   :  { %10657 = vmatprep.subr.bf16.mxu0 %v19646_v31 }
 0x705   :  { %10941 = vmatpush1.bf16.msra.mxu1 %v13603_v3  ;;  %v13620_v3 = vld [vmem:[%s19524_s3 + $0xf60] sm:$0xff]  }
 0x706   :  { %10942 = vmatprep.subr.bf16.mxu1 %v19646_v31  ;;  %10658 = vmatpush1.bf16.msra.mxu0 %v13604_v34  ;;  %v13621_v34 = vld [vmem:[%s19524_s3 + $0xf68] sm:$0xff]  }
 0x707   :  { %10659 = vmatprep.subr.bf16.mxu0 %v19646_v31 }
 0x709   :  { %10943 = vmatpush1.bf16.msra.mxu1 %v13605_v38 }
 0x70a   :  { %10944 = vmatprep.subr.bf16.mxu1 %v19646_v31  ;;  %10660 = vmatpush1.bf16.msra.mxu0 %v13606_v2 }
 0x70b   :  { %11201 = vmatprep.subr.bf16.mxu0 %v19646_v31 }
 0x70d   :  { %10945 = vmatpush1.bf16.msra.mxu1 %v13607_v47  ;;  %10664 = vmatmul.mubr.bf16.vlgmr.msra.gmra.mrb[96].mxu0 %v10505_v22 }
 0x70e   :  { %11202 = vmatpush1.bf16.msra.mxu0 %v13608_v50 }
 0x70f   :  { %11203 = vmatprep.subr.bf16.mxu0 %v19646_v31 }
 0x710   :  { %10949 = vmatmul.mubr.bf16.vlgmr.msra.gmra.mrb[120].mxu1 %v10790_v18 }
 0x712   :  { %11204 = vmatpush1.bf16.msra.mxu0 %v13609_v43 }
 0x713   :  { %11205 = vmatprep.subr.bf16.mxu0 %v19646_v31 }
 0x716   :  { %11206 = vmatpush1.bf16.msra.mxu0 %v13610_v62 }
 0x717   :  { %11207 = vmatprep.subr.bf16.mxu0 %v19646_v31 }
 0x71a   :  { %11208 = vmatpush1.bf16.msra.mxu0 %v13611_v49 }
 0x71b   :  { %11209 = vmatprep.subr.bf16.mxu0 %v19646_v31 }
 0x71e   :  { %11210 = vmatpush1.bf16.msra.mxu0 %v13612_v40 }
 0x71f   :  { %11211 = vmatprep.subr.bf16.mxu0 %v19646_v31 }
 0x722   :  { %11212 = vmatpush1.bf16.msra.mxu0 %v13613_v39 }
 0x723   :  { %11213 = vmatprep.subr.bf16.mxu0 %v19646_v31 }
 0x726   :  { %11214 = vmatpush1.bf16.msra.mxu0 %v13614_v29 }
 0x727   :  { %11215 = vmatprep.subr.bf16.mxu0 %v19646_v31 }
 0x72a   :  { %11216 = vmatpush1.bf16.msra.mxu0 %v13615_v51 }
 0x72b   :  { %v8955_v55 = vpop.f32.mrb[84].mxu0  ;;  %11217 = vmatprep.subr.bf16.mxu0 %v19646_v31 }
 0x72c   :  { %v8961_v36 = vadd.f32 %v8955_v55, %v18878_v33  ;;  %v8957_v14 = vpop.f32.mrb[85].mxu0  ;;  %v13618_v33 = vld [vmem:[%s19524_s3 + $0xf50] sm:$0xff]  }
 0x72d   :  { %v8958_v21 = vpop.f32.mrb[86].mxu0 }
 0x72e   :  { %v8959_v28 = vpop.f32.mrb[87].mxu0  ;;  %11218 = vmatpush1.bf16.msra.mxu0 %v13616_v26 }
 0x72f   :  { %v9240_v42 = vpop.f32.mrb[108].mxu1  ;;  %11219 = vmatprep.subr.bf16.mxu0 %v19646_v31 }
 0x730   :  { %v9246_v30 = vadd.f32 %v9240_v42, %v8961_v36  ;;  %v9242_v20 = vpop.f32.mrb[109].mxu1 }
 0x731   :  { %v9243_v13 = vpop.f32.mrb[110].mxu1 }
 0x732   :  { %v9244_v37 = vpop.f32.mrb[111].mxu1  ;;  %11220 = vmatpush1.bf16.msra.mxu0 %v13617_v6 }
 0x733   :  { %11221 = vmatprep.subr.bf16.mxu0 %v19646_v31 }
 0x736   :  { %11222 = vmatpush1.bf16.msra.mxu0 %v13618_v33 }
 0x737   :  { %11223 = vmatprep.subr.bf16.mxu0 %v19646_v31 }
 0x73a   :  { %11224 = vmatpush1.bf16.msra.mxu0 %v13619_v45 }
 0x73b   :  { %11225 = vmatprep.subr.bf16.mxu0 %v19646_v31 }
 0x73e   :  { %11226 = vmatpush1.bf16.msra.mxu0 %v13620_v3 }
 0x73f   :  { %11227 = vmatprep.subr.bf16.mxu0 %v19646_v31 }
 0x742   :  { %11228 = vmatpush1.bf16.msra.mxu0 %v13621_v34 }
 0x743   :  { %11229 = vmatprep.subr.bf16.mxu0 %v19646_v31 }
 0x746   :  { %11230 = vmatpush1.bf16.msra.mxu0 %v13622_v15 }
 0x75d   :  { %v246_v11 = vpop.xlane.xlu1 %245 }
 0x75e   :  { %v251_v54 = vmul.f32 0.004166667, %v246_v11 }
 0x760   :  { %v256_v32 = vadd.f32 1e-05, %v251_v54 }
 0x762   :  { %13687 = vrsqrt.f32 %v256_v32 }
 0x764   :  { %v691_v41 = vpop.xlane.xlu1 %690 }
 0x765   :  { %v696_v4 = vmul.f32 0.004166667, %v691_v41 }
 0x767   :  { %v9525_v10 = vpop.f32.mrb[88].mxu0  ;;  %v701_v25 = vadd.f32 1e-05, %v696_v4 }
 0x768   :  { %v9531_v38 = vadd.f32 %v9525_v10, %v9246_v30  ;;  %v9527_v2 = vpop.f32.mrb[89].mxu0  ;;  %v468_v44 = vpop.xlane.xlu0 %467 }
 0x769   :  { %v9528_v57 = vpop.f32.mrb[90].mxu0  ;;  %13689 = vrsqrt.f32 %v701_v25  ;;  %v473_v46 = vmul.f32 0.004166667, %v468_v44 }
 0x76a   :  { %v9529_v59 = vpop.f32.mrb[91].mxu0 }
 0x76b   :  { %v9810_v1 = vpop.f32.mrb[112].mxu1  ;;  %v478_v56 = vadd.f32 1e-05, %v473_v46 }
 0x76c   :  { %v13688_v60 = vpop.eup %13687  ;;  %v19437_v47 = vadd.f32 %v9810_v1, %v9531_v38  ;;  %v9812_v31 = vpop.f32.mrb[113].mxu1 }
 0x76d   :  { %v270_v50 = vmul.f32 %v13688_v60, %v19073_v52  ;;  %v271_v22 = vmul.f32 %v13688_v60, %v19077_v7  ;;  %v9813_v17 = vpop.f32.mrb[114].mxu1  ;;  %v1137_v18 = vpop.xlane.xlu1 %1136  ;;  %13691 = vrsqrt.f32 %v478_v56 }
 0x76e   :  { %v9814_v43 = vpop.f32.mrb[115].mxu1  ;;  %v1142_v62 = vmul.f32 0.004166667, %v1137_v18  ;;  %v914_v49 = vpop.xlane.xlu0 %913 }
 0x76f   :  { %280 = vst [vmem:[#allocation2 + $0x40] sm:$0x1] %v270_v50  ;;  %281 = vst.msk [vmem:[#allocation2 + $0x48] sm:$0x1] %vm195_vm9, %v271_v22  ;;  %v919_v40 = vmul.f32 0.004166667, %v914_v49 }
 0x770   :  { %v1147_v39 = vadd.f32 1e-05, %v1142_v62 }
 0x771   :  { %v924_v29 = vadd.f32 1e-05, %v919_v40  ;;  %v1583_v51 = vpop.xlane.xlu1 %1582 }
 0x772   :  { %13693 = vrsqrt.f32 %v1147_v39  ;;  %v1588_v26 = vmul.f32 0.004166667, %v1583_v51  ;;  %v1360_v55 = vpop.xlane.xlu0 %1359 }
 0x773   :  { %v13690_v36 = vpop.eup %13689  ;;  %13695 = vrsqrt.f32 %v924_v29  ;;  %v1365_v52 = vmul.f32 0.004166667, %v1360_v55 }
 0x774   :  { %v715_v7 = vmul.f32 %v13690_v36, %v19113_v12  ;;  %v716_v14 = vmul.f32 %v13690_v36, %v19117_v9  ;;  %v1593_v21 = vadd.f32 1e-05, %v1588_v26 }
 0x775   :  { %v1370_v28 = vadd.f32 1e-05, %v1365_v52 }
 0x776   :  { %726 = vst [vmem:[#allocation2 + $0xe0] sm:$0x1] %v715_v7  ;;  %727 = vst.msk [vmem:[#allocation2 + $0xe8] sm:$0x1] %vm195_vm9, %v716_v14  ;;  %13697 = vrsqrt.f32 %v1593_v21  ;;  %v1806_v6 = vpop.xlane.xlu0 %1805 }
 0x777   :  { %13699 = vrsqrt.f32 %v1370_v28  ;;  %v1811_v42 = vmul.f32 0.004166667, %v1806_v6  ;;  %v13692_v30 = vpop.eup %13691  ;;  %v10958_v54 = vld [vmem:[#allocation2 + $0x40] ss:$8 sm:$0x3] }
 0x778   :  { %v492_v20 = vmul.f32 %v13692_v30, %v19139_v63  ;;  %v493_v13 = vmul.f32 %v13692_v30, %v19143_v58 }
 0x779   :  { %v1816_v37 = vadd.f32 1e-05, %v1811_v42 }
 0x77a   :  { %503 = vst [vmem:[#allocation2 + $0x90] sm:$0x1] %v492_v20  ;;  %504 = vst.msk [vmem:[#allocation2 + $0x98] sm:$0x1] %vm195_vm9, %v493_v13 }
 0x77b   :  { %13701 = vrsqrt.f32 %v1816_v37 }
 0x77c   :  { %v13694_v12 = vpop.eup %13693 }
 0x77d   :  { %v13696_v9 = vpop.eup %13695  ;;  %v1161_v33 = vmul.f32 %v13694_v12, %v19172_v8  ;;  %v1162_v45 = vmul.f32 %v13694_v12, %v19176_v61  ;;  %v10962_v41 = vld [vmem:[#allocation2 + $0xe0] ss:$8 sm:$0x3] }
 0x77e   :  { %v938_v3 = vmul.f32 %v13696_v9, %v19147_v5  ;;  %v939_v34 = vmul.f32 %v13696_v9, %v19151_v0  ;;  %v11003_v57 = vrot.slane %v10962_v41, %v14597_v27  ;;  %v10999_v44 = vrot.slane %v10962_v41, %v14595_v53 }
 0x77f   :  { %1172 = vst [vmem:[#allocation2 + $0x180] sm:$0x1] %v1161_v33  ;;  %1173 = vst.msk [vmem:[#allocation2 + $0x188] sm:$0x1] %vm195_vm9, %v1162_v45 }
 0x780   :  { %v13698_v63 = vpop.eup %13697  ;;  %949 = vst [vmem:[#allocation2 + $0x130] sm:$0x1] %v938_v3  ;;  %950 = vst.msk [vmem:[#allocation2 + $0x138] sm:$0x1] %vm195_vm9, %v939_v34 }
 0x781   :  { %v13700_v58 = vpop.eup %13699  ;;  %v1607_v15 = vmul.f32 %v13698_v63, %v19208_v19  ;;  %v1608_v11 = vmul.f32 %v13698_v63, %v19212_v16  ;;  %v10960_v5 = vld [vmem:[#allocation2 + $0x90] ss:$8 sm:$0x3]  ;;  %v10981_v19 = vrot.slane %v10958_v54, %v14597_v27  ;;  %v10977_v16 = vrot.slane %v10958_v54, %v14595_v53 }
 0x782   :  { %v1384_v8 = vmul.f32 %v13700_v58, %v19182_v24  ;;  %v1385_v61 = vmul.f32 %v13700_v58, %v19186_v48  ;;  %v10992_v0 = vrot.slane %v10960_v5, %v14597_v27  ;;  %v10988_v32 = vrot.slane %v10960_v5, %v14595_v53 }
 0x783   :  { %1618 = vst [vmem:[#allocation2 + $0x220] sm:$0x1] %v1607_v15  ;;  %1619 = vst.msk [vmem:[#allocation2 + $0x228] sm:$0x1] %vm195_vm9, %v1608_v11 }
 0x784   :  { %1395 = vst [vmem:[#allocation2 + $0x1d0] sm:$0x1] %v1384_v8  ;;  %1396 = vst.msk [vmem:[#allocation2 + $0x1d8] sm:$0x1] %vm195_vm9, %v1385_v61  ;;  %v11062_v25 = vsel %vm193_vm3, %v10981_v19, %v10992_v0  ;;  %v11061_v38 = vsel %vm193_vm3, %v10977_v16, %v10988_v32 }
 0x785   :  { %v13702_v4 = vpop.eup %13701  ;;  %v11063_v60 = vsel %vm1941_vm4, %v11061_v38, %v10999_v44 }
 0x786   :  { %v1830_v24 = vmul.f32 %v13702_v4, %v19216_v35  ;;  %v1831_v48 = vmul.f32 %v13702_v4, %v19220_v23  ;;  %v10966_v10 = vld [vmem:[#allocation2 + $0x180] ss:$8 sm:$0x3]  ;;  %v11064_v23 = vsel %vm1941_vm4, %v11062_v25, %v11003_v57 }
 0x787   :  { %v10964_v2 = vld [vmem:[#allocation2 + $0x130] ss:$8 sm:$0x3]  ;;  %v11025_v35 = vrot.slane %v10966_v10, %v14597_v27  ;;  %v11021_v1 = vrot.slane %v10966_v10, %v14595_v53 }
 0x788   :  { %1841 = vst [vmem:[#allocation2 + $0x270] sm:$0x1] %v1830_v24  ;;  %1842 = vst.msk [vmem:[#allocation2 + $0x278] sm:$0x1] %vm195_vm9, %v1831_v48  ;;  %v11014_v59 = vrot.slane %v10964_v2, %v14597_v27  ;;  %v11010_v46 = vrot.slane %v10964_v2, %v14595_v53 }
 0x78a   :  { %v10970_v31 = vld [vmem:[#allocation2 + $0x220] ss:$8 sm:$0x3]  ;;  %v11066_v56 = vsel %vm1944_vm5, %v11064_v23, %v11014_v59  ;;  %v11065_v50 = vsel %vm1944_vm5, %v11063_v60, %v11010_v46 }
 0x78b   :  { %v10968_v22 = vld [vmem:[#allocation2 + $0x1d0] ss:$8 sm:$0x3]  ;;  %v11047_v43 = vrot.slane %v10970_v31, %v14597_v27  ;;  %v11068_v62 = vsel %vm1947_vm6, %v11066_v56, %v11025_v35  ;;  %v11043_v49 = vrot.slane %v10970_v31, %v14595_v53  ;;  %v11067_v40 = vsel %vm1947_vm6, %v11065_v50, %v11021_v1 }
 0x78c   :  { %v11036_v17 = vrot.slane %v10968_v22, %v14597_v27  ;;  %v11032_v18 = vrot.slane %v10968_v22, %v14595_v53 }
 0x78e   :  { %v11070_v39 = vsel %vm1950_vm7, %v11068_v62, %v11036_v17  ;;  %v11069_v29 = vsel %vm1950_vm7, %v11067_v40, %v11032_v18  ;;  %v13119_v17 = vld [vmem:[%s19526_s5] ss:$0 sm:$0xff]  ;;  %s13734_s5 = smov [#allocation3]  }
 0x78f   :  { %v10972_v51 = vld [vmem:[#allocation2 + $0x270] ss:$8 sm:$0x3]  ;;  %v11072_v36 = vsel %vm1953_vm8, %v11070_v39, %v11047_v43  ;;  %v11071_v52 = vsel %vm1953_vm8, %v11069_v29, %v11043_v49  ;;  %v13120_v43 = vld [vmem:[%s19527_s6] ss:$0 sm:$0xff]  ;;  %s11307_s24 = sshll.u32 %s13734_s5, 4  ;;  %s11308_s24 = int_to_ptr.vmem [resolvable:$true] %s11307_s24 }
 0x790   :  { %v11058_v26 = vrot.slane %v10972_v51, %v14597_v27  ;;  %v11054_v55 = vrot.slane %v10972_v51, %v14595_v53  ;;  %s13709_s6 = scalar_lea.vmem %s11308_s24, 128  ;;  %p13714_p1 = scmp.lt.s32.totalorder %s11308_s24, %s11308_s24 }
 0x791   :  { %p13710_p0 = scmp.ne.s32.totalorder %s11308_s24, %s13709_s6  ;;  %p13715_p2 = scmp.lt.s32.totalorder %s13709_s6, %s13709_s6 }
 0x792   :  { %v11074_v7 = vsel %vm98_vm0, %v11072_v36, %v11058_v26  ;;  %v11073_v14 = vsel %vm98_vm0, %v11071_v52, %v11054_v55 }
 0x793   :  { %v11076_v21 = vpack.c.bf16 %v11074_v7, %v11074_v7  ;;  %v11075_v28 = vpack.c.bf16 %v11073_v14, %v11073_v14  ;;  %p13716_p3 = por %p13715_p2, %p13714_p1 }
 0x795   :  { %13117 = vmatprep.mubr.msk.bf16.mxu0 %vm176_vm2, %v11076_v21  ;;  %p13717_p4 = pnand %p13716_p3, %p13710_p0 }
 0x796   :  { %11234 = vmatmul.mubr.bf16.vlgmr.msra.gmra.mrb[100].mxu0 %v11075_v28 }
 0x7a4   :  { %v10095_v6 = vpop.f32.mrb[92].mxu0 }
 0x7a5   :  { %v10101_v42 = vadd.f32 %v10095_v6, %v19437_v47  ;;  %v10097_v30 = vpop.f32.mrb[93].mxu0  ;;  %v13118_v47 = vld [vmem:[%s19525_s4] ss:$0 sm:$0xff] }
 0x7a6   :  { %v10098_v27 = vpop.f32.mrb[94].mxu0 }
 0x7a7   :  { %v10380_v20 = vpop.f32.mrb[116].mxu1  ;;  %v10099_v53 = vpop.f32.mrb[95].mxu0 }
 0x7a8   :  { %v10386_v13 = vadd.f32 %v10380_v20, %v10101_v42  ;;  %v10382_v37 = vpop.f32.mrb[117].mxu1 }
 0x7a9   :  { %v10383_v12 = vpop.f32.mrb[118].mxu1 }
 0x7aa   :  { %v10384_v9 = vpop.f32.mrb[119].mxu1 }
 0x7e0   :  { %v10665_v33 = vpop.f32.mrb[96].mxu0 }
 0x7e1   :  { %v10671_v45 = vadd.f32 %v10665_v33, %v10386_v13  ;;  %v10667_v3 = vpop.f32.mrb[97].mxu0 }
 0x7e2   :  { %v10668_v34 = vpop.f32.mrb[98].mxu0 }
 0x7e3   :  { %v10950_v63 = vpop.f32.mrb[120].mxu1  ;;  %v10669_v58 = vpop.f32.mrb[99].mxu0 }
 0x7e4   :  { %v10956_v15 = vadd.f32 %v10950_v63, %v10671_v45  ;;  %v10952_v11 = vpop.f32.mrb[121].mxu1 }
 0x7e5   :  { %v10953_v54 = vpop.f32.mrb[122].mxu1 }
 0x7e6   :  { %v10954_v8 = vpop.f32.mrb[123].mxu1 }
 0x869   :  { %v11235_v61 = vpop.f32.mrb[100].mxu0 }
 0x86a   :  { %v11241_v5 = vadd.f32 %v11235_v61, %v10956_v15  ;;  %v11237_v0 = vpop.f32.mrb[101].mxu0 }
 0x86b   :  { %v11238_v32 = vpop.f32.mrb[102].mxu0 }
 0x86c   :  { %v11249_v41 = vadd.f32 %v13118_v47, %v11241_v5  ;;  %v11239_v19 = vpop.f32.mrb[103].mxu0 }
 0x86e   :  { %v11251_v16 = vsel %vm11250_vm10, %v11249_v41, 0.0 }
 0x86f   :  { %v11252_v4 = vrot.slane %v11251_v16, 4 }
 0x871   :  { %v11253_v24 = vadd.f32 %v11252_v4, %v11251_v16 }
 0x873   :  { %v11254_v48 = vrot.slane %v11253_v24, 2 }
 0x875   :  { %v11255_v10 = vadd.f32 %v11254_v48, %v11253_v24 }
 0x877   :  { %v11256_v25 = vrot.slane %v11255_v10, 1 }
 0x879   :  { %v11257_v38 = vadd.f32 %v11256_v25, %v11255_v10 }
 0x87b   :  { %v11259_v2 = vmul.f32 0.125, %v11257_v38 }
 0x87d   :  { %v11260_v57 = vsub.f32 %v11249_v41, %v11259_v2 }
 0x87f   :  { %v11261_v44 = vmul.f32 %v11260_v57, %v11260_v57 }
 0x881   :  { %v11262_v59 = vsel %vm11250_vm10, %v11261_v44, 0.0 }
 0x882   :  { %v11263_v46 = vrot.slane %v11262_v59, 4 }
 0x884   :  { %v11264_v35 = vadd.f32 %v11263_v46, %v11262_v59 }
 0x886   :  { %v11265_v23 = vrot.slane %v11264_v35, 2 }
 0x888   :  { %v11266_v1 = vadd.f32 %v11265_v23, %v11264_v35 }
 0x88a   :  { %v11267_v60 = vrot.slane %v11266_v1, 1 }
 0x88c   :  { %v11268_v31 = vadd.f32 %v11267_v60, %v11266_v1 }
 0x88e   :  { %v11269_v56 = vmul.f32 0.125, %v11268_v31 }
 0x890   :  { %v11270_v50 = vadd.f32 1e-05, %v11269_v56 }
 0x892   :  { %13703 = vrsqrt.f32 %v11270_v50 }
 0x89c   :  { %v13704_v22 = vpop.eup %13703 }
 0x89d   :  { %v11272_v18 = vmul.f32 %v13704_v22, %v11260_v57 }
 0x89f   :  { %v11280_v62 = vmul.f32 %v13119_v17, %v11272_v18 }
 0x8a1   :  { %v11288_v49 = vadd.f32 %v13120_v43, %v11280_v62 }
 0x8a3   :  { %v11289_v40 = vsel %vm11250_vm10, %v11288_v49, -inf }
 0x8a4   :  { %11290 = vmax.xlane.f32.xlu1 %v11289_v40 }
 0x931   :  { %v11291_v39 = vpop.xlane.xlu1 %11290 }
 0x932   :  { %v11292_v29 = vsub.f32 %v11288_v49, %v11291_v39 }
 0x934   :  { %v11293_v51 = vmul.f32 1.442695, %v11292_v29 }
 0x936   :  { %13705 = vpow2.f32 %v11293_v51 }
 0x940   :  { %v13706_v26 = vpop.eup %13705 }
 0x941   :  { %v11295_v55 = vsel %vm11250_vm10, %v13706_v26, 0.0 }
 0x942   :  { %11296 = vadd.xlane.f32.xlu0 %v11295_v55 }
 0x9cf   :  { %v11297_v36 = vpop.xlane.xlu0 %11296 }
 0x9d0   :  { %13707 = vrcp.f32 %v11297_v36 }
 0x9da   :  { %v13708_v52 = vpop.eup %13707 }
 0x9db   :  { %v11299_v7 = vmul.f32 %v13708_v52, %v13706_v26 }
 0x9dd   :  { %11300 = vst.msk [vmem:[#allocation3] sm:$0xff] %vm11250_vm10, %v11299_v7 }
 0x9de   :  { %13720 = shalt.err (!%p13717_p4)
}
 0x9df   :  { %s13721_s27 = scalar_lea.hbm %s19528_s7, 128 }
 0x9e0   :  { %p13722_p5 = scmp.ne.s32.totalorder %s19528_s7, %s13721_s27  ;;  %p13725_p6 = scmp.lt.u32.totalorder %s13721_s27, %s19528_s7 }
 0x9e2   :  { %p13727_p7 = pnand %p13725_p6, %p13722_p5 }
 0x9e4   :  { %13730 = shalt.err (!%p13727_p7)
}
 0x9e5   :  { %11310 = dma.vmem_to_hbm [thread:$0]  %s11308_s24, 128, %s19528_s7, [#allocation4]  }
 0x9e6   :  { %13731 = dma.done.wait [#allocation4], 128  }
 0x9e7   :  { %13732 = vsyncadd [#allocation4], 4294967168 }
 0x9e8   :  { %11314 = vsyncpa [#allocation4], 1 }

</bundles_post_ra>
